<compile_context>
chip_gen: v5e
topology: v5e:2x2
jax: 0.10.0
libtpu: 0.0.40
codegen_flags: <defaults>
</compile_context>

<pallas_src>
import functools

import jax
import jax.numpy as jnp
from jax import lax
from jax.experimental import pallas as pl
from jax.experimental.pallas import tpu as pltpu

# --------------------------------------------------------------------------
# Model constants
# --------------------------------------------------------------------------
C_IN = 3                       # RGB input
C_FB, C_BB = 16, 32            # reduced FaceBoxes / TDDFA-backbone channels
NB_SHP, NB_EXP, NV = 40, 10, 68
TDDFA_SIZE = 120.0             # TDDFA crop size used by similar_transform

KTAP = 9 * C_IN                # 27 im2col columns
KPAD = 32                      # conv contraction dim padded for alignment
FPAD = 128                     # fused feature / fc width (lane-dense)
APAD = 64                      # padded alpha row width (51 -> 64)
VPAD = 128                     # per-coordinate lane padding for NV=68 verts


# --------------------------------------------------------------------------
# The single fused Pallas kernel
# --------------------------------------------------------------------------
def _landmark3d_kernel(xpad_ref, cw_ref, cb_ref, fcw_ref, fcb_ref,
                       std_ref, mean_ref, wbt_ref, o_ref, *, H, W):
    HW = H * W

    # ---- fused (FaceBoxes | backbone) conv3x3 + bias + ReLU + mean pool ----
    # Build the (H*W, 32) patch matrix in-kernel from the padded HWC frame;
    # column ordering is (ky, kx, cin), matching the packed weight rows.
    taps = [xpad_ref[ky:ky + H, kx:kx + W, :]
            for ky in range(3) for kx in range(3)]
    taps.append(jnp.zeros((H, W, KPAD - KTAP), jnp.float32))
    patch = jnp.concatenate(taps, axis=2).reshape(HW, KPAD)        # (HW, 32)

    h = jnp.dot(patch, cw_ref[...], preferred_element_type=jnp.float32)
    h = jnp.maximum(h + cb_ref[...], 0.0)                          # (HW, 128)
    feat = jnp.sum(h, axis=0, keepdims=True) * (1.0 / HW)          # (1, 128)

    # ---- fused fc heads: cols 0:4 box logits, cols 4:66 raw 62-d params ----
    fc = jnp.dot(feat, fcw_ref[...], preferred_element_type=jnp.float32)
    deq = (fc + fcb_ref[...]) * std_ref[...] + mean_ref[...]       # (1, 128)

    # ---- FaceBoxes (reduced) box decode -> roi box / scales -----------------
    f = jax.nn.sigmoid(deq[:, 0:4])                                # (1, 4)
    cx = f[:, 0:1] * W
    cy = f[:, 1:2] * H
    bw = (0.25 + 0.75 * f[:, 2:3]) * W
    bh = (0.25 + 0.75 * f[:, 3:4]) * H
    sx = cx - bw * 0.5
    sy = cy - bh * 0.5
    scale_x = bw * (1.0 / TDDFA_SIZE)                              # (ex-sx)/120
    scale_y = bh * (1.0 / TDDFA_SIZE)
    s = (scale_x + scale_y) * 0.5

    # ---- 3DMM pose: R (3x3) and translation from param62[:12] --------------
    r00 = deq[:, 4:5];   r01 = deq[:, 5:6];   r02 = deq[:, 6:7];   ox = deq[:, 7:8]
    r10 = deq[:, 8:9];   r11 = deq[:, 9:10];  r12 = deq[:, 10:11]; oy = deq[:, 11:12]
    r20 = deq[:, 12:13]; r21 = deq[:, 13:14]; r22 = deq[:, 14:15]; oz = deq[:, 15:16]

    # ---- shape/expression basis combination as a row-vector matmul ---------
    # alpha = [alpha_shp(40) | alpha_exp(10) | 1 | 0-pad]  (1, 64)
    alpha = jnp.concatenate(
        [deq[:, 16:66],
         jnp.ones((1, 1), jnp.float32),
         jnp.zeros((1, APAD - (NB_SHP + NB_EXP + 1)), jnp.float32)], axis=1)
    vec = jnp.dot(alpha, wbt_ref[...], preferred_element_type=jnp.float32)
    vx = vec[:, 0:VPAD]                 # x coords of the 68 verts (lanes 0:68)
    vy = vec[:, VPAD:2 * VPAD]
    vz = vec[:, 2 * VPAD:3 * VPAD]

    # ---- rotation + offset (VPU broadcast-FMAs, no MXU 3-wide dot) ----------
    lm_x = r00 * vx + r01 * vy + r02 * vz + ox
    lm_y = r10 * vx + r11 * vy + r12 * vz + oy
    lm_z = r20 * vx + r21 * vy + r22 * vz + oz

    # ---- TDDFA similar_transform folded into per-coordinate affine ----------
    x_t = lm_x * scale_x + (sx - scale_x)                  # (x-1)*sx + sx0
    y_t = lm_y * (-scale_y) + (TDDFA_SIZE * scale_y + sy)  # (120-y)*sy + sy0
    z_t = lm_z * s - s                                     # (z-1)*s

    lane = lax.broadcasted_iota(jnp.int32, (1, VPAD), 1)
    valid = lane < NV
    zmin = jnp.min(jnp.where(valid, z_t, jnp.inf))
    z_t = jnp.where(valid, z_t - zmin, 0.0)

    # Full-width (8, 128) store: rows 0/1/2 hold x/y/z, rest zero padding.
    o_ref[...] = jnp.concatenate(
        [x_t, y_t, z_t, jnp.zeros((5, VPAD), jnp.float32)], axis=0)


# --------------------------------------------------------------------------
# Parameters: raw (PyTorch-like) init + one-time packing into fused buffers
# --------------------------------------------------------------------------
def init_params(key):
    ks = jax.random.split(key, 9)
    p = {}
    # FaceBoxes (reduced): conv3x3 -> relu -> global-avg-pool -> fc(4)
    p["fb_conv_w"] = 0.1 * jax.random.normal(ks[0], (C_FB, C_IN, 3, 3), jnp.float32)
    p["fb_conv_b"] = jnp.zeros((1, C_FB), jnp.float32)
    p["fb_fc_w"] = 0.1 * jax.random.normal(ks[1], (C_FB, 4), jnp.float32)
    p["fb_fc_b"] = jnp.zeros((1, 4), jnp.float32)
    # TDDFA backbone (reduced): conv3x3 -> relu -> global-avg-pool -> fc(62)
    p["bb_conv_w"] = 0.1 * jax.random.normal(ks[2], (C_BB, C_IN, 3, 3), jnp.float32)
    p["bb_conv_b"] = jnp.zeros((1, C_BB), jnp.float32)
    p["bb_fc_w"] = 0.1 * jax.random.normal(ks[3], (C_BB, 62), jnp.float32)
    p["bb_fc_b"] = jnp.zeros((1, 62), jnp.float32)
    # 3DMM (BFM-like) statistics and bases, synthetic but deterministic
    p["param_mean"] = 0.01 * jax.random.normal(ks[4], (62,), jnp.float32)
    p["param_std"] = 1.0 + 0.01 * jax.random.normal(ks[5], (62,), jnp.float32)
    p["u_base"] = 10.0 * jax.random.normal(ks[6], (3 * NV, 1), jnp.float32)
    p["w_shp_base"] = jax.random.normal(ks[7], (3 * NV, NB_SHP), jnp.float32)
    p["w_exp_base"] = jax.random.normal(ks[8], (3 * NV, NB_EXP), jnp.float32)
    return p


def pack_params(p):
    """One-time packing of static weights into fused, lane-dense buffers."""
    def conv_rows(w):
        # (Cout, Cin, 3, 3) -> (27, Cout) with row ordering (ky, kx, cin)
        return w.transpose(2, 3, 1, 0).reshape(KTAP, -1)

    cw = jnp.zeros((KPAD, FPAD), jnp.float32)
    cw = cw.at[:KTAP, 0:C_FB].set(conv_rows(p["fb_conv_w"]))
    cw = cw.at[:KTAP, C_FB:C_FB + C_BB].set(conv_rows(p["bb_conv_w"]))
    cb = jnp.zeros((1, FPAD), jnp.float32)
    cb = cb.at[:, 0:C_FB].set(p["fb_conv_b"])
    cb = cb.at[:, C_FB:C_FB + C_BB].set(p["bb_conv_b"])

    # Fused fc: box head reads feat[0:16], param head reads feat[16:48].
    fcw = jnp.zeros((FPAD, FPAD), jnp.float32)
    fcw = fcw.at[0:C_FB, 0:4].set(p["fb_fc_w"])
    fcw = fcw.at[C_FB:C_FB + C_BB, 4:66].set(p["bb_fc_w"])
    fcb = jnp.zeros((1, FPAD), jnp.float32)
    fcb = fcb.at[:, 0:4].set(p["fb_fc_b"])
    fcb = fcb.at[:, 4:66].set(p["bb_fc_b"])

    # De-standardization row: identity on box logits, std/mean on param62.
    std = jnp.ones((1, FPAD), jnp.float32)
    std = std.at[:, 4:66].set(p["param_std"])
    mean = jnp.zeros((1, FPAD), jnp.float32)
    mean = mean.at[:, 4:66].set(p["param_mean"])

    # 3DMM bases: wb = [w_shp | w_exp | u] (204, 51); split x/y/z rows,
    # transpose, and lay the three coordinate blocks in 128-lane slots.
    wb = jnp.concatenate(
        [p["w_shp_base"], p["w_exp_base"], p["u_base"]], axis=1)   # (204, 51)
    nb1 = NB_SHP + NB_EXP + 1
    wbt = jnp.zeros((APAD, 3 * VPAD), jnp.float32)
    for c in range(3):                                   # rows 3v+c -> coord c
        wbt = wbt.at[0:nb1, c * VPAD:c * VPAD + NV].set(wb[c::3, :].T)

    return {"cw": cw, "cb": cb, "fcw": fcw, "fcb": fcb,
            "std": std, "mean": mean, "wbt": wbt}


# --------------------------------------------------------------------------
# Forward pass: one pallas_call + tiny wrapper glue
# --------------------------------------------------------------------------
def landmark3d_forward(packed, x):
    N, C, H, W = x.shape        # NCHW, PyTorch convention; N must be 1
    xhwc = jnp.transpose(x[0], (1, 2, 0))                 # (H, W, C)
    xpad = jnp.pad(xhwc, ((1, 1), (1, 1), (0, 0)))        # (H+2, W+2, C)

    kernel = functools.partial(_landmark3d_kernel, H=H, W=W)
    args = (xpad, packed["cw"], packed["cb"], packed["fcw"], packed["fcb"],
            packed["std"], packed["mean"], packed["wbt"])
    in_specs = [pl.BlockSpec(a.shape, lambda i, _nd=a.ndim: (0,) * _nd)
                for a in args]

    out = pl.pallas_call(
        kernel,
        grid=(1,),
        in_specs=in_specs,
        out_specs=pl.BlockSpec((8, VPAD), lambda i: (0, 0)),
        out_shape=jax.ShapeDtypeStruct((8, VPAD), jnp.float32),
        compiler_params=pltpu.CompilerParams(
            dimension_semantics=("arbitrary",)),
    )(*args)

    # rows 0/1/2 = x/y/z of the 68 landmarks -> (68, 3) == ver_lst[0].T
    return out[0:3, 0:NV].T


if __name__ == "__main__":
    key = jax.random.PRNGKey(0)
    kp, kx = jax.random.split(key)
    params = init_params(kp)
    packed = pack_params(params)                          # hoisted, runs once
    x = jax.random.uniform(kx, (1, 3, 32, 32), dtype=jnp.float32)  # NCHW
    lm = jax.jit(landmark3d_forward)(packed, x)
    lm = jax.block_until_ready(lm)
    assert lm.shape == (NV, 3) and lm.dtype == jnp.float32
    assert bool(jnp.all(jnp.isfinite(lm)))
    print("KERNEL_OK")
</pallas_src>

<mosaic_0001>
module attributes {stable_mosaic.version = 11 : i64} {
  func.func @_landmark3d_kernel(%arg0: i32, %arg1: memref<34x34x3xf32, #tpu.memory_space<vmem>>, %arg2: memref<32x128xf32, #tpu.memory_space<vmem>>, %arg3: memref<1x128xf32, #tpu.memory_space<vmem>>, %arg4: memref<128x128xf32, #tpu.memory_space<vmem>>, %arg5: memref<1x128xf32, #tpu.memory_space<vmem>>, %arg6: memref<1x128xf32, #tpu.memory_space<vmem>>, %arg7: memref<1x128xf32, #tpu.memory_space<vmem>>, %arg8: memref<64x384xf32, #tpu.memory_space<vmem>>, %arg9: memref<8x128xf32, #tpu.memory_space<vmem>>) attributes {dimension_semantics = [#tpu.dimension_semantics<arbitrary>], iteration_bounds = array<i64: 1>, scalar_prefetch = 0 : i64, scratch_operands = 0 : i64, tpu.core_type = #tpu.core_type<tc>, window_params = [{pipeline_mode = #tpu.pipeline_mode<synchronous>, transform_indices = @transform_0, window_bounds = array<i64: 34, 34, 3>}, {pipeline_mode = #tpu.pipeline_mode<synchronous>, transform_indices = @transform_1, window_bounds = array<i64: 32, 128>}, {pipeline_mode = #tpu.pipeline_mode<synchronous>, transform_indices = @transform_2, window_bounds = array<i64: 1, 128>}, {pipeline_mode = #tpu.pipeline_mode<synchronous>, transform_indices = @transform_3, window_bounds = array<i64: 128, 128>}, {pipeline_mode = #tpu.pipeline_mode<synchronous>, transform_indices = @transform_4, window_bounds = array<i64: 1, 128>}, {pipeline_mode = #tpu.pipeline_mode<synchronous>, transform_indices = @transform_5, window_bounds = array<i64: 1, 128>}, {pipeline_mode = #tpu.pipeline_mode<synchronous>, transform_indices = @transform_6, window_bounds = array<i64: 1, 128>}, {pipeline_mode = #tpu.pipeline_mode<synchronous>, transform_indices = @transform_7, window_bounds = array<i64: 64, 384>}, {pipeline_mode = #tpu.pipeline_mode<synchronous>, transform_indices = @transform_8, window_bounds = array<i64: 8, 128>}]} {
    %c0 = arith.constant 0 : index
    %c0_0 = arith.constant 0 : index
    %c0_1 = arith.constant 0 : index
    %0 = vector.load %arg1[%c0, %c0_0, %c0_1] : memref<34x34x3xf32, #tpu.memory_space<vmem>>, vector<32x32x3xf32>
    %c0_2 = arith.constant 0 : index
    %c1 = arith.constant 1 : index
    %c0_3 = arith.constant 0 : index
    %1 = vector.load %arg1[%c0_2, %c1, %c0_3] : memref<34x34x3xf32, #tpu.memory_space<vmem>>, vector<32x32x3xf32>
    %c0_4 = arith.constant 0 : index
    %c2 = arith.constant 2 : index
    %c0_5 = arith.constant 0 : index
    %2 = vector.load %arg1[%c0_4, %c2, %c0_5] : memref<34x34x3xf32, #tpu.memory_space<vmem>>, vector<32x32x3xf32>
    %c1_6 = arith.constant 1 : index
    %c0_7 = arith.constant 0 : index
    %c0_8 = arith.constant 0 : index
    %3 = vector.load %arg1[%c1_6, %c0_7, %c0_8] : memref<34x34x3xf32, #tpu.memory_space<vmem>>, vector<32x32x3xf32>
    %c1_9 = arith.constant 1 : index
    %c1_10 = arith.constant 1 : index
    %c0_11 = arith.constant 0 : index
    %4 = vector.load %arg1[%c1_9, %c1_10, %c0_11] : memref<34x34x3xf32, #tpu.memory_space<vmem>>, vector<32x32x3xf32>
    %c1_12 = arith.constant 1 : index
    %c2_13 = arith.constant 2 : index
    %c0_14 = arith.constant 0 : index
    %5 = vector.load %arg1[%c1_12, %c2_13, %c0_14] : memref<34x34x3xf32, #tpu.memory_space<vmem>>, vector<32x32x3xf32>
    %c2_15 = arith.constant 2 : index
    %c0_16 = arith.constant 0 : index
    %c0_17 = arith.constant 0 : index
    %6 = vector.load %arg1[%c2_15, %c0_16, %c0_17] : memref<34x34x3xf32, #tpu.memory_space<vmem>>, vector<32x32x3xf32>
    %c2_18 = arith.constant 2 : index
    %c1_19 = arith.constant 1 : index
    %c0_20 = arith.constant 0 : index
    %7 = vector.load %arg1[%c2_18, %c1_19, %c0_20] : memref<34x34x3xf32, #tpu.memory_space<vmem>>, vector<32x32x3xf32>
    %c2_21 = arith.constant 2 : index
    %c2_22 = arith.constant 2 : index
    %c0_23 = arith.constant 0 : index
    %8 = vector.load %arg1[%c2_21, %c2_22, %c0_23] : memref<34x34x3xf32, #tpu.memory_space<vmem>>, vector<32x32x3xf32>
    %cst = arith.constant 0.000000e+00 : f32
    %9 = vector.broadcast %cst : f32 to vector<32x32x5xf32>
    %10 = tpu.concatenate %0, %1, %2, %3, %4, %5, %6, %7, %8, %9 in 2 : vector<32x32x3xf32>, vector<32x32x3xf32>, vector<32x32x3xf32>, vector<32x32x3xf32>, vector<32x32x3xf32>, vector<32x32x3xf32>, vector<32x32x3xf32>, vector<32x32x3xf32>, vector<32x32x3xf32>, vector<32x32x5xf32> -> vector<32x32x32xf32>
    %11 = vector.shape_cast %10 : vector<32x32x32xf32> to vector<1024x32xf32>
    %c0_24 = arith.constant 0 : index
    %c0_25 = arith.constant 0 : index
    %12 = vector.load %arg2[%c0_24, %c0_25] : memref<32x128xf32, #tpu.memory_space<vmem>>, vector<32x128xf32>
    %cst_26 = arith.constant dense<0.000000e+00> : vector<1024x128xf32>
    %13 = tpu.matmul %11, %12, %cst_26 {dimension_numbers = #tpu.dot_dimension_numbers<[1], [0], [0], [1], [0, 0, 1, 1], [], []>} : vector<1024x32xf32>, vector<32x128xf32>, vector<1024x128xf32> -> vector<1024x128xf32>
    %c0_27 = arith.constant 0 : index
    %c0_28 = arith.constant 0 : index
    %14 = vector.load %arg3[%c0_27, %c0_28] : memref<1x128xf32, #tpu.memory_space<vmem>>, vector<1x128xf32>
    %15 = vector.broadcast %14 : vector<1x128xf32> to vector<1024x128xf32>
    %16 = arith.addf %13, %15 : vector<1024x128xf32>
    %cst_29 = arith.constant 0.000000e+00 : f32
    %17 = vector.broadcast %cst_29 : f32 to vector<1024x128xf32>
    %18 = arith.maximumf %16, %17 : vector<1024x128xf32>
    %cst_30 = arith.constant dense<0.000000e+00> : vector<128xf32>
    %19 = vector.multi_reduction <add>, %18, %cst_30 [0] : vector<1024x128xf32> to vector<128xf32>
    %20 = vector.shape_cast %19 : vector<128xf32> to vector<1x128xf32>
    %cst_31 = arith.constant 9.765625E-4 : f32
    %21 = vector.broadcast %cst_31 : f32 to vector<1x128xf32>
    %22 = arith.mulf %20, %21 : vector<1x128xf32>
    %c0_32 = arith.constant 0 : index
    %c0_33 = arith.constant 0 : index
    %23 = vector.load %arg4[%c0_32, %c0_33] : memref<128x128xf32, #tpu.memory_space<vmem>>, vector<128x128xf32>
    %cst_34 = arith.constant dense<0.000000e+00> : vector<1x128xf32>
    %24 = tpu.matmul %22, %23, %cst_34 {dimension_numbers = #tpu.dot_dimension_numbers<[1], [0], [0], [1], [0, 0, 1, 1], [], []>} : vector<1x128xf32>, vector<128x128xf32>, vector<1x128xf32> -> vector<1x128xf32>
    %c0_35 = arith.constant 0 : index
    %c0_36 = arith.constant 0 : index
    %25 = vector.load %arg5[%c0_35, %c0_36] : memref<1x128xf32, #tpu.memory_space<vmem>>, vector<1x128xf32>
    %26 = arith.addf %24, %25 : vector<1x128xf32>
    %c0_37 = arith.constant 0 : index
    %c0_38 = arith.constant 0 : index
    %27 = vector.load %arg6[%c0_37, %c0_38] : memref<1x128xf32, #tpu.memory_space<vmem>>, vector<1x128xf32>
    %28 = arith.mulf %26, %27 : vector<1x128xf32>
    %c0_39 = arith.constant 0 : index
    %c0_40 = arith.constant 0 : index
    %29 = vector.load %arg7[%c0_39, %c0_40] : memref<1x128xf32, #tpu.memory_space<vmem>>, vector<1x128xf32>
    %30 = arith.addf %28, %29 : vector<1x128xf32>
    %31 = vector.extract_strided_slice %30 {offsets = [0, 0], sizes = [1, 4], strides = [1, 1]} : vector<1x128xf32> to vector<1x4xf32>
    %32 = arith.negf %31 : vector<1x4xf32>
    %33 = math.exp %32 : vector<1x4xf32>
    %cst_41 = arith.constant 1.000000e+00 : f32
    %34 = vector.broadcast %cst_41 : f32 to vector<1x4xf32>
    %35 = arith.addf %34, %33 : vector<1x4xf32>
    %36 = arith.divf %34, %35 : vector<1x4xf32>
    %37 = vector.extract_strided_slice %36 {offsets = [0, 0], sizes = [1, 1], strides = [1, 1]} : vector<1x4xf32> to vector<1x1xf32>
    %cst_42 = arith.constant 3.200000e+01 : f32
    %38 = vector.broadcast %cst_42 : f32 to vector<1x1xf32>
    %39 = arith.mulf %37, %38 : vector<1x1xf32>
    %40 = vector.extract_strided_slice %36 {offsets = [0, 1], sizes = [1, 1], strides = [1, 1]} : vector<1x4xf32> to vector<1x1xf32>
    %cst_43 = arith.constant 3.200000e+01 : f32
    %41 = vector.broadcast %cst_43 : f32 to vector<1x1xf32>
    %42 = arith.mulf %40, %41 : vector<1x1xf32>
    %43 = vector.extract_strided_slice %36 {offsets = [0, 2], sizes = [1, 1], strides = [1, 1]} : vector<1x4xf32> to vector<1x1xf32>
    %cst_44 = arith.constant 7.500000e-01 : f32
    %44 = vector.broadcast %cst_44 : f32 to vector<1x1xf32>
    %45 = arith.mulf %44, %43 : vector<1x1xf32>
    %cst_45 = arith.constant 2.500000e-01 : f32
    %46 = vector.broadcast %cst_45 : f32 to vector<1x1xf32>
    %47 = arith.addf %46, %45 : vector<1x1xf32>
    %cst_46 = arith.constant 3.200000e+01 : f32
    %48 = vector.broadcast %cst_46 : f32 to vector<1x1xf32>
    %49 = arith.mulf %47, %48 : vector<1x1xf32>
    %50 = vector.extract_strided_slice %36 {offsets = [0, 3], sizes = [1, 1], strides = [1, 1]} : vector<1x4xf32> to vector<1x1xf32>
    %cst_47 = arith.constant 7.500000e-01 : f32
    %51 = vector.broadcast %cst_47 : f32 to vector<1x1xf32>
    %52 = arith.mulf %51, %50 : vector<1x1xf32>
    %cst_48 = arith.constant 2.500000e-01 : f32
    %53 = vector.broadcast %cst_48 : f32 to vector<1x1xf32>
    %54 = arith.addf %53, %52 : vector<1x1xf32>
    %cst_49 = arith.constant 3.200000e+01 : f32
    %55 = vector.broadcast %cst_49 : f32 to vector<1x1xf32>
    %56 = arith.mulf %54, %55 : vector<1x1xf32>
    %cst_50 = arith.constant 5.000000e-01 : f32
    %57 = vector.broadcast %cst_50 : f32 to vector<1x1xf32>
    %58 = arith.mulf %49, %57 : vector<1x1xf32>
    %59 = arith.subf %39, %58 : vector<1x1xf32>
    %cst_51 = arith.constant 5.000000e-01 : f32
    %60 = vector.broadcast %cst_51 : f32 to vector<1x1xf32>
    %61 = arith.mulf %56, %60 : vector<1x1xf32>
    %62 = arith.subf %42, %61 : vector<1x1xf32>
    %cst_52 = arith.constant 0.00833333377 : f32
    %63 = vector.broadcast %cst_52 : f32 to vector<1x1xf32>
    %64 = arith.mulf %49, %63 : vector<1x1xf32>
    %cst_53 = arith.constant 0.00833333377 : f32
    %65 = vector.broadcast %cst_53 : f32 to vector<1x1xf32>
    %66 = arith.mulf %56, %65 : vector<1x1xf32>
    %67 = arith.addf %64, %66 : vector<1x1xf32>
    %cst_54 = arith.constant 5.000000e-01 : f32
    %68 = vector.broadcast %cst_54 : f32 to vector<1x1xf32>
    %69 = arith.mulf %67, %68 : vector<1x1xf32>
    %70 = vector.extract_strided_slice %30 {offsets = [0, 4], sizes = [1, 1], strides = [1, 1]} : vector<1x128xf32> to vector<1x1xf32>
    %71 = vector.extract_strided_slice %30 {offsets = [0, 5], sizes = [1, 1], strides = [1, 1]} : vector<1x128xf32> to vector<1x1xf32>
    %72 = vector.extract_strided_slice %30 {offsets = [0, 6], sizes = [1, 1], strides = [1, 1]} : vector<1x128xf32> to vector<1x1xf32>
    %73 = vector.extract_strided_slice %30 {offsets = [0, 7], sizes = [1, 1], strides = [1, 1]} : vector<1x128xf32> to vector<1x1xf32>
    %74 = vector.extract_strided_slice %30 {offsets = [0, 8], sizes = [1, 1], strides = [1, 1]} : vector<1x128xf32> to vector<1x1xf32>
    %75 = vector.extract_strided_slice %30 {offsets = [0, 9], sizes = [1, 1], strides = [1, 1]} : vector<1x128xf32> to vector<1x1xf32>
    %76 = vector.extract_strided_slice %30 {offsets = [0, 10], sizes = [1, 1], strides = [1, 1]} : vector<1x128xf32> to vector<1x1xf32>
    %77 = vector.extract_strided_slice %30 {offsets = [0, 11], sizes = [1, 1], strides = [1, 1]} : vector<1x128xf32> to vector<1x1xf32>
    %78 = vector.extract_strided_slice %30 {offsets = [0, 12], sizes = [1, 1], strides = [1, 1]} : vector<1x128xf32> to vector<1x1xf32>
    %79 = vector.extract_strided_slice %30 {offsets = [0, 13], sizes = [1, 1], strides = [1, 1]} : vector<1x128xf32> to vector<1x1xf32>
    %80 = vector.extract_strided_slice %30 {offsets = [0, 14], sizes = [1, 1], strides = [1, 1]} : vector<1x128xf32> to vector<1x1xf32>
    %81 = vector.extract_strided_slice %30 {offsets = [0, 15], sizes = [1, 1], strides = [1, 1]} : vector<1x128xf32> to vector<1x1xf32>
    %82 = vector.extract_strided_slice %30 {offsets = [0, 16], sizes = [1, 50], strides = [1, 1]} : vector<1x128xf32> to vector<1x50xf32>
    %cst_55 = arith.constant 1.000000e+00 : f32
    %83 = vector.broadcast %cst_55 : f32 to vector<1x1xf32>
    %cst_56 = arith.constant 0.000000e+00 : f32
    %84 = vector.broadcast %cst_56 : f32 to vector<1x13xf32>
    %85 = tpu.concatenate %82, %83, %84 in 1 : vector<1x50xf32>, vector<1x1xf32>, vector<1x13xf32> -> vector<1x64xf32>
    %c0_57 = arith.constant 0 : index
    %c0_58 = arith.constant 0 : index
    %86 = vector.load %arg8[%c0_57, %c0_58] : memref<64x384xf32, #tpu.memory_space<vmem>>, vector<64x384xf32>
    %cst_59 = arith.constant dense<0.000000e+00> : vector<1x384xf32>
    %87 = tpu.matmul %85, %86, %cst_59 {dimension_numbers = #tpu.dot_dimension_numbers<[1], [0], [0], [1], [0, 0, 1, 1], [], []>} : vector<1x64xf32>, vector<64x384xf32>, vector<1x384xf32> -> vector<1x384xf32>
    %88 = vector.extract_strided_slice %87 {offsets = [0, 0], sizes = [1, 128], strides = [1, 1]} : vector<1x384xf32> to vector<1x128xf32>
    %89 = vector.extract_strided_slice %87 {offsets = [0, 128], sizes = [1, 128], strides = [1, 1]} : vector<1x384xf32> to vector<1x128xf32>
    %90 = vector.extract_strided_slice %87 {offsets = [0, 256], sizes = [1, 128], strides = [1, 1]} : vector<1x384xf32> to vector<1x128xf32>
    %91 = vector.broadcast %70 : vector<1x1xf32> to vector<1x128xf32>
    %92 = arith.mulf %91, %88 : vector<1x128xf32>
    %93 = vector.broadcast %71 : vector<1x1xf32> to vector<1x128xf32>
    %94 = arith.mulf %93, %89 : vector<1x128xf32>
    %95 = arith.addf %92, %94 : vector<1x128xf32>
    %96 = vector.broadcast %72 : vector<1x1xf32> to vector<1x128xf32>
    %97 = arith.mulf %96, %90 : vector<1x128xf32>
    %98 = arith.addf %95, %97 : vector<1x128xf32>
    %99 = vector.broadcast %73 : vector<1x1xf32> to vector<1x128xf32>
    %100 = arith.addf %98, %99 : vector<1x128xf32>
    %101 = vector.broadcast %74 : vector<1x1xf32> to vector<1x128xf32>
    %102 = arith.mulf %101, %88 : vector<1x128xf32>
    %103 = vector.broadcast %75 : vector<1x1xf32> to vector<1x128xf32>
    %104 = arith.mulf %103, %89 : vector<1x128xf32>
    %105 = arith.addf %102, %104 : vector<1x128xf32>
    %106 = vector.broadcast %76 : vector<1x1xf32> to vector<1x128xf32>
    %107 = arith.mulf %106, %90 : vector<1x128xf32>
    %108 = arith.addf %105, %107 : vector<1x128xf32>
    %109 = vector.broadcast %77 : vector<1x1xf32> to vector<1x128xf32>
    %110 = arith.addf %108, %109 : vector<1x128xf32>
    %111 = vector.broadcast %78 : vector<1x1xf32> to vector<1x128xf32>
    %112 = arith.mulf %111, %88 : vector<1x128xf32>
    %113 = vector.broadcast %79 : vector<1x1xf32> to vector<1x128xf32>
    %114 = arith.mulf %113, %89 : vector<1x128xf32>
    %115 = arith.addf %112, %114 : vector<1x128xf32>
    %116 = vector.broadcast %80 : vector<1x1xf32> to vector<1x128xf32>
    %117 = arith.mulf %116, %90 : vector<1x128xf32>
    %118 = arith.addf %115, %117 : vector<1x128xf32>
    %119 = vector.broadcast %81 : vector<1x1xf32> to vector<1x128xf32>
    %120 = arith.addf %118, %119 : vector<1x128xf32>
    %121 = vector.broadcast %64 : vector<1x1xf32> to vector<1x128xf32>
    %122 = arith.mulf %100, %121 : vector<1x128xf32>
    %123 = arith.subf %59, %64 : vector<1x1xf32>
    %124 = vector.broadcast %123 : vector<1x1xf32> to vector<1x128xf32>
    %125 = arith.addf %122, %124 : vector<1x128xf32>
    %cst_60 = arith.constant 0.000000e+00 : f32
    %126 = vector.broadcast %cst_60 : f32 to vector<1x1xf32>
    %127 = arith.subf %126, %66 : vector<1x1xf32>
    %128 = vector.broadcast %127 : vector<1x1xf32> to vector<1x128xf32>
    %129 = arith.mulf %110, %128 : vector<1x128xf32>
    %cst_61 = arith.constant 1.200000e+02 : f32
    %130 = vector.broadcast %cst_61 : f32 to vector<1x1xf32>
    %131 = arith.mulf %130, %66 : vector<1x1xf32>
    %132 = arith.addf %131, %62 : vector<1x1xf32>
    %133 = vector.broadcast %132 : vector<1x1xf32> to vector<1x128xf32>
    %134 = arith.addf %129, %133 : vector<1x128xf32>
    %135 = vector.broadcast %69 : vector<1x1xf32> to vector<1x128xf32>
    %136 = arith.mulf %120, %135 : vector<1x128xf32>
    %137 = vector.broadcast %69 : vector<1x1xf32> to vector<1x128xf32>
    %138 = arith.subf %136, %137 : vector<1x128xf32>
    %139 = tpu.iota {dimensions = array<i32: 1>} : vector<1x128xi32>
    %c68_i32 = arith.constant 68 : i32
    %140 = vector.broadcast %c68_i32 : i32 to vector<1x128xi32>
    %141 = arith.cmpi slt, %139, %140 : vector<1x128xi32>
    %cst_62 = arith.constant 0x7F800000 : f32
    %142 = vector.broadcast %cst_62 : f32 to vector<1x128xf32>
    %143 = arith.select %141, %138, %142 : vector<1x128xi1>, vector<1x128xf32>
    %144 = vector.shape_cast %143 : vector<1x128xf32> to vector<1x1x128xf32>
    %cst_63 = arith.constant dense<0x7F800000> : vector<1xf32>
    %145 = vector.multi_reduction <minimumf>, %144, %cst_63 [1, 2] : vector<1x1x128xf32> to vector<1xf32>
    %146 = vector.shape_cast %145 : vector<1xf32> to vector<1x1x1xf32>
    %147 = vector.extract %146[0, 0, 0] : f32 from vector<1x1x1xf32>
    %148 = vector.broadcast %147 : f32 to vector<1x128xf32>
    %149 = arith.subf %138, %148 : vector<1x128xf32>
    %cst_64 = arith.constant 0.000000e+00 : f32
    %150 = vector.broadcast %cst_64 : f32 to vector<1x128xf32>
    %151 = arith.select %141, %149, %150 : vector<1x128xi1>, vector<1x128xf32>
    %cst_65 = arith.constant 0.000000e+00 : f32
    %152 = vector.broadcast %cst_65 : f32 to vector<5x128xf32>
    %153 = tpu.concatenate %125, %134, %151, %152 in 0 : vector<1x128xf32>, vector<1x128xf32>, vector<1x128xf32>, vector<5x128xf32> -> vector<8x128xf32>
    %c0_66 = arith.constant 0 : index
    %c0_67 = arith.constant 0 : index
    %154 = vector.load %arg9[%c0_66, %c0_67] : memref<8x128xf32, #tpu.memory_space<vmem>>, vector<8x128xf32>
    tpu.vector_store %arg9[%c0_66, %c0_67], %153 {strides = array<i32>} : memref<8x128xf32, #tpu.memory_space<vmem>>, vector<8x128xf32>,
    return
  }
  func.func @transform_0(%arg0: i32) -> (i32, i32, i32) {
    %c0_i32 = arith.constant 0 : i32
    %c0_i32_0 = arith.constant 0 : i32
    %c0_i32_1 = arith.constant 0 : i32
    %c0_i32_2 = arith.constant 0 : i32
    return %c0_i32, %c0_i32_0, %c0_i32_1 : i32, i32, i32
  }
  func.func @transform_1(%arg0: i32) -> (i32, i32) {
    %c0_i32 = arith.constant 0 : i32
    %c0_i32_0 = arith.constant 0 : i32
    %c0_i32_1 = arith.constant 0 : i32
    return %c0_i32, %c0_i32_0 : i32, i32
  }
  func.func @transform_2(%arg0: i32) -> (i32, i32) {
    %c0_i32 = arith.constant 0 : i32
    %c0_i32_0 = arith.constant 0 : i32
    %c0_i32_1 = arith.constant 0 : i32
    return %c0_i32, %c0_i32_0 : i32, i32
  }
  func.func @transform_3(%arg0: i32) -> (i32, i32) {
    %c0_i32 = arith.constant 0 : i32
    %c0_i32_0 = arith.constant 0 : i32
    %c0_i32_1 = arith.constant 0 : i32
    return %c0_i32, %c0_i32_0 : i32, i32
  }
  func.func @transform_4(%arg0: i32) -> (i32, i32) {
    %c0_i32 = arith.constant 0 : i32
    %c0_i32_0 = arith.constant 0 : i32
    %c0_i32_1 = arith.constant 0 : i32
    return %c0_i32, %c0_i32_0 : i32, i32
  }
  func.func @transform_5(%arg0: i32) -> (i32, i32) {
    %c0_i32 = arith.constant 0 : i32
    %c0_i32_0 = arith.constant 0 : i32
    %c0_i32_1 = arith.constant 0 : i32
    return %c0_i32, %c0_i32_0 : i32, i32
  }
  func.func @transform_6(%arg0: i32) -> (i32, i32) {
    %c0_i32 = arith.constant 0 : i32
    %c0_i32_0 = arith.constant 0 : i32
    %c0_i32_1 = arith.constant 0 : i32
    return %c0_i32, %c0_i32_0 : i32, i32
  }
  func.func @transform_7(%arg0: i32) -> (i32, i32) {
    %c0_i32 = arith.constant 0 : i32
    %c0_i32_0 = arith.constant 0 : i32
    %c0_i32_1 = arith.constant 0 : i32
    return %c0_i32, %c0_i32_0 : i32, i32
  }
  func.func @transform_8(%arg0: i32) -> (i32, i32) {
    %c0_i32 = arith.constant 0 : i32
    %c0_i32_0 = arith.constant 0 : i32
    %c0_i32_1 = arith.constant 0 : i32
    return %c0_i32, %c0_i32_0 : i32, i32
  }
}

</mosaic_0001>

<bundles_post_ra>
// kernel: landmark3d_forward.1
= control target key start
LH: loop header
LB: loop body
LE: loop exit
PB: predicated region body
PF: predicated region fallthrough
CT: control target
= control target key end

     0   :  { %s8777_s11 = smov 3   ;;  %s8778_s12 = smov 6   ;;  %vm5279_vm0 = vcmask 23552   ;;  %vm5408_vm1 = vcmask 48128   ;;  %vm5537_vm2 = vcmask 72704   ;;  %vm5795_vm3 = vcmask 121856   ;;  %s17548_s0 = inlined_call_operand.vmem [shape: f32[34,34,3], index: 0, kind: input, shape index: {}]   ;;  %s17549_s1 = inlined_call_operand.vmem [shape: f32[32,128], index: 1, kind: input, shape index: {}]   ;;  %s17550_s2 = inlined_call_operand.vmem [shape: f32[1,128], index: 2, kind: input, shape index: {}]   ;;  %s17551_s3 = inlined_call_operand.vmem [shape: f32[128,128], index: 3, kind: input, shape index: {}]   ;;  %s17552_s7 = inlined_call_operand.vmem [shape: f32[64,384], index: 7, kind: input, shape index: {}]   ;;  %s17553_s4 = inlined_call_operand.vmem [shape: f32[1,128], index: 4, kind: input, shape index: {}]   ;;  %s17554_s5 = inlined_call_operand.vmem [shape: f32[1,128], index: 5, kind: input, shape index: {}]   ;;  %s17555_s6 = inlined_call_operand.vmem [shape: f32[1,128], index: 6, kind: input, shape index: {}]   ;;  %s17556_s8 = inlined_call_operand.vmem [shape: f32[8,128], index: 8, kind: output, shape index: {}]  }
   0x1   :  { %v161_v0 = vld [vmem:[%s17548_s0 + $0x29] sm:$0xff]  ;;  %v159_v1 = vld [vmem:[%s17548_s0 + $0x11] sm:$0xff]  ;;  %v157_v2 = vld [vmem:[%s17548_s0 + $0x1] sm:$0xff]  ;;  %s8783_s22 = smov 21   ;;  %s8784_s23 = smov 24   ;;  %vm5666_vm4 = vcmask 97280  }
   0x2   :  { %1319 = vrot.lane.b32.xlu2 %v161_v0, %s8777_s11  ;;  %1315 = vrot.lane.b32.xlu1 %v159_v1, %s8777_s11  ;;  %v162_v3 = vld [vmem:[%s17548_s0 + $0x31] sm:$0xff]  ;;  %v160_v4 = vld [vmem:[%s17548_s0 + $0x19] sm:$0xff]  ;;  %vm5924_vm5 = vcmask 146432   ;;  %vm6182_vm6 = vcmask 195584   ;;  %vm6053_vm7 = vcmask 171008   ;;  %vm6311_vm8 = vcmask 220160  }
   0x3   :  { %1311 = vrot.lane.b32.xlu0 %v157_v2, %s8777_s11  ;;  %v158_v5 = vld [vmem:[%s17548_s0 + $0x9] sm:$0xff]  ;;  %v165_v6 = vld [vmem:[%s17548_s0 + $0x51] sm:$0xff]  ;;  %v164_v7 = vld [vmem:[%s17548_s0 + $0x41] sm:$0xff]  ;;  %vm6448_vm9 = vcmask 261120   ;;  %s8791_s30 = smov 127   ;;  %s8792_s9 = smov 126  }
   0x4   :  { %v163_v8 = vld [vmem:[%s17548_s0 + $0x39] sm:$0xff]  ;;  %v168_v9 = vld [vmem:[%s17548_s0 + $0x69] sm:$0xff]  ;;  %v167_v10 = vld [vmem:[%s17548_s0 + $0x61] sm:$0xff]  ;;  %vm7577_vm14 = vcmask 408576   ;;  %vm7579_vm15 = vcmask 416768  }
   0x5   :  { %v166_v11 = vld [vmem:[%s17548_s0 + $0x59] sm:$0xff]  ;;  %v171_v12 = vld [vmem:[%s17548_s0 + $0x89] sm:$0xff]  ;;  %v170_v13 = vld [vmem:[%s17548_s0 + $0x81] sm:$0xff] }
   0x6   :  { %v169_v14 = vld [vmem:[%s17548_s0 + $0x79] sm:$0xff]  ;;  %v174_v15 = vld [vmem:[%s17548_s0 + $0xa9] sm:$0xff]  ;;  %v173_v16 = vld [vmem:[%s17548_s0 + $0xa1] sm:$0xff] }
   0x7   :  { %v172_v17 = vld [vmem:[%s17548_s0 + $0x91] sm:$0xff]  ;;  %v177_v18 = vld [vmem:[%s17548_s0 + $0xc9] sm:$0xff]  ;;  %v176_v19 = vld [vmem:[%s17548_s0 + $0xb9] sm:$0xff] }
   0x8   :  { %v175_v20 = vld [vmem:[%s17548_s0 + $0xb1] sm:$0xff]  ;;  %v180_v21 = vld [vmem:[%s17548_s0 + $0xe1] sm:$0xff]  ;;  %v179_v22 = vld [vmem:[%s17548_s0 + $0xd9] sm:$0xff] }
   0x9   :  { %v178_v23 = vld [vmem:[%s17548_s0 + $0xd1] sm:$0xff]  ;;  %v183_v24 = vld [vmem:[%s17548_s0 + $0x101] sm:$0xff]  ;;  %v182_v25 = vld [vmem:[%s17548_s0 + $0xf9] sm:$0xff] }
   0xa   :  { %1321 = vrot.lane.b32.xlu2 %v162_v3, %s8777_s11  ;;  %1317 = vrot.lane.b32.xlu1 %v160_v4, %s8777_s11  ;;  %v181_v26 = vld [vmem:[%s17548_s0 + $0xf1] sm:$0xff]  ;;  %v186_v27 = vld [vmem:[%s17548_s0 + $0x121] sm:$0xff] }
   0xb   :  { %1313 = vrot.lane.b32.xlu0 %v158_v5, %s8777_s11  ;;  %v185_v28 = vld [vmem:[%s17548_s0 + $0x119] sm:$0xff]  ;;  %v184_v29 = vld [vmem:[%s17548_s0 + $0x109] sm:$0xff]  ;;  %v189_v30 = vld [vmem:[%s17548_s0 + $0x141] sm:$0xff] }
   0xc   :  { %v188_v31 = vld [vmem:[%s17548_s0 + $0x131] sm:$0xff]  ;;  %v187_v32 = vld [vmem:[%s17548_s0 + $0x129] sm:$0xff]  ;;  %v192_v33 = vld [vmem:[%s17548_s0 + $0x159] sm:$0xff] }
   0xd   :  { %v191_v34 = vld [vmem:[%s17548_s0 + $0x151] sm:$0xff]  ;;  %v190_v35 = vld [vmem:[%s17548_s0 + $0x149] sm:$0xff]  ;;  %v195_v37 = vld [vmem:[%s17548_s0 + $0x179] sm:$0xff] }
   0xe   :  { %v194_v38 = vld [vmem:[%s17548_s0 + $0x171] sm:$0xff]  ;;  %v193_v39 = vld [vmem:[%s17548_s0 + $0x169] sm:$0xff]  ;;  %v198_v41 = vld [vmem:[%s17548_s0 + $0x199] sm:$0xff] }
   0xf   :  { %v197_v42 = vld [vmem:[%s17548_s0 + $0x191] sm:$0xff]  ;;  %v196_v43 = vld [vmem:[%s17548_s0 + $0x181] sm:$0xff]  ;;  %v201_v45 = vld [vmem:[%s17548_s0 + $0x1b9] sm:$0xff] }
  0x10   :  { %v200_v46 = vld [vmem:[%s17548_s0 + $0x1a9] sm:$0xff]  ;;  %v199_v47 = vld [vmem:[%s17548_s0 + $0x1a1] sm:$0xff]  ;;  %v204_v51 = vld [vmem:[%s17548_s0 + $0x1d1] sm:$0xff] }
  0x11   :  { %v203_v52 = vld [vmem:[%s17548_s0 + $0x1c9] sm:$0xff]  ;;  %v202_v53 = vld [vmem:[%s17548_s0 + $0x1c1] sm:$0xff]  ;;  %v207_v57 = vld [vmem:[%s17548_s0 + $0x1f1] sm:$0xff] }
  0x12   :  { %1327 = vrot.lane.b32.xlu2 %v165_v6, %s8777_s11  ;;  %1325 = vrot.lane.b32.xlu1 %v164_v7, %s8777_s11  ;;  %v206_v58 = vld [vmem:[%s17548_s0 + $0x1e9] sm:$0xff]  ;;  %v205_v59 = vld [vmem:[%s17548_s0 + $0x1e1] sm:$0xff] }
  0x13   :  { %1323 = vrot.lane.b32.xlu0 %v163_v8, %s8777_s11  ;;  %v210_v63 = vld [vmem:[%s17548_s0 + $0x211] sm:$0xff]  ;;  %v209_v0 = vld [vmem:[%s17548_s0 + $0x209] sm:$0xff]  ;;  %v208_v1 = vld [vmem:[%s17548_s0 + $0x1f9] sm:$0xff] }
  0x14   :  { %v213_v5 = vld [vmem:[%s17548_s0 + $0x231] sm:$0xff]  ;;  %v212_v6 = vld [vmem:[%s17548_s0 + $0x221] sm:$0xff]  ;;  %v211_v7 = vld [vmem:[%s17548_s0 + $0x219] sm:$0xff] }
  0x1a   :  { %1333 = vrot.lane.b32.xlu2 %v168_v9, %s8777_s11  ;;  %1331 = vrot.lane.b32.xlu1 %v167_v10, %s8777_s11 }
  0x1b   :  { %1329 = vrot.lane.b32.xlu0 %v166_v11, %s8777_s11  ;;  %v216_v11 = vld [vmem:[%s17548_s0 + $0x249] sm:$0xff] }
  0x22   :  { %1339 = vrot.lane.b32.xlu2 %v171_v12, %s8777_s11  ;;  %1337 = vrot.lane.b32.xlu1 %v170_v13, %s8777_s11  ;;  %v215_v12 = vld [vmem:[%s17548_s0 + $0x241] sm:$0xff]  ;;  %v214_v13 = vld [vmem:[%s17548_s0 + $0x239] sm:$0xff] }
  0x23   :  { %1335 = vrot.lane.b32.xlu0 %v169_v14, %s8777_s11 }
  0x2a   :  { %1345 = vrot.lane.b32.xlu2 %v174_v15, %s8777_s11  ;;  %1343 = vrot.lane.b32.xlu1 %v173_v16, %s8777_s11 }
  0x2b   :  { %1341 = vrot.lane.b32.xlu0 %v172_v17, %s8777_s11  ;;  %v219_v17 = vld [vmem:[%s17548_s0 + $0x269] sm:$0xff] }
  0x32   :  { %1351 = vrot.lane.b32.xlu2 %v177_v18, %s8777_s11  ;;  %1349 = vrot.lane.b32.xlu1 %v176_v19, %s8777_s11  ;;  %v218_v18 = vld [vmem:[%s17548_s0 + $0x261] sm:$0xff]  ;;  %v217_v19 = vld [vmem:[%s17548_s0 + $0x259] sm:$0xff] }
  0x33   :  { %1347 = vrot.lane.b32.xlu0 %v175_v20, %s8777_s11 }
  0x3a   :  { %1357 = vrot.lane.b32.xlu2 %v180_v21, %s8777_s11  ;;  %1355 = vrot.lane.b32.xlu1 %v179_v22, %s8777_s11 }
  0x3b   :  { %1353 = vrot.lane.b32.xlu0 %v178_v23, %s8777_s11  ;;  %v222_v23 = vld [vmem:[%s17548_s0 + $0x289] sm:$0xff] }
  0x42   :  { %1363 = vrot.lane.b32.xlu2 %v183_v24, %s8777_s11  ;;  %1361 = vrot.lane.b32.xlu1 %v182_v25, %s8777_s11  ;;  %v221_v24 = vld [vmem:[%s17548_s0 + $0x281] sm:$0xff]  ;;  %v220_v25 = vld [vmem:[%s17548_s0 + $0x271] sm:$0xff] }
  0x43   :  { %1359 = vrot.lane.b32.xlu0 %v181_v26, %s8777_s11 }
  0x4a   :  { %1369 = vrot.lane.b32.xlu2 %v186_v27, %s8777_s11  ;;  %1367 = vrot.lane.b32.xlu1 %v185_v28, %s8777_s11 }
  0x4b   :  { %1365 = vrot.lane.b32.xlu0 %v184_v29, %s8777_s11  ;;  %v225_v29 = vld [vmem:[%s17548_s0 + $0x2a9] sm:$0xff] }
  0x52   :  { %1375 = vrot.lane.b32.xlu2 %v189_v30, %s8777_s11  ;;  %1373 = vrot.lane.b32.xlu1 %v188_v31, %s8777_s11  ;;  %v224_v30 = vld [vmem:[%s17548_s0 + $0x299] sm:$0xff]  ;;  %v223_v31 = vld [vmem:[%s17548_s0 + $0x291] sm:$0xff] }
  0x53   :  { %1371 = vrot.lane.b32.xlu0 %v187_v32, %s8777_s11 }
  0x5a   :  { %1381 = vrot.lane.b32.xlu2 %v192_v33, %s8777_s11  ;;  %1379 = vrot.lane.b32.xlu1 %v191_v34, %s8777_s11 }
  0x5b   :  { %1377 = vrot.lane.b32.xlu0 %v190_v35, %s8777_s11  ;;  %v228_v35 = vld [vmem:[%s17548_s0 + $0x2c1] sm:$0xff] }
  0x5c   :  { %v8993_v36 = vpop.permute.xlu2 %1319 }
  0x62   :  { %1387 = vrot.lane.b32.xlu2 %v195_v37, %s8777_s11  ;;  %1385 = vrot.lane.b32.xlu1 %v194_v38, %s8777_s11  ;;  %v227_v37 = vld [vmem:[%s17548_s0 + $0x2b9] sm:$0xff]  ;;  %v226_v38 = vld [vmem:[%s17548_s0 + $0x2b1] sm:$0xff] }
  0x63   :  { %1383 = vrot.lane.b32.xlu0 %v193_v39, %s8777_s11 }
  0x64   :  { %v9007_v40 = vpop.permute.xlu2 %1321 }
  0x6a   :  { %1393 = vrot.lane.b32.xlu2 %v198_v41, %s8777_s11  ;;  %1391 = vrot.lane.b32.xlu1 %v197_v42, %s8777_s11 }
  0x6b   :  { %1389 = vrot.lane.b32.xlu0 %v196_v43, %s8777_s11  ;;  %v231_v43 = vld [vmem:[%s17548_s0 + $0x2e1] sm:$0xff] }
  0x6c   :  { %v9021_v44 = vpop.permute.xlu2 %1327 }
  0x72   :  { %1399 = vrot.lane.b32.xlu2 %v201_v45, %s8777_s11  ;;  %1397 = vrot.lane.b32.xlu1 %v200_v46, %s8777_s11  ;;  %v230_v45 = vld [vmem:[%s17548_s0 + $0x2d9] sm:$0xff]  ;;  %v229_v46 = vld [vmem:[%s17548_s0 + $0x2d1] sm:$0xff] }
  0x73   :  { %1395 = vrot.lane.b32.xlu0 %v199_v47, %s8777_s11 }
  0x74   :  { %v9035_v48 = vpop.permute.xlu2 %1333  ;;  %v9037_v49 = vpop.permute.xlu1 %1315 }
  0x75   :  { %17557 = vst [vmem:[#allocation2_spill] sm:$0xff] %v9035_v48  ;;  %v9039_v50 = vpop.permute.xlu0 %1311  ;;  %v8119_v48 = vld [vmem:[%s17548_s0 + $0x23a] sm:$0xff] }
  0x7a   :  { %1405 = vrot.lane.b32.xlu2 %v204_v51, %s8777_s11  ;;  %1403 = vrot.lane.b32.xlu1 %v203_v52, %s8777_s11 }
  0x7b   :  { %1401 = vrot.lane.b32.xlu0 %v202_v53, %s8777_s11  ;;  %v234_v53 = vld [vmem:[%s17548_s0 + $0x301] sm:$0xff] }
  0x7c   :  { %v9053_v54 = vpop.permute.xlu2 %1339  ;;  %v9055_v55 = vpop.permute.xlu1 %1317 }
  0x7d   :  { %17558 = vst [vmem:[#allocation3_spill] sm:$0xff] %v9053_v54  ;;  %v9057_v56 = vpop.permute.xlu0 %1313  ;;  %v7981_v54 = vld [vmem:[%s17548_s0 + $0x1d1] sm:$0xff] }
  0x82   :  { %1411 = vrot.lane.b32.xlu2 %v207_v57, %s8777_s11  ;;  %1409 = vrot.lane.b32.xlu1 %v206_v58, %s8777_s11  ;;  %v233_v57 = vld [vmem:[%s17548_s0 + $0x2f9] sm:$0xff]  ;;  %v232_v58 = vld [vmem:[%s17548_s0 + $0x2e9] sm:$0xff] }
  0x83   :  { %1407 = vrot.lane.b32.xlu0 %v205_v59, %s8777_s11 }
  0x84   :  { %v9071_v60 = vpop.permute.xlu2 %1345  ;;  %v9073_v61 = vpop.permute.xlu1 %1325 }
  0x85   :  { %17559 = vst [vmem:[#allocation4_spill] sm:$0xff] %v9071_v60  ;;  %v9075_v62 = vpop.permute.xlu0 %1323  ;;  %v7861_v60 = vld [vmem:[%s17548_s0 + $0x220] sm:$0xff] }
  0x8a   :  { %1417 = vrot.lane.b32.xlu2 %v210_v63, %s8777_s11  ;;  %1415 = vrot.lane.b32.xlu1 %v209_v0, %s8777_s11 }
  0x8b   :  { %1413 = vrot.lane.b32.xlu0 %v208_v1, %s8777_s11  ;;  %v237_v1 = vld [vmem:[%s17548_s0 + $0x321] sm:$0xff] }
  0x8c   :  { %v9089_v2 = vpop.permute.xlu2 %1351  ;;  %v9091_v3 = vpop.permute.xlu1 %1331 }
  0x8d   :  { %17560 = vst [vmem:[#allocation5_spill] sm:$0xff] %v9089_v2  ;;  %v9093_v4 = vpop.permute.xlu0 %1329  ;;  %v371_v2 = vld [vmem:[%s17548_s0 + $0x35a] sm:$0xff] }
  0x8e   :  { %17561 = vst [vmem:[#allocation6_spill] sm:$0xff] %v9091_v3  ;;  %v8233_v3 = vld [vmem:[%s17548_s0 + $0x1d0] sm:$0xff] }
  0x8f   :  { %17562 = vst [vmem:[#allocation7_spill] sm:$0xff] %v9093_v4 }
  0x92   :  { %1423 = vrot.lane.b32.xlu2 %v213_v5, %s8777_s11  ;;  %1421 = vrot.lane.b32.xlu1 %v212_v6, %s8777_s11  ;;  %v236_v5 = vld [vmem:[%s17548_s0 + $0x311] sm:$0xff]  ;;  %v235_v6 = vld [vmem:[%s17548_s0 + $0x309] sm:$0xff] }
  0x93   :  { %1419 = vrot.lane.b32.xlu0 %v211_v7, %s8777_s11 }
  0x94   :  { %v9107_v8 = vpop.permute.xlu2 %1357  ;;  %v9109_v9 = vpop.permute.xlu1 %1337 }
  0x95   :  { %17563 = vst [vmem:[#allocation8_spill] sm:$0xff] %v9107_v8  ;;  %v9111_v10 = vpop.permute.xlu0 %1335  ;;  %v351_v8 = vld [vmem:[%s17548_s0 + $0x292] sm:$0xff] }
  0x96   :  { %17564 = vst [vmem:[#allocation9_spill] sm:$0xff] %v9109_v9  ;;  %v7990_v9 = vld [vmem:[%s17548_s0 + $0x231] sm:$0xff] }
  0x97   :  { %17565 = vst [vmem:[#allocation10_spill] sm:$0xff] %v9111_v10  ;;  %v8023_v10 = vld [vmem:[%s17548_s0 + $0x379] sm:$0xff] }
  0x9a   :  { %1429 = vrot.lane.b32.xlu2 %v216_v11, %s8777_s11  ;;  %1427 = vrot.lane.b32.xlu1 %v215_v12, %s8777_s11 }
  0x9b   :  { %1425 = vrot.lane.b32.xlu0 %v214_v13, %s8777_s11  ;;  %v240_v13 = vld [vmem:[%s17548_s0 + $0x339] sm:$0xff] }
  0x9c   :  { %v9125_v14 = vpop.permute.xlu2 %1363  ;;  %v9127_v15 = vpop.permute.xlu1 %1343 }
  0x9d   :  { %17566 = vst [vmem:[#allocation11_spill] sm:$0xff] %v9125_v14  ;;  %v9129_v16 = vpop.permute.xlu0 %1341  ;;  %v335_v14 = vld [vmem:[%s17548_s0 + $0x1f2] sm:$0xff] }
  0x9e   :  { %17567 = vst [vmem:[#allocation12_spill] sm:$0xff] %v9127_v15  ;;  %v7867_v15 = vld [vmem:[%s17548_s0 + $0x260] sm:$0xff] }
  0x9f   :  { %17568 = vst [vmem:[#allocation13_spill] sm:$0xff] %v9129_v16  ;;  %v7894_v16 = vld [vmem:[%s17548_s0 + $0x370] sm:$0xff] }
  0xa2   :  { %1435 = vrot.lane.b32.xlu2 %v219_v17, %s8777_s11  ;;  %1433 = vrot.lane.b32.xlu1 %v218_v18, %s8777_s11  ;;  %v239_v17 = vld [vmem:[%s17548_s0 + $0x331] sm:$0xff]  ;;  %v238_v18 = vld [vmem:[%s17548_s0 + $0x329] sm:$0xff] }
  0xa3   :  { %1431 = vrot.lane.b32.xlu0 %v217_v19, %s8777_s11 }
  0xa4   :  { %v9143_v20 = vpop.permute.xlu2 %1369  ;;  %v9145_v21 = vpop.permute.xlu1 %1349 }
  0xa5   :  { %17569 = vst [vmem:[#allocation14_spill] sm:$0xff] %v9143_v20  ;;  %v9147_v22 = vpop.permute.xlu0 %1347  ;;  %v290_v20 = vld [vmem:[%s17548_s0 + $0x32] sm:$0xff] }
  0xa6   :  { %17570 = vst [vmem:[#allocation15_spill] sm:$0xff] %v9145_v21  ;;  %v377_v21 = vld [vmem:[%s17548_s0 + $0x39a] sm:$0xff] }
  0xa7   :  { %17571 = vst [vmem:[#allocation16_spill] sm:$0xff] %v9147_v22 }
  0xaa   :  { %1441 = vrot.lane.b32.xlu2 %v222_v23, %s8777_s11  ;;  %1439 = vrot.lane.b32.xlu1 %v221_v24, %s8777_s11 }
  0xab   :  { %1437 = vrot.lane.b32.xlu0 %v220_v25, %s8777_s11  ;;  %v243_v25 = vld [vmem:[%s17548_s0 + $0x359] sm:$0xff] }
  0xac   :  { %v9161_v26 = vpop.permute.xlu2 %1375  ;;  %v9163_v27 = vpop.permute.xlu1 %1355 }
  0xad   :  { %17572 = vst [vmem:[#allocation17_spill] sm:$0xff] %v9161_v26  ;;  %v9165_v28 = vpop.permute.xlu0 %1353  ;;  %v266_v26 = vld [vmem:[%s17548_s0 + $0x441] sm:$0xff] }
  0xae   :  { %17573 = vst [vmem:[#allocation18_spill] sm:$0xff] %v9163_v27  ;;  %v353_v27 = vld [vmem:[%s17548_s0 + $0x2aa] sm:$0xff] }
  0xaf   :  { %17574 = vst [vmem:[#allocation19_spill] sm:$0xff] %v9165_v28  ;;  %v368_v28 = vld [vmem:[%s17548_s0 + $0x33a] sm:$0xff] }
  0xb2   :  { %1447 = vrot.lane.b32.xlu2 %v225_v29, %s8777_s11  ;;  %1445 = vrot.lane.b32.xlu1 %v224_v30, %s8777_s11  ;;  %v242_v29 = vld [vmem:[%s17548_s0 + $0x351] sm:$0xff]  ;;  %v241_v30 = vld [vmem:[%s17548_s0 + $0x349] sm:$0xff] }
  0xb3   :  { %1443 = vrot.lane.b32.xlu0 %v223_v31, %s8777_s11 }
  0xb4   :  { %v9179_v32 = vpop.permute.xlu2 %1381  ;;  %v9181_v33 = vpop.permute.xlu1 %1361 }
  0xb5   :  { %17575 = vst [vmem:[#allocation20_spill] sm:$0xff] %v9179_v32  ;;  %v9183_v34 = vpop.permute.xlu0 %1359  ;;  %v8248_v32 = vld [vmem:[%s17548_s0 + $0x268] sm:$0xff] }
  0xb6   :  { %17576 = vst [vmem:[#allocation21_spill] sm:$0xff] %v9181_v33 }
  0xb7   :  { %17577 = vst [vmem:[#allocation22_spill] sm:$0xff] %v9183_v34  ;;  %v345_v34 = vld [vmem:[%s17548_s0 + $0x25a] sm:$0xff] }
  0xba   :  { %1453 = vrot.lane.b32.xlu2 %v228_v35, %s8777_s11  ;;  %1451 = vrot.lane.b32.xlu1 %v227_v37, %s8777_s11 }
  0xbb   :  { %1449 = vrot.lane.b32.xlu0 %v226_v38, %s8777_s11  ;;  %v246_v38 = vld [vmem:[%s17548_s0 + $0x379] sm:$0xff] }
  0xbc   :  { %v9197_v39 = vpop.permute.xlu2 %1387  ;;  %v9199_v41 = vpop.permute.xlu1 %1367 }
  0xbd   :  { %17578 = vst [vmem:[#allocation23_spill] sm:$0xff] %v9197_v39  ;;  %v9201_v42 = vpop.permute.xlu0 %1365  ;;  %v7991_v39 = vld [vmem:[%s17548_s0 + $0x239] sm:$0xff] }
  0xbe   :  { %17579 = vst [vmem:[#allocation24_spill] sm:$0xff] %v9199_v41  ;;  %v303_v41 = vld [vmem:[%s17548_s0 + $0xb2] sm:$0xff] }
  0xbf   :  { %17580 = vst [vmem:[#allocation25_spill] sm:$0xff] %v9201_v42  ;;  %v329_v42 = vld [vmem:[%s17548_s0 + $0x1ba] sm:$0xff] }
  0xc2   :  { %1459 = vrot.lane.b32.xlu2 %v231_v43, %s8777_s11  ;;  %1457 = vrot.lane.b32.xlu1 %v230_v45, %s8777_s11  ;;  %v245_v43 = vld [vmem:[%s17548_s0 + $0x371] sm:$0xff]  ;;  %v244_v45 = vld [vmem:[%s17548_s0 + $0x361] sm:$0xff] }
  0xc3   :  { %1455 = vrot.lane.b32.xlu0 %v229_v46, %s8777_s11 }
  0xc4   :  { %v9215_v47 = vpop.permute.xlu2 %1393  ;;  %v9217_v51 = vpop.permute.xlu1 %1373 }
  0xc5   :  { %17581 = vst [vmem:[#allocation26_spill] sm:$0xff] %v9215_v47  ;;  %v9219_v52 = vpop.permute.xlu0 %1371  ;;  %v7868_v47 = vld [vmem:[%s17548_s0 + $0x268] sm:$0xff] }
  0xc6   :  { %17582 = vst [vmem:[#allocation27_spill] sm:$0xff] %v9217_v51  ;;  %v269_v51 = vld [vmem:[%s17548_s0 + $0x461] sm:$0xff] }
  0xc7   :  { %17583 = vst [vmem:[#allocation28_spill] sm:$0xff] %v9219_v52  ;;  %v279_v52 = vld [vmem:[%s17548_s0 + $0x4c1] sm:$0xff] }
  0xca   :  { %1465 = vrot.lane.b32.xlu2 %v234_v53, %s8777_s11  ;;  %1463 = vrot.lane.b32.xlu1 %v233_v57, %s8777_s11 }
  0xcb   :  { %1461 = vrot.lane.b32.xlu0 %v232_v58, %s8777_s11  ;;  %v249_v58 = vld [vmem:[%s17548_s0 + $0x399] sm:$0xff] }
  0xcc   :  { %v9233_v59 = vpop.permute.xlu2 %1399  ;;  %v9235_v63 = vpop.permute.xlu1 %1379 }
  0xcd   :  { %17584 = vst [vmem:[#allocation29_spill] sm:$0xff] %v9233_v59  ;;  %v9237_v0 = vpop.permute.xlu0 %1377  ;;  %v374_v59 = vld [vmem:[%s17548_s0 + $0x37a] sm:$0xff] }
  0xce   :  { %17585 = vst [vmem:[#allocation30_spill] sm:$0xff] %v9235_v63  ;;  %v261_v63 = vld [vmem:[%s17548_s0 + $0x411] sm:$0xff] }
  0xcf   :  { %17586 = vst [vmem:[#allocation31_spill] sm:$0xff] %v9237_v0  ;;  %v264_v0 = vld [vmem:[%s17548_s0 + $0x429] sm:$0xff] }
  0xd2   :  { %1471 = vrot.lane.b32.xlu2 %v237_v1, %s8777_s11  ;;  %1469 = vrot.lane.b32.xlu1 %v236_v5, %s8777_s11  ;;  %v248_v1 = vld [vmem:[%s17548_s0 + $0x389] sm:$0xff]  ;;  %v247_v5 = vld [vmem:[%s17548_s0 + $0x381] sm:$0xff] }
  0xd3   :  { %1467 = vrot.lane.b32.xlu0 %v235_v6, %s8777_s11 }
  0xd4   :  { %v9251_v7 = vpop.permute.xlu2 %1405  ;;  %v9253_v11 = vpop.permute.xlu1 %1385 }
  0xd5   :  { %17587 = vst [vmem:[#allocation32_spill] sm:$0xff] %v9251_v7  ;;  %v9255_v12 = vpop.permute.xlu0 %1383  ;;  %v350_v7 = vld [vmem:[%s17548_s0 + $0x28a] sm:$0xff] }
  0xd6   :  { %17588 = vst [vmem:[#allocation33_spill] sm:$0xff] %v9253_v11  ;;  %v7997_v11 = vld [vmem:[%s17548_s0 + $0x271] sm:$0xff] }
  0xd7   :  { %17589 = vst [vmem:[#allocation34_spill] sm:$0xff] %v9255_v12  ;;  %v8117_v12 = vld [vmem:[%s17548_s0 + $0x222] sm:$0xff] }
  0xda   :  { %1477 = vrot.lane.b32.xlu2 %v240_v13, %s8777_s11  ;;  %1475 = vrot.lane.b32.xlu1 %v239_v17, %s8777_s11 }
  0xdb   :  { %1473 = vrot.lane.b32.xlu0 %v238_v18, %s8777_s11  ;;  %v252_v18 = vld [vmem:[%s17548_s0 + $0x3b1] sm:$0xff] }
  0xdc   :  { %v9269_v19 = vpop.permute.xlu2 %1411  ;;  %v9271_v23 = vpop.permute.xlu1 %1391 }
  0xdd   :  { %17590 = vst [vmem:[#allocation35_spill] sm:$0xff] %v9269_v19  ;;  %v9273_v24 = vpop.permute.xlu0 %1389  ;;  %v338_v19 = vld [vmem:[%s17548_s0 + $0x212] sm:$0xff] }
  0xde   :  { %17591 = vst [vmem:[#allocation36_spill] sm:$0xff] %v9271_v23  ;;  %v7870_v23 = vld [vmem:[%s17548_s0 + $0x280] sm:$0xff] }
  0xdf   :  { %17592 = vst [vmem:[#allocation37_spill] sm:$0xff] %v9273_v24  ;;  %v7895_v24 = vld [vmem:[%s17548_s0 + $0x378] sm:$0xff] }
  0xe2   :  { %1483 = vrot.lane.b32.xlu2 %v243_v25, %s8777_s11  ;;  %1481 = vrot.lane.b32.xlu1 %v242_v29, %s8777_s11  ;;  %v251_v25 = vld [vmem:[%s17548_s0 + $0x3a9] sm:$0xff]  ;;  %v250_v29 = vld [vmem:[%s17548_s0 + $0x3a1] sm:$0xff] }
  0xe3   :  { %1479 = vrot.lane.b32.xlu0 %v241_v30, %s8777_s11 }
  0xe4   :  { %v9287_v31 = vpop.permute.xlu2 %1417  ;;  %v9289_v35 = vpop.permute.xlu1 %1397 }
  0xe5   :  { %17593 = vst [vmem:[#allocation38_spill] sm:$0xff] %v9287_v31  ;;  %v9291_v37 = vpop.permute.xlu0 %1395  ;;  %v323_v31 = vld [vmem:[%s17548_s0 + $0x17a] sm:$0xff] }
  0xe6   :  { %17594 = vst [vmem:[#allocation39_spill] sm:$0xff] %v9289_v35  ;;  %v7852_v35 = vld [vmem:[%s17548_s0 + $0x1c8] sm:$0xff] }
  0xe7   :  { %17595 = vst [vmem:[#allocation40_spill] sm:$0xff] %v9291_v37  ;;  %v7858_v37 = vld [vmem:[%s17548_s0 + $0x208] sm:$0xff] }
  0xea   :  { %1489 = vrot.lane.b32.xlu2 %v246_v38, %s8777_s11  ;;  %1487 = vrot.lane.b32.xlu1 %v245_v43, %s8777_s11 }
  0xeb   :  { %1485 = vrot.lane.b32.xlu0 %v244_v45, %s8777_s11  ;;  %v255_v45 = vld [vmem:[%s17548_s0 + $0x3d1] sm:$0xff] }
  0xec   :  { %v9305_v46 = vpop.permute.xlu2 %1423  ;;  %v9307_v53 = vpop.permute.xlu1 %1403 }
  0xed   :  { %17596 = vst [vmem:[#allocation41_spill] sm:$0xff] %v9305_v46  ;;  %v9309_v57 = vpop.permute.xlu0 %1401  ;;  %v276_v46 = vld [vmem:[%s17548_s0 + $0x4a1] sm:$0xff] }
  0xee   :  { %17597 = vst [vmem:[#allocation42_spill] sm:$0xff] %v9307_v53  ;;  %v359_v53 = vld [vmem:[%s17548_s0 + $0x2e2] sm:$0xff] }
  0xef   :  { %17598 = vst [vmem:[#allocation43_spill] sm:$0xff] %v9309_v57  ;;  %v365_v57 = vld [vmem:[%s17548_s0 + $0x322] sm:$0xff] }
  0xf2   :  { %1495 = vrot.lane.b32.xlu2 %v249_v58, %s8777_s11  ;;  %1493 = vrot.lane.b32.xlu1 %v248_v1, %s8777_s11  ;;  %v254_v58 = vld [vmem:[%s17548_s0 + $0x3c9] sm:$0xff]  ;;  %v253_v1 = vld [vmem:[%s17548_s0 + $0x3c1] sm:$0xff] }
  0xf3   :  { %1491 = vrot.lane.b32.xlu0 %v247_v5, %s8777_s11 }
  0xf4   :  { %v9323_v6 = vpop.permute.xlu2 %1429  ;;  %v9325_v13 = vpop.permute.xlu1 %1409 }
  0xf5   :  { %17599 = vst [vmem:[#allocation44_spill] sm:$0xff] %v9323_v6  ;;  %v9327_v17 = vpop.permute.xlu0 %1407  ;;  %v260_v6 = vld [vmem:[%s17548_s0 + $0x401] sm:$0xff] }
  0xf6   :  { %17600 = vst [vmem:[#allocation45_spill] sm:$0xff] %v9325_v13 }
  0xf7   :  { %17601 = vst [vmem:[#allocation46_spill] sm:$0xff] %v9327_v17  ;;  %v347_v17 = vld [vmem:[%s17548_s0 + $0x26a] sm:$0xff] }
  0xfa   :  { %1501 = vrot.lane.b32.xlu2 %v252_v18, %s8777_s11  ;;  %1499 = vrot.lane.b32.xlu1 %v251_v25, %s8777_s11 }
  0xfb   :  { %1497 = vrot.lane.b32.xlu0 %v250_v29, %s8777_s11  ;;  %v258_v29 = vld [vmem:[%s17548_s0 + $0x3f1] sm:$0xff] }
  0xfc   :  { %v9341_v30 = vpop.permute.xlu2 %1435  ;;  %v9343_v38 = vpop.permute.xlu1 %1415 }
  0xfd   :  { %17602 = vst [vmem:[#allocation47_spill] sm:$0xff] %v9341_v30  ;;  %v9345_v43 = vpop.permute.xlu0 %1413  ;;  %v257_v30 = vld [vmem:[%s17548_s0 + $0x3e9] sm:$0xff] }
  0xfe   :  { %17603 = vst [vmem:[#allocation48_spill] sm:$0xff] %v9343_v38  ;;  %v326_v38 = vld [vmem:[%s17548_s0 + $0x19a] sm:$0xff] }
  0xff   :  { %17604 = vst [vmem:[#allocation49_spill] sm:$0xff] %v9345_v43  ;;  %v336_v43 = vld [vmem:[%s17548_s0 + $0x1fa] sm:$0xff] }
 0x102   :  { %1507 = vrot.lane.b32.xlu2 %v255_v45, %s8777_s11  ;;  %1505 = vrot.lane.b32.xlu1 %v254_v58, %s8777_s11  ;;  %v256_v45 = vld [vmem:[%s17548_s0 + $0x3d9] sm:$0xff] }
 0x103   :  { %1503 = vrot.lane.b32.xlu0 %v253_v1, %s8777_s11 }
 0x104   :  { %v9359_v5 = vpop.permute.xlu2 %1441  ;;  %v9361_v18 = vpop.permute.xlu1 %1421 }
 0x105   :  { %17605 = vst [vmem:[#allocation50_spill] sm:$0xff] %v9359_v5  ;;  %v9363_v25 = vpop.permute.xlu0 %1419 }
 0x106   :  { %17606 = vst [vmem:[#allocation51_spill] sm:$0xff] %v9361_v18  ;;  %v275_v18 = vld [vmem:[%s17548_s0 + $0x499] sm:$0xff] }
 0x107   :  { %17607 = vst [vmem:[#allocation52_spill] sm:$0xff] %v9363_v25  ;;  %v278_v25 = vld [vmem:[%s17548_s0 + $0x4b9] sm:$0xff] }
 0x10a   :  { %1513 = vrot.lane.b32.xlu2 %v258_v29, %s8777_s11  ;;  %1511 = vrot.lane.b32.xlu1 %v257_v30, %s8777_s11  ;;  %v259_v30 = vld [vmem:[%s17548_s0 + $0x3f9] sm:$0xff] }
 0x10b   :  { %1509 = vrot.lane.b32.xlu0 %v256_v45, %s8777_s11 }
 0x10c   :  { %v9377_v58 = vpop.permute.xlu2 %1447  ;;  %v9379_v1 = vpop.permute.xlu1 %1427 }
 0x10d   :  { %17608 = vst [vmem:[#allocation53_spill] sm:$0xff] %v9377_v58  ;;  %v9381_v5 = vpop.permute.xlu0 %1425  ;;  %v354_v58 = vld [vmem:[%s17548_s0 + $0x2b2] sm:$0xff] }
 0x10e   :  { %17609 = vst [vmem:[#allocation54_spill] sm:$0xff] %v9379_v1 }
 0x10f   :  { %17610 = vst [vmem:[#allocation55_spill] sm:$0xff] %v9381_v5  ;;  %v263_v5 = vld [vmem:[%s17548_s0 + $0x421] sm:$0xff] }
 0x112   :  { %1519 = vrot.lane.b32.xlu2 %v261_v63, %s8777_s11  ;;  %1517 = vrot.lane.b32.xlu1 %v260_v6, %s8777_s11  ;;  %v262_v63 = vld [vmem:[%s17548_s0 + $0x419] sm:$0xff] }
 0x113   :  { %1515 = vrot.lane.b32.xlu0 %v259_v30, %s8777_s11 }
 0x114   :  { %v9395_v29 = vpop.permute.xlu2 %1453  ;;  %v9397_v45 = vpop.permute.xlu1 %1433 }
 0x115   :  { %17611 = vst [vmem:[#allocation56_spill] sm:$0xff] %v9395_v29  ;;  %v9399_v1 = vpop.permute.xlu0 %1431  ;;  %v341_v29 = vld [vmem:[%s17548_s0 + $0x232] sm:$0xff] }
 0x116   :  { %17612 = vst [vmem:[#allocation57_spill] sm:$0xff] %v9397_v45 }
 0x117   :  { %17613 = vst [vmem:[#allocation58_spill] sm:$0xff] %v9399_v1  ;;  %v267_v1 = vld [vmem:[%s17548_s0 + $0x449] sm:$0xff] }
 0x11a   :  { %1525 = vrot.lane.b32.xlu2 %v264_v0, %s8777_s11  ;;  %1523 = vrot.lane.b32.xlu1 %v263_v5, %s8777_s11  ;;  %v265_v0 = vld [vmem:[%s17548_s0 + $0x439] sm:$0xff] }
 0x11b   :  { %1521 = vrot.lane.b32.xlu0 %v262_v63, %s8777_s11 }
 0x11c   :  { %v9413_v6 = vpop.permute.xlu2 %1459  ;;  %v9415_v30 = vpop.permute.xlu1 %1439 }
 0x11d   :  { %17614 = vst [vmem:[#allocation59_spill] sm:$0xff] %v9413_v6  ;;  %v9417_v45 = vpop.permute.xlu0 %1437  ;;  %v293_v6 = vld [vmem:[%s17548_s0 + $0x52] sm:$0xff] }
 0x11e   :  { %17615 = vst [vmem:[#allocation60_spill] sm:$0xff] %v9415_v30 }
 0x11f   :  { %17616 = vst [vmem:[#allocation61_spill] sm:$0xff] %v9417_v45  ;;  %v270_v45 = vld [vmem:[%s17548_s0 + $0x469] sm:$0xff] }
 0x122   :  { %1531 = vrot.lane.b32.xlu2 %v267_v1, %s8777_s11  ;;  %1529 = vrot.lane.b32.xlu1 %v266_v26, %s8777_s11  ;;  %v268_v26 = vld [vmem:[%s17548_s0 + $0x451] sm:$0xff] }
 0x123   :  { %1527 = vrot.lane.b32.xlu0 %v265_v0, %s8777_s11 }
 0x124   :  { %v9431_v5 = vpop.permute.xlu2 %1465  ;;  %v9433_v63 = vpop.permute.xlu1 %1445 }
 0x125   :  { %17617 = vst [vmem:[#allocation62_spill] sm:$0xff] %v9431_v5  ;;  %v9435_v30 = vpop.permute.xlu0 %1443  ;;  %v272_v5 = vld [vmem:[%s17548_s0 + $0x479] sm:$0xff] }
 0x126   :  { %17618 = vst [vmem:[#allocation63_spill] sm:$0xff] %v9433_v63 }
 0x127   :  { %17619 = vst [vmem:[#allocation64_spill] sm:$0xff] %v9435_v30  ;;  %v273_v30 = vld [vmem:[%s17548_s0 + $0x489] sm:$0xff] }
 0x12a   :  { %1537 = vrot.lane.b32.xlu2 %v270_v45, %s8777_s11  ;;  %1535 = vrot.lane.b32.xlu1 %v269_v51, %s8777_s11  ;;  %v271_v51 = vld [vmem:[%s17548_s0 + $0x471] sm:$0xff] }
 0x12b   :  { %1533 = vrot.lane.b32.xlu0 %v268_v26, %s8777_s11 }
 0x12c   :  { %v9449_v1 = vpop.permute.xlu2 %1471  ;;  %v9451_v0 = vpop.permute.xlu1 %1451 }
 0x12d   :  { %17620 = vst [vmem:[#allocation65_spill] sm:$0xff] %v9449_v1  ;;  %v9453_v63 = vpop.permute.xlu0 %1449 }
 0x12e   :  { %17621 = vst [vmem:[#allocation66_spill] sm:$0xff] %v9451_v0  ;;  %v344_v0 = vld [vmem:[%s17548_s0 + $0x24a] sm:$0xff] }
 0x12f   :  { %17622 = vst [vmem:[#allocation67_spill] sm:$0xff] %v9453_v63  ;;  %v348_v63 = vld [vmem:[%s17548_s0 + $0x272] sm:$0xff] }
 0x132   :  { %1543 = vrot.lane.b32.xlu2 %v273_v30, %s8777_s11  ;;  %1541 = vrot.lane.b32.xlu1 %v272_v5, %s8777_s11  ;;  %v274_v30 = vld [vmem:[%s17548_s0 + $0x491] sm:$0xff] }
 0x133   :  { %1539 = vrot.lane.b32.xlu0 %v271_v51, %s8777_s11 }
 0x134   :  { %v9467_v45 = vpop.permute.xlu2 %1477  ;;  %v9469_v26 = vpop.permute.xlu1 %1457 }
 0x135   :  { %17623 = vst [vmem:[#allocation68_spill] sm:$0xff] %v9467_v45  ;;  %v9471_v1 = vpop.permute.xlu0 %1455 }
 0x136   :  { %17624 = vst [vmem:[#allocation69_spill] sm:$0xff] %v9469_v26 }
 0x137   :  { %17625 = vst [vmem:[#allocation70_spill] sm:$0xff] %v9471_v1  ;;  %v339_v1 = vld [vmem:[%s17548_s0 + $0x21a] sm:$0xff] }
 0x13a   :  { %1549 = vrot.lane.b32.xlu2 %v276_v46, %s8777_s11  ;;  %1547 = vrot.lane.b32.xlu1 %v275_v18, %s8777_s11  ;;  %v277_v46 = vld [vmem:[%s17548_s0 + $0x4b1] sm:$0xff] }
 0x13b   :  { %1545 = vrot.lane.b32.xlu0 %v274_v30, %s8777_s11 }
 0x13c   :  { %v9485_v5 = vpop.permute.xlu2 %1483  ;;  %v9487_v51 = vpop.permute.xlu1 %1463 }
 0x13d   :  { %17626 = vst [vmem:[#allocation71_spill] sm:$0xff] %v9485_v5  ;;  %v9489_v45 = vpop.permute.xlu0 %1461 }
 0x13e   :  { %17627 = vst [vmem:[#allocation72_spill] sm:$0xff] %v9487_v51  ;;  %v282_v51 = vld [vmem:[%s17548_s0 + $0x4e1] sm:$0xff] }
 0x13f   :  { %17628 = vst [vmem:[#allocation73_spill] sm:$0xff] %v9489_v45  ;;  %v281_v45 = vld [vmem:[%s17548_s0 + $0x4d9] sm:$0xff] }
 0x142   :  { %1555 = vrot.lane.b32.xlu2 %v279_v52, %s8777_s11  ;;  %1553 = vrot.lane.b32.xlu1 %v278_v25, %s8777_s11  ;;  %v280_v52 = vld [vmem:[%s17548_s0 + $0x4c9] sm:$0xff] }
 0x143   :  { %1551 = vrot.lane.b32.xlu0 %v277_v46, %s8777_s11 }
 0x144   :  { %v9503_v18 = vpop.permute.xlu2 %1489  ;;  %v9505_v30 = vpop.permute.xlu1 %1469 }
 0x145   :  { %17629 = vst [vmem:[#allocation74_spill] sm:$0xff] %v9503_v18  ;;  %v9507_v5 = vpop.permute.xlu0 %1467 }
 0x146   :  { %17630 = vst [vmem:[#allocation75_spill] sm:$0xff] %v9505_v30  ;;  %v285_v30 = vld [vmem:[%s17548_s0 + $0x2] sm:$0xff] }
 0x147   :  { %17631 = vst [vmem:[#allocation76_spill] sm:$0xff] %v9507_v5  ;;  %v284_v5 = vld [vmem:[%s17548_s0 + $0x4f1] sm:$0xff] }
 0x14a   :  { %1561 = vrot.lane.b32.xlu2 %v282_v51, %s8777_s11  ;;  %1559 = vrot.lane.b32.xlu1 %v281_v45, %s8777_s11  ;;  %v283_v45 = vld [vmem:[%s17548_s0 + $0x4e9] sm:$0xff] }
 0x14b   :  { %1557 = vrot.lane.b32.xlu0 %v280_v52, %s8777_s11 }
 0x14c   :  { %v9521_v25 = vpop.permute.xlu2 %1495  ;;  %v9523_v46 = vpop.permute.xlu1 %1475 }
 0x14d   :  { %17632 = vst [vmem:[#allocation77_spill] sm:$0xff] %v9521_v25  ;;  %v9525_v18 = vpop.permute.xlu0 %1473 }
 0x14e   :  { %17633 = vst [vmem:[#allocation78_spill] sm:$0xff] %v9523_v46  ;;  %v288_v46 = vld [vmem:[%s17548_s0 + $0x1a] sm:$0xff] }
 0x14f   :  { %17634 = vst [vmem:[#allocation79_spill] sm:$0xff] %v9525_v18  ;;  %v287_v18 = vld [vmem:[%s17548_s0 + $0x12] sm:$0xff] }
 0x152   :  { %1823 = vrot.lane.b32.xlu2 %v285_v30, %s8778_s12  ;;  %1565 = vrot.lane.b32.xlu1 %v284_v5, %s8777_s11  ;;  %v286_v5 = vld [vmem:[%s17548_s0 + $0xa] sm:$0xff] }
 0x153   :  { %1563 = vrot.lane.b32.xlu0 %v283_v45, %s8777_s11  ;;  %s8779_s11 = smov 9  }
 0x154   :  { %v9539_v51 = vpop.permute.xlu2 %1501  ;;  %v9541_v52 = vpop.permute.xlu1 %1481 }
 0x155   :  { %17635 = vst [vmem:[#allocation80_spill] sm:$0xff] %v9539_v51  ;;  %v9543_v25 = vpop.permute.xlu0 %1479  ;;  %v342_v51 = vld [vmem:[%s17548_s0 + $0x23a] sm:$0xff] }
 0x156   :  { %17636 = vst [vmem:[#allocation81_spill] sm:$0xff] %v9541_v52 }
 0x157   :  { %17637 = vst [vmem:[#allocation82_spill] sm:$0xff] %v9543_v25  ;;  %v291_v25 = vld [vmem:[%s17548_s0 + $0x3a] sm:$0xff] }
 0x15a   :  { %1829 = vrot.lane.b32.xlu2 %v288_v46, %s8778_s12  ;;  %1827 = vrot.lane.b32.xlu1 %v287_v18, %s8778_s12  ;;  %v289_v18 = vld [vmem:[%s17548_s0 + $0x2a] sm:$0xff] }
 0x15b   :  { %1825 = vrot.lane.b32.xlu0 %v286_v5, %s8778_s12 }
 0x15c   :  { %v9557_v30 = vpop.permute.xlu2 %1507  ;;  %v9559_v45 = vpop.permute.xlu1 %1487 }
 0x15d   :  { %17638 = vst [vmem:[#allocation83_spill] sm:$0xff] %v9557_v30  ;;  %v9561_v52 = vpop.permute.xlu0 %1485  ;;  %v302_v30 = vld [vmem:[%s17548_s0 + $0xaa] sm:$0xff] }
 0x15e   :  { %17639 = vst [vmem:[#allocation84_spill] sm:$0xff] %v9559_v45 }
 0x15f   :  { %17640 = vst [vmem:[#allocation85_spill] sm:$0xff] %v9561_v52  ;;  %v294_v52 = vld [vmem:[%s17548_s0 + $0x5a] sm:$0xff] }
 0x162   :  { %1835 = vrot.lane.b32.xlu2 %v291_v25, %s8778_s12  ;;  %1833 = vrot.lane.b32.xlu1 %v290_v20, %s8778_s12  ;;  %v292_v20 = vld [vmem:[%s17548_s0 + $0x42] sm:$0xff] }
 0x163   :  { %1831 = vrot.lane.b32.xlu0 %v289_v18, %s8778_s12 }
 0x164   :  { %v9575_v46 = vpop.permute.xlu2 %1513  ;;  %v9577_v5 = vpop.permute.xlu1 %1493 }
 0x165   :  { %17641 = vst [vmem:[#allocation86_spill] sm:$0xff] %v9575_v46  ;;  %v9579_v45 = vpop.permute.xlu0 %1491  ;;  %v296_v46 = vld [vmem:[%s17548_s0 + $0x6a] sm:$0xff] }
 0x166   :  { %17642 = vst [vmem:[#allocation87_spill] sm:$0xff] %v9577_v5 }
 0x167   :  { %17643 = vst [vmem:[#allocation88_spill] sm:$0xff] %v9579_v45  ;;  %v297_v45 = vld [vmem:[%s17548_s0 + $0x7a] sm:$0xff] }
 0x16a   :  { %1841 = vrot.lane.b32.xlu2 %v294_v52, %s8778_s12  ;;  %1839 = vrot.lane.b32.xlu1 %v293_v6, %s8778_s12  ;;  %v295_v6 = vld [vmem:[%s17548_s0 + $0x62] sm:$0xff] }
 0x16b   :  { %1837 = vrot.lane.b32.xlu0 %v292_v20, %s8778_s12 }
 0x16c   :  { %v9593_v25 = vpop.permute.xlu2 %1519  ;;  %v9595_v18 = vpop.permute.xlu1 %1499 }
 0x16d   :  { %17644 = vst [vmem:[#allocation89_spill] sm:$0xff] %v9593_v25  ;;  %v9597_v5 = vpop.permute.xlu0 %1497  ;;  %v299_v25 = vld [vmem:[%s17548_s0 + $0x8a] sm:$0xff] }
 0x16e   :  { %17645 = vst [vmem:[#allocation90_spill] sm:$0xff] %v9595_v18 }
 0x16f   :  { %17646 = vst [vmem:[#allocation91_spill] sm:$0xff] %v9597_v5  ;;  %v300_v5 = vld [vmem:[%s17548_s0 + $0x92] sm:$0xff] }
 0x172   :  { %1847 = vrot.lane.b32.xlu2 %v297_v45, %s8778_s12  ;;  %1845 = vrot.lane.b32.xlu1 %v296_v46, %s8778_s12  ;;  %v298_v45 = vld [vmem:[%s17548_s0 + $0x82] sm:$0xff] }
 0x173   :  { %1843 = vrot.lane.b32.xlu0 %v295_v6, %s8778_s12 }
 0x174   :  { %v9611_v52 = vpop.permute.xlu2 %1525  ;;  %v9613_v20 = vpop.permute.xlu1 %1505 }
 0x175   :  { %17647 = vst [vmem:[#allocation92_spill] sm:$0xff] %v9611_v52  ;;  %v9615_v18 = vpop.permute.xlu0 %1503 }
 0x176   :  { %17648 = vst [vmem:[#allocation93_spill] sm:$0xff] %v9613_v20  ;;  %v332_v20 = vld [vmem:[%s17548_s0 + $0x1d2] sm:$0xff] }
 0x177   :  { %17649 = vst [vmem:[#allocation94_spill] sm:$0xff] %v9615_v18 }
 0x17a   :  { %1853 = vrot.lane.b32.xlu2 %v300_v5, %s8778_s12  ;;  %1851 = vrot.lane.b32.xlu1 %v299_v25, %s8778_s12  ;;  %v301_v5 = vld [vmem:[%s17548_s0 + $0xa2] sm:$0xff] }
 0x17b   :  { %1849 = vrot.lane.b32.xlu0 %v298_v45, %s8778_s12 }
 0x17c   :  { %v9629_v46 = vpop.permute.xlu2 %1531  ;;  %v9631_v6 = vpop.permute.xlu1 %1511 }
 0x17d   :  { %17650 = vst [vmem:[#allocation95_spill] sm:$0xff] %v9629_v46  ;;  %v9633_v52 = vpop.permute.xlu0 %1509 }
 0x17e   :  { %17651 = vst [vmem:[#allocation96_spill] sm:$0xff] %v9631_v6  ;;  %v306_v6 = vld [vmem:[%s17548_s0 + $0xd2] sm:$0xff] }
 0x17f   :  { %17652 = vst [vmem:[#allocation97_spill] sm:$0xff] %v9633_v52  ;;  %v305_v52 = vld [vmem:[%s17548_s0 + $0xca] sm:$0xff] }
 0x182   :  { %1859 = vrot.lane.b32.xlu2 %v303_v41, %s8778_s12  ;;  %1857 = vrot.lane.b32.xlu1 %v302_v30, %s8778_s12  ;;  %v304_v41 = vld [vmem:[%s17548_s0 + $0xba] sm:$0xff] }
 0x183   :  { %1855 = vrot.lane.b32.xlu0 %v301_v5, %s8778_s12 }
 0x184   :  { %v9647_v25 = vpop.permute.xlu2 %1537  ;;  %v9649_v45 = vpop.permute.xlu1 %1517 }
 0x185   :  { %17653 = vst [vmem:[#allocation98_spill] sm:$0xff] %v9647_v25  ;;  %v9651_v46 = vpop.permute.xlu0 %1515 }
 0x186   :  { %17654 = vst [vmem:[#allocation99_spill] sm:$0xff] %v9649_v45  ;;  %v309_v45 = vld [vmem:[%s17548_s0 + $0xf2] sm:$0xff] }
 0x187   :  { %17655 = vst [vmem:[#allocation100_spill] sm:$0xff] %v9651_v46  ;;  %v308_v46 = vld [vmem:[%s17548_s0 + $0xe2] sm:$0xff] }
 0x18a   :  { %1865 = vrot.lane.b32.xlu2 %v306_v6, %s8778_s12  ;;  %1863 = vrot.lane.b32.xlu1 %v305_v52, %s8778_s12  ;;  %v307_v52 = vld [vmem:[%s17548_s0 + $0xda] sm:$0xff] }
 0x18b   :  { %1861 = vrot.lane.b32.xlu0 %v304_v41, %s8778_s12 }
 0x18c   :  { %v9665_v30 = vpop.permute.xlu2 %1543  ;;  %v9667_v5 = vpop.permute.xlu1 %1523 }
 0x18d   :  { %17656 = vst [vmem:[#allocation101_spill] sm:$0xff] %v9665_v30  ;;  %v9669_v25 = vpop.permute.xlu0 %1521 }
 0x18e   :  { %17657 = vst [vmem:[#allocation102_spill] sm:$0xff] %v9667_v5  ;;  %v312_v5 = vld [vmem:[%s17548_s0 + $0x10a] sm:$0xff] }
 0x18f   :  { %17658 = vst [vmem:[#allocation103_spill] sm:$0xff] %v9669_v25  ;;  %v311_v25 = vld [vmem:[%s17548_s0 + $0x102] sm:$0xff] }
 0x192   :  { %1871 = vrot.lane.b32.xlu2 %v309_v45, %s8778_s12  ;;  %1869 = vrot.lane.b32.xlu1 %v308_v46, %s8778_s12  ;;  %v310_v46 = vld [vmem:[%s17548_s0 + $0xfa] sm:$0xff] }
 0x193   :  { %1867 = vrot.lane.b32.xlu0 %v307_v52, %s8778_s12 }
 0x194   :  { %v9683_v6 = vpop.permute.xlu2 %1549  ;;  %v9685_v41 = vpop.permute.xlu1 %1529 }
 0x195   :  { %17659 = vst [vmem:[#allocation104_spill] sm:$0xff] %v9683_v6  ;;  %v9687_v30 = vpop.permute.xlu0 %1527 }
 0x196   :  { %17660 = vst [vmem:[#allocation105_spill] sm:$0xff] %v9685_v41  ;;  %v315_v41 = vld [vmem:[%s17548_s0 + $0x12a] sm:$0xff] }
 0x197   :  { %17661 = vst [vmem:[#allocation106_spill] sm:$0xff] %v9687_v30  ;;  %v314_v30 = vld [vmem:[%s17548_s0 + $0x122] sm:$0xff] }
 0x19a   :  { %1877 = vrot.lane.b32.xlu2 %v312_v5, %s8778_s12  ;;  %1875 = vrot.lane.b32.xlu1 %v311_v25, %s8778_s12  ;;  %v313_v25 = vld [vmem:[%s17548_s0 + $0x11a] sm:$0xff] }
 0x19b   :  { %1873 = vrot.lane.b32.xlu0 %v310_v46, %s8778_s12 }
 0x19c   :  { %v9701_v45 = vpop.permute.xlu2 %1555  ;;  %v9703_v52 = vpop.permute.xlu1 %1535 }
 0x19d   :  { %17662 = vst [vmem:[#allocation107_spill] sm:$0xff] %v9701_v45  ;;  %v9705_v6 = vpop.permute.xlu0 %1533 }
 0x19e   :  { %17663 = vst [vmem:[#allocation108_spill] sm:$0xff] %v9703_v52  ;;  %v318_v52 = vld [vmem:[%s17548_s0 + $0x14a] sm:$0xff] }
 0x19f   :  { %17664 = vst [vmem:[#allocation109_spill] sm:$0xff] %v9705_v6  ;;  %v317_v6 = vld [vmem:[%s17548_s0 + $0x142] sm:$0xff] }
 0x1a2   :  { %1883 = vrot.lane.b32.xlu2 %v315_v41, %s8778_s12  ;;  %1881 = vrot.lane.b32.xlu1 %v314_v30, %s8778_s12  ;;  %v316_v30 = vld [vmem:[%s17548_s0 + $0x132] sm:$0xff] }
 0x1a3   :  { %1879 = vrot.lane.b32.xlu0 %v313_v25, %s8778_s12 }
 0x1a4   :  { %v9719_v5 = vpop.permute.xlu2 %1561  ;;  %v9721_v46 = vpop.permute.xlu1 %1541 }
 0x1a5   :  { %17665 = vst [vmem:[#allocation110_spill] sm:$0xff] %v9719_v5  ;;  %v9723_v45 = vpop.permute.xlu0 %1539 }
 0x1a6   :  { %17666 = vst [vmem:[#allocation111_spill] sm:$0xff] %v9721_v46  ;;  %v321_v46 = vld [vmem:[%s17548_s0 + $0x16a] sm:$0xff] }
 0x1a7   :  { %17667 = vst [vmem:[#allocation112_spill] sm:$0xff] %v9723_v45  ;;  %v320_v45 = vld [vmem:[%s17548_s0 + $0x15a] sm:$0xff] }
 0x1aa   :  { %1889 = vrot.lane.b32.xlu2 %v318_v52, %s8778_s12  ;;  %1887 = vrot.lane.b32.xlu1 %v317_v6, %s8778_s12  ;;  %v319_v6 = vld [vmem:[%s17548_s0 + $0x152] sm:$0xff] }
 0x1ab   :  { %1885 = vrot.lane.b32.xlu0 %v316_v30, %s8778_s12 }
 0x1ac   :  { %v9737_v41 = vpop.permute.xlu2 %1823  ;;  %v9739_v25 = vpop.permute.xlu1 %1547 }
 0x1ad   :  { %17668 = vst [vmem:[#allocation113_spill] sm:$0xff] %v9739_v25  ;;  %v9741_v5 = vpop.permute.xlu0 %1545 }
 0x1ae   :  { %17669 = vst [vmem:[#allocation114_spill] sm:$0xff] %v9741_v5  ;;  %v324_v5 = vld [vmem:[%s17548_s0 + $0x182] sm:$0xff] }
 0x1b2   :  { %1895 = vrot.lane.b32.xlu2 %v321_v46, %s8778_s12  ;;  %1893 = vrot.lane.b32.xlu1 %v320_v45, %s8778_s12  ;;  %v322_v45 = vld [vmem:[%s17548_s0 + $0x172] sm:$0xff] }
 0x1b3   :  { %1891 = vrot.lane.b32.xlu0 %v319_v6, %s8778_s12 }
 0x1b4   :  { %v9755_v52 = vpop.permute.xlu2 %1829  ;;  %v9757_v30 = vpop.permute.xlu1 %1553 }
 0x1b5   :  { %17670 = vst [vmem:[#allocation115_spill] sm:$0xff] %v9757_v30  ;;  %v9759_v25 = vpop.permute.xlu0 %1551 }
 0x1b6   :  { %17671 = vst [vmem:[#allocation116_spill] sm:$0xff] %v9759_v25  ;;  %v327_v25 = vld [vmem:[%s17548_s0 + $0x1a2] sm:$0xff] }
 0x1ba   :  { %1901 = vrot.lane.b32.xlu2 %v324_v5, %s8778_s12  ;;  %1899 = vrot.lane.b32.xlu1 %v323_v31, %s8778_s12  ;;  %v325_v31 = vld [vmem:[%s17548_s0 + $0x192] sm:$0xff] }
 0x1bb   :  { %1897 = vrot.lane.b32.xlu0 %v322_v45, %s8778_s12 }
 0x1bc   :  { %v9773_v46 = vpop.permute.xlu2 %1835  ;;  %v9775_v6 = vpop.permute.xlu1 %1559 }
 0x1bd   :  { %17672 = vst [vmem:[#allocation117_spill] sm:$0xff] %v9775_v6  ;;  %v9777_v30 = vpop.permute.xlu0 %1557 }
 0x1be   :  { %17673 = vst [vmem:[#allocation118_spill] sm:$0xff] %v9777_v30  ;;  %v330_v30 = vld [vmem:[%s17548_s0 + $0x1c2] sm:$0xff] }
 0x1c2   :  { %1907 = vrot.lane.b32.xlu2 %v327_v25, %s8778_s12  ;;  %1905 = vrot.lane.b32.xlu1 %v326_v38, %s8778_s12  ;;  %v328_v38 = vld [vmem:[%s17548_s0 + $0x1aa] sm:$0xff] }
 0x1c3   :  { %1903 = vrot.lane.b32.xlu0 %v325_v31, %s8778_s12 }
 0x1c4   :  { %v9791_v5 = vpop.permute.xlu2 %1841  ;;  %v9793_v45 = vpop.permute.xlu1 %1565 }
 0x1c5   :  { %17674 = vst [vmem:[#allocation119_spill] sm:$0xff] %v9791_v5  ;;  %v9795_v6 = vpop.permute.xlu0 %1563  ;;  %v8360_v5 = vld [vmem:[%s17548_s0 + $0x1c9] sm:$0xff] }
 0x1c6   :  { %17675 = vst [vmem:[#allocation120_spill] sm:$0xff] %v9793_v45 }
 0x1c7   :  { %17676 = vst [vmem:[#allocation121_spill] sm:$0xff] %v9795_v6  ;;  %v333_v6 = vld [vmem:[%s17548_s0 + $0x1e2] sm:$0xff] }
 0x1ca   :  { %1913 = vrot.lane.b32.xlu2 %v330_v30, %s8778_s12  ;;  %1911 = vrot.lane.b32.xlu1 %v329_v42, %s8778_s12  ;;  %v331_v42 = vld [vmem:[%s17548_s0 + $0x1ca] sm:$0xff] }
 0x1cb   :  { %1909 = vrot.lane.b32.xlu0 %v328_v38, %s8778_s12 }
 0x1cc   :  { %v9809_v25 = vpop.permute.xlu2 %1847  ;;  %v9811_v31 = vpop.permute.xlu1 %1827 }
 0x1cd   :  { %17677 = vst [vmem:[#allocation122_spill] sm:$0xff] %v9809_v25  ;;  %v9813_v45 = vpop.permute.xlu0 %1825  ;;  %v8011_v25 = vld [vmem:[%s17548_s0 + $0x301] sm:$0xff] }
 0x1d2   :  { %1919 = vrot.lane.b32.xlu2 %v333_v6, %s8778_s12  ;;  %1917 = vrot.lane.b32.xlu1 %v332_v20, %s8778_s12  ;;  %v334_v20 = vld [vmem:[%s17548_s0 + $0x1ea] sm:$0xff] }
 0x1d3   :  { %1915 = vrot.lane.b32.xlu0 %v331_v42, %s8778_s12 }
 0x1d4   :  { %v9827_v30 = vpop.permute.xlu2 %1853  ;;  %v9829_v38 = vpop.permute.xlu1 %1833 }
 0x1d5   :  { %17678 = vst [vmem:[#allocation123_spill] sm:$0xff] %v9827_v30  ;;  %v9831_v26 = vpop.permute.xlu0 %1831  ;;  %v7885_v30 = vld [vmem:[%s17548_s0 + $0x310] sm:$0xff] }
 0x1da   :  { %1925 = vrot.lane.b32.xlu2 %v336_v43, %s8778_s12  ;;  %1923 = vrot.lane.b32.xlu1 %v335_v14, %s8778_s12  ;;  %v337_v14 = vld [vmem:[%s17548_s0 + $0x20a] sm:$0xff] }
 0x1db   :  { %1921 = vrot.lane.b32.xlu0 %v334_v20, %s8778_s12 }
 0x1dc   :  { %v9845_v6 = vpop.permute.xlu2 %1859  ;;  %v9847_v42 = vpop.permute.xlu1 %1839 }
 0x1dd   :  { %17679 = vst [vmem:[#allocation124_spill] sm:$0xff] %v9845_v6  ;;  %v9849_v18 = vpop.permute.xlu0 %1837  ;;  %v7859_v6 = vld [vmem:[%s17548_s0 + $0x210] sm:$0xff] }
 0x1e2   :  { %1931 = vrot.lane.b32.xlu2 %v339_v1, %s8778_s12  ;;  %1929 = vrot.lane.b32.xlu1 %v338_v19, %s8778_s12  ;;  %v340_v19 = vld [vmem:[%s17548_s0 + $0x222] sm:$0xff] }
 0x1e3   :  { %1927 = vrot.lane.b32.xlu0 %v337_v14, %s8778_s12 }
 0x1e4   :  { %v9863_v43 = vpop.permute.xlu2 %1865  ;;  %v9865_v20 = vpop.permute.xlu1 %1845 }
 0x1e5   :  { %17680 = vst [vmem:[#allocation125_spill] sm:$0xff] %v9863_v43  ;;  %v9867_v33 = vpop.permute.xlu0 %1843  ;;  %v362_v43 = vld [vmem:[%s17548_s0 + $0x302] sm:$0xff] }
 0x1e6   :  { %17681 = vst [vmem:[#allocation126_spill] sm:$0xff] %v9865_v20  ;;  %v8120_v20 = vld [vmem:[%s17548_s0 + $0x242] sm:$0xff] }
 0x1e7   :  { %17682 = vst [vmem:[#allocation127_spill] sm:$0xff] %v9867_v33  ;;  %v8149_v33 = vld [vmem:[%s17548_s0 + $0x362] sm:$0xff] }
 0x1ea   :  { %1937 = vrot.lane.b32.xlu2 %v342_v51, %s8778_s12  ;;  %1935 = vrot.lane.b32.xlu1 %v341_v29, %s8778_s12  ;;  %v343_v29 = vld [vmem:[%s17548_s0 + $0x242] sm:$0xff] }
 0x1eb   :  { %1933 = vrot.lane.b32.xlu0 %v340_v19, %s8778_s12 }
 0x1ec   :  { %v9881_v1 = vpop.permute.xlu2 %1871  ;;  %v9883_v14 = vpop.permute.xlu1 %1851 }
 0x1ed   :  { %17683 = vst [vmem:[#allocation128_spill] sm:$0xff] %v9881_v1  ;;  %v9885_v13 = vpop.permute.xlu0 %1849 }
 0x1ee   :  { %17684 = vst [vmem:[#allocation129_spill] sm:$0xff] %v9883_v14  ;;  %v7978_v14 = vld [vmem:[%s17548_s0 + $0x1b9] sm:$0xff] }
 0x1ef   :  { %17685 = vst [vmem:[#allocation130_spill] sm:$0xff] %v9885_v13  ;;  %v7987_v13 = vld [vmem:[%s17548_s0 + $0x211] sm:$0xff] }
 0x1f2   :  { %1943 = vrot.lane.b32.xlu2 %v345_v34, %s8778_s12  ;;  %1941 = vrot.lane.b32.xlu1 %v344_v0, %s8778_s12  ;;  %v346_v34 = vld [vmem:[%s17548_s0 + $0x262] sm:$0xff] }
 0x1f3   :  { %1939 = vrot.lane.b32.xlu0 %v343_v29, %s8778_s12 }
 0x1f4   :  { %v9899_v51 = vpop.permute.xlu2 %1877  ;;  %v9901_v19 = vpop.permute.xlu1 %1857 }
 0x1f5   :  { %17686 = vst [vmem:[#allocation131_spill] sm:$0xff] %v9899_v51  ;;  %v9903_v1 = vpop.permute.xlu0 %1855 }
 0x1f6   :  { %17687 = vst [vmem:[#allocation132_spill] sm:$0xff] %v9901_v19  ;;  %v7862_v19 = vld [vmem:[%s17548_s0 + $0x230] sm:$0xff] }
 0x1f7   :  { %17688 = vst [vmem:[#allocation133_spill] sm:$0xff] %v9903_v1  ;;  %v7864_v1 = vld [vmem:[%s17548_s0 + $0x240] sm:$0xff] }
 0x1fa   :  { %1949 = vrot.lane.b32.xlu2 %v348_v63, %s8778_s12  ;;  %1947 = vrot.lane.b32.xlu1 %v347_v17, %s8778_s12  ;;  %v349_v17 = vld [vmem:[%s17548_s0 + $0x282] sm:$0xff] }
 0x1fb   :  { %1945 = vrot.lane.b32.xlu0 %v346_v34, %s8778_s12 }
 0x1fc   :  { %v9917_v0 = vpop.permute.xlu2 %1883  ;;  %v9919_v29 = vpop.permute.xlu1 %1863 }
 0x1fd   :  { %17689 = vst [vmem:[#allocation134_spill] sm:$0xff] %v9917_v0  ;;  %v9921_v51 = vpop.permute.xlu0 %1861 }
 0x1fe   :  { %17690 = vst [vmem:[#allocation135_spill] sm:$0xff] %v9919_v29  ;;  %v372_v29 = vld [vmem:[%s17548_s0 + $0x362] sm:$0xff] }
 0x1ff   :  { %17691 = vst [vmem:[#allocation136_spill] sm:$0xff] %v9921_v51  ;;  %v375_v51 = vld [vmem:[%s17548_s0 + $0x382] sm:$0xff] }
 0x202   :  { %1955 = vrot.lane.b32.xlu2 %v351_v8, %s8778_s12  ;;  %1953 = vrot.lane.b32.xlu1 %v350_v7, %s8778_s12  ;;  %v352_v8 = vld [vmem:[%s17548_s0 + $0x29a] sm:$0xff] }
 0x203   :  { %1951 = vrot.lane.b32.xlu0 %v349_v17, %s8778_s12 }
 0x204   :  { %v9935_v63 = vpop.permute.xlu2 %1889  ;;  %v9937_v34 = vpop.permute.xlu1 %1869 }
 0x205   :  { %17692 = vst [vmem:[#allocation137_spill] sm:$0xff] %v9935_v63  ;;  %v9939_v0 = vpop.permute.xlu0 %1867 }
 0x206   :  { %17693 = vst [vmem:[#allocation138_spill] sm:$0xff] %v9937_v34  ;;  %v357_v34 = vld [vmem:[%s17548_s0 + $0x2d2] sm:$0xff] }
 0x207   :  { %17694 = vst [vmem:[#allocation139_spill] sm:$0xff] %v9939_v0  ;;  %v356_v0 = vld [vmem:[%s17548_s0 + $0x2c2] sm:$0xff] }
 0x20a   :  { %1961 = vrot.lane.b32.xlu2 %v354_v58, %s8778_s12  ;;  %1959 = vrot.lane.b32.xlu1 %v353_v27, %s8778_s12  ;;  %v355_v27 = vld [vmem:[%s17548_s0 + $0x2ba] sm:$0xff] }
 0x20b   :  { %1957 = vrot.lane.b32.xlu0 %v352_v8, %s8778_s12 }
 0x20c   :  { %v9953_v7 = vpop.permute.xlu2 %1895  ;;  %v9955_v17 = vpop.permute.xlu1 %1875 }
 0x20d   :  { %17695 = vst [vmem:[#allocation140_spill] sm:$0xff] %v9953_v7  ;;  %v9957_v63 = vpop.permute.xlu0 %1873  ;;  %v8110_v7 = vld [vmem:[%s17548_s0 + $0x1e2] sm:$0xff] }
 0x20e   :  { %17696 = vst [vmem:[#allocation141_spill] sm:$0xff] %v9955_v17 }
 0x20f   :  { %17697 = vst [vmem:[#allocation142_spill] sm:$0xff] %v9957_v63  ;;  %v360_v63 = vld [vmem:[%s17548_s0 + $0x2ea] sm:$0xff] }
 0x212   :  { %1967 = vrot.lane.b32.xlu2 %v357_v34, %s8778_s12  ;;  %1965 = vrot.lane.b32.xlu1 %v356_v0, %s8778_s12  ;;  %v358_v0 = vld [vmem:[%s17548_s0 + $0x2da] sm:$0xff] }
 0x213   :  { %1963 = vrot.lane.b32.xlu0 %v355_v27, %s8778_s12 }
 0x214   :  { %v9971_v58 = vpop.permute.xlu2 %1901  ;;  %v9973_v8 = vpop.permute.xlu1 %1881 }
 0x215   :  { %17698 = vst [vmem:[#allocation143_spill] sm:$0xff] %v9971_v58  ;;  %v9975_v17 = vpop.permute.xlu0 %1879  ;;  %v7873_v58 = vld [vmem:[%s17548_s0 + $0x298] sm:$0xff] }
 0x216   :  { %17699 = vst [vmem:[#allocation144_spill] sm:$0xff] %v9973_v8 }
 0x217   :  { %17700 = vst [vmem:[#allocation145_spill] sm:$0xff] %v9975_v17  ;;  %v363_v17 = vld [vmem:[%s17548_s0 + $0x30a] sm:$0xff] }
 0x21a   :  { %1973 = vrot.lane.b32.xlu2 %v360_v63, %s8778_s12  ;;  %1971 = vrot.lane.b32.xlu1 %v359_v53, %s8778_s12  ;;  %v361_v53 = vld [vmem:[%s17548_s0 + $0x2fa] sm:$0xff] }
 0x21b   :  { %1969 = vrot.lane.b32.xlu0 %v358_v0, %s8778_s12 }
 0x21c   :  { %v9989_v34 = vpop.permute.xlu2 %1907  ;;  %v9991_v27 = vpop.permute.xlu1 %1887 }
 0x21d   :  { %17701 = vst [vmem:[#allocation146_spill] sm:$0xff] %v9989_v34  ;;  %v9993_v8 = vpop.permute.xlu0 %1885  ;;  %v7855_v34 = vld [vmem:[%s17548_s0 + $0x1e8] sm:$0xff] }
 0x21e   :  { %17702 = vst [vmem:[#allocation147_spill] sm:$0xff] %v9991_v27 }
 0x21f   :  { %17703 = vst [vmem:[#allocation148_spill] sm:$0xff] %v9993_v8  ;;  %v366_v8 = vld [vmem:[%s17548_s0 + $0x32a] sm:$0xff] }
 0x222   :  { %1979 = vrot.lane.b32.xlu2 %v363_v17, %s8778_s12  ;;  %1977 = vrot.lane.b32.xlu1 %v362_v43, %s8778_s12  ;;  %v364_v43 = vld [vmem:[%s17548_s0 + $0x312] sm:$0xff] }
 0x223   :  { %1975 = vrot.lane.b32.xlu0 %v361_v53, %s8778_s12 }
 0x224   :  { %v10007_v63 = vpop.permute.xlu2 %1913  ;;  %v10009_v0 = vpop.permute.xlu1 %1893 }
 0x225   :  { %17704 = vst [vmem:[#allocation149_spill] sm:$0xff] %v10007_v63  ;;  %v10011_v27 = vpop.permute.xlu0 %1891  ;;  %v369_v63 = vld [vmem:[%s17548_s0 + $0x34a] sm:$0xff] }
 0x226   :  { %17705 = vst [vmem:[#allocation150_spill] sm:$0xff] %v10009_v0  ;;  %v8245_v0 = vld [vmem:[%s17548_s0 + $0x248] sm:$0xff] }
 0x227   :  { %17706 = vst [vmem:[#allocation151_spill] sm:$0xff] %v10011_v27 }
 0x22a   :  { %1985 = vrot.lane.b32.xlu2 %v366_v8, %s8778_s12  ;;  %1983 = vrot.lane.b32.xlu1 %v365_v57, %s8778_s12  ;;  %v367_v57 = vld [vmem:[%s17548_s0 + $0x332] sm:$0xff] }
 0x22b   :  { %1981 = vrot.lane.b32.xlu0 %v364_v43, %s8778_s12 }
 0x22c   :  { %v10025_v17 = vpop.permute.xlu2 %1919  ;;  %v10027_v53 = vpop.permute.xlu1 %1899 }
 0x22d   :  { %17707 = vst [vmem:[#allocation152_spill] sm:$0xff] %v10025_v17  ;;  %v10029_v27 = vpop.permute.xlu0 %1897 }
 0x22e   :  { %17708 = vst [vmem:[#allocation153_spill] sm:$0xff] %v10027_v53  ;;  %v7988_v53 = vld [vmem:[%s17548_s0 + $0x219] sm:$0xff] }
 0x22f   :  { %17709 = vst [vmem:[#allocation154_spill] sm:$0xff] %v10029_v27  ;;  %v7993_v27 = vld [vmem:[%s17548_s0 + $0x249] sm:$0xff] }
 0x232   :  { %1991 = vrot.lane.b32.xlu2 %v369_v63, %s8778_s12  ;;  %1989 = vrot.lane.b32.xlu1 %v368_v28, %s8778_s12  ;;  %v370_v28 = vld [vmem:[%s17548_s0 + $0x352] sm:$0xff] }
 0x233   :  { %1987 = vrot.lane.b32.xlu0 %v367_v57, %s8778_s12 }
 0x234   :  { %v10043_v8 = vpop.permute.xlu2 %1925  ;;  %v10045_v43 = vpop.permute.xlu1 %1905 }
 0x235   :  { %17710 = vst [vmem:[#allocation155_spill] sm:$0xff] %v10043_v8  ;;  %v10047_v17 = vpop.permute.xlu0 %1903 }
 0x236   :  { %17711 = vst [vmem:[#allocation156_spill] sm:$0xff] %v10045_v43  ;;  %v7865_v43 = vld [vmem:[%s17548_s0 + $0x248] sm:$0xff] }
 0x237   :  { %17712 = vst [vmem:[#allocation157_spill] sm:$0xff] %v10047_v17  ;;  %v7871_v17 = vld [vmem:[%s17548_s0 + $0x288] sm:$0xff] }
 0x23a   :  { %1997 = vrot.lane.b32.xlu2 %v372_v29, %s8778_s12  ;;  %1995 = vrot.lane.b32.xlu1 %v371_v2, %s8778_s12  ;;  %v373_v2 = vld [vmem:[%s17548_s0 + $0x372] sm:$0xff] }
 0x23b   :  { %1993 = vrot.lane.b32.xlu0 %v370_v28, %s8778_s12 }
 0x23c   :  { %v10061_v63 = vpop.permute.xlu2 %1931  ;;  %v10063_v57 = vpop.permute.xlu1 %1911 }
 0x23d   :  { %17713 = vst [vmem:[#allocation158_spill] sm:$0xff] %v10061_v63  ;;  %v10065_v8 = vpop.permute.xlu0 %1909 }
 0x23e   :  { %17714 = vst [vmem:[#allocation159_spill] sm:$0xff] %v10063_v57  ;;  %v378_v57 = vld [vmem:[%s17548_s0 + $0x3a2] sm:$0xff] }
 0x23f   :  { %17715 = vst [vmem:[#allocation160_spill] sm:$0xff] %v10065_v8  ;;  %v7849_v8 = vld [vmem:[%s17548_s0 + $0x1a8] sm:$0xff] }
 0x242   :  { %2003 = vrot.lane.b32.xlu2 %v375_v51, %s8778_s12  ;;  %2001 = vrot.lane.b32.xlu1 %v374_v59, %s8778_s12  ;;  %v376_v59 = vld [vmem:[%s17548_s0 + $0x38a] sm:$0xff] }
 0x243   :  { %1999 = vrot.lane.b32.xlu0 %v373_v2, %s8778_s12 }
 0x244   :  { %v10079_v29 = vpop.permute.xlu2 %1937  ;;  %v10081_v28 = vpop.permute.xlu1 %1917 }
 0x245   :  { %17716 = vst [vmem:[#allocation161_spill] sm:$0xff] %v10079_v29  ;;  %v10083_v63 = vpop.permute.xlu0 %1915 }
 0x246   :  { %17717 = vst [vmem:[#allocation162_spill] sm:$0xff] %v10081_v28  ;;  %v381_v28 = vld [vmem:[%s17548_s0 + $0x3c2] sm:$0xff] }
 0x247   :  { %17718 = vst [vmem:[#allocation163_spill] sm:$0xff] %v10083_v63  ;;  %v380_v63 = vld [vmem:[%s17548_s0 + $0x3b2] sm:$0xff] }
 0x24a   :  { %2009 = vrot.lane.b32.xlu2 %v378_v57, %s8778_s12  ;;  %2007 = vrot.lane.b32.xlu1 %v377_v21, %s8778_s12  ;;  %v379_v21 = vld [vmem:[%s17548_s0 + $0x3aa] sm:$0xff] }
 0x24b   :  { %2005 = vrot.lane.b32.xlu0 %v376_v59, %s8778_s12 }
 0x24c   :  { %v10097_v51 = vpop.permute.xlu2 %1943  ;;  %v10099_v2 = vpop.permute.xlu1 %1923 }
 0x24d   :  { %17719 = vst [vmem:[#allocation164_spill] sm:$0xff] %v10097_v51  ;;  %v10101_v29 = vpop.permute.xlu0 %1921 }
 0x24e   :  { %17720 = vst [vmem:[#allocation165_spill] sm:$0xff] %v10099_v2  ;;  %v384_v2 = vld [vmem:[%s17548_s0 + $0x3da] sm:$0xff] }
 0x24f   :  { %17721 = vst [vmem:[#allocation166_spill] sm:$0xff] %v10101_v29  ;;  %v383_v29 = vld [vmem:[%s17548_s0 + $0x3d2] sm:$0xff] }
 0x252   :  { %2015 = vrot.lane.b32.xlu2 %v381_v28, %s8778_s12  ;;  %2013 = vrot.lane.b32.xlu1 %v380_v63, %s8778_s12  ;;  %v382_v63 = vld [vmem:[%s17548_s0 + $0x3ca] sm:$0xff] }
 0x253   :  { %2011 = vrot.lane.b32.xlu0 %v379_v21, %s8778_s12 }
 0x254   :  { %v10115_v57 = vpop.permute.xlu2 %1949  ;;  %v10117_v59 = vpop.permute.xlu1 %1929 }
 0x255   :  { %17722 = vst [vmem:[#allocation167_spill] sm:$0xff] %v10115_v57  ;;  %v10119_v51 = vpop.permute.xlu0 %1927 }
 0x256   :  { %17723 = vst [vmem:[#allocation168_spill] sm:$0xff] %v10117_v59  ;;  %v387_v59 = vld [vmem:[%s17548_s0 + $0x3fa] sm:$0xff] }
 0x257   :  { %17724 = vst [vmem:[#allocation169_spill] sm:$0xff] %v10119_v51  ;;  %v386_v51 = vld [vmem:[%s17548_s0 + $0x3f2] sm:$0xff] }
 0x25a   :  { %2021 = vrot.lane.b32.xlu2 %v384_v2, %s8778_s12  ;;  %2019 = vrot.lane.b32.xlu1 %v383_v29, %s8778_s12  ;;  %v385_v29 = vld [vmem:[%s17548_s0 + $0x3ea] sm:$0xff] }
 0x25b   :  { %2017 = vrot.lane.b32.xlu0 %v382_v63, %s8778_s12 }
 0x25c   :  { %v10133_v28 = vpop.permute.xlu2 %1955  ;;  %v10135_v21 = vpop.permute.xlu1 %1935 }
 0x25d   :  { %17725 = vst [vmem:[#allocation170_spill] sm:$0xff] %v10133_v28  ;;  %v10137_v57 = vpop.permute.xlu0 %1933 }
 0x25e   :  { %17726 = vst [vmem:[#allocation171_spill] sm:$0xff] %v10135_v21  ;;  %v390_v21 = vld [vmem:[%s17548_s0 + $0x41a] sm:$0xff] }
 0x25f   :  { %17727 = vst [vmem:[#allocation172_spill] sm:$0xff] %v10137_v57  ;;  %v389_v57 = vld [vmem:[%s17548_s0 + $0x412] sm:$0xff] }
 0x262   :  { %2027 = vrot.lane.b32.xlu2 %v387_v59, %s8778_s12  ;;  %2025 = vrot.lane.b32.xlu1 %v386_v51, %s8778_s12  ;;  %v388_v51 = vld [vmem:[%s17548_s0 + $0x402] sm:$0xff] }
 0x263   :  { %2023 = vrot.lane.b32.xlu0 %v385_v29, %s8778_s12 }
 0x264   :  { %v10151_v2 = vpop.permute.xlu2 %1961  ;;  %v10153_v63 = vpop.permute.xlu1 %1941 }
 0x265   :  { %17728 = vst [vmem:[#allocation173_spill] sm:$0xff] %v10151_v2  ;;  %v10155_v28 = vpop.permute.xlu0 %1939  ;;  %v392_v2 = vld [vmem:[%s17548_s0 + $0x42a] sm:$0xff] }
 0x266   :  { %17729 = vst [vmem:[#allocation174_spill] sm:$0xff] %v10153_v63 }
 0x267   :  { %17730 = vst [vmem:[#allocation175_spill] sm:$0xff] %v10155_v28  ;;  %v393_v28 = vld [vmem:[%s17548_s0 + $0x43a] sm:$0xff] }
 0x26a   :  { %2033 = vrot.lane.b32.xlu2 %v390_v21, %s8778_s12  ;;  %2031 = vrot.lane.b32.xlu1 %v389_v57, %s8778_s12  ;;  %v391_v57 = vld [vmem:[%s17548_s0 + $0x422] sm:$0xff] }
 0x26b   :  { %2029 = vrot.lane.b32.xlu0 %v388_v51, %s8778_s12 }
 0x26c   :  { %v10169_v59 = vpop.permute.xlu2 %1967  ;;  %v10171_v29 = vpop.permute.xlu1 %1947 }
 0x26d   :  { %17731 = vst [vmem:[#allocation176_spill] sm:$0xff] %v10169_v59  ;;  %v10173_v63 = vpop.permute.xlu0 %1945  ;;  %v395_v59 = vld [vmem:[%s17548_s0 + $0x44a] sm:$0xff] }
 0x26e   :  { %17732 = vst [vmem:[#allocation177_spill] sm:$0xff] %v10171_v29 }
 0x26f   :  { %17733 = vst [vmem:[#allocation178_spill] sm:$0xff] %v10173_v63  ;;  %v396_v63 = vld [vmem:[%s17548_s0 + $0x452] sm:$0xff] }
 0x272   :  { %2039 = vrot.lane.b32.xlu2 %v393_v28, %s8778_s12  ;;  %2037 = vrot.lane.b32.xlu1 %v392_v2, %s8778_s12  ;;  %v394_v28 = vld [vmem:[%s17548_s0 + $0x442] sm:$0xff] }
 0x273   :  { %2035 = vrot.lane.b32.xlu0 %v391_v57, %s8778_s12 }
 0x274   :  { %v10187_v21 = vpop.permute.xlu2 %1973  ;;  %v10189_v51 = vpop.permute.xlu1 %1953 }
 0x275   :  { %17734 = vst [vmem:[#allocation179_spill] sm:$0xff] %v10187_v21  ;;  %v10191_v29 = vpop.permute.xlu0 %1951  ;;  %v398_v21 = vld [vmem:[%s17548_s0 + $0x46a] sm:$0xff] }
 0x276   :  { %17735 = vst [vmem:[#allocation180_spill] sm:$0xff] %v10189_v51 }
 0x277   :  { %17736 = vst [vmem:[#allocation181_spill] sm:$0xff] %v10191_v29  ;;  %v399_v29 = vld [vmem:[%s17548_s0 + $0x472] sm:$0xff] }
 0x27a   :  { %2045 = vrot.lane.b32.xlu2 %v396_v63, %s8778_s12  ;;  %2043 = vrot.lane.b32.xlu1 %v395_v59, %s8778_s12  ;;  %v397_v63 = vld [vmem:[%s17548_s0 + $0x462] sm:$0xff] }
 0x27b   :  { %2041 = vrot.lane.b32.xlu0 %v394_v28, %s8778_s12 }
 0x27c   :  { %v10205_v2 = vpop.permute.xlu2 %1979  ;;  %v10207_v57 = vpop.permute.xlu1 %1959 }
 0x27d   :  { %17737 = vst [vmem:[#allocation182_spill] sm:$0xff] %v10205_v2  ;;  %v10209_v51 = vpop.permute.xlu0 %1957  ;;  %v402_v2 = vld [vmem:[%s17548_s0 + $0x492] sm:$0xff] }
 0x27e   :  { %17738 = vst [vmem:[#allocation183_spill] sm:$0xff] %v10207_v57  ;;  %v401_v57 = vld [vmem:[%s17548_s0 + $0x48a] sm:$0xff] }
 0x27f   :  { %17739 = vst [vmem:[#allocation184_spill] sm:$0xff] %v10209_v51 }
 0x282   :  { %2051 = vrot.lane.b32.xlu2 %v399_v29, %s8778_s12  ;;  %2049 = vrot.lane.b32.xlu1 %v398_v21, %s8778_s12  ;;  %v400_v29 = vld [vmem:[%s17548_s0 + $0x47a] sm:$0xff] }
 0x283   :  { %2047 = vrot.lane.b32.xlu0 %v397_v63, %s8778_s12 }
 0x284   :  { %v10223_v59 = vpop.permute.xlu2 %1985  ;;  %v10225_v28 = vpop.permute.xlu1 %1965 }
 0x285   :  { %17740 = vst [vmem:[#allocation185_spill] sm:$0xff] %v10223_v59  ;;  %v10227_v51 = vpop.permute.xlu0 %1963 }
 0x286   :  { %17741 = vst [vmem:[#allocation186_spill] sm:$0xff] %v10225_v28  ;;  %v405_v28 = vld [vmem:[%s17548_s0 + $0x4b2] sm:$0xff] }
 0x287   :  { %17742 = vst [vmem:[#allocation187_spill] sm:$0xff] %v10227_v51  ;;  %v404_v51 = vld [vmem:[%s17548_s0 + $0x4a2] sm:$0xff] }
 0x28a   :  { %2057 = vrot.lane.b32.xlu2 %v402_v2, %s8778_s12  ;;  %2055 = vrot.lane.b32.xlu1 %v401_v57, %s8778_s12  ;;  %v403_v2 = vld [vmem:[%s17548_s0 + $0x49a] sm:$0xff] }
 0x28b   :  { %2053 = vrot.lane.b32.xlu0 %v400_v29, %s8778_s12 }
 0x28c   :  { %v10241_v21 = vpop.permute.xlu2 %1991  ;;  %v10243_v63 = vpop.permute.xlu1 %1971 }
 0x28d   :  { %17743 = vst [vmem:[#allocation188_spill] sm:$0xff] %v10241_v21  ;;  %v10245_v59 = vpop.permute.xlu0 %1969 }
 0x28e   :  { %17744 = vst [vmem:[#allocation189_spill] sm:$0xff] %v10243_v63  ;;  %v408_v63 = vld [vmem:[%s17548_s0 + $0x4ca] sm:$0xff] }
 0x28f   :  { %17745 = vst [vmem:[#allocation190_spill] sm:$0xff] %v10245_v59  ;;  %v407_v59 = vld [vmem:[%s17548_s0 + $0x4c2] sm:$0xff] }
 0x292   :  { %2063 = vrot.lane.b32.xlu2 %v405_v28, %s8778_s12  ;;  %2061 = vrot.lane.b32.xlu1 %v404_v51, %s8778_s12  ;;  %v406_v51 = vld [vmem:[%s17548_s0 + $0x4ba] sm:$0xff] }
 0x293   :  { %2059 = vrot.lane.b32.xlu0 %v403_v2, %s8778_s12 }
 0x294   :  { %v10259_v57 = vpop.permute.xlu2 %1997  ;;  %v10261_v29 = vpop.permute.xlu1 %1977 }
 0x295   :  { %17746 = vst [vmem:[#allocation191_spill] sm:$0xff] %v10259_v57  ;;  %v10263_v21 = vpop.permute.xlu0 %1975 }
 0x296   :  { %17747 = vst [vmem:[#allocation192_spill] sm:$0xff] %v10261_v29  ;;  %v411_v29 = vld [vmem:[%s17548_s0 + $0x4ea] sm:$0xff] }
 0x297   :  { %17748 = vst [vmem:[#allocation193_spill] sm:$0xff] %v10263_v21  ;;  %v410_v21 = vld [vmem:[%s17548_s0 + $0x4e2] sm:$0xff] }
 0x29a   :  { %2069 = vrot.lane.b32.xlu2 %v408_v63, %s8778_s12  ;;  %2067 = vrot.lane.b32.xlu1 %v407_v59, %s8778_s12  ;;  %v409_v59 = vld [vmem:[%s17548_s0 + $0x4da] sm:$0xff] }
 0x29b   :  { %2065 = vrot.lane.b32.xlu0 %v406_v51, %s8778_s12 }
 0x29c   :  { %v10277_v28 = vpop.permute.xlu2 %2003  ;;  %v10279_v2 = vpop.permute.xlu1 %1983 }
 0x29d   :  { %17749 = vst [vmem:[#allocation194_spill] sm:$0xff] %v10277_v28  ;;  %v10281_v57 = vpop.permute.xlu0 %1981 }
 0x29e   :  { %17750 = vst [vmem:[#allocation195_spill] sm:$0xff] %v10279_v2  ;;  %v7811_v2 = vld [vmem:[%s17548_s0 + $0x30] sm:$0xff] }
 0x29f   :  { %17751 = vst [vmem:[#allocation196_spill] sm:$0xff] %v10281_v57  ;;  %v7810_v57 = vld [vmem:[%s17548_s0 + $0x28] sm:$0xff] }
 0x2a2   :  { %2075 = vrot.lane.b32.xlu2 %v411_v29, %s8778_s12  ;;  %2073 = vrot.lane.b32.xlu1 %v410_v21, %s8778_s12  ;;  %v412_v21 = vld [vmem:[%s17548_s0 + $0x4f2] sm:$0xff] }
 0x2a3   :  { %2071 = vrot.lane.b32.xlu0 %v409_v59, %s8778_s12 }
 0x2a4   :  { %v10295_v63 = vpop.permute.xlu2 %2009  ;;  %v10297_v51 = vpop.permute.xlu1 %1989 }
 0x2a5   :  { %17752 = vst [vmem:[#allocation197_spill] sm:$0xff] %v10295_v63  ;;  %v10299_v28 = vpop.permute.xlu0 %1987 }
 0x2a6   :  { %17753 = vst [vmem:[#allocation198_spill] sm:$0xff] %v10297_v51  ;;  %v7814_v51 = vld [vmem:[%s17548_s0 + $0x50] sm:$0xff] }
 0x2a7   :  { %17754 = vst [vmem:[#allocation199_spill] sm:$0xff] %v10299_v28  ;;  %v7813_v28 = vld [vmem:[%s17548_s0 + $0x40] sm:$0xff] }
 0x2aa   :  { %2337 = vrot.lane.b32.xlu2 %v7811_v2, %s8779_s11  ;;  %2335 = vrot.lane.b32.xlu1 %v7810_v57, %s8779_s11  ;;  %v7812_v57 = vld [vmem:[%s17548_s0 + $0x38] sm:$0xff] }
 0x2ab   :  { %2077 = vrot.lane.b32.xlu0 %v412_v21, %s8778_s12  ;;  %s8780_s12 = smov 12  }
 0x2ac   :  { %v10313_v29 = vpop.permute.xlu2 %2015  ;;  %v10315_v59 = vpop.permute.xlu1 %1995 }
 0x2ad   :  { %17755 = vst [vmem:[#allocation200_spill] sm:$0xff] %v10313_v29  ;;  %v10317_v63 = vpop.permute.xlu0 %1993  ;;  %v7816_v29 = vld [vmem:[%s17548_s0 + $0x60] sm:$0xff] }
 0x2ae   :  { %17756 = vst [vmem:[#allocation201_spill] sm:$0xff] %v10315_v59 }
 0x2af   :  { %17757 = vst [vmem:[#allocation202_spill] sm:$0xff] %v10317_v63  ;;  %v7817_v63 = vld [vmem:[%s17548_s0 + $0x68] sm:$0xff] }
 0x2b2   :  { %2343 = vrot.lane.b32.xlu2 %v7814_v51, %s8779_s11  ;;  %2341 = vrot.lane.b32.xlu1 %v7813_v28, %s8779_s11  ;;  %v7815_v28 = vld [vmem:[%s17548_s0 + $0x58] sm:$0xff] }
 0x2b3   :  { %2339 = vrot.lane.b32.xlu0 %v7812_v57, %s8779_s11 }
 0x2b4   :  { %v10331_v2 = vpop.permute.xlu2 %2021  ;;  %v10333_v21 = vpop.permute.xlu1 %2001 }
 0x2b5   :  { %17758 = vst [vmem:[#allocation203_spill] sm:$0xff] %v10331_v2  ;;  %v10335_v59 = vpop.permute.xlu0 %1999  ;;  %v7819_v2 = vld [vmem:[%s17548_s0 + $0x80] sm:$0xff] }
 0x2b6   :  { %17759 = vst [vmem:[#allocation204_spill] sm:$0xff] %v10333_v21 }
 0x2b7   :  { %17760 = vst [vmem:[#allocation205_spill] sm:$0xff] %v10335_v59  ;;  %v7820_v59 = vld [vmem:[%s17548_s0 + $0x88] sm:$0xff] }
 0x2ba   :  { %2349 = vrot.lane.b32.xlu2 %v7817_v63, %s8779_s11  ;;  %2347 = vrot.lane.b32.xlu1 %v7816_v29, %s8779_s11  ;;  %v7818_v63 = vld [vmem:[%s17548_s0 + $0x78] sm:$0xff] }
 0x2bb   :  { %2345 = vrot.lane.b32.xlu0 %v7815_v28, %s8779_s11 }
 0x2bc   :  { %v10349_v51 = vpop.permute.xlu2 %2027  ;;  %v10351_v57 = vpop.permute.xlu1 %2007 }
 0x2bd   :  { %17761 = vst [vmem:[#allocation206_spill] sm:$0xff] %v10349_v51  ;;  %v10353_v21 = vpop.permute.xlu0 %2005  ;;  %v7822_v51 = vld [vmem:[%s17548_s0 + $0xa0] sm:$0xff] }
 0x2be   :  { %17762 = vst [vmem:[#allocation207_spill] sm:$0xff] %v10351_v57 }
 0x2bf   :  { %17763 = vst [vmem:[#allocation208_spill] sm:$0xff] %v10353_v21  ;;  %v7823_v21 = vld [vmem:[%s17548_s0 + $0xa8] sm:$0xff] }
 0x2c2   :  { %2355 = vrot.lane.b32.xlu2 %v7820_v59, %s8779_s11  ;;  %2353 = vrot.lane.b32.xlu1 %v7819_v2, %s8779_s11  ;;  %v7821_v59 = vld [vmem:[%s17548_s0 + $0x90] sm:$0xff] }
 0x2c3   :  { %2351 = vrot.lane.b32.xlu0 %v7818_v63, %s8779_s11 }
 0x2c4   :  { %v10367_v29 = vpop.permute.xlu2 %2033  ;;  %v10369_v28 = vpop.permute.xlu1 %2013 }
 0x2c5   :  { %17764 = vst [vmem:[#allocation209_spill] sm:$0xff] %v10367_v29  ;;  %v10371_v57 = vpop.permute.xlu0 %2011  ;;  %v7826_v29 = vld [vmem:[%s17548_s0 + $0xc8] sm:$0xff] }
 0x2c6   :  { %17765 = vst [vmem:[#allocation210_spill] sm:$0xff] %v10369_v28  ;;  %v7825_v28 = vld [vmem:[%s17548_s0 + $0xb8] sm:$0xff] }
 0x2c7   :  { %17766 = vst [vmem:[#allocation211_spill] sm:$0xff] %v10371_v57 }
 0x2ca   :  { %2361 = vrot.lane.b32.xlu2 %v7823_v21, %s8779_s11  ;;  %2359 = vrot.lane.b32.xlu1 %v7822_v51, %s8779_s11  ;;  %v7824_v21 = vld [vmem:[%s17548_s0 + $0xb0] sm:$0xff] }
 0x2cb   :  { %2357 = vrot.lane.b32.xlu0 %v7821_v59, %s8779_s11 }
 0x2cc   :  { %v10385_v2 = vpop.permute.xlu2 %2039  ;;  %v10387_v63 = vpop.permute.xlu1 %2019 }
 0x2cd   :  { %17767 = vst [vmem:[#allocation212_spill] sm:$0xff] %v10385_v2  ;;  %v10389_v57 = vpop.permute.xlu0 %2017 }
 0x2ce   :  { %17768 = vst [vmem:[#allocation213_spill] sm:$0xff] %v10387_v63  ;;  %v7829_v63 = vld [vmem:[%s17548_s0 + $0xe0] sm:$0xff] }
 0x2cf   :  { %17769 = vst [vmem:[#allocation214_spill] sm:$0xff] %v10389_v57  ;;  %v7828_v57 = vld [vmem:[%s17548_s0 + $0xd8] sm:$0xff] }
 0x2d2   :  { %2367 = vrot.lane.b32.xlu2 %v7826_v29, %s8779_s11  ;;  %2365 = vrot.lane.b32.xlu1 %v7825_v28, %s8779_s11  ;;  %v7827_v29 = vld [vmem:[%s17548_s0 + $0xd0] sm:$0xff] }
 0x2d3   :  { %2363 = vrot.lane.b32.xlu0 %v7824_v21, %s8779_s11 }
 0x2d4   :  { %v10403_v51 = vpop.permute.xlu2 %2045  ;;  %v10405_v59 = vpop.permute.xlu1 %2025 }
 0x2d5   :  { %17770 = vst [vmem:[#allocation215_spill] sm:$0xff] %v10403_v51  ;;  %v10407_v2 = vpop.permute.xlu0 %2023 }
 0x2d6   :  { %17771 = vst [vmem:[#allocation216_spill] sm:$0xff] %v10405_v59  ;;  %v7832_v59 = vld [vmem:[%s17548_s0 + $0x100] sm:$0xff] }
 0x2d7   :  { %17772 = vst [vmem:[#allocation217_spill] sm:$0xff] %v10407_v2  ;;  %v7831_v2 = vld [vmem:[%s17548_s0 + $0xf8] sm:$0xff] }
 0x2da   :  { %2373 = vrot.lane.b32.xlu2 %v7829_v63, %s8779_s11  ;;  %2371 = vrot.lane.b32.xlu1 %v7828_v57, %s8779_s11  ;;  %v7830_v57 = vld [vmem:[%s17548_s0 + $0xf0] sm:$0xff] }
 0x2db   :  { %2369 = vrot.lane.b32.xlu0 %v7827_v29, %s8779_s11 }
 0x2dc   :  { %v10421_v28 = vpop.permute.xlu2 %2051  ;;  %v10423_v21 = vpop.permute.xlu1 %2031 }
 0x2dd   :  { %17773 = vst [vmem:[#allocation218_spill] sm:$0xff] %v10421_v28  ;;  %v10425_v51 = vpop.permute.xlu0 %2029 }
 0x2de   :  { %17774 = vst [vmem:[#allocation219_spill] sm:$0xff] %v10423_v21  ;;  %v7835_v21 = vld [vmem:[%s17548_s0 + $0x120] sm:$0xff] }
 0x2df   :  { %17775 = vst [vmem:[#allocation220_spill] sm:$0xff] %v10425_v51  ;;  %v7834_v51 = vld [vmem:[%s17548_s0 + $0x118] sm:$0xff] }
 0x2e2   :  { %2379 = vrot.lane.b32.xlu2 %v7832_v59, %s8779_s11  ;;  %2377 = vrot.lane.b32.xlu1 %v7831_v2, %s8779_s11  ;;  %v7833_v2 = vld [vmem:[%s17548_s0 + $0x108] sm:$0xff] }
 0x2e3   :  { %2375 = vrot.lane.b32.xlu0 %v7830_v57, %s8779_s11 }
 0x2e4   :  { %v10439_v63 = vpop.permute.xlu2 %2057  ;;  %v10441_v29 = vpop.permute.xlu1 %2037 }
 0x2e5   :  { %17776 = vst [vmem:[#allocation221_spill] sm:$0xff] %v10439_v63  ;;  %v10443_v28 = vpop.permute.xlu0 %2035 }
 0x2e6   :  { %17777 = vst [vmem:[#allocation222_spill] sm:$0xff] %v10441_v29  ;;  %v7838_v29 = vld [vmem:[%s17548_s0 + $0x140] sm:$0xff] }
 0x2e7   :  { %17778 = vst [vmem:[#allocation223_spill] sm:$0xff] %v10443_v28  ;;  %v7837_v28 = vld [vmem:[%s17548_s0 + $0x130] sm:$0xff] }
 0x2ea   :  { %2385 = vrot.lane.b32.xlu2 %v7835_v21, %s8779_s11  ;;  %2383 = vrot.lane.b32.xlu1 %v7834_v51, %s8779_s11  ;;  %v7836_v51 = vld [vmem:[%s17548_s0 + $0x128] sm:$0xff] }
 0x2eb   :  { %2381 = vrot.lane.b32.xlu0 %v7833_v2, %s8779_s11 }
 0x2ec   :  { %v10457_v59 = vpop.permute.xlu2 %2063  ;;  %v10459_v57 = vpop.permute.xlu1 %2043 }
 0x2ed   :  { %17779 = vst [vmem:[#allocation224_spill] sm:$0xff] %v10457_v59  ;;  %v10461_v63 = vpop.permute.xlu0 %2041 }
 0x2ee   :  { %17780 = vst [vmem:[#allocation225_spill] sm:$0xff] %v10459_v57  ;;  %v7841_v57 = vld [vmem:[%s17548_s0 + $0x158] sm:$0xff] }
 0x2ef   :  { %17781 = vst [vmem:[#allocation226_spill] sm:$0xff] %v10461_v63  ;;  %v7840_v63 = vld [vmem:[%s17548_s0 + $0x150] sm:$0xff] }
 0x2f2   :  { %2391 = vrot.lane.b32.xlu2 %v7838_v29, %s8779_s11  ;;  %2389 = vrot.lane.b32.xlu1 %v7837_v28, %s8779_s11  ;;  %v7839_v28 = vld [vmem:[%s17548_s0 + $0x148] sm:$0xff] }
 0x2f3   :  { %2387 = vrot.lane.b32.xlu0 %v7836_v51, %s8779_s11 }
 0x2f4   :  { %v10475_v21 = vpop.permute.xlu2 %2069  ;;  %v10477_v2 = vpop.permute.xlu1 %2049 }
 0x2f5   :  { %17782 = vst [vmem:[#allocation227_spill] sm:$0xff] %v10475_v21  ;;  %v10479_v59 = vpop.permute.xlu0 %2047 }
 0x2f6   :  { %17783 = vst [vmem:[#allocation228_spill] sm:$0xff] %v10477_v2  ;;  %v7844_v2 = vld [vmem:[%s17548_s0 + $0x178] sm:$0xff] }
 0x2f7   :  { %17784 = vst [vmem:[#allocation229_spill] sm:$0xff] %v10479_v59  ;;  %v7843_v59 = vld [vmem:[%s17548_s0 + $0x170] sm:$0xff] }
 0x2fa   :  { %2397 = vrot.lane.b32.xlu2 %v7841_v57, %s8779_s11  ;;  %2395 = vrot.lane.b32.xlu1 %v7840_v63, %s8779_s11  ;;  %v7842_v63 = vld [vmem:[%s17548_s0 + $0x168] sm:$0xff] }
 0x2fb   :  { %2393 = vrot.lane.b32.xlu0 %v7839_v28, %s8779_s11 }
 0x2fc   :  { %v10493_v29 = vpop.permute.xlu2 %2075  ;;  %v10495_v51 = vpop.permute.xlu1 %2055 }
 0x2fd   :  { %17785 = vst [vmem:[#allocation230_spill] sm:$0xff] %v10493_v29  ;;  %v10497_v21 = vpop.permute.xlu0 %2053 }
 0x2fe   :  { %17786 = vst [vmem:[#allocation231_spill] sm:$0xff] %v10495_v51  ;;  %v7847_v51 = vld [vmem:[%s17548_s0 + $0x198] sm:$0xff] }
 0x2ff   :  { %17787 = vst [vmem:[#allocation232_spill] sm:$0xff] %v10497_v21  ;;  %v7846_v21 = vld [vmem:[%s17548_s0 + $0x190] sm:$0xff] }
 0x302   :  { %2403 = vrot.lane.b32.xlu2 %v7844_v2, %s8779_s11  ;;  %2401 = vrot.lane.b32.xlu1 %v7843_v59, %s8779_s11  ;;  %v7845_v59 = vld [vmem:[%s17548_s0 + $0x180] sm:$0xff] }
 0x303   :  { %2399 = vrot.lane.b32.xlu0 %v7842_v63, %s8779_s11 }
 0x304   :  { %v10511_v57 = vpop.permute.xlu2 %2337  ;;  %v10513_v28 = vpop.permute.xlu1 %2061 }
 0x305   :  { %17788 = vst [vmem:[#allocation233_spill] sm:$0xff] %v10513_v28  ;;  %v10515_v29 = vpop.permute.xlu0 %2059 }
 0x306   :  { %17789 = vst [vmem:[#allocation234_spill] sm:$0xff] %v10515_v29  ;;  %v7850_v29 = vld [vmem:[%s17548_s0 + $0x1b8] sm:$0xff] }
 0x30a   :  { %2409 = vrot.lane.b32.xlu2 %v7847_v51, %s8779_s11  ;;  %2407 = vrot.lane.b32.xlu1 %v7846_v21, %s8779_s11  ;;  %v7848_v21 = vld [vmem:[%s17548_s0 + $0x1a0] sm:$0xff] }
 0x30b   :  { %2405 = vrot.lane.b32.xlu0 %v7845_v59, %s8779_s11 }
 0x30c   :  { %v10529_v2 = vpop.permute.xlu2 %2343  ;;  %v10531_v63 = vpop.permute.xlu1 %2067 }
 0x30d   :  { %17790 = vst [vmem:[#allocation235_spill] sm:$0xff] %v10531_v63  ;;  %v10533_v28 = vpop.permute.xlu0 %2065 }
 0x30e   :  { %17791 = vst [vmem:[#allocation236_spill] sm:$0xff] %v10533_v28  ;;  %v7853_v28 = vld [vmem:[%s17548_s0 + $0x1d0] sm:$0xff] }
 0x312   :  { %2415 = vrot.lane.b32.xlu2 %v7850_v29, %s8779_s11  ;;  %2413 = vrot.lane.b32.xlu1 %v7849_v8, %s8779_s11  ;;  %v7851_v8 = vld [vmem:[%s17548_s0 + $0x1c0] sm:$0xff] }
 0x313   :  { %2411 = vrot.lane.b32.xlu0 %v7848_v21, %s8779_s11 }
 0x314   :  { %v10547_v51 = vpop.permute.xlu2 %2349  ;;  %v10549_v59 = vpop.permute.xlu1 %2073 }
 0x315   :  { %17792 = vst [vmem:[#allocation237_spill] sm:$0xff] %v10549_v59  ;;  %v10551_v63 = vpop.permute.xlu0 %2071 }
 0x316   :  { %17793 = vst [vmem:[#allocation238_spill] sm:$0xff] %v10551_v63  ;;  %v7856_v63 = vld [vmem:[%s17548_s0 + $0x1f0] sm:$0xff] }
 0x31a   :  { %2421 = vrot.lane.b32.xlu2 %v7853_v28, %s8779_s11  ;;  %2419 = vrot.lane.b32.xlu1 %v7852_v35, %s8779_s11  ;;  %v7854_v35 = vld [vmem:[%s17548_s0 + $0x1e0] sm:$0xff] }
 0x31b   :  { %2417 = vrot.lane.b32.xlu0 %v7851_v8, %s8779_s11 }
 0x31c   :  { %v10565_v29 = vpop.permute.xlu2 %2355  ;;  %v10567_v21 = vpop.permute.xlu1 %2335 }
 0x31d   :  { %17794 = vst [vmem:[#allocation239_spill] sm:$0xff] %v10565_v29  ;;  %v10569_v59 = vpop.permute.xlu0 %2077  ;;  %v8122_v29 = vld [vmem:[%s17548_s0 + $0x25a] sm:$0xff] }
 0x31e   :  { %17795 = vst [vmem:[#allocation240_spill] sm:$0xff] %v10569_v59 }
 0x322   :  { %2427 = vrot.lane.b32.xlu2 %v7856_v63, %s8779_s11  ;;  %2425 = vrot.lane.b32.xlu1 %v7855_v34, %s8779_s11  ;;  %v7857_v34 = vld [vmem:[%s17548_s0 + $0x1f8] sm:$0xff] }
 0x323   :  { %2423 = vrot.lane.b32.xlu0 %v7854_v35, %s8779_s11 }
 0x324   :  { %v10583_v28 = vpop.permute.xlu2 %2361  ;;  %v10585_v8 = vpop.permute.xlu1 %2341 }
 0x325   :  { %17796 = vst [vmem:[#allocation241_spill] sm:$0xff] %v10583_v28  ;;  %v10587_v59 = vpop.permute.xlu0 %2339 }
 0x32a   :  { %2433 = vrot.lane.b32.xlu2 %v7859_v6, %s8779_s11  ;;  %2431 = vrot.lane.b32.xlu1 %v7858_v37, %s8779_s11  ;;  %v7860_v37 = vld [vmem:[%s17548_s0 + $0x218] sm:$0xff] }
 0x32b   :  { %2429 = vrot.lane.b32.xlu0 %v7857_v34, %s8779_s11 }
 0x32c   :  { %v10601_v63 = vpop.permute.xlu2 %2367  ;;  %v10603_v35 = vpop.permute.xlu1 %2347 }
 0x32d   :  { %17797 = vst [vmem:[#allocation242_spill] sm:$0xff] %v10601_v63  ;;  %v10605_v22 = vpop.permute.xlu0 %2345 }
 0x332   :  { %2439 = vrot.lane.b32.xlu2 %v7862_v19, %s8779_s11  ;;  %2437 = vrot.lane.b32.xlu1 %v7861_v60, %s8779_s11  ;;  %v7863_v60 = vld [vmem:[%s17548_s0 + $0x238] sm:$0xff] }
 0x333   :  { %2435 = vrot.lane.b32.xlu0 %v7860_v37, %s8779_s11 }
 0x334   :  { %v10619_v6 = vpop.permute.xlu2 %2373  ;;  %v10621_v34 = vpop.permute.xlu1 %2353 }
 0x335   :  { %17798 = vst [vmem:[#allocation243_spill] sm:$0xff] %v10619_v6  ;;  %v10623_v63 = vpop.permute.xlu0 %2351 }
 0x336   :  { %17799 = vst [vmem:[#allocation244_spill] sm:$0xff] %v10621_v34  ;;  %v8251_v34 = vld [vmem:[%s17548_s0 + $0x288] sm:$0xff] }
 0x33a   :  { %2445 = vrot.lane.b32.xlu2 %v7865_v43, %s8779_s11  ;;  %2443 = vrot.lane.b32.xlu1 %v7864_v1, %s8779_s11  ;;  %v7866_v1 = vld [vmem:[%s17548_s0 + $0x258] sm:$0xff] }
 0x33b   :  { %2441 = vrot.lane.b32.xlu0 %v7863_v60, %s8779_s11 }
 0x33c   :  { %v10637_v19 = vpop.permute.xlu2 %2379  ;;  %v10639_v37 = vpop.permute.xlu1 %2359 }
 0x33d   :  { %17800 = vst [vmem:[#allocation245_spill] sm:$0xff] %v10637_v19  ;;  %v10641_v6 = vpop.permute.xlu0 %2357 }
 0x33e   :  { %17801 = vst [vmem:[#allocation246_spill] sm:$0xff] %v10639_v37  ;;  %v7996_v37 = vld [vmem:[%s17548_s0 + $0x269] sm:$0xff] }
 0x33f   :  { %17802 = vst [vmem:[#allocation247_spill] sm:$0xff] %v10641_v6  ;;  %v8116_v6 = vld [vmem:[%s17548_s0 + $0x21a] sm:$0xff] }
 0x342   :  { %2451 = vrot.lane.b32.xlu2 %v7868_v47, %s8779_s11  ;;  %2449 = vrot.lane.b32.xlu1 %v7867_v15, %s8779_s11  ;;  %v7869_v15 = vld [vmem:[%s17548_s0 + $0x270] sm:$0xff] }
 0x343   :  { %2447 = vrot.lane.b32.xlu0 %v7866_v1, %s8779_s11 }
 0x344   :  { %v10655_v43 = vpop.permute.xlu2 %2385  ;;  %v10657_v60 = vpop.permute.xlu1 %2365 }
 0x345   :  { %17803 = vst [vmem:[#allocation248_spill] sm:$0xff] %v10655_v43  ;;  %v10659_v19 = vpop.permute.xlu0 %2363 }
 0x346   :  { %17804 = vst [vmem:[#allocation249_spill] sm:$0xff] %v10657_v60  ;;  %v7874_v60 = vld [vmem:[%s17548_s0 + $0x2a8] sm:$0xff] }
 0x347   :  { %17805 = vst [vmem:[#allocation250_spill] sm:$0xff] %v10659_v19  ;;  %v7897_v19 = vld [vmem:[%s17548_s0 + $0x388] sm:$0xff] }
 0x34a   :  { %2457 = vrot.lane.b32.xlu2 %v7871_v17, %s8779_s11  ;;  %2455 = vrot.lane.b32.xlu1 %v7870_v23, %s8779_s11  ;;  %v7872_v23 = vld [vmem:[%s17548_s0 + $0x290] sm:$0xff] }
 0x34b   :  { %2453 = vrot.lane.b32.xlu0 %v7869_v15, %s8779_s11 }
 0x34c   :  { %v10673_v47 = vpop.permute.xlu2 %2391  ;;  %v10675_v1 = vpop.permute.xlu1 %2371 }
 0x34d   :  { %17806 = vst [vmem:[#allocation251_spill] sm:$0xff] %v10673_v47  ;;  %v10677_v43 = vpop.permute.xlu0 %2369 }
 0x34e   :  { %17807 = vst [vmem:[#allocation252_spill] sm:$0xff] %v10675_v1  ;;  %v7877_v1 = vld [vmem:[%s17548_s0 + $0x2c0] sm:$0xff] }
 0x34f   :  { %17808 = vst [vmem:[#allocation253_spill] sm:$0xff] %v10677_v43  ;;  %v7876_v43 = vld [vmem:[%s17548_s0 + $0x2b8] sm:$0xff] }
 0x352   :  { %2463 = vrot.lane.b32.xlu2 %v7874_v60, %s8779_s11  ;;  %2461 = vrot.lane.b32.xlu1 %v7873_v58, %s8779_s11  ;;  %v7875_v58 = vld [vmem:[%s17548_s0 + $0x2b0] sm:$0xff] }
 0x353   :  { %2459 = vrot.lane.b32.xlu0 %v7872_v23, %s8779_s11 }
 0x354   :  { %v10691_v17 = vpop.permute.xlu2 %2397  ;;  %v10693_v15 = vpop.permute.xlu1 %2377 }
 0x355   :  { %17809 = vst [vmem:[#allocation254_spill] sm:$0xff] %v10691_v17  ;;  %v10695_v47 = vpop.permute.xlu0 %2375 }
 0x356   :  { %17810 = vst [vmem:[#allocation255_spill] sm:$0xff] %v10693_v15  ;;  %v7880_v15 = vld [vmem:[%s17548_s0 + $0x2e0] sm:$0xff] }
 0x357   :  { %17811 = vst [vmem:[#allocation256_spill] sm:$0xff] %v10695_v47  ;;  %v7879_v47 = vld [vmem:[%s17548_s0 + $0x2d8] sm:$0xff] }
 0x35a   :  { %2469 = vrot.lane.b32.xlu2 %v7877_v1, %s8779_s11  ;;  %2467 = vrot.lane.b32.xlu1 %v7876_v43, %s8779_s11  ;;  %v7878_v43 = vld [vmem:[%s17548_s0 + $0x2d0] sm:$0xff] }
 0x35b   :  { %2465 = vrot.lane.b32.xlu0 %v7875_v58, %s8779_s11 }
 0x35c   :  { %v10709_v60 = vpop.permute.xlu2 %2403  ;;  %v10711_v23 = vpop.permute.xlu1 %2383 }
 0x35d   :  { %17812 = vst [vmem:[#allocation257_spill] sm:$0xff] %v10709_v60  ;;  %v10713_v17 = vpop.permute.xlu0 %2381 }
 0x35e   :  { %17813 = vst [vmem:[#allocation258_spill] sm:$0xff] %v10711_v23  ;;  %v7883_v23 = vld [vmem:[%s17548_s0 + $0x300] sm:$0xff] }
 0x35f   :  { %17814 = vst [vmem:[#allocation259_spill] sm:$0xff] %v10713_v17  ;;  %v7882_v17 = vld [vmem:[%s17548_s0 + $0x2f8] sm:$0xff] }
 0x362   :  { %2475 = vrot.lane.b32.xlu2 %v7880_v15, %s8779_s11  ;;  %2473 = vrot.lane.b32.xlu1 %v7879_v47, %s8779_s11  ;;  %v7881_v47 = vld [vmem:[%s17548_s0 + $0x2e8] sm:$0xff] }
 0x363   :  { %2471 = vrot.lane.b32.xlu0 %v7878_v43, %s8779_s11 }
 0x364   :  { %v10727_v1 = vpop.permute.xlu2 %2409  ;;  %v10729_v58 = vpop.permute.xlu1 %2389 }
 0x365   :  { %17815 = vst [vmem:[#allocation260_spill] sm:$0xff] %v10727_v1  ;;  %v10731_v60 = vpop.permute.xlu0 %2387  ;;  %v7994_v1 = vld [vmem:[%s17548_s0 + $0x259] sm:$0xff] }
 0x366   :  { %17816 = vst [vmem:[#allocation261_spill] sm:$0xff] %v10729_v58 }
 0x367   :  { %17817 = vst [vmem:[#allocation262_spill] sm:$0xff] %v10731_v60  ;;  %v7886_v60 = vld [vmem:[%s17548_s0 + $0x320] sm:$0xff] }
 0x36a   :  { %2481 = vrot.lane.b32.xlu2 %v7883_v23, %s8779_s11  ;;  %2479 = vrot.lane.b32.xlu1 %v7882_v17, %s8779_s11  ;;  %v7884_v17 = vld [vmem:[%s17548_s0 + $0x308] sm:$0xff] }
 0x36b   :  { %2477 = vrot.lane.b32.xlu0 %v7881_v47, %s8779_s11 }
 0x36c   :  { %v10745_v15 = vpop.permute.xlu2 %2415  ;;  %v10747_v43 = vpop.permute.xlu1 %2395 }
 0x36d   :  { %17818 = vst [vmem:[#allocation263_spill] sm:$0xff] %v10745_v15  ;;  %v10749_v58 = vpop.permute.xlu0 %2393  ;;  %v7888_v15 = vld [vmem:[%s17548_s0 + $0x330] sm:$0xff] }
 0x36e   :  { %17819 = vst [vmem:[#allocation264_spill] sm:$0xff] %v10747_v43 }
 0x36f   :  { %17820 = vst [vmem:[#allocation265_spill] sm:$0xff] %v10749_v58  ;;  %v7889_v58 = vld [vmem:[%s17548_s0 + $0x338] sm:$0xff] }
 0x372   :  { %2487 = vrot.lane.b32.xlu2 %v7886_v60, %s8779_s11  ;;  %2485 = vrot.lane.b32.xlu1 %v7885_v30, %s8779_s11  ;;  %v7887_v30 = vld [vmem:[%s17548_s0 + $0x328] sm:$0xff] }
 0x373   :  { %2483 = vrot.lane.b32.xlu0 %v7884_v17, %s8779_s11 }
 0x374   :  { %v10763_v23 = vpop.permute.xlu2 %2421  ;;  %v10765_v47 = vpop.permute.xlu1 %2401 }
 0x375   :  { %17821 = vst [vmem:[#allocation266_spill] sm:$0xff] %v10763_v23  ;;  %v10767_v43 = vpop.permute.xlu0 %2399  ;;  %v7891_v23 = vld [vmem:[%s17548_s0 + $0x350] sm:$0xff] }
 0x376   :  { %17822 = vst [vmem:[#allocation267_spill] sm:$0xff] %v10765_v47 }
 0x377   :  { %17823 = vst [vmem:[#allocation268_spill] sm:$0xff] %v10767_v43  ;;  %v7892_v43 = vld [vmem:[%s17548_s0 + $0x358] sm:$0xff] }
 0x37a   :  { %2493 = vrot.lane.b32.xlu2 %v7889_v58, %s8779_s11  ;;  %2491 = vrot.lane.b32.xlu1 %v7888_v15, %s8779_s11  ;;  %v7890_v58 = vld [vmem:[%s17548_s0 + $0x348] sm:$0xff] }
 0x37b   :  { %2489 = vrot.lane.b32.xlu0 %v7887_v30, %s8779_s11 }
 0x37c   :  { %v10781_v60 = vpop.permute.xlu2 %2427  ;;  %v10783_v17 = vpop.permute.xlu1 %2407 }
 0x37d   :  { %17824 = vst [vmem:[#allocation269_spill] sm:$0xff] %v10781_v60  ;;  %v10785_v47 = vpop.permute.xlu0 %2405 }
 0x37e   :  { %17825 = vst [vmem:[#allocation270_spill] sm:$0xff] %v10783_v17  ;;  %v8107_v17 = vld [vmem:[%s17548_s0 + $0x1c2] sm:$0xff] }
 0x37f   :  { %17826 = vst [vmem:[#allocation271_spill] sm:$0xff] %v10785_v47  ;;  %v8242_v47 = vld [vmem:[%s17548_s0 + $0x230] sm:$0xff] }
 0x382   :  { %2499 = vrot.lane.b32.xlu2 %v7892_v43, %s8779_s11  ;;  %2497 = vrot.lane.b32.xlu1 %v7891_v23, %s8779_s11  ;;  %v7893_v43 = vld [vmem:[%s17548_s0 + $0x360] sm:$0xff] }
 0x383   :  { %2495 = vrot.lane.b32.xlu0 %v7890_v58, %s8779_s11 }
 0x384   :  { %v10799_v15 = vpop.permute.xlu2 %2433  ;;  %v10801_v30 = vpop.permute.xlu1 %2413 }
 0x385   :  { %17827 = vst [vmem:[#allocation272_spill] sm:$0xff] %v10799_v15  ;;  %v10803_v60 = vpop.permute.xlu0 %2411 }
 0x386   :  { %17828 = vst [vmem:[#allocation273_spill] sm:$0xff] %v10801_v30  ;;  %v7898_v30 = vld [vmem:[%s17548_s0 + $0x398] sm:$0xff] }
 0x387   :  { %17829 = vst [vmem:[#allocation274_spill] sm:$0xff] %v10803_v60  ;;  %v7984_v60 = vld [vmem:[%s17548_s0 + $0x1f1] sm:$0xff] }
 0x38a   :  { %2505 = vrot.lane.b32.xlu2 %v7895_v24, %s8779_s11  ;;  %2503 = vrot.lane.b32.xlu1 %v7894_v16, %s8779_s11  ;;  %v7896_v16 = vld [vmem:[%s17548_s0 + $0x380] sm:$0xff] }
 0x38b   :  { %2501 = vrot.lane.b32.xlu0 %v7893_v43, %s8779_s11 }
 0x38c   :  { %v10817_v23 = vpop.permute.xlu2 %2439  ;;  %v10819_v58 = vpop.permute.xlu1 %2419 }
 0x38d   :  { %17830 = vst [vmem:[#allocation275_spill] sm:$0xff] %v10817_v23  ;;  %v10821_v15 = vpop.permute.xlu0 %2417 }
 0x38e   :  { %17831 = vst [vmem:[#allocation276_spill] sm:$0xff] %v10819_v58  ;;  %v7901_v58 = vld [vmem:[%s17548_s0 + $0x3b0] sm:$0xff] }
 0x38f   :  { %17832 = vst [vmem:[#allocation277_spill] sm:$0xff] %v10821_v15  ;;  %v7900_v15 = vld [vmem:[%s17548_s0 + $0x3a8] sm:$0xff] }
 0x392   :  { %2511 = vrot.lane.b32.xlu2 %v7898_v30, %s8779_s11  ;;  %2509 = vrot.lane.b32.xlu1 %v7897_v19, %s8779_s11  ;;  %v7899_v19 = vld [vmem:[%s17548_s0 + $0x3a0] sm:$0xff] }
 0x393   :  { %2507 = vrot.lane.b32.xlu0 %v7896_v16, %s8779_s11 }
 0x394   :  { %v10835_v24 = vpop.permute.xlu2 %2445  ;;  %v10837_v43 = vpop.permute.xlu1 %2425 }
 0x395   :  { %17833 = vst [vmem:[#allocation278_spill] sm:$0xff] %v10835_v24  ;;  %v10839_v23 = vpop.permute.xlu0 %2423 }
 0x396   :  { %17834 = vst [vmem:[#allocation279_spill] sm:$0xff] %v10837_v43  ;;  %v7904_v43 = vld [vmem:[%s17548_s0 + $0x3d0] sm:$0xff] }
 0x397   :  { %17835 = vst [vmem:[#allocation280_spill] sm:$0xff] %v10839_v23  ;;  %v7903_v23 = vld [vmem:[%s17548_s0 + $0x3c8] sm:$0xff] }
 0x39a   :  { %2517 = vrot.lane.b32.xlu2 %v7901_v58, %s8779_s11  ;;  %2515 = vrot.lane.b32.xlu1 %v7900_v15, %s8779_s11  ;;  %v7902_v15 = vld [vmem:[%s17548_s0 + $0x3c0] sm:$0xff] }
 0x39b   :  { %2513 = vrot.lane.b32.xlu0 %v7899_v19, %s8779_s11 }
 0x39c   :  { %v10853_v30 = vpop.permute.xlu2 %2451  ;;  %v10855_v16 = vpop.permute.xlu1 %2431 }
 0x39d   :  { %17836 = vst [vmem:[#allocation281_spill] sm:$0xff] %v10853_v30  ;;  %v10857_v24 = vpop.permute.xlu0 %2429 }
 0x39e   :  { %17837 = vst [vmem:[#allocation282_spill] sm:$0xff] %v10855_v16  ;;  %v7907_v16 = vld [vmem:[%s17548_s0 + $0x3f0] sm:$0xff] }
 0x39f   :  { %17838 = vst [vmem:[#allocation283_spill] sm:$0xff] %v10857_v24  ;;  %v7906_v24 = vld [vmem:[%s17548_s0 + $0x3e8] sm:$0xff] }
 0x3a2   :  { %2523 = vrot.lane.b32.xlu2 %v7904_v43, %s8779_s11  ;;  %2521 = vrot.lane.b32.xlu1 %v7903_v23, %s8779_s11  ;;  %v7905_v23 = vld [vmem:[%s17548_s0 + $0x3d8] sm:$0xff] }
 0x3a3   :  { %2519 = vrot.lane.b32.xlu0 %v7902_v15, %s8779_s11 }
 0x3a4   :  { %v10871_v58 = vpop.permute.xlu2 %2457  ;;  %v10873_v19 = vpop.permute.xlu1 %2437 }
 0x3a5   :  { %17839 = vst [vmem:[#allocation284_spill] sm:$0xff] %v10871_v58  ;;  %v10875_v30 = vpop.permute.xlu0 %2435 }
 0x3a6   :  { %17840 = vst [vmem:[#allocation285_spill] sm:$0xff] %v10873_v19  ;;  %v7910_v19 = vld [vmem:[%s17548_s0 + $0x410] sm:$0xff] }
 0x3a7   :  { %17841 = vst [vmem:[#allocation286_spill] sm:$0xff] %v10875_v30  ;;  %v7909_v30 = vld [vmem:[%s17548_s0 + $0x400] sm:$0xff] }
 0x3aa   :  { %2529 = vrot.lane.b32.xlu2 %v7907_v16, %s8779_s11  ;;  %2527 = vrot.lane.b32.xlu1 %v7906_v24, %s8779_s11  ;;  %v7908_v24 = vld [vmem:[%s17548_s0 + $0x3f8] sm:$0xff] }
 0x3ab   :  { %2525 = vrot.lane.b32.xlu0 %v7905_v23, %s8779_s11 }
 0x3ac   :  { %v10889_v43 = vpop.permute.xlu2 %2463  ;;  %v10891_v15 = vpop.permute.xlu1 %2443 }
 0x3ad   :  { %17842 = vst [vmem:[#allocation287_spill] sm:$0xff] %v10889_v43  ;;  %v10893_v58 = vpop.permute.xlu0 %2441 }
 0x3ae   :  { %17843 = vst [vmem:[#allocation288_spill] sm:$0xff] %v10891_v15  ;;  %v7913_v15 = vld [vmem:[%s17548_s0 + $0x428] sm:$0xff] }
 0x3af   :  { %17844 = vst [vmem:[#allocation289_spill] sm:$0xff] %v10893_v58  ;;  %v7912_v58 = vld [vmem:[%s17548_s0 + $0x420] sm:$0xff] }
 0x3b2   :  { %2535 = vrot.lane.b32.xlu2 %v7910_v19, %s8779_s11  ;;  %2533 = vrot.lane.b32.xlu1 %v7909_v30, %s8779_s11  ;;  %v7911_v30 = vld [vmem:[%s17548_s0 + $0x418] sm:$0xff] }
 0x3b3   :  { %2531 = vrot.lane.b32.xlu0 %v7908_v24, %s8779_s11 }
 0x3b4   :  { %v10907_v16 = vpop.permute.xlu2 %2469  ;;  %v10909_v23 = vpop.permute.xlu1 %2449 }
 0x3b5   :  { %17845 = vst [vmem:[#allocation290_spill] sm:$0xff] %v10907_v16  ;;  %v10911_v43 = vpop.permute.xlu0 %2447 }
 0x3b6   :  { %17846 = vst [vmem:[#allocation291_spill] sm:$0xff] %v10909_v23  ;;  %v7916_v23 = vld [vmem:[%s17548_s0 + $0x448] sm:$0xff] }
 0x3b7   :  { %17847 = vst [vmem:[#allocation292_spill] sm:$0xff] %v10911_v43  ;;  %v7915_v43 = vld [vmem:[%s17548_s0 + $0x440] sm:$0xff] }
 0x3ba   :  { %2541 = vrot.lane.b32.xlu2 %v7913_v15, %s8779_s11  ;;  %2539 = vrot.lane.b32.xlu1 %v7912_v58, %s8779_s11  ;;  %v7914_v58 = vld [vmem:[%s17548_s0 + $0x438] sm:$0xff] }
 0x3bb   :  { %2537 = vrot.lane.b32.xlu0 %v7911_v30, %s8779_s11 }
 0x3bc   :  { %v10925_v19 = vpop.permute.xlu2 %2475  ;;  %v10927_v24 = vpop.permute.xlu1 %2455 }
 0x3bd   :  { %17848 = vst [vmem:[#allocation293_spill] sm:$0xff] %v10925_v19  ;;  %v10929_v16 = vpop.permute.xlu0 %2453  ;;  %v7918_v19 = vld [vmem:[%s17548_s0 + $0x460] sm:$0xff] }
 0x3be   :  { %17849 = vst [vmem:[#allocation294_spill] sm:$0xff] %v10927_v24 }
 0x3bf   :  { %17850 = vst [vmem:[#allocation295_spill] sm:$0xff] %v10929_v16  ;;  %v7919_v16 = vld [vmem:[%s17548_s0 + $0x468] sm:$0xff] }
 0x3c2   :  { %2547 = vrot.lane.b32.xlu2 %v7916_v23, %s8779_s11  ;;  %2545 = vrot.lane.b32.xlu1 %v7915_v43, %s8779_s11  ;;  %v7917_v43 = vld [vmem:[%s17548_s0 + $0x450] sm:$0xff] }
 0x3c3   :  { %2543 = vrot.lane.b32.xlu0 %v7914_v58, %s8779_s11 }
 0x3c4   :  { %v10943_v15 = vpop.permute.xlu2 %2481  ;;  %v10945_v30 = vpop.permute.xlu1 %2461 }
 0x3c5   :  { %17851 = vst [vmem:[#allocation296_spill] sm:$0xff] %v10943_v15  ;;  %v10947_v24 = vpop.permute.xlu0 %2459  ;;  %v7921_v15 = vld [vmem:[%s17548_s0 + $0x478] sm:$0xff] }
 0x3c6   :  { %17852 = vst [vmem:[#allocation297_spill] sm:$0xff] %v10945_v30 }
 0x3c7   :  { %17853 = vst [vmem:[#allocation298_spill] sm:$0xff] %v10947_v24  ;;  %v7922_v24 = vld [vmem:[%s17548_s0 + $0x488] sm:$0xff] }
 0x3ca   :  { %2553 = vrot.lane.b32.xlu2 %v7919_v16, %s8779_s11  ;;  %2551 = vrot.lane.b32.xlu1 %v7918_v19, %s8779_s11  ;;  %v7920_v16 = vld [vmem:[%s17548_s0 + $0x470] sm:$0xff] }
 0x3cb   :  { %2549 = vrot.lane.b32.xlu0 %v7917_v43, %s8779_s11 }
 0x3cc   :  { %v10961_v23 = vpop.permute.xlu2 %2487  ;;  %v10963_v58 = vpop.permute.xlu1 %2467 }
 0x3cd   :  { %17854 = vst [vmem:[#allocation299_spill] sm:$0xff] %v10961_v23  ;;  %v10965_v30 = vpop.permute.xlu0 %2465  ;;  %v7924_v23 = vld [vmem:[%s17548_s0 + $0x498] sm:$0xff] }
 0x3ce   :  { %17855 = vst [vmem:[#allocation300_spill] sm:$0xff] %v10963_v58 }
 0x3cf   :  { %17856 = vst [vmem:[#allocation301_spill] sm:$0xff] %v10965_v30  ;;  %v7925_v30 = vld [vmem:[%s17548_s0 + $0x4a0] sm:$0xff] }
 0x3d2   :  { %2559 = vrot.lane.b32.xlu2 %v7922_v24, %s8779_s11  ;;  %2557 = vrot.lane.b32.xlu1 %v7921_v15, %s8779_s11  ;;  %v7923_v24 = vld [vmem:[%s17548_s0 + $0x490] sm:$0xff] }
 0x3d3   :  { %2555 = vrot.lane.b32.xlu0 %v7920_v16, %s8779_s11 }
 0x3d4   :  { %v10979_v19 = vpop.permute.xlu2 %2493  ;;  %v10981_v43 = vpop.permute.xlu1 %2473 }
 0x3d5   :  { %17857 = vst [vmem:[#allocation302_spill] sm:$0xff] %v10979_v19  ;;  %v10983_v58 = vpop.permute.xlu0 %2471 }
 0x3d6   :  { %17858 = vst [vmem:[#allocation303_spill] sm:$0xff] %v10981_v43  ;;  %v7928_v43 = vld [vmem:[%s17548_s0 + $0x4c0] sm:$0xff] }
 0x3d7   :  { %17859 = vst [vmem:[#allocation304_spill] sm:$0xff] %v10983_v58  ;;  %v7927_v58 = vld [vmem:[%s17548_s0 + $0x4b8] sm:$0xff] }
 0x3da   :  { %2565 = vrot.lane.b32.xlu2 %v7925_v30, %s8779_s11  ;;  %2563 = vrot.lane.b32.xlu1 %v7924_v23, %s8779_s11  ;;  %v7926_v30 = vld [vmem:[%s17548_s0 + $0x4b0] sm:$0xff] }
 0x3db   :  { %2561 = vrot.lane.b32.xlu0 %v7923_v24, %s8779_s11 }
 0x3dc   :  { %v10997_v15 = vpop.permute.xlu2 %2499  ;;  %v10999_v16 = vpop.permute.xlu1 %2479 }
 0x3dd   :  { %17860 = vst [vmem:[#allocation305_spill] sm:$0xff] %v10997_v15  ;;  %v11001_v19 = vpop.permute.xlu0 %2477 }
 0x3de   :  { %17861 = vst [vmem:[#allocation306_spill] sm:$0xff] %v10999_v16  ;;  %v7931_v16 = vld [vmem:[%s17548_s0 + $0x4e0] sm:$0xff] }
 0x3df   :  { %17862 = vst [vmem:[#allocation307_spill] sm:$0xff] %v11001_v19  ;;  %v7930_v19 = vld [vmem:[%s17548_s0 + $0x4d8] sm:$0xff] }
 0x3e2   :  { %2571 = vrot.lane.b32.xlu2 %v7928_v43, %s8779_s11  ;;  %2569 = vrot.lane.b32.xlu1 %v7927_v58, %s8779_s11  ;;  %v7929_v58 = vld [vmem:[%s17548_s0 + $0x4c8] sm:$0xff] }
 0x3e3   :  { %2567 = vrot.lane.b32.xlu0 %v7926_v30, %s8779_s11 }
 0x3e4   :  { %v11015_v23 = vpop.permute.xlu2 %2505  ;;  %v11017_v24 = vpop.permute.xlu1 %2485 }
 0x3e5   :  { %17863 = vst [vmem:[#allocation308_spill] sm:$0xff] %v11015_v23  ;;  %v11019_v15 = vpop.permute.xlu0 %2483 }
 0x3e6   :  { %17864 = vst [vmem:[#allocation309_spill] sm:$0xff] %v11017_v24  ;;  %v7934_v24 = vld [vmem:[%s17548_s0 + $0x500] sm:$0xff] }
 0x3e7   :  { %17865 = vst [vmem:[#allocation310_spill] sm:$0xff] %v11019_v15  ;;  %v7933_v15 = vld [vmem:[%s17548_s0 + $0x4f0] sm:$0xff] }
 0x3ea   :  { %2577 = vrot.lane.b32.xlu2 %v7931_v16, %s8779_s11  ;;  %2575 = vrot.lane.b32.xlu1 %v7930_v19, %s8779_s11  ;;  %v7932_v19 = vld [vmem:[%s17548_s0 + $0x4e8] sm:$0xff] }
 0x3eb   :  { %2573 = vrot.lane.b32.xlu0 %v7929_v58, %s8779_s11 }
 0x3ec   :  { %v11033_v43 = vpop.permute.xlu2 %2511  ;;  %v11035_v30 = vpop.permute.xlu1 %2491 }
 0x3ed   :  { %17866 = vst [vmem:[#allocation311_spill] sm:$0xff] %v11033_v43  ;;  %v11037_v23 = vpop.permute.xlu0 %2489 }
 0x3ee   :  { %17867 = vst [vmem:[#allocation312_spill] sm:$0xff] %v11035_v30  ;;  %v7937_v30 = vld [vmem:[%s17548_s0 + $0x518] sm:$0xff] }
 0x3ef   :  { %17868 = vst [vmem:[#allocation313_spill] sm:$0xff] %v11037_v23  ;;  %v7936_v23 = vld [vmem:[%s17548_s0 + $0x510] sm:$0xff] }
 0x3f2   :  { %2583 = vrot.lane.b32.xlu2 %v7934_v24, %s8779_s11  ;;  %2581 = vrot.lane.b32.xlu1 %v7933_v15, %s8779_s11  ;;  %v7935_v15 = vld [vmem:[%s17548_s0 + $0x508] sm:$0xff] }
 0x3f3   :  { %2579 = vrot.lane.b32.xlu0 %v7932_v19, %s8779_s11 }
 0x3f4   :  { %v11051_v16 = vpop.permute.xlu2 %2517  ;;  %v11053_v58 = vpop.permute.xlu1 %2497 }
 0x3f5   :  { %17869 = vst [vmem:[#allocation314_spill] sm:$0xff] %v11051_v16  ;;  %v11055_v43 = vpop.permute.xlu0 %2495 }
 0x3f6   :  { %17870 = vst [vmem:[#allocation315_spill] sm:$0xff] %v11053_v58  ;;  %v7940_v58 = vld [vmem:[%s17548_s0 + $0x39] sm:$0xff] }
 0x3f7   :  { %17871 = vst [vmem:[#allocation316_spill] sm:$0xff] %v11055_v43  ;;  %v7939_v43 = vld [vmem:[%s17548_s0 + $0x31] sm:$0xff] }
 0x3fa   :  { %2589 = vrot.lane.b32.xlu2 %v7937_v30, %s8779_s11  ;;  %2587 = vrot.lane.b32.xlu1 %v7936_v23, %s8779_s11  ;;  %v7938_v23 = vld [vmem:[%s17548_s0 + $0x29] sm:$0xff] }
 0x3fb   :  { %2585 = vrot.lane.b32.xlu0 %v7935_v15, %s8779_s11  ;;  %s8781_s11 = smov 15  }
 0x3fc   :  { %v11069_v24 = vpop.permute.xlu2 %2523  ;;  %v11071_v19 = vpop.permute.xlu1 %2503 }
 0x3fd   :  { %17872 = vst [vmem:[#allocation317_spill] sm:$0xff] %v11069_v24  ;;  %v11073_v16 = vpop.permute.xlu0 %2501 }
 0x3fe   :  { %17873 = vst [vmem:[#allocation318_spill] sm:$0xff] %v11071_v19  ;;  %v7943_v19 = vld [vmem:[%s17548_s0 + $0x59] sm:$0xff] }
 0x3ff   :  { %17874 = vst [vmem:[#allocation319_spill] sm:$0xff] %v11073_v16  ;;  %v7942_v16 = vld [vmem:[%s17548_s0 + $0x51] sm:$0xff] }
 0x402   :  { %2851 = vrot.lane.b32.xlu2 %v7940_v58, %s8780_s12  ;;  %2849 = vrot.lane.b32.xlu1 %v7939_v43, %s8780_s12  ;;  %v7941_v43 = vld [vmem:[%s17548_s0 + $0x41] sm:$0xff] }
 0x403   :  { %2847 = vrot.lane.b32.xlu0 %v7938_v23, %s8780_s12 }
 0x404   :  { %v11087_v30 = vpop.permute.xlu2 %2529  ;;  %v11089_v15 = vpop.permute.xlu1 %2509 }
 0x405   :  { %17875 = vst [vmem:[#allocation320_spill] sm:$0xff] %v11087_v30  ;;  %v11091_v24 = vpop.permute.xlu0 %2507  ;;  %v7945_v30 = vld [vmem:[%s17548_s0 + $0x69] sm:$0xff] }
 0x406   :  { %17876 = vst [vmem:[#allocation321_spill] sm:$0xff] %v11089_v15 }
 0x407   :  { %17877 = vst [vmem:[#allocation322_spill] sm:$0xff] %v11091_v24  ;;  %v7946_v24 = vld [vmem:[%s17548_s0 + $0x79] sm:$0xff] }
 0x40a   :  { %2857 = vrot.lane.b32.xlu2 %v7943_v19, %s8780_s12  ;;  %2855 = vrot.lane.b32.xlu1 %v7942_v16, %s8780_s12  ;;  %v7944_v16 = vld [vmem:[%s17548_s0 + $0x61] sm:$0xff] }
 0x40b   :  { %2853 = vrot.lane.b32.xlu0 %v7941_v43, %s8780_s12 }
 0x40c   :  { %v11105_v58 = vpop.permute.xlu2 %2535  ;;  %v11107_v23 = vpop.permute.xlu1 %2515 }
 0x40d   :  { %17878 = vst [vmem:[#allocation323_spill] sm:$0xff] %v11105_v58  ;;  %v11109_v15 = vpop.permute.xlu0 %2513  ;;  %v7948_v58 = vld [vmem:[%s17548_s0 + $0x89] sm:$0xff] }
 0x40e   :  { %17879 = vst [vmem:[#allocation324_spill] sm:$0xff] %v11107_v23 }
 0x40f   :  { %17880 = vst [vmem:[#allocation325_spill] sm:$0xff] %v11109_v15  ;;  %v7949_v15 = vld [vmem:[%s17548_s0 + $0x91] sm:$0xff] }
 0x412   :  { %2863 = vrot.lane.b32.xlu2 %v7946_v24, %s8780_s12  ;;  %2861 = vrot.lane.b32.xlu1 %v7945_v30, %s8780_s12  ;;  %v7947_v24 = vld [vmem:[%s17548_s0 + $0x81] sm:$0xff] }
 0x413   :  { %2859 = vrot.lane.b32.xlu0 %v7944_v16, %s8780_s12 }
 0x414   :  { %v11123_v19 = vpop.permute.xlu2 %2541  ;;  %v11125_v43 = vpop.permute.xlu1 %2521 }
 0x415   :  { %17881 = vst [vmem:[#allocation326_spill] sm:$0xff] %v11123_v19  ;;  %v11127_v23 = vpop.permute.xlu0 %2519  ;;  %v7951_v19 = vld [vmem:[%s17548_s0 + $0xa9] sm:$0xff] }
 0x416   :  { %17882 = vst [vmem:[#allocation327_spill] sm:$0xff] %v11125_v43 }
 0x417   :  { %17883 = vst [vmem:[#allocation328_spill] sm:$0xff] %v11127_v23  ;;  %v7952_v23 = vld [vmem:[%s17548_s0 + $0xb1] sm:$0xff] }
 0x41a   :  { %2869 = vrot.lane.b32.xlu2 %v7949_v15, %s8780_s12  ;;  %2867 = vrot.lane.b32.xlu1 %v7948_v58, %s8780_s12  ;;  %v7950_v15 = vld [vmem:[%s17548_s0 + $0xa1] sm:$0xff] }
 0x41b   :  { %2865 = vrot.lane.b32.xlu0 %v7947_v24, %s8780_s12 }
 0x41c   :  { %v11141_v30 = vpop.permute.xlu2 %2547  ;;  %v11143_v16 = vpop.permute.xlu1 %2527 }
 0x41d   :  { %17884 = vst [vmem:[#allocation329_spill] sm:$0xff] %v11141_v30  ;;  %v11145_v43 = vpop.permute.xlu0 %2525 }
 0x41e   :  { %17885 = vst [vmem:[#allocation330_spill] sm:$0xff] %v11143_v16  ;;  %v7955_v16 = vld [vmem:[%s17548_s0 + $0xd1] sm:$0xff] }
 0x41f   :  { %17886 = vst [vmem:[#allocation331_spill] sm:$0xff] %v11145_v43  ;;  %v7954_v43 = vld [vmem:[%s17548_s0 + $0xc9] sm:$0xff] }
 0x422   :  { %2875 = vrot.lane.b32.xlu2 %v7952_v23, %s8780_s12  ;;  %2873 = vrot.lane.b32.xlu1 %v7951_v19, %s8780_s12  ;;  %v7953_v23 = vld [vmem:[%s17548_s0 + $0xb9] sm:$0xff] }
 0x423   :  { %2871 = vrot.lane.b32.xlu0 %v7950_v15, %s8780_s12 }
 0x424   :  { %v11159_v58 = vpop.permute.xlu2 %2553  ;;  %v11161_v24 = vpop.permute.xlu1 %2533 }
 0x425   :  { %17887 = vst [vmem:[#allocation332_spill] sm:$0xff] %v11159_v58  ;;  %v11163_v30 = vpop.permute.xlu0 %2531 }
 0x426   :  { %17888 = vst [vmem:[#allocation333_spill] sm:$0xff] %v11161_v24  ;;  %v7958_v24 = vld [vmem:[%s17548_s0 + $0xf1] sm:$0xff] }
 0x427   :  { %17889 = vst [vmem:[#allocation334_spill] sm:$0xff] %v11163_v30  ;;  %v7957_v30 = vld [vmem:[%s17548_s0 + $0xe1] sm:$0xff] }
 0x42a   :  { %2881 = vrot.lane.b32.xlu2 %v7955_v16, %s8780_s12  ;;  %2879 = vrot.lane.b32.xlu1 %v7954_v43, %s8780_s12  ;;  %v7956_v43 = vld [vmem:[%s17548_s0 + $0xd9] sm:$0xff] }
 0x42b   :  { %2877 = vrot.lane.b32.xlu0 %v7953_v23, %s8780_s12 }
 0x42c   :  { %v11177_v19 = vpop.permute.xlu2 %2559  ;;  %v11179_v15 = vpop.permute.xlu1 %2539 }
 0x42d   :  { %17890 = vst [vmem:[#allocation335_spill] sm:$0xff] %v11177_v19  ;;  %v11181_v58 = vpop.permute.xlu0 %2537 }
 0x42e   :  { %17891 = vst [vmem:[#allocation336_spill] sm:$0xff] %v11179_v15  ;;  %v7961_v15 = vld [vmem:[%s17548_s0 + $0x109] sm:$0xff] }
 0x42f   :  { %17892 = vst [vmem:[#allocation337_spill] sm:$0xff] %v11181_v58  ;;  %v7960_v58 = vld [vmem:[%s17548_s0 + $0x101] sm:$0xff] }
 0x432   :  { %2887 = vrot.lane.b32.xlu2 %v7958_v24, %s8780_s12  ;;  %2885 = vrot.lane.b32.xlu1 %v7957_v30, %s8780_s12  ;;  %v7959_v30 = vld [vmem:[%s17548_s0 + $0xf9] sm:$0xff] }
 0x433   :  { %2883 = vrot.lane.b32.xlu0 %v7956_v43, %s8780_s12 }
 0x434   :  { %v11195_v16 = vpop.permute.xlu2 %2565  ;;  %v11197_v23 = vpop.permute.xlu1 %2545 }
 0x435   :  { %17893 = vst [vmem:[#allocation338_spill] sm:$0xff] %v11195_v16  ;;  %v11199_v19 = vpop.permute.xlu0 %2543 }
 0x436   :  { %17894 = vst [vmem:[#allocation339_spill] sm:$0xff] %v11197_v23  ;;  %v7964_v23 = vld [vmem:[%s17548_s0 + $0x129] sm:$0xff] }
 0x437   :  { %17895 = vst [vmem:[#allocation340_spill] sm:$0xff] %v11199_v19  ;;  %v7963_v19 = vld [vmem:[%s17548_s0 + $0x121] sm:$0xff] }
 0x43a   :  { %2893 = vrot.lane.b32.xlu2 %v7961_v15, %s8780_s12  ;;  %2891 = vrot.lane.b32.xlu1 %v7960_v58, %s8780_s12  ;;  %v7962_v58 = vld [vmem:[%s17548_s0 + $0x119] sm:$0xff] }
 0x43b   :  { %2889 = vrot.lane.b32.xlu0 %v7959_v30, %s8780_s12 }
 0x43c   :  { %v11213_v24 = vpop.permute.xlu2 %2571  ;;  %v11215_v43 = vpop.permute.xlu1 %2551 }
 0x43d   :  { %17896 = vst [vmem:[#allocation341_spill] sm:$0xff] %v11213_v24  ;;  %v11217_v16 = vpop.permute.xlu0 %2549 }
 0x43e   :  { %17897 = vst [vmem:[#allocation342_spill] sm:$0xff] %v11215_v43  ;;  %v7967_v43 = vld [vmem:[%s17548_s0 + $0x149] sm:$0xff] }
 0x43f   :  { %17898 = vst [vmem:[#allocation343_spill] sm:$0xff] %v11217_v16  ;;  %v7966_v16 = vld [vmem:[%s17548_s0 + $0x141] sm:$0xff] }
 0x442   :  { %2899 = vrot.lane.b32.xlu2 %v7964_v23, %s8780_s12  ;;  %2897 = vrot.lane.b32.xlu1 %v7963_v19, %s8780_s12  ;;  %v7965_v19 = vld [vmem:[%s17548_s0 + $0x131] sm:$0xff] }
 0x443   :  { %2895 = vrot.lane.b32.xlu0 %v7962_v58, %s8780_s12 }
 0x444   :  { %v11231_v15 = vpop.permute.xlu2 %2577  ;;  %v11233_v30 = vpop.permute.xlu1 %2557 }
 0x445   :  { %17899 = vst [vmem:[#allocation344_spill] sm:$0xff] %v11231_v15  ;;  %v11235_v24 = vpop.permute.xlu0 %2555 }
 0x446   :  { %17900 = vst [vmem:[#allocation345_spill] sm:$0xff] %v11233_v30  ;;  %v7970_v30 = vld [vmem:[%s17548_s0 + $0x169] sm:$0xff] }
 0x447   :  { %17901 = vst [vmem:[#allocation346_spill] sm:$0xff] %v11235_v24  ;;  %v7969_v24 = vld [vmem:[%s17548_s0 + $0x159] sm:$0xff] }
 0x44a   :  { %2905 = vrot.lane.b32.xlu2 %v7967_v43, %s8780_s12  ;;  %2903 = vrot.lane.b32.xlu1 %v7966_v16, %s8780_s12  ;;  %v7968_v16 = vld [vmem:[%s17548_s0 + $0x151] sm:$0xff] }
 0x44b   :  { %2901 = vrot.lane.b32.xlu0 %v7965_v19, %s8780_s12 }
 0x44c   :  { %v11249_v23 = vpop.permute.xlu2 %2583  ;;  %v11251_v58 = vpop.permute.xlu1 %2563 }
 0x44d   :  { %17902 = vst [vmem:[#allocation347_spill] sm:$0xff] %v11249_v23  ;;  %v11253_v15 = vpop.permute.xlu0 %2561 }
 0x44e   :  { %17903 = vst [vmem:[#allocation348_spill] sm:$0xff] %v11251_v58  ;;  %v7973_v58 = vld [vmem:[%s17548_s0 + $0x181] sm:$0xff] }
 0x44f   :  { %17904 = vst [vmem:[#allocation349_spill] sm:$0xff] %v11253_v15  ;;  %v7972_v15 = vld [vmem:[%s17548_s0 + $0x179] sm:$0xff] }
 0x452   :  { %2911 = vrot.lane.b32.xlu2 %v7970_v30, %s8780_s12  ;;  %2909 = vrot.lane.b32.xlu1 %v7969_v24, %s8780_s12  ;;  %v7971_v24 = vld [vmem:[%s17548_s0 + $0x171] sm:$0xff] }
 0x453   :  { %2907 = vrot.lane.b32.xlu0 %v7968_v16, %s8780_s12 }
 0x454   :  { %v11267_v43 = vpop.permute.xlu2 %2589  ;;  %v11269_v19 = vpop.permute.xlu1 %2569 }
 0x455   :  { %17905 = vst [vmem:[#allocation350_spill] sm:$0xff] %v11267_v43  ;;  %v11271_v23 = vpop.permute.xlu0 %2567 }
 0x456   :  { %17906 = vst [vmem:[#allocation351_spill] sm:$0xff] %v11269_v19  ;;  %v7976_v19 = vld [vmem:[%s17548_s0 + $0x1a1] sm:$0xff] }
 0x457   :  { %17907 = vst [vmem:[#allocation352_spill] sm:$0xff] %v11271_v23  ;;  %v7975_v23 = vld [vmem:[%s17548_s0 + $0x199] sm:$0xff] }
 0x45a   :  { %2917 = vrot.lane.b32.xlu2 %v7973_v58, %s8780_s12  ;;  %2915 = vrot.lane.b32.xlu1 %v7972_v15, %s8780_s12  ;;  %v7974_v15 = vld [vmem:[%s17548_s0 + $0x191] sm:$0xff] }
 0x45b   :  { %2913 = vrot.lane.b32.xlu0 %v7971_v24, %s8780_s12 }
 0x45c   :  { %v11285_v30 = vpop.permute.xlu2 %2851  ;;  %v11287_v16 = vpop.permute.xlu1 %2575 }
 0x45d   :  { %17908 = vst [vmem:[#allocation353_spill] sm:$0xff] %v11287_v16  ;;  %v11289_v43 = vpop.permute.xlu0 %2573 }
 0x45e   :  { %17909 = vst [vmem:[#allocation354_spill] sm:$0xff] %v11289_v43  ;;  %v7979_v43 = vld [vmem:[%s17548_s0 + $0x1c1] sm:$0xff] }
 0x462   :  { %2923 = vrot.lane.b32.xlu2 %v7976_v19, %s8780_s12  ;;  %2921 = vrot.lane.b32.xlu1 %v7975_v23, %s8780_s12  ;;  %v7977_v23 = vld [vmem:[%s17548_s0 + $0x1a9] sm:$0xff] }
 0x463   :  { %2919 = vrot.lane.b32.xlu0 %v7974_v15, %s8780_s12 }
 0x464   :  { %v11303_v58 = vpop.permute.xlu2 %2857  ;;  %v11305_v24 = vpop.permute.xlu1 %2581 }
 0x465   :  { %17910 = vst [vmem:[#allocation355_spill] sm:$0xff] %v11305_v24  ;;  %v11307_v16 = vpop.permute.xlu0 %2579 }
 0x466   :  { %17911 = vst [vmem:[#allocation356_spill] sm:$0xff] %v11307_v16  ;;  %v7982_v16 = vld [vmem:[%s17548_s0 + $0x1e1] sm:$0xff] }
 0x46a   :  { %2929 = vrot.lane.b32.xlu2 %v7979_v43, %s8780_s12  ;;  %2927 = vrot.lane.b32.xlu1 %v7978_v14, %s8780_s12  ;;  %v7980_v14 = vld [vmem:[%s17548_s0 + $0x1c9] sm:$0xff] }
 0x46b   :  { %2925 = vrot.lane.b32.xlu0 %v7977_v23, %s8780_s12 }
 0x46c   :  { %v11321_v19 = vpop.permute.xlu2 %2863  ;;  %v11323_v15 = vpop.permute.xlu1 %2587 }
 0x46d   :  { %17912 = vst [vmem:[#allocation357_spill] sm:$0xff] %v11323_v15  ;;  %v11325_v24 = vpop.permute.xlu0 %2585 }
 0x46e   :  { %17913 = vst [vmem:[#allocation358_spill] sm:$0xff] %v11325_v24  ;;  %v7985_v24 = vld [vmem:[%s17548_s0 + $0x1f9] sm:$0xff] }
 0x472   :  { %2935 = vrot.lane.b32.xlu2 %v7982_v16, %s8780_s12  ;;  %2933 = vrot.lane.b32.xlu1 %v7981_v54, %s8780_s12  ;;  %v7983_v54 = vld [vmem:[%s17548_s0 + $0x1e9] sm:$0xff] }
 0x473   :  { %2931 = vrot.lane.b32.xlu0 %v7980_v14, %s8780_s12 }
 0x474   :  { %v11339_v43 = vpop.permute.xlu2 %2869  ;;  %v11341_v23 = vpop.permute.xlu1 %2849 }
 0x475   :  { %17914 = vst [vmem:[#allocation359_spill] sm:$0xff] %v11339_v43  ;;  %v11343_v15 = vpop.permute.xlu0 %2847  ;;  %v8113_v43 = vld [vmem:[%s17548_s0 + $0x1fa] sm:$0xff] }
 0x47a   :  { %2941 = vrot.lane.b32.xlu2 %v7985_v24, %s8780_s12  ;;  %2939 = vrot.lane.b32.xlu1 %v7984_v60, %s8780_s12  ;;  %v7986_v60 = vld [vmem:[%s17548_s0 + $0x209] sm:$0xff] }
 0x47b   :  { %2937 = vrot.lane.b32.xlu0 %v7983_v54, %s8780_s12 }
 0x47c   :  { %v11357_v16 = vpop.permute.xlu2 %2875  ;;  %v11359_v14 = vpop.permute.xlu1 %2855 }
 0x47d   :  { %17915 = vst [vmem:[#allocation360_spill] sm:$0xff] %v11357_v16  ;;  %v11361_v28 = vpop.permute.xlu0 %2853 }
 0x482   :  { %2947 = vrot.lane.b32.xlu2 %v7988_v53, %s8780_s12  ;;  %2945 = vrot.lane.b32.xlu1 %v7987_v13, %s8780_s12  ;;  %v7989_v13 = vld [vmem:[%s17548_s0 + $0x221] sm:$0xff] }
 0x483   :  { %2943 = vrot.lane.b32.xlu0 %v7986_v60, %s8780_s12 }
 0x484   :  { %v11375_v24 = vpop.permute.xlu2 %2881  ;;  %v11377_v54 = vpop.permute.xlu1 %2861 }
 0x485   :  { %17916 = vst [vmem:[#allocation361_spill] sm:$0xff] %v11375_v24  ;;  %v11379_v16 = vpop.permute.xlu0 %2859 }
 0x48a   :  { %2953 = vrot.lane.b32.xlu2 %v7991_v39, %s8780_s12  ;;  %2951 = vrot.lane.b32.xlu1 %v7990_v9, %s8780_s12  ;;  %v7992_v9 = vld [vmem:[%s17548_s0 + $0x241] sm:$0xff] }
 0x48b   :  { %2949 = vrot.lane.b32.xlu0 %v7989_v13, %s8780_s12 }
 0x48c   :  { %v11393_v53 = vpop.permute.xlu2 %2887  ;;  %v11395_v60 = vpop.permute.xlu1 %2867 }
 0x48d   :  { %17917 = vst [vmem:[#allocation362_spill] sm:$0xff] %v11393_v53  ;;  %v11397_v24 = vpop.permute.xlu0 %2865 }
 0x48e   :  { %17918 = vst [vmem:[#allocation363_spill] sm:$0xff] %v11395_v60  ;;  %v8123_v60 = vld [vmem:[%s17548_s0 + $0x262] sm:$0xff] }
 0x48f   :  { %17919 = vst [vmem:[#allocation364_spill] sm:$0xff] %v11397_v24  ;;  %v8249_v24 = vld [vmem:[%s17548_s0 + $0x270] sm:$0xff] }
 0x492   :  { %2959 = vrot.lane.b32.xlu2 %v7994_v1, %s8780_s12  ;;  %2957 = vrot.lane.b32.xlu1 %v7993_v27, %s8780_s12  ;;  %v7995_v27 = vld [vmem:[%s17548_s0 + $0x261] sm:$0xff] }
 0x493   :  { %2955 = vrot.lane.b32.xlu0 %v7992_v9, %s8780_s12 }
 0x494   :  { %v11411_v39 = vpop.permute.xlu2 %2893  ;;  %v11413_v13 = vpop.permute.xlu1 %2873 }
 0x495   :  { %17920 = vst [vmem:[#allocation365_spill] sm:$0xff] %v11411_v39  ;;  %v11415_v53 = vpop.permute.xlu0 %2871 }
 0x496   :  { %17921 = vst [vmem:[#allocation366_spill] sm:$0xff] %v11413_v13  ;;  %v8000_v13 = vld [vmem:[%s17548_s0 + $0x291] sm:$0xff] }
 0x497   :  { %17922 = vst [vmem:[#allocation367_spill] sm:$0xff] %v11415_v53  ;;  %v7999_v53 = vld [vmem:[%s17548_s0 + $0x289] sm:$0xff] }
 0x49a   :  { %2965 = vrot.lane.b32.xlu2 %v7997_v11, %s8780_s12  ;;  %2963 = vrot.lane.b32.xlu1 %v7996_v37, %s8780_s12  ;;  %v7998_v11 = vld [vmem:[%s17548_s0 + $0x281] sm:$0xff] }
 0x49b   :  { %2961 = vrot.lane.b32.xlu0 %v7995_v27, %s8780_s12 }
 0x49c   :  { %v11429_v1 = vpop.permute.xlu2 %2899  ;;  %v11431_v9 = vpop.permute.xlu1 %2879 }
 0x49d   :  { %17923 = vst [vmem:[#allocation368_spill] sm:$0xff] %v11429_v1  ;;  %v11433_v39 = vpop.permute.xlu0 %2877 }
 0x49e   :  { %17924 = vst [vmem:[#allocation369_spill] sm:$0xff] %v11431_v9  ;;  %v8003_v9 = vld [vmem:[%s17548_s0 + $0x2b1] sm:$0xff] }
 0x49f   :  { %17925 = vst [vmem:[#allocation370_spill] sm:$0xff] %v11433_v39  ;;  %v8002_v39 = vld [vmem:[%s17548_s0 + $0x2a9] sm:$0xff] }
 0x4a2   :  { %2971 = vrot.lane.b32.xlu2 %v8000_v13, %s8780_s12  ;;  %2969 = vrot.lane.b32.xlu1 %v7999_v53, %s8780_s12  ;;  %v8001_v53 = vld [vmem:[%s17548_s0 + $0x299] sm:$0xff] }
 0x4a3   :  { %2967 = vrot.lane.b32.xlu0 %v7998_v11, %s8780_s12 }
 0x4a4   :  { %v11447_v37 = vpop.permute.xlu2 %2905  ;;  %v11449_v27 = vpop.permute.xlu1 %2885 }
 0x4a5   :  { %17926 = vst [vmem:[#allocation371_spill] sm:$0xff] %v11447_v37  ;;  %v11451_v1 = vpop.permute.xlu0 %2883 }
 0x4a6   :  { %17927 = vst [vmem:[#allocation372_spill] sm:$0xff] %v11449_v27  ;;  %v8006_v27 = vld [vmem:[%s17548_s0 + $0x2d1] sm:$0xff] }
 0x4a7   :  { %17928 = vst [vmem:[#allocation373_spill] sm:$0xff] %v11451_v1  ;;  %v8005_v1 = vld [vmem:[%s17548_s0 + $0x2c1] sm:$0xff] }
 0x4aa   :  { %2977 = vrot.lane.b32.xlu2 %v8003_v9, %s8780_s12  ;;  %2975 = vrot.lane.b32.xlu1 %v8002_v39, %s8780_s12  ;;  %v8004_v39 = vld [vmem:[%s17548_s0 + $0x2b9] sm:$0xff] }
 0x4ab   :  { %2973 = vrot.lane.b32.xlu0 %v8001_v53, %s8780_s12 }
 0x4ac   :  { %v11465_v13 = vpop.permute.xlu2 %2911  ;;  %v11467_v11 = vpop.permute.xlu1 %2891 }
 0x4ad   :  { %17929 = vst [vmem:[#allocation374_spill] sm:$0xff] %v11465_v13  ;;  %v11469_v37 = vpop.permute.xlu0 %2889 }
 0x4ae   :  { %17930 = vst [vmem:[#allocation375_spill] sm:$0xff] %v11467_v11  ;;  %v8009_v11 = vld [vmem:[%s17548_s0 + $0x2e9] sm:$0xff] }
 0x4af   :  { %17931 = vst [vmem:[#allocation376_spill] sm:$0xff] %v11469_v37  ;;  %v8008_v37 = vld [vmem:[%s17548_s0 + $0x2e1] sm:$0xff] }
 0x4b2   :  { %2983 = vrot.lane.b32.xlu2 %v8006_v27, %s8780_s12  ;;  %2981 = vrot.lane.b32.xlu1 %v8005_v1, %s8780_s12  ;;  %v8007_v1 = vld [vmem:[%s17548_s0 + $0x2d9] sm:$0xff] }
 0x4b3   :  { %2979 = vrot.lane.b32.xlu0 %v8004_v39, %s8780_s12 }
 0x4b4   :  { %v11483_v9 = vpop.permute.xlu2 %2917  ;;  %v11485_v53 = vpop.permute.xlu1 %2897 }
 0x4b5   :  { %17932 = vst [vmem:[#allocation377_spill] sm:$0xff] %v11483_v9  ;;  %v11487_v13 = vpop.permute.xlu0 %2895  ;;  %v8239_v9 = vld [vmem:[%s17548_s0 + $0x210] sm:$0xff] }
 0x4b6   :  { %17933 = vst [vmem:[#allocation378_spill] sm:$0xff] %v11485_v53 }
 0x4b7   :  { %17934 = vst [vmem:[#allocation379_spill] sm:$0xff] %v11487_v13  ;;  %v8012_v13 = vld [vmem:[%s17548_s0 + $0x309] sm:$0xff] }
 0x4ba   :  { %2989 = vrot.lane.b32.xlu2 %v8009_v11, %s8780_s12  ;;  %2987 = vrot.lane.b32.xlu1 %v8008_v37, %s8780_s12  ;;  %v8010_v37 = vld [vmem:[%s17548_s0 + $0x2f9] sm:$0xff] }
 0x4bb   :  { %2985 = vrot.lane.b32.xlu0 %v8007_v1, %s8780_s12 }
 0x4bc   :  { %v11501_v27 = vpop.permute.xlu2 %2923  ;;  %v11503_v39 = vpop.permute.xlu1 %2903 }
 0x4bd   :  { %17935 = vst [vmem:[#allocation380_spill] sm:$0xff] %v11501_v27  ;;  %v11505_v53 = vpop.permute.xlu0 %2901  ;;  %v8014_v27 = vld [vmem:[%s17548_s0 + $0x321] sm:$0xff] }
 0x4be   :  { %17936 = vst [vmem:[#allocation381_spill] sm:$0xff] %v11503_v39 }
 0x4bf   :  { %17937 = vst [vmem:[#allocation382_spill] sm:$0xff] %v11505_v53  ;;  %v8015_v53 = vld [vmem:[%s17548_s0 + $0x329] sm:$0xff] }
 0x4c2   :  { %2995 = vrot.lane.b32.xlu2 %v8012_v13, %s8780_s12  ;;  %2993 = vrot.lane.b32.xlu1 %v8011_v25, %s8780_s12  ;;  %v8013_v25 = vld [vmem:[%s17548_s0 + $0x311] sm:$0xff] }
 0x4c3   :  { %2991 = vrot.lane.b32.xlu0 %v8010_v37, %s8780_s12 }
 0x4c4   :  { %v11519_v11 = vpop.permute.xlu2 %2929  ;;  %v11521_v1 = vpop.permute.xlu1 %2909 }
 0x4c5   :  { %17938 = vst [vmem:[#allocation383_spill] sm:$0xff] %v11519_v11  ;;  %v11523_v39 = vpop.permute.xlu0 %2907  ;;  %v8017_v11 = vld [vmem:[%s17548_s0 + $0x339] sm:$0xff] }
 0x4c6   :  { %17939 = vst [vmem:[#allocation384_spill] sm:$0xff] %v11521_v1 }
 0x4c7   :  { %17940 = vst [vmem:[#allocation385_spill] sm:$0xff] %v11523_v39  ;;  %v8018_v39 = vld [vmem:[%s17548_s0 + $0x349] sm:$0xff] }
 0x4ca   :  { %3001 = vrot.lane.b32.xlu2 %v8015_v53, %s8780_s12  ;;  %2999 = vrot.lane.b32.xlu1 %v8014_v27, %s8780_s12  ;;  %v8016_v53 = vld [vmem:[%s17548_s0 + $0x331] sm:$0xff] }
 0x4cb   :  { %2997 = vrot.lane.b32.xlu0 %v8013_v25, %s8780_s12 }
 0x4cc   :  { %v11537_v13 = vpop.permute.xlu2 %2935  ;;  %v11539_v37 = vpop.permute.xlu1 %2915 }
 0x4cd   :  { %17941 = vst [vmem:[#allocation386_spill] sm:$0xff] %v11537_v13  ;;  %v11541_v1 = vpop.permute.xlu0 %2913  ;;  %v8020_v13 = vld [vmem:[%s17548_s0 + $0x359] sm:$0xff] }
 0x4ce   :  { %17942 = vst [vmem:[#allocation387_spill] sm:$0xff] %v11539_v37 }
 0x4cf   :  { %17943 = vst [vmem:[#allocation388_spill] sm:$0xff] %v11541_v1  ;;  %v8021_v1 = vld [vmem:[%s17548_s0 + $0x361] sm:$0xff] }
 0x4d2   :  { %3007 = vrot.lane.b32.xlu2 %v8018_v39, %s8780_s12  ;;  %3005 = vrot.lane.b32.xlu1 %v8017_v11, %s8780_s12  ;;  %v8019_v39 = vld [vmem:[%s17548_s0 + $0x351] sm:$0xff] }
 0x4d3   :  { %3003 = vrot.lane.b32.xlu0 %v8016_v53, %s8780_s12 }
 0x4d4   :  { %v11555_v27 = vpop.permute.xlu2 %2941  ;;  %v11557_v25 = vpop.permute.xlu1 %2921 }
 0x4d5   :  { %17944 = vst [vmem:[#allocation389_spill] sm:$0xff] %v11555_v27  ;;  %v11559_v37 = vpop.permute.xlu0 %2919 }
 0x4d6   :  { %17945 = vst [vmem:[#allocation390_spill] sm:$0xff] %v11557_v25  ;;  %v8024_v25 = vld [vmem:[%s17548_s0 + $0x381] sm:$0xff] }
 0x4d7   :  { %17946 = vst [vmem:[#allocation391_spill] sm:$0xff] %v11559_v37  ;;  %v8104_v37 = vld [vmem:[%s17548_s0 + $0x1a2] sm:$0xff] }
 0x4da   :  { %3013 = vrot.lane.b32.xlu2 %v8021_v1, %s8780_s12  ;;  %3011 = vrot.lane.b32.xlu1 %v8020_v13, %s8780_s12  ;;  %v8022_v1 = vld [vmem:[%s17548_s0 + $0x371] sm:$0xff] }
 0x4db   :  { %3009 = vrot.lane.b32.xlu0 %v8019_v39, %s8780_s12 }
 0x4dc   :  { %v11573_v11 = vpop.permute.xlu2 %2947  ;;  %v11575_v53 = vpop.permute.xlu1 %2927 }
 0x4dd   :  { %17947 = vst [vmem:[#allocation392_spill] sm:$0xff] %v11573_v11  ;;  %v11577_v27 = vpop.permute.xlu0 %2925 }
 0x4de   :  { %17948 = vst [vmem:[#allocation393_spill] sm:$0xff] %v11575_v53  ;;  %v8027_v53 = vld [vmem:[%s17548_s0 + $0x3a1] sm:$0xff] }
 0x4df   :  { %17949 = vst [vmem:[#allocation394_spill] sm:$0xff] %v11577_v27  ;;  %v8026_v27 = vld [vmem:[%s17548_s0 + $0x399] sm:$0xff] }
 0x4e2   :  { %3019 = vrot.lane.b32.xlu2 %v8024_v25, %s8780_s12  ;;  %3017 = vrot.lane.b32.xlu1 %v8023_v10, %s8780_s12  ;;  %v8025_v10 = vld [vmem:[%s17548_s0 + $0x389] sm:$0xff] }
 0x4e3   :  { %3015 = vrot.lane.b32.xlu0 %v8022_v1, %s8780_s12 }
 0x4e4   :  { %v11591_v13 = vpop.permute.xlu2 %2953  ;;  %v11593_v39 = vpop.permute.xlu1 %2933 }
 0x4e5   :  { %17950 = vst [vmem:[#allocation395_spill] sm:$0xff] %v11591_v13  ;;  %v11595_v11 = vpop.permute.xlu0 %2931 }
 0x4e6   :  { %17951 = vst [vmem:[#allocation396_spill] sm:$0xff] %v11593_v39  ;;  %v8030_v39 = vld [vmem:[%s17548_s0 + $0x3c1] sm:$0xff] }
 0x4e7   :  { %17952 = vst [vmem:[#allocation397_spill] sm:$0xff] %v11595_v11  ;;  %v8029_v11 = vld [vmem:[%s17548_s0 + $0x3b1] sm:$0xff] }
 0x4ea   :  { %3025 = vrot.lane.b32.xlu2 %v8027_v53, %s8780_s12  ;;  %3023 = vrot.lane.b32.xlu1 %v8026_v27, %s8780_s12  ;;  %v8028_v27 = vld [vmem:[%s17548_s0 + $0x3a9] sm:$0xff] }
 0x4eb   :  { %3021 = vrot.lane.b32.xlu0 %v8025_v10, %s8780_s12 }
 0x4ec   :  { %v11609_v25 = vpop.permute.xlu2 %2959  ;;  %v11611_v1 = vpop.permute.xlu1 %2939 }
 0x4ed   :  { %17953 = vst [vmem:[#allocation398_spill] sm:$0xff] %v11609_v25  ;;  %v11613_v13 = vpop.permute.xlu0 %2937 }
 0x4ee   :  { %17954 = vst [vmem:[#allocation399_spill] sm:$0xff] %v11611_v1  ;;  %v8033_v1 = vld [vmem:[%s17548_s0 + $0x3d9] sm:$0xff] }
 0x4ef   :  { %17955 = vst [vmem:[#allocation400_spill] sm:$0xff] %v11613_v13  ;;  %v8032_v13 = vld [vmem:[%s17548_s0 + $0x3d1] sm:$0xff] }
 0x4f2   :  { %3031 = vrot.lane.b32.xlu2 %v8030_v39, %s8780_s12  ;;  %3029 = vrot.lane.b32.xlu1 %v8029_v11, %s8780_s12  ;;  %v8031_v11 = vld [vmem:[%s17548_s0 + $0x3c9] sm:$0xff] }
 0x4f3   :  { %3027 = vrot.lane.b32.xlu0 %v8028_v27, %s8780_s12 }
 0x4f4   :  { %v11627_v53 = vpop.permute.xlu2 %2965  ;;  %v11629_v10 = vpop.permute.xlu1 %2945 }
 0x4f5   :  { %17956 = vst [vmem:[#allocation401_spill] sm:$0xff] %v11627_v53  ;;  %v11631_v25 = vpop.permute.xlu0 %2943 }
 0x4f6   :  { %17957 = vst [vmem:[#allocation402_spill] sm:$0xff] %v11629_v10  ;;  %v8036_v10 = vld [vmem:[%s17548_s0 + $0x3f9] sm:$0xff] }
 0x4f7   :  { %17958 = vst [vmem:[#allocation403_spill] sm:$0xff] %v11631_v25  ;;  %v8035_v25 = vld [vmem:[%s17548_s0 + $0x3f1] sm:$0xff] }
 0x4fa   :  { %3037 = vrot.lane.b32.xlu2 %v8033_v1, %s8780_s12  ;;  %3035 = vrot.lane.b32.xlu1 %v8032_v13, %s8780_s12  ;;  %v8034_v13 = vld [vmem:[%s17548_s0 + $0x3e9] sm:$0xff] }
 0x4fb   :  { %3033 = vrot.lane.b32.xlu0 %v8031_v11, %s8780_s12 }
 0x4fc   :  { %v11645_v39 = vpop.permute.xlu2 %2971  ;;  %v11647_v27 = vpop.permute.xlu1 %2951 }
 0x4fd   :  { %17959 = vst [vmem:[#allocation404_spill] sm:$0xff] %v11645_v39  ;;  %v11649_v53 = vpop.permute.xlu0 %2949 }
 0x4fe   :  { %17960 = vst [vmem:[#allocation405_spill] sm:$0xff] %v11647_v27  ;;  %v8039_v27 = vld [vmem:[%s17548_s0 + $0x419] sm:$0xff] }
 0x4ff   :  { %17961 = vst [vmem:[#allocation406_spill] sm:$0xff] %v11649_v53  ;;  %v8038_v53 = vld [vmem:[%s17548_s0 + $0x411] sm:$0xff] }
 0x502   :  { %3043 = vrot.lane.b32.xlu2 %v8036_v10, %s8780_s12  ;;  %3041 = vrot.lane.b32.xlu1 %v8035_v25, %s8780_s12  ;;  %v8037_v25 = vld [vmem:[%s17548_s0 + $0x401] sm:$0xff] }
 0x503   :  { %3039 = vrot.lane.b32.xlu0 %v8034_v13, %s8780_s12 }
 0x504   :  { %v11663_v1 = vpop.permute.xlu2 %2977  ;;  %v11665_v11 = vpop.permute.xlu1 %2957 }
 0x505   :  { %17962 = vst [vmem:[#allocation407_spill] sm:$0xff] %v11663_v1  ;;  %v11667_v39 = vpop.permute.xlu0 %2955 }
 0x506   :  { %17963 = vst [vmem:[#allocation408_spill] sm:$0xff] %v11665_v11  ;;  %v8042_v11 = vld [vmem:[%s17548_s0 + $0x439] sm:$0xff] }
 0x507   :  { %17964 = vst [vmem:[#allocation409_spill] sm:$0xff] %v11667_v39  ;;  %v8041_v39 = vld [vmem:[%s17548_s0 + $0x429] sm:$0xff] }
 0x50a   :  { %3049 = vrot.lane.b32.xlu2 %v8039_v27, %s8780_s12  ;;  %3047 = vrot.lane.b32.xlu1 %v8038_v53, %s8780_s12  ;;  %v8040_v53 = vld [vmem:[%s17548_s0 + $0x421] sm:$0xff] }
 0x50b   :  { %3045 = vrot.lane.b32.xlu0 %v8037_v25, %s8780_s12 }
 0x50c   :  { %v11681_v10 = vpop.permute.xlu2 %2983  ;;  %v11683_v13 = vpop.permute.xlu1 %2963 }
 0x50d   :  { %17965 = vst [vmem:[#allocation410_spill] sm:$0xff] %v11681_v10  ;;  %v11685_v1 = vpop.permute.xlu0 %2961  ;;  %v8044_v10 = vld [vmem:[%s17548_s0 + $0x449] sm:$0xff] }
 0x50e   :  { %17966 = vst [vmem:[#allocation411_spill] sm:$0xff] %v11683_v13 }
 0x50f   :  { %17967 = vst [vmem:[#allocation412_spill] sm:$0xff] %v11685_v1  ;;  %v8045_v1 = vld [vmem:[%s17548_s0 + $0x451] sm:$0xff] }
 0x512   :  { %3055 = vrot.lane.b32.xlu2 %v8042_v11, %s8780_s12  ;;  %3053 = vrot.lane.b32.xlu1 %v8041_v39, %s8780_s12  ;;  %v8043_v39 = vld [vmem:[%s17548_s0 + $0x441] sm:$0xff] }
 0x513   :  { %3051 = vrot.lane.b32.xlu0 %v8040_v53, %s8780_s12 }
 0x514   :  { %v11699_v27 = vpop.permute.xlu2 %2989  ;;  %v11701_v25 = vpop.permute.xlu1 %2969 }
 0x515   :  { %17968 = vst [vmem:[#allocation413_spill] sm:$0xff] %v11699_v27  ;;  %v11703_v13 = vpop.permute.xlu0 %2967  ;;  %v8047_v27 = vld [vmem:[%s17548_s0 + $0x469] sm:$0xff] }
 0x516   :  { %17969 = vst [vmem:[#allocation414_spill] sm:$0xff] %v11701_v25 }
 0x517   :  { %17970 = vst [vmem:[#allocation415_spill] sm:$0xff] %v11703_v13  ;;  %v8048_v13 = vld [vmem:[%s17548_s0 + $0x471] sm:$0xff] }
 0x51a   :  { %3061 = vrot.lane.b32.xlu2 %v8045_v1, %s8780_s12  ;;  %3059 = vrot.lane.b32.xlu1 %v8044_v10, %s8780_s12  ;;  %v8046_v1 = vld [vmem:[%s17548_s0 + $0x461] sm:$0xff] }
 0x51b   :  { %3057 = vrot.lane.b32.xlu0 %v8043_v39, %s8780_s12 }
 0x51c   :  { %v11717_v11 = vpop.permute.xlu2 %2995  ;;  %v11719_v53 = vpop.permute.xlu1 %2975 }
 0x51d   :  { %17971 = vst [vmem:[#allocation416_spill] sm:$0xff] %v11717_v11  ;;  %v11721_v25 = vpop.permute.xlu0 %2973  ;;  %v8050_v11 = vld [vmem:[%s17548_s0 + $0x489] sm:$0xff] }
 0x51e   :  { %17972 = vst [vmem:[#allocation417_spill] sm:$0xff] %v11719_v53 }
 0x51f   :  { %17973 = vst [vmem:[#allocation418_spill] sm:$0xff] %v11721_v25  ;;  %v8051_v25 = vld [vmem:[%s17548_s0 + $0x491] sm:$0xff] }
 0x522   :  { %3067 = vrot.lane.b32.xlu2 %v8048_v13, %s8780_s12  ;;  %3065 = vrot.lane.b32.xlu1 %v8047_v27, %s8780_s12  ;;  %v8049_v13 = vld [vmem:[%s17548_s0 + $0x479] sm:$0xff] }
 0x523   :  { %3063 = vrot.lane.b32.xlu0 %v8046_v1, %s8780_s12 }
 0x524   :  { %v11735_v10 = vpop.permute.xlu2 %3001  ;;  %v11737_v39 = vpop.permute.xlu1 %2981 }
 0x525   :  { %17974 = vst [vmem:[#allocation419_spill] sm:$0xff] %v11735_v10  ;;  %v11739_v53 = vpop.permute.xlu0 %2979  ;;  %v8053_v10 = vld [vmem:[%s17548_s0 + $0x4a1] sm:$0xff] }
 0x526   :  { %17975 = vst [vmem:[#allocation420_spill] sm:$0xff] %v11737_v39 }
 0x527   :  { %17976 = vst [vmem:[#allocation421_spill] sm:$0xff] %v11739_v53  ;;  %v8054_v53 = vld [vmem:[%s17548_s0 + $0x4b1] sm:$0xff] }
 0x52a   :  { %3073 = vrot.lane.b32.xlu2 %v8051_v25, %s8780_s12  ;;  %3071 = vrot.lane.b32.xlu1 %v8050_v11, %s8780_s12  ;;  %v8052_v25 = vld [vmem:[%s17548_s0 + $0x499] sm:$0xff] }
 0x52b   :  { %3069 = vrot.lane.b32.xlu0 %v8049_v13, %s8780_s12 }
 0x52c   :  { %v11753_v27 = vpop.permute.xlu2 %3007  ;;  %v11755_v1 = vpop.permute.xlu1 %2987 }
 0x52d   :  { %17977 = vst [vmem:[#allocation422_spill] sm:$0xff] %v11753_v27  ;;  %v11757_v39 = vpop.permute.xlu0 %2985 }
 0x52e   :  { %17978 = vst [vmem:[#allocation423_spill] sm:$0xff] %v11755_v1  ;;  %v8057_v1 = vld [vmem:[%s17548_s0 + $0x4c9] sm:$0xff] }
 0x52f   :  { %17979 = vst [vmem:[#allocation424_spill] sm:$0xff] %v11757_v39  ;;  %v8056_v39 = vld [vmem:[%s17548_s0 + $0x4c1] sm:$0xff] }
 0x532   :  { %3079 = vrot.lane.b32.xlu2 %v8054_v53, %s8780_s12  ;;  %3077 = vrot.lane.b32.xlu1 %v8053_v10, %s8780_s12  ;;  %v8055_v53 = vld [vmem:[%s17548_s0 + $0x4b9] sm:$0xff] }
 0x533   :  { %3075 = vrot.lane.b32.xlu0 %v8052_v25, %s8780_s12 }
 0x534   :  { %v11771_v11 = vpop.permute.xlu2 %3013  ;;  %v11773_v13 = vpop.permute.xlu1 %2993 }
 0x535   :  { %17980 = vst [vmem:[#allocation425_spill] sm:$0xff] %v11771_v11  ;;  %v11775_v27 = vpop.permute.xlu0 %2991 }
 0x536   :  { %17981 = vst [vmem:[#allocation426_spill] sm:$0xff] %v11773_v13  ;;  %v8060_v13 = vld [vmem:[%s17548_s0 + $0x4e9] sm:$0xff] }
 0x537   :  { %17982 = vst [vmem:[#allocation427_spill] sm:$0xff] %v11775_v27  ;;  %v8059_v27 = vld [vmem:[%s17548_s0 + $0x4e1] sm:$0xff] }
 0x53a   :  { %3085 = vrot.lane.b32.xlu2 %v8057_v1, %s8780_s12  ;;  %3083 = vrot.lane.b32.xlu1 %v8056_v39, %s8780_s12  ;;  %v8058_v39 = vld [vmem:[%s17548_s0 + $0x4d9] sm:$0xff] }
 0x53b   :  { %3081 = vrot.lane.b32.xlu0 %v8055_v53, %s8780_s12 }
 0x53c   :  { %v11789_v10 = vpop.permute.xlu2 %3019  ;;  %v11791_v25 = vpop.permute.xlu1 %2999 }
 0x53d   :  { %17983 = vst [vmem:[#allocation428_spill] sm:$0xff] %v11789_v10  ;;  %v11793_v11 = vpop.permute.xlu0 %2997 }
 0x53e   :  { %17984 = vst [vmem:[#allocation429_spill] sm:$0xff] %v11791_v25  ;;  %v8063_v25 = vld [vmem:[%s17548_s0 + $0x509] sm:$0xff] }
 0x53f   :  { %17985 = vst [vmem:[#allocation430_spill] sm:$0xff] %v11793_v11  ;;  %v8062_v11 = vld [vmem:[%s17548_s0 + $0x501] sm:$0xff] }
 0x542   :  { %3091 = vrot.lane.b32.xlu2 %v8060_v13, %s8780_s12  ;;  %3089 = vrot.lane.b32.xlu1 %v8059_v27, %s8780_s12  ;;  %v8061_v27 = vld [vmem:[%s17548_s0 + $0x4f1] sm:$0xff] }
 0x543   :  { %3087 = vrot.lane.b32.xlu0 %v8058_v39, %s8780_s12 }
 0x544   :  { %v11807_v1 = vpop.permute.xlu2 %3025  ;;  %v11809_v53 = vpop.permute.xlu1 %3005 }
 0x545   :  { %17986 = vst [vmem:[#allocation431_spill] sm:$0xff] %v11807_v1  ;;  %v11811_v10 = vpop.permute.xlu0 %3003 }
 0x546   :  { %17987 = vst [vmem:[#allocation432_spill] sm:$0xff] %v11809_v53  ;;  %v8066_v53 = vld [vmem:[%s17548_s0 + $0x2a] sm:$0xff] }
 0x547   :  { %17988 = vst [vmem:[#allocation433_spill] sm:$0xff] %v11811_v10  ;;  %v8065_v10 = vld [vmem:[%s17548_s0 + $0x519] sm:$0xff] }
 0x54a   :  { %3097 = vrot.lane.b32.xlu2 %v8063_v25, %s8780_s12  ;;  %3095 = vrot.lane.b32.xlu1 %v8062_v11, %s8780_s12  ;;  %v8064_v11 = vld [vmem:[%s17548_s0 + $0x511] sm:$0xff] }
 0x54b   :  { %3093 = vrot.lane.b32.xlu0 %v8061_v27, %s8780_s12 }
 0x54c   :  { %v11825_v13 = vpop.permute.xlu2 %3031  ;;  %v11827_v39 = vpop.permute.xlu1 %3011 }
 0x54d   :  { %17989 = vst [vmem:[#allocation434_spill] sm:$0xff] %v11825_v13  ;;  %v11829_v1 = vpop.permute.xlu0 %3009 }
 0x54e   :  { %17990 = vst [vmem:[#allocation435_spill] sm:$0xff] %v11827_v39  ;;  %v8069_v39 = vld [vmem:[%s17548_s0 + $0x42] sm:$0xff] }
 0x54f   :  { %17991 = vst [vmem:[#allocation436_spill] sm:$0xff] %v11829_v1  ;;  %v8068_v1 = vld [vmem:[%s17548_s0 + $0x3a] sm:$0xff] }
 0x552   :  { %3359 = vrot.lane.b32.xlu2 %v8066_v53, %s8781_s11  ;;  %3101 = vrot.lane.b32.xlu1 %v8065_v10, %s8780_s12  ;;  %v8067_v10 = vld [vmem:[%s17548_s0 + $0x32] sm:$0xff] }
 0x553   :  { %3099 = vrot.lane.b32.xlu0 %v8064_v11, %s8780_s12  ;;  %s8782_s12 = smov 18  }
 0x554   :  { %v11843_v25 = vpop.permute.xlu2 %3037  ;;  %v11845_v27 = vpop.permute.xlu1 %3017 }
 0x555   :  { %17992 = vst [vmem:[#allocation437_spill] sm:$0xff] %v11843_v25  ;;  %v11847_v13 = vpop.permute.xlu0 %3015  ;;  %v8071_v25 = vld [vmem:[%s17548_s0 + $0x5a] sm:$0xff] }
 0x556   :  { %17993 = vst [vmem:[#allocation438_spill] sm:$0xff] %v11845_v27 }
 0x557   :  { %17994 = vst [vmem:[#allocation439_spill] sm:$0xff] %v11847_v13  ;;  %v8072_v13 = vld [vmem:[%s17548_s0 + $0x62] sm:$0xff] }
 0x55a   :  { %3365 = vrot.lane.b32.xlu2 %v8069_v39, %s8781_s11  ;;  %3363 = vrot.lane.b32.xlu1 %v8068_v1, %s8781_s11  ;;  %v8070_v1 = vld [vmem:[%s17548_s0 + $0x52] sm:$0xff] }
 0x55b   :  { %3361 = vrot.lane.b32.xlu0 %v8067_v10, %s8781_s11 }
 0x55c   :  { %v11861_v53 = vpop.permute.xlu2 %3043  ;;  %v11863_v11 = vpop.permute.xlu1 %3023 }
 0x55d   :  { %17995 = vst [vmem:[#allocation440_spill] sm:$0xff] %v11861_v53  ;;  %v11865_v27 = vpop.permute.xlu0 %3021  ;;  %v8074_v53 = vld [vmem:[%s17548_s0 + $0x7a] sm:$0xff] }
 0x55e   :  { %17996 = vst [vmem:[#allocation441_spill] sm:$0xff] %v11863_v11 }
 0x55f   :  { %17997 = vst [vmem:[#allocation442_spill] sm:$0xff] %v11865_v27  ;;  %v8075_v27 = vld [vmem:[%s17548_s0 + $0x82] sm:$0xff] }
 0x562   :  { %3371 = vrot.lane.b32.xlu2 %v8072_v13, %s8781_s11  ;;  %3369 = vrot.lane.b32.xlu1 %v8071_v25, %s8781_s11  ;;  %v8073_v13 = vld [vmem:[%s17548_s0 + $0x6a] sm:$0xff] }
 0x563   :  { %3367 = vrot.lane.b32.xlu0 %v8070_v1, %s8781_s11 }
 0x564   :  { %v11879_v39 = vpop.permute.xlu2 %3049  ;;  %v11881_v10 = vpop.permute.xlu1 %3029 }
 0x565   :  { %17998 = vst [vmem:[#allocation443_spill] sm:$0xff] %v11879_v39  ;;  %v11883_v11 = vpop.permute.xlu0 %3027  ;;  %v8077_v39 = vld [vmem:[%s17548_s0 + $0x92] sm:$0xff] }
 0x566   :  { %17999 = vst [vmem:[#allocation444_spill] sm:$0xff] %v11881_v10 }
 0x567   :  { %18000 = vst [vmem:[#allocation445_spill] sm:$0xff] %v11883_v11  ;;  %v8078_v11 = vld [vmem:[%s17548_s0 + $0xa2] sm:$0xff] }
 0x56a   :  { %3377 = vrot.lane.b32.xlu2 %v8075_v27, %s8781_s11  ;;  %3375 = vrot.lane.b32.xlu1 %v8074_v53, %s8781_s11  ;;  %v8076_v27 = vld [vmem:[%s17548_s0 + $0x8a] sm:$0xff] }
 0x56b   :  { %3373 = vrot.lane.b32.xlu0 %v8073_v13, %s8781_s11 }
 0x56c   :  { %v11897_v25 = vpop.permute.xlu2 %3055  ;;  %v11899_v1 = vpop.permute.xlu1 %3035 }
 0x56d   :  { %18001 = vst [vmem:[#allocation446_spill] sm:$0xff] %v11897_v25  ;;  %v11901_v10 = vpop.permute.xlu0 %3033  ;;  %v8080_v25 = vld [vmem:[%s17548_s0 + $0xb2] sm:$0xff] }
 0x56e   :  { %18002 = vst [vmem:[#allocation447_spill] sm:$0xff] %v11899_v1 }
 0x56f   :  { %18003 = vst [vmem:[#allocation448_spill] sm:$0xff] %v11901_v10  ;;  %v8081_v10 = vld [vmem:[%s17548_s0 + $0xba] sm:$0xff] }
 0x572   :  { %3383 = vrot.lane.b32.xlu2 %v8078_v11, %s8781_s11  ;;  %3381 = vrot.lane.b32.xlu1 %v8077_v39, %s8781_s11  ;;  %v8079_v11 = vld [vmem:[%s17548_s0 + $0xaa] sm:$0xff] }
 0x573   :  { %3379 = vrot.lane.b32.xlu0 %v8076_v27, %s8781_s11 }
 0x574   :  { %v11915_v53 = vpop.permute.xlu2 %3061  ;;  %v11917_v13 = vpop.permute.xlu1 %3041 }
 0x575   :  { %18004 = vst [vmem:[#allocation449_spill] sm:$0xff] %v11915_v53  ;;  %v11919_v1 = vpop.permute.xlu0 %3039 }
 0x576   :  { %18005 = vst [vmem:[#allocation450_spill] sm:$0xff] %v11917_v13  ;;  %v8084_v13 = vld [vmem:[%s17548_s0 + $0xda] sm:$0xff] }
 0x577   :  { %18006 = vst [vmem:[#allocation451_spill] sm:$0xff] %v11919_v1  ;;  %v8083_v1 = vld [vmem:[%s17548_s0 + $0xd2] sm:$0xff] }
 0x57a   :  { %3389 = vrot.lane.b32.xlu2 %v8081_v10, %s8781_s11  ;;  %3387 = vrot.lane.b32.xlu1 %v8080_v25, %s8781_s11  ;;  %v8082_v10 = vld [vmem:[%s17548_s0 + $0xca] sm:$0xff] }
 0x57b   :  { %3385 = vrot.lane.b32.xlu0 %v8079_v11, %s8781_s11 }
 0x57c   :  { %v11933_v39 = vpop.permute.xlu2 %3067  ;;  %v11935_v27 = vpop.permute.xlu1 %3047 }
 0x57d   :  { %18007 = vst [vmem:[#allocation452_spill] sm:$0xff] %v11933_v39  ;;  %v11937_v53 = vpop.permute.xlu0 %3045 }
 0x57e   :  { %18008 = vst [vmem:[#allocation453_spill] sm:$0xff] %v11935_v27  ;;  %v8087_v27 = vld [vmem:[%s17548_s0 + $0xfa] sm:$0xff] }
 0x57f   :  { %18009 = vst [vmem:[#allocation454_spill] sm:$0xff] %v11937_v53  ;;  %v8086_v53 = vld [vmem:[%s17548_s0 + $0xf2] sm:$0xff] }
 0x582   :  { %3395 = vrot.lane.b32.xlu2 %v8084_v13, %s8781_s11  ;;  %3393 = vrot.lane.b32.xlu1 %v8083_v1, %s8781_s11  ;;  %v8085_v1 = vld [vmem:[%s17548_s0 + $0xe2] sm:$0xff] }
 0x583   :  { %3391 = vrot.lane.b32.xlu0 %v8082_v10, %s8781_s11 }
 0x584   :  { %v11951_v25 = vpop.permute.xlu2 %3073  ;;  %v11953_v11 = vpop.permute.xlu1 %3053 }
 0x585   :  { %18010 = vst [vmem:[#allocation455_spill] sm:$0xff] %v11951_v25  ;;  %v11955_v39 = vpop.permute.xlu0 %3051 }
 0x586   :  { %18011 = vst [vmem:[#allocation456_spill] sm:$0xff] %v11953_v11  ;;  %v8090_v11 = vld [vmem:[%s17548_s0 + $0x11a] sm:$0xff] }
 0x587   :  { %18012 = vst [vmem:[#allocation457_spill] sm:$0xff] %v11955_v39  ;;  %v8089_v39 = vld [vmem:[%s17548_s0 + $0x10a] sm:$0xff] }
 0x58a   :  { %3401 = vrot.lane.b32.xlu2 %v8087_v27, %s8781_s11  ;;  %3399 = vrot.lane.b32.xlu1 %v8086_v53, %s8781_s11  ;;  %v8088_v53 = vld [vmem:[%s17548_s0 + $0x102] sm:$0xff] }
 0x58b   :  { %3397 = vrot.lane.b32.xlu0 %v8085_v1, %s8781_s11 }
 0x58c   :  { %v11969_v13 = vpop.permute.xlu2 %3079  ;;  %v11971_v10 = vpop.permute.xlu1 %3059 }
 0x58d   :  { %18013 = vst [vmem:[#allocation458_spill] sm:$0xff] %v11969_v13  ;;  %v11973_v25 = vpop.permute.xlu0 %3057 }
 0x58e   :  { %18014 = vst [vmem:[#allocation459_spill] sm:$0xff] %v11971_v10  ;;  %v8093_v10 = vld [vmem:[%s17548_s0 + $0x132] sm:$0xff] }
 0x58f   :  { %18015 = vst [vmem:[#allocation460_spill] sm:$0xff] %v11973_v25  ;;  %v8092_v25 = vld [vmem:[%s17548_s0 + $0x12a] sm:$0xff] }
 0x592   :  { %3407 = vrot.lane.b32.xlu2 %v8090_v11, %s8781_s11  ;;  %3405 = vrot.lane.b32.xlu1 %v8089_v39, %s8781_s11  ;;  %v8091_v39 = vld [vmem:[%s17548_s0 + $0x122] sm:$0xff] }
 0x593   :  { %3403 = vrot.lane.b32.xlu0 %v8088_v53, %s8781_s11 }
 0x594   :  { %v11987_v27 = vpop.permute.xlu2 %3085  ;;  %v11989_v1 = vpop.permute.xlu1 %3065 }
 0x595   :  { %18016 = vst [vmem:[#allocation461_spill] sm:$0xff] %v11987_v27  ;;  %v11991_v13 = vpop.permute.xlu0 %3063 }
 0x596   :  { %18017 = vst [vmem:[#allocation462_spill] sm:$0xff] %v11989_v1  ;;  %v8096_v1 = vld [vmem:[%s17548_s0 + $0x152] sm:$0xff] }
 0x597   :  { %18018 = vst [vmem:[#allocation463_spill] sm:$0xff] %v11991_v13  ;;  %v8095_v13 = vld [vmem:[%s17548_s0 + $0x14a] sm:$0xff] }
 0x59a   :  { %3413 = vrot.lane.b32.xlu2 %v8093_v10, %s8781_s11  ;;  %3411 = vrot.lane.b32.xlu1 %v8092_v25, %s8781_s11  ;;  %v8094_v25 = vld [vmem:[%s17548_s0 + $0x142] sm:$0xff] }
 0x59b   :  { %3409 = vrot.lane.b32.xlu0 %v8091_v39, %s8781_s11 }
 0x59c   :  { %v12005_v11 = vpop.permute.xlu2 %3091  ;;  %v12007_v53 = vpop.permute.xlu1 %3071 }
 0x59d   :  { %18019 = vst [vmem:[#allocation464_spill] sm:$0xff] %v12005_v11  ;;  %v12009_v27 = vpop.permute.xlu0 %3069 }
 0x59e   :  { %18020 = vst [vmem:[#allocation465_spill] sm:$0xff] %v12007_v53  ;;  %v8099_v53 = vld [vmem:[%s17548_s0 + $0x172] sm:$0xff] }
 0x59f   :  { %18021 = vst [vmem:[#allocation466_spill] sm:$0xff] %v12009_v27  ;;  %v8098_v27 = vld [vmem:[%s17548_s0 + $0x16a] sm:$0xff] }
 0x5a2   :  { %3419 = vrot.lane.b32.xlu2 %v8096_v1, %s8781_s11  ;;  %3417 = vrot.lane.b32.xlu1 %v8095_v13, %s8781_s11  ;;  %v8097_v13 = vld [vmem:[%s17548_s0 + $0x15a] sm:$0xff] }
 0x5a3   :  { %3415 = vrot.lane.b32.xlu0 %v8094_v25, %s8781_s11 }
 0x5a4   :  { %v12023_v10 = vpop.permute.xlu2 %3097  ;;  %v12025_v39 = vpop.permute.xlu1 %3077 }
 0x5a5   :  { %18022 = vst [vmem:[#allocation467_spill] sm:$0xff] %v12023_v10  ;;  %v12027_v11 = vpop.permute.xlu0 %3075 }
 0x5a6   :  { %18023 = vst [vmem:[#allocation468_spill] sm:$0xff] %v12025_v39  ;;  %v8102_v39 = vld [vmem:[%s17548_s0 + $0x192] sm:$0xff] }
 0x5a7   :  { %18024 = vst [vmem:[#allocation469_spill] sm:$0xff] %v12027_v11  ;;  %v8101_v11 = vld [vmem:[%s17548_s0 + $0x182] sm:$0xff] }
 0x5aa   :  { %3425 = vrot.lane.b32.xlu2 %v8099_v53, %s8781_s11  ;;  %3423 = vrot.lane.b32.xlu1 %v8098_v27, %s8781_s11  ;;  %v8100_v27 = vld [vmem:[%s17548_s0 + $0x17a] sm:$0xff] }
 0x5ab   :  { %3421 = vrot.lane.b32.xlu0 %v8097_v13, %s8781_s11 }
 0x5ac   :  { %v12041_v1 = vpop.permute.xlu2 %3359  ;;  %v12043_v25 = vpop.permute.xlu1 %3083 }
 0x5ad   :  { %18025 = vst [vmem:[#allocation470_spill] sm:$0xff] %v12043_v25  ;;  %v12045_v10 = vpop.permute.xlu0 %3081 }
 0x5ae   :  { %18026 = vst [vmem:[#allocation471_spill] sm:$0xff] %v12045_v10  ;;  %v8105_v10 = vld [vmem:[%s17548_s0 + $0x1aa] sm:$0xff] }
 0x5b2   :  { %3431 = vrot.lane.b32.xlu2 %v8102_v39, %s8781_s11  ;;  %3429 = vrot.lane.b32.xlu1 %v8101_v11, %s8781_s11  ;;  %v8103_v11 = vld [vmem:[%s17548_s0 + $0x19a] sm:$0xff] }
 0x5b3   :  { %3427 = vrot.lane.b32.xlu0 %v8100_v27, %s8781_s11 }
 0x5b4   :  { %v12059_v53 = vpop.permute.xlu2 %3365  ;;  %v12061_v13 = vpop.permute.xlu1 %3089 }
 0x5b5   :  { %18027 = vst [vmem:[#allocation472_spill] sm:$0xff] %v12061_v13  ;;  %v12063_v25 = vpop.permute.xlu0 %3087 }
 0x5b6   :  { %18028 = vst [vmem:[#allocation473_spill] sm:$0xff] %v12063_v25  ;;  %v8108_v25 = vld [vmem:[%s17548_s0 + $0x1ca] sm:$0xff] }
 0x5ba   :  { %3437 = vrot.lane.b32.xlu2 %v8105_v10, %s8781_s11  ;;  %3435 = vrot.lane.b32.xlu1 %v8104_v37, %s8781_s11  ;;  %v8106_v37 = vld [vmem:[%s17548_s0 + $0x1ba] sm:$0xff] }
 0x5bb   :  { %3433 = vrot.lane.b32.xlu0 %v8103_v11, %s8781_s11 }
 0x5bc   :  { %v12077_v39 = vpop.permute.xlu2 %3371  ;;  %v12079_v27 = vpop.permute.xlu1 %3095 }
 0x5bd   :  { %18029 = vst [vmem:[#allocation474_spill] sm:$0xff] %v12079_v27  ;;  %v12081_v13 = vpop.permute.xlu0 %3093 }
 0x5be   :  { %18030 = vst [vmem:[#allocation475_spill] sm:$0xff] %v12081_v13  ;;  %v8111_v13 = vld [vmem:[%s17548_s0 + $0x1ea] sm:$0xff] }
 0x5c2   :  { %3443 = vrot.lane.b32.xlu2 %v8108_v25, %s8781_s11  ;;  %3441 = vrot.lane.b32.xlu1 %v8107_v17, %s8781_s11  ;;  %v8109_v17 = vld [vmem:[%s17548_s0 + $0x1d2] sm:$0xff] }
 0x5c3   :  { %3439 = vrot.lane.b32.xlu0 %v8106_v37, %s8781_s11 }
 0x5c4   :  { %v12095_v10 = vpop.permute.xlu2 %3377  ;;  %v12097_v11 = vpop.permute.xlu1 %3101 }
 0x5c5   :  { %18031 = vst [vmem:[#allocation476_spill] sm:$0xff] %v12095_v10  ;;  %v12099_v27 = vpop.permute.xlu0 %3099  ;;  %v8246_v10 = vld [vmem:[%s17548_s0 + $0x258] sm:$0xff] }
 0x5c6   :  { %18032 = vst [vmem:[#allocation477_spill] sm:$0xff] %v12097_v11 }
 0x5c7   :  { %18033 = vst [vmem:[#allocation478_spill] sm:$0xff] %v12099_v27  ;;  %v8114_v27 = vld [vmem:[%s17548_s0 + $0x20a] sm:$0xff] }
 0x5ca   :  { %3449 = vrot.lane.b32.xlu2 %v8111_v13, %s8781_s11  ;;  %3447 = vrot.lane.b32.xlu1 %v8110_v7, %s8781_s11  ;;  %v8112_v7 = vld [vmem:[%s17548_s0 + $0x1f2] sm:$0xff] }
 0x5cb   :  { %3445 = vrot.lane.b32.xlu0 %v8109_v17, %s8781_s11 }
 0x5cc   :  { %v12113_v25 = vpop.permute.xlu2 %3383  ;;  %v12115_v37 = vpop.permute.xlu1 %3363 }
 0x5cd   :  { %18034 = vst [vmem:[#allocation479_spill] sm:$0xff] %v12113_v25  ;;  %v12117_v11 = vpop.permute.xlu0 %3361 }
 0x5d2   :  { %3455 = vrot.lane.b32.xlu2 %v8114_v27, %s8781_s11  ;;  %3453 = vrot.lane.b32.xlu1 %v8113_v43, %s8781_s11  ;;  %v8115_v43 = vld [vmem:[%s17548_s0 + $0x212] sm:$0xff] }
 0x5d3   :  { %3451 = vrot.lane.b32.xlu0 %v8112_v7, %s8781_s11 }
 0x5d4   :  { %v12131_v13 = vpop.permute.xlu2 %3389  ;;  %v12133_v17 = vpop.permute.xlu1 %3369 }
 0x5d5   :  { %18035 = vst [vmem:[#allocation480_spill] sm:$0xff] %v12131_v13  ;;  %v12135_v25 = vpop.permute.xlu0 %3367 }
 0x5da   :  { %3461 = vrot.lane.b32.xlu2 %v8117_v12, %s8781_s11  ;;  %3459 = vrot.lane.b32.xlu1 %v8116_v6, %s8781_s11  ;;  %v8118_v12 = vld [vmem:[%s17548_s0 + $0x232] sm:$0xff] }
 0x5db   :  { %3457 = vrot.lane.b32.xlu0 %v8115_v43, %s8781_s11 }
 0x5dc   :  { %v12149_v27 = vpop.permute.xlu2 %3395  ;;  %v12151_v7 = vpop.permute.xlu1 %3375 }
 0x5dd   :  { %18036 = vst [vmem:[#allocation481_spill] sm:$0xff] %v12149_v27  ;;  %v12153_v13 = vpop.permute.xlu0 %3373 }
 0x5e2   :  { %3467 = vrot.lane.b32.xlu2 %v8120_v20, %s8781_s11  ;;  %3465 = vrot.lane.b32.xlu1 %v8119_v48, %s8781_s11  ;;  %v8121_v48 = vld [vmem:[%s17548_s0 + $0x24a] sm:$0xff] }
 0x5e3   :  { %3463 = vrot.lane.b32.xlu0 %v8118_v12, %s8781_s11 }
 0x5e4   :  { %v12167_v6 = vpop.permute.xlu2 %3401  ;;  %v12169_v43 = vpop.permute.xlu1 %3381 }
 0x5e5   :  { %18037 = vst [vmem:[#allocation482_spill] sm:$0xff] %v12167_v6  ;;  %v12171_v27 = vpop.permute.xlu0 %3379 }
 0x5e6   :  { %18038 = vst [vmem:[#allocation483_spill] sm:$0xff] %v12169_v43  ;;  %v8126_v43 = vld [vmem:[%s17548_s0 + $0x282] sm:$0xff] }
 0x5e7   :  { %18039 = vst [vmem:[#allocation484_spill] sm:$0xff] %v12171_v27  ;;  %v8125_v27 = vld [vmem:[%s17548_s0 + $0x272] sm:$0xff] }
 0x5ea   :  { %3473 = vrot.lane.b32.xlu2 %v8123_v60, %s8781_s11  ;;  %3471 = vrot.lane.b32.xlu1 %v8122_v29, %s8781_s11  ;;  %v8124_v29 = vld [vmem:[%s17548_s0 + $0x26a] sm:$0xff] }
 0x5eb   :  { %3469 = vrot.lane.b32.xlu0 %v8121_v48, %s8781_s11 }
 0x5ec   :  { %v12185_v20 = vpop.permute.xlu2 %3407  ;;  %v12187_v12 = vpop.permute.xlu1 %3387 }
 0x5ed   :  { %18040 = vst [vmem:[#allocation485_spill] sm:$0xff] %v12185_v20  ;;  %v12189_v6 = vpop.permute.xlu0 %3385 }
 0x5ee   :  { %18041 = vst [vmem:[#allocation486_spill] sm:$0xff] %v12187_v12  ;;  %v8129_v12 = vld [vmem:[%s17548_s0 + $0x29a] sm:$0xff] }
 0x5ef   :  { %18042 = vst [vmem:[#allocation487_spill] sm:$0xff] %v12189_v6  ;;  %v8128_v6 = vld [vmem:[%s17548_s0 + $0x292] sm:$0xff] }
 0x5f2   :  { %3479 = vrot.lane.b32.xlu2 %v8126_v43, %s8781_s11  ;;  %3477 = vrot.lane.b32.xlu1 %v8125_v27, %s8781_s11  ;;  %v8127_v27 = vld [vmem:[%s17548_s0 + $0x28a] sm:$0xff] }
 0x5f3   :  { %3475 = vrot.lane.b32.xlu0 %v8124_v29, %s8781_s11 }
 0x5f4   :  { %v12203_v60 = vpop.permute.xlu2 %3413  ;;  %v12205_v48 = vpop.permute.xlu1 %3393 }
 0x5f5   :  { %18043 = vst [vmem:[#allocation488_spill] sm:$0xff] %v12203_v60  ;;  %v12207_v20 = vpop.permute.xlu0 %3391 }
 0x5f6   :  { %18044 = vst [vmem:[#allocation489_spill] sm:$0xff] %v12205_v48  ;;  %v8132_v48 = vld [vmem:[%s17548_s0 + $0x2ba] sm:$0xff] }
 0x5f7   :  { %18045 = vst [vmem:[#allocation490_spill] sm:$0xff] %v12207_v20  ;;  %v8131_v20 = vld [vmem:[%s17548_s0 + $0x2b2] sm:$0xff] }
 0x5fa   :  { %3485 = vrot.lane.b32.xlu2 %v8129_v12, %s8781_s11  ;;  %3483 = vrot.lane.b32.xlu1 %v8128_v6, %s8781_s11  ;;  %v8130_v6 = vld [vmem:[%s17548_s0 + $0x2aa] sm:$0xff] }
 0x5fb   :  { %3481 = vrot.lane.b32.xlu0 %v8127_v27, %s8781_s11 }
 0x5fc   :  { %v12221_v43 = vpop.permute.xlu2 %3419  ;;  %v12223_v29 = vpop.permute.xlu1 %3399 }
 0x5fd   :  { %18046 = vst [vmem:[#allocation491_spill] sm:$0xff] %v12221_v43  ;;  %v12225_v60 = vpop.permute.xlu0 %3397 }
 0x5fe   :  { %18047 = vst [vmem:[#allocation492_spill] sm:$0xff] %v12223_v29  ;;  %v8135_v29 = vld [vmem:[%s17548_s0 + $0x2da] sm:$0xff] }
 0x5ff   :  { %18048 = vst [vmem:[#allocation493_spill] sm:$0xff] %v12225_v60  ;;  %v8134_v60 = vld [vmem:[%s17548_s0 + $0x2d2] sm:$0xff] }
 0x602   :  { %3491 = vrot.lane.b32.xlu2 %v8132_v48, %s8781_s11  ;;  %3489 = vrot.lane.b32.xlu1 %v8131_v20, %s8781_s11  ;;  %v8133_v20 = vld [vmem:[%s17548_s0 + $0x2c2] sm:$0xff] }
 0x603   :  { %3487 = vrot.lane.b32.xlu0 %v8130_v6, %s8781_s11 }
 0x604   :  { %v12239_v12 = vpop.permute.xlu2 %3425  ;;  %v12241_v27 = vpop.permute.xlu1 %3405 }
 0x605   :  { %18049 = vst [vmem:[#allocation494_spill] sm:$0xff] %v12239_v12  ;;  %v12243_v43 = vpop.permute.xlu0 %3403 }
 0x606   :  { %18050 = vst [vmem:[#allocation495_spill] sm:$0xff] %v12241_v27  ;;  %v8138_v27 = vld [vmem:[%s17548_s0 + $0x2fa] sm:$0xff] }
 0x607   :  { %18051 = vst [vmem:[#allocation496_spill] sm:$0xff] %v12243_v43  ;;  %v8137_v43 = vld [vmem:[%s17548_s0 + $0x2ea] sm:$0xff] }
 0x60a   :  { %3497 = vrot.lane.b32.xlu2 %v8135_v29, %s8781_s11  ;;  %3495 = vrot.lane.b32.xlu1 %v8134_v60, %s8781_s11  ;;  %v8136_v60 = vld [vmem:[%s17548_s0 + $0x2e2] sm:$0xff] }
 0x60b   :  { %3493 = vrot.lane.b32.xlu0 %v8133_v20, %s8781_s11 }
 0x60c   :  { %v12257_v48 = vpop.permute.xlu2 %3431  ;;  %v12259_v6 = vpop.permute.xlu1 %3411 }
 0x60d   :  { %18052 = vst [vmem:[#allocation497_spill] sm:$0xff] %v12257_v48  ;;  %v12261_v12 = vpop.permute.xlu0 %3409  ;;  %v8140_v48 = vld [vmem:[%s17548_s0 + $0x30a] sm:$0xff] }
 0x60e   :  { %18053 = vst [vmem:[#allocation498_spill] sm:$0xff] %v12259_v6 }
 0x60f   :  { %18054 = vst [vmem:[#allocation499_spill] sm:$0xff] %v12261_v12  ;;  %v8141_v12 = vld [vmem:[%s17548_s0 + $0x312] sm:$0xff] }
 0x612   :  { %3503 = vrot.lane.b32.xlu2 %v8138_v27, %s8781_s11  ;;  %3501 = vrot.lane.b32.xlu1 %v8137_v43, %s8781_s11  ;;  %v8139_v43 = vld [vmem:[%s17548_s0 + $0x302] sm:$0xff] }
 0x613   :  { %3499 = vrot.lane.b32.xlu0 %v8136_v60, %s8781_s11 }
 0x614   :  { %v12275_v29 = vpop.permute.xlu2 %3437  ;;  %v12277_v20 = vpop.permute.xlu1 %3417 }
 0x615   :  { %18055 = vst [vmem:[#allocation500_spill] sm:$0xff] %v12275_v29  ;;  %v12279_v6 = vpop.permute.xlu0 %3415  ;;  %v8143_v29 = vld [vmem:[%s17548_s0 + $0x32a] sm:$0xff] }
 0x616   :  { %18056 = vst [vmem:[#allocation501_spill] sm:$0xff] %v12277_v20 }
 0x617   :  { %18057 = vst [vmem:[#allocation502_spill] sm:$0xff] %v12279_v6  ;;  %v8144_v6 = vld [vmem:[%s17548_s0 + $0x332] sm:$0xff] }
 0x61a   :  { %3509 = vrot.lane.b32.xlu2 %v8141_v12, %s8781_s11  ;;  %3507 = vrot.lane.b32.xlu1 %v8140_v48, %s8781_s11  ;;  %v8142_v12 = vld [vmem:[%s17548_s0 + $0x322] sm:$0xff] }
 0x61b   :  { %3505 = vrot.lane.b32.xlu0 %v8139_v43, %s8781_s11 }
 0x61c   :  { %v12293_v27 = vpop.permute.xlu2 %3443  ;;  %v12295_v60 = vpop.permute.xlu1 %3423 }
 0x61d   :  { %18058 = vst [vmem:[#allocation503_spill] sm:$0xff] %v12293_v27  ;;  %v12297_v20 = vpop.permute.xlu0 %3421  ;;  %v8146_v27 = vld [vmem:[%s17548_s0 + $0x34a] sm:$0xff] }
 0x61e   :  { %18059 = vst [vmem:[#allocation504_spill] sm:$0xff] %v12295_v60 }
 0x61f   :  { %18060 = vst [vmem:[#allocation505_spill] sm:$0xff] %v12297_v20  ;;  %v8147_v20 = vld [vmem:[%s17548_s0 + $0x352] sm:$0xff] }
 0x622   :  { %3515 = vrot.lane.b32.xlu2 %v8144_v6, %s8781_s11  ;;  %3513 = vrot.lane.b32.xlu1 %v8143_v29, %s8781_s11  ;;  %v8145_v6 = vld [vmem:[%s17548_s0 + $0x33a] sm:$0xff] }
 0x623   :  { %3511 = vrot.lane.b32.xlu0 %v8142_v12, %s8781_s11 }
 0x624   :  { %v12311_v48 = vpop.permute.xlu2 %3449  ;;  %v12313_v43 = vpop.permute.xlu1 %3429 }
 0x625   :  { %18061 = vst [vmem:[#allocation506_spill] sm:$0xff] %v12311_v48  ;;  %v12315_v60 = vpop.permute.xlu0 %3427  ;;  %v8150_v48 = vld [vmem:[%s17548_s0 + $0x372] sm:$0xff] }
 0x626   :  { %18062 = vst [vmem:[#allocation507_spill] sm:$0xff] %v12313_v43  ;;  %v8236_v43 = vld [vmem:[%s17548_s0 + $0x1f0] sm:$0xff] }
 0x627   :  { %18063 = vst [vmem:[#allocation508_spill] sm:$0xff] %v12315_v60 }
 0x62a   :  { %3521 = vrot.lane.b32.xlu2 %v8147_v20, %s8781_s11  ;;  %3519 = vrot.lane.b32.xlu1 %v8146_v27, %s8781_s11  ;;  %v8148_v20 = vld [vmem:[%s17548_s0 + $0x35a] sm:$0xff] }
 0x62b   :  { %3517 = vrot.lane.b32.xlu0 %v8145_v6, %s8781_s11 }
 0x62c   :  { %v12329_v29 = vpop.permute.xlu2 %3455  ;;  %v12331_v12 = vpop.permute.xlu1 %3435 }
 0x62d   :  { %18064 = vst [vmem:[#allocation509_spill] sm:$0xff] %v12329_v29  ;;  %v12333_v60 = vpop.permute.xlu0 %3433 }
 0x62e   :  { %18065 = vst [vmem:[#allocation510_spill] sm:$0xff] %v12331_v12  ;;  %v8153_v12 = vld [vmem:[%s17548_s0 + $0x38a] sm:$0xff] }
 0x62f   :  { %18066 = vst [vmem:[#allocation511_spill] sm:$0xff] %v12333_v60  ;;  %v8152_v60 = vld [vmem:[%s17548_s0 + $0x382] sm:$0xff] }
 0x632   :  { %3527 = vrot.lane.b32.xlu2 %v8150_v48, %s8781_s11  ;;  %3525 = vrot.lane.b32.xlu1 %v8149_v33, %s8781_s11  ;;  %v8151_v33 = vld [vmem:[%s17548_s0 + $0x37a] sm:$0xff] }
 0x633   :  { %3523 = vrot.lane.b32.xlu0 %v8148_v20, %s8781_s11 }
 0x634   :  { %v12347_v27 = vpop.permute.xlu2 %3461  ;;  %v12349_v6 = vpop.permute.xlu1 %3441 }
 0x635   :  { %18067 = vst [vmem:[#allocation512_spill] sm:$0xff] %v12347_v27  ;;  %v12351_v29 = vpop.permute.xlu0 %3439 }
 0x636   :  { %18068 = vst [vmem:[#allocation513_spill] sm:$0xff] %v12349_v6  ;;  %v8156_v6 = vld [vmem:[%s17548_s0 + $0x3aa] sm:$0xff] }
 0x637   :  { %18069 = vst [vmem:[#allocation514_spill] sm:$0xff] %v12351_v29  ;;  %v8155_v29 = vld [vmem:[%s17548_s0 + $0x3a2] sm:$0xff] }
 0x63a   :  { %3533 = vrot.lane.b32.xlu2 %v8153_v12, %s8781_s11  ;;  %3531 = vrot.lane.b32.xlu1 %v8152_v60, %s8781_s11  ;;  %v8154_v60 = vld [vmem:[%s17548_s0 + $0x39a] sm:$0xff] }
 0x63b   :  { %3529 = vrot.lane.b32.xlu0 %v8151_v33, %s8781_s11 }
 0x63c   :  { %v12365_v48 = vpop.permute.xlu2 %3467  ;;  %v12367_v20 = vpop.permute.xlu1 %3447 }
 0x63d   :  { %18070 = vst [vmem:[#allocation515_spill] sm:$0xff] %v12365_v48  ;;  %v12369_v27 = vpop.permute.xlu0 %3445 }
 0x63e   :  { %18071 = vst [vmem:[#allocation516_spill] sm:$0xff] %v12367_v20  ;;  %v8159_v20 = vld [vmem:[%s17548_s0 + $0x3ca] sm:$0xff] }
 0x63f   :  { %18072 = vst [vmem:[#allocation517_spill] sm:$0xff] %v12369_v27  ;;  %v8158_v27 = vld [vmem:[%s17548_s0 + $0x3c2] sm:$0xff] }
 0x642   :  { %3539 = vrot.lane.b32.xlu2 %v8156_v6, %s8781_s11  ;;  %3537 = vrot.lane.b32.xlu1 %v8155_v29, %s8781_s11  ;;  %v8157_v29 = vld [vmem:[%s17548_s0 + $0x3b2] sm:$0xff] }
 0x643   :  { %3535 = vrot.lane.b32.xlu0 %v8154_v60, %s8781_s11 }
 0x644   :  { %v12383_v12 = vpop.permute.xlu2 %3473  ;;  %v12385_v33 = vpop.permute.xlu1 %3453 }
 0x645   :  { %18073 = vst [vmem:[#allocation518_spill] sm:$0xff] %v12383_v12  ;;  %v12387_v48 = vpop.permute.xlu0 %3451 }
 0x646   :  { %18074 = vst [vmem:[#allocation519_spill] sm:$0xff] %v12385_v33  ;;  %v8162_v33 = vld [vmem:[%s17548_s0 + $0x3ea] sm:$0xff] }
 0x647   :  { %18075 = vst [vmem:[#allocation520_spill] sm:$0xff] %v12387_v48  ;;  %v8161_v48 = vld [vmem:[%s17548_s0 + $0x3da] sm:$0xff] }
 0x64a   :  { %3545 = vrot.lane.b32.xlu2 %v8159_v20, %s8781_s11  ;;  %3543 = vrot.lane.b32.xlu1 %v8158_v27, %s8781_s11  ;;  %v8160_v27 = vld [vmem:[%s17548_s0 + $0x3d2] sm:$0xff] }
 0x64b   :  { %3541 = vrot.lane.b32.xlu0 %v8157_v29, %s8781_s11 }
 0x64c   :  { %v12401_v6 = vpop.permute.xlu2 %3479  ;;  %v12403_v60 = vpop.permute.xlu1 %3459 }
 0x64d   :  { %18076 = vst [vmem:[#allocation521_spill] sm:$0xff] %v12401_v6  ;;  %v12405_v12 = vpop.permute.xlu0 %3457 }
 0x64e   :  { %18077 = vst [vmem:[#allocation522_spill] sm:$0xff] %v12403_v60  ;;  %v8165_v60 = vld [vmem:[%s17548_s0 + $0x402] sm:$0xff] }
 0x64f   :  { %18078 = vst [vmem:[#allocation523_spill] sm:$0xff] %v12405_v12  ;;  %v8164_v12 = vld [vmem:[%s17548_s0 + $0x3fa] sm:$0xff] }
 0x652   :  { %3551 = vrot.lane.b32.xlu2 %v8162_v33, %s8781_s11  ;;  %3549 = vrot.lane.b32.xlu1 %v8161_v48, %s8781_s11  ;;  %v8163_v48 = vld [vmem:[%s17548_s0 + $0x3f2] sm:$0xff] }
 0x653   :  { %3547 = vrot.lane.b32.xlu0 %v8160_v27, %s8781_s11 }
 0x654   :  { %v12419_v20 = vpop.permute.xlu2 %3485  ;;  %v12421_v29 = vpop.permute.xlu1 %3465 }
 0x655   :  { %18079 = vst [vmem:[#allocation524_spill] sm:$0xff] %v12419_v20  ;;  %v12423_v6 = vpop.permute.xlu0 %3463 }
 0x656   :  { %18080 = vst [vmem:[#allocation525_spill] sm:$0xff] %v12421_v29  ;;  %v8168_v29 = vld [vmem:[%s17548_s0 + $0x422] sm:$0xff] }
 0x657   :  { %18081 = vst [vmem:[#allocation526_spill] sm:$0xff] %v12423_v6  ;;  %v8167_v6 = vld [vmem:[%s17548_s0 + $0x41a] sm:$0xff] }
 0x65a   :  { %3557 = vrot.lane.b32.xlu2 %v8165_v60, %s8781_s11  ;;  %3555 = vrot.lane.b32.xlu1 %v8164_v12, %s8781_s11  ;;  %v8166_v12 = vld [vmem:[%s17548_s0 + $0x412] sm:$0xff] }
 0x65b   :  { %3553 = vrot.lane.b32.xlu0 %v8163_v48, %s8781_s11 }
 0x65c   :  { %v12437_v33 = vpop.permute.xlu2 %3491  ;;  %v12439_v27 = vpop.permute.xlu1 %3471 }
 0x65d   :  { %18082 = vst [vmem:[#allocation527_spill] sm:$0xff] %v12437_v33  ;;  %v12441_v20 = vpop.permute.xlu0 %3469 }
 0x65e   :  { %18083 = vst [vmem:[#allocation528_spill] sm:$0xff] %v12439_v27  ;;  %v8171_v27 = vld [vmem:[%s17548_s0 + $0x442] sm:$0xff] }
 0x65f   :  { %18084 = vst [vmem:[#allocation529_spill] sm:$0xff] %v12441_v20  ;;  %v8170_v20 = vld [vmem:[%s17548_s0 + $0x43a] sm:$0xff] }
 0x662   :  { %3563 = vrot.lane.b32.xlu2 %v8168_v29, %s8781_s11  ;;  %3561 = vrot.lane.b32.xlu1 %v8167_v6, %s8781_s11  ;;  %v8169_v6 = vld [vmem:[%s17548_s0 + $0x42a] sm:$0xff] }
 0x663   :  { %3559 = vrot.lane.b32.xlu0 %v8166_v12, %s8781_s11 }
 0x664   :  { %v12455_v60 = vpop.permute.xlu2 %3497  ;;  %v12457_v48 = vpop.permute.xlu1 %3477 }
 0x665   :  { %18085 = vst [vmem:[#allocation530_spill] sm:$0xff] %v12455_v60  ;;  %v12459_v33 = vpop.permute.xlu0 %3475  ;;  %v8173_v60 = vld [vmem:[%s17548_s0 + $0x452] sm:$0xff] }
 0x666   :  { %18086 = vst [vmem:[#allocation531_spill] sm:$0xff] %v12457_v48 }
 0x667   :  { %18087 = vst [vmem:[#allocation532_spill] sm:$0xff] %v12459_v33  ;;  %v8174_v33 = vld [vmem:[%s17548_s0 + $0x462] sm:$0xff] }
 0x66a   :  { %3569 = vrot.lane.b32.xlu2 %v8171_v27, %s8781_s11  ;;  %3567 = vrot.lane.b32.xlu1 %v8170_v20, %s8781_s11  ;;  %v8172_v20 = vld [vmem:[%s17548_s0 + $0x44a] sm:$0xff] }
 0x66b   :  { %3565 = vrot.lane.b32.xlu0 %v8169_v6, %s8781_s11 }
 0x66c   :  { %v12473_v29 = vpop.permute.xlu2 %3503  ;;  %v12475_v12 = vpop.permute.xlu1 %3483 }
 0x66d   :  { %18088 = vst [vmem:[#allocation533_spill] sm:$0xff] %v12473_v29  ;;  %v12477_v48 = vpop.permute.xlu0 %3481  ;;  %v8176_v29 = vld [vmem:[%s17548_s0 + $0x472] sm:$0xff] }
 0x66e   :  { %18089 = vst [vmem:[#allocation534_spill] sm:$0xff] %v12475_v12 }
 0x66f   :  { %18090 = vst [vmem:[#allocation535_spill] sm:$0xff] %v12477_v48  ;;  %v8177_v48 = vld [vmem:[%s17548_s0 + $0x47a] sm:$0xff] }
 0x672   :  { %3575 = vrot.lane.b32.xlu2 %v8174_v33, %s8781_s11  ;;  %3573 = vrot.lane.b32.xlu1 %v8173_v60, %s8781_s11  ;;  %v8175_v33 = vld [vmem:[%s17548_s0 + $0x46a] sm:$0xff] }
 0x673   :  { %3571 = vrot.lane.b32.xlu0 %v8172_v20, %s8781_s11 }
 0x674   :  { %v12491_v27 = vpop.permute.xlu2 %3509  ;;  %v12493_v6 = vpop.permute.xlu1 %3489 }
 0x675   :  { %18091 = vst [vmem:[#allocation536_spill] sm:$0xff] %v12491_v27  ;;  %v12495_v12 = vpop.permute.xlu0 %3487  ;;  %v8179_v27 = vld [vmem:[%s17548_s0 + $0x492] sm:$0xff] }
 0x676   :  { %18092 = vst [vmem:[#allocation537_spill] sm:$0xff] %v12493_v6 }
 0x677   :  { %18093 = vst [vmem:[#allocation538_spill] sm:$0xff] %v12495_v12  ;;  %v8180_v12 = vld [vmem:[%s17548_s0 + $0x49a] sm:$0xff] }
 0x67a   :  { %3581 = vrot.lane.b32.xlu2 %v8177_v48, %s8781_s11  ;;  %3579 = vrot.lane.b32.xlu1 %v8176_v29, %s8781_s11  ;;  %v8178_v48 = vld [vmem:[%s17548_s0 + $0x48a] sm:$0xff] }
 0x67b   :  { %3577 = vrot.lane.b32.xlu0 %v8175_v33, %s8781_s11 }
 0x67c   :  { %v12509_v60 = vpop.permute.xlu2 %3515  ;;  %v12511_v20 = vpop.permute.xlu1 %3495 }
 0x67d   :  { %18094 = vst [vmem:[#allocation539_spill] sm:$0xff] %v12509_v60  ;;  %v12513_v6 = vpop.permute.xlu0 %3493  ;;  %v8183_v60 = vld [vmem:[%s17548_s0 + $0x4ba] sm:$0xff] }
 0x67e   :  { %18095 = vst [vmem:[#allocation540_spill] sm:$0xff] %v12511_v20  ;;  %v8182_v20 = vld [vmem:[%s17548_s0 + $0x4b2] sm:$0xff] }
 0x67f   :  { %18096 = vst [vmem:[#allocation541_spill] sm:$0xff] %v12513_v6 }
 0x682   :  { %3587 = vrot.lane.b32.xlu2 %v8180_v12, %s8781_s11  ;;  %3585 = vrot.lane.b32.xlu1 %v8179_v27, %s8781_s11  ;;  %v8181_v12 = vld [vmem:[%s17548_s0 + $0x4a2] sm:$0xff] }
 0x683   :  { %3583 = vrot.lane.b32.xlu0 %v8178_v48, %s8781_s11 }
 0x684   :  { %v12527_v29 = vpop.permute.xlu2 %3521  ;;  %v12529_v33 = vpop.permute.xlu1 %3501 }
 0x685   :  { %18097 = vst [vmem:[#allocation542_spill] sm:$0xff] %v12527_v29  ;;  %v12531_v6 = vpop.permute.xlu0 %3499 }
 0x686   :  { %18098 = vst [vmem:[#allocation543_spill] sm:$0xff] %v12529_v33  ;;  %v8186_v33 = vld [vmem:[%s17548_s0 + $0x4da] sm:$0xff] }
 0x687   :  { %18099 = vst [vmem:[#allocation544_spill] sm:$0xff] %v12531_v6  ;;  %v8185_v6 = vld [vmem:[%s17548_s0 + $0x4ca] sm:$0xff] }
 0x68a   :  { %3593 = vrot.lane.b32.xlu2 %v8183_v60, %s8781_s11  ;;  %3591 = vrot.lane.b32.xlu1 %v8182_v20, %s8781_s11  ;;  %v8184_v60 = vld [vmem:[%s17548_s0 + $0x4c2] sm:$0xff] }
 0x68b   :  { %3589 = vrot.lane.b32.xlu0 %v8181_v12, %s8781_s11 }
 0x68c   :  { %v12545_v27 = vpop.permute.xlu2 %3527  ;;  %v12547_v48 = vpop.permute.xlu1 %3507 }
 0x68d   :  { %18100 = vst [vmem:[#allocation545_spill] sm:$0xff] %v12545_v27  ;;  %v12549_v29 = vpop.permute.xlu0 %3505 }
 0x68e   :  { %18101 = vst [vmem:[#allocation546_spill] sm:$0xff] %v12547_v48  ;;  %v8189_v48 = vld [vmem:[%s17548_s0 + $0x4f2] sm:$0xff] }
 0x68f   :  { %18102 = vst [vmem:[#allocation547_spill] sm:$0xff] %v12549_v29  ;;  %v8188_v29 = vld [vmem:[%s17548_s0 + $0x4ea] sm:$0xff] }
 0x692   :  { %3599 = vrot.lane.b32.xlu2 %v8186_v33, %s8781_s11  ;;  %3597 = vrot.lane.b32.xlu1 %v8185_v6, %s8781_s11  ;;  %v8187_v6 = vld [vmem:[%s17548_s0 + $0x4e2] sm:$0xff] }
 0x693   :  { %3595 = vrot.lane.b32.xlu0 %v8184_v60, %s8781_s11 }
 0x694   :  { %v12563_v20 = vpop.permute.xlu2 %3533  ;;  %v12565_v12 = vpop.permute.xlu1 %3513 }
 0x695   :  { %18103 = vst [vmem:[#allocation548_spill] sm:$0xff] %v12563_v20  ;;  %v12567_v27 = vpop.permute.xlu0 %3511 }
 0x696   :  { %18104 = vst [vmem:[#allocation549_spill] sm:$0xff] %v12565_v12  ;;  %v8192_v12 = vld [vmem:[%s17548_s0 + $0x512] sm:$0xff] }
 0x697   :  { %18105 = vst [vmem:[#allocation550_spill] sm:$0xff] %v12567_v27  ;;  %v8191_v27 = vld [vmem:[%s17548_s0 + $0x50a] sm:$0xff] }
 0x69a   :  { %3605 = vrot.lane.b32.xlu2 %v8189_v48, %s8781_s11  ;;  %3603 = vrot.lane.b32.xlu1 %v8188_v29, %s8781_s11  ;;  %v8190_v29 = vld [vmem:[%s17548_s0 + $0x502] sm:$0xff] }
 0x69b   :  { %3601 = vrot.lane.b32.xlu0 %v8187_v6, %s8781_s11 }
 0x69c   :  { %v12581_v33 = vpop.permute.xlu2 %3539  ;;  %v12583_v60 = vpop.permute.xlu1 %3519 }
 0x69d   :  { %18106 = vst [vmem:[#allocation551_spill] sm:$0xff] %v12581_v33  ;;  %v12585_v20 = vpop.permute.xlu0 %3517 }
 0x69e   :  { %18107 = vst [vmem:[#allocation552_spill] sm:$0xff] %v12583_v60  ;;  %v8195_v60 = vld [vmem:[%s17548_s0 + $0x58] sm:$0xff] }
 0x69f   :  { %18108 = vst [vmem:[#allocation553_spill] sm:$0xff] %v12585_v20  ;;  %v8194_v20 = vld [vmem:[%s17548_s0 + $0x50] sm:$0xff] }
 0x6a2   :  { %3611 = vrot.lane.b32.xlu2 %v8192_v12, %s8781_s11  ;;  %3609 = vrot.lane.b32.xlu1 %v8191_v27, %s8781_s11  ;;  %v8193_v27 = vld [vmem:[%s17548_s0 + $0x51a] sm:$0xff] }
 0x6a3   :  { %3607 = vrot.lane.b32.xlu0 %v8190_v29, %s8781_s11 }
 0x6a4   :  { %v12599_v48 = vpop.permute.xlu2 %3545  ;;  %v12601_v6 = vpop.permute.xlu1 %3525 }
 0x6a5   :  { %18109 = vst [vmem:[#allocation554_spill] sm:$0xff] %v12599_v48  ;;  %v12603_v33 = vpop.permute.xlu0 %3523 }
 0x6a6   :  { %18110 = vst [vmem:[#allocation555_spill] sm:$0xff] %v12601_v6  ;;  %v8198_v6 = vld [vmem:[%s17548_s0 + $0x78] sm:$0xff] }
 0x6a7   :  { %18111 = vst [vmem:[#allocation556_spill] sm:$0xff] %v12603_v33  ;;  %v8197_v33 = vld [vmem:[%s17548_s0 + $0x68] sm:$0xff] }
 0x6aa   :  { %3873 = vrot.lane.b32.xlu2 %v8195_v60, %s8782_s12  ;;  %3871 = vrot.lane.b32.xlu1 %v8194_v20, %s8782_s12  ;;  %v8196_v20 = vld [vmem:[%s17548_s0 + $0x60] sm:$0xff] }
 0x6ab   :  { %3613 = vrot.lane.b32.xlu0 %v8193_v27, %s8781_s11 }
 0x6ac   :  { %v12617_v12 = vpop.permute.xlu2 %3551  ;;  %v12619_v29 = vpop.permute.xlu1 %3531 }
 0x6ad   :  { %18112 = vst [vmem:[#allocation557_spill] sm:$0xff] %v12617_v12  ;;  %v12621_v48 = vpop.permute.xlu0 %3529  ;;  %v8200_v12 = vld [vmem:[%s17548_s0 + $0x88] sm:$0xff] }
 0x6ae   :  { %18113 = vst [vmem:[#allocation558_spill] sm:$0xff] %v12619_v29 }
 0x6af   :  { %18114 = vst [vmem:[#allocation559_spill] sm:$0xff] %v12621_v48  ;;  %v8201_v48 = vld [vmem:[%s17548_s0 + $0x90] sm:$0xff] }
 0x6b2   :  { %3879 = vrot.lane.b32.xlu2 %v8198_v6, %s8782_s12  ;;  %3877 = vrot.lane.b32.xlu1 %v8197_v33, %s8782_s12  ;;  %v8199_v33 = vld [vmem:[%s17548_s0 + $0x80] sm:$0xff] }
 0x6b3   :  { %3875 = vrot.lane.b32.xlu0 %v8196_v20, %s8782_s12 }
 0x6b4   :  { %v12635_v60 = vpop.permute.xlu2 %3557  ;;  %v12637_v27 = vpop.permute.xlu1 %3537 }
 0x6b5   :  { %18115 = vst [vmem:[#allocation560_spill] sm:$0xff] %v12635_v60  ;;  %v12639_v29 = vpop.permute.xlu0 %3535  ;;  %v8203_v60 = vld [vmem:[%s17548_s0 + $0xa8] sm:$0xff] }
 0x6b6   :  { %18116 = vst [vmem:[#allocation561_spill] sm:$0xff] %v12637_v27 }
 0x6b7   :  { %18117 = vst [vmem:[#allocation562_spill] sm:$0xff] %v12639_v29  ;;  %v8204_v29 = vld [vmem:[%s17548_s0 + $0xb0] sm:$0xff] }
 0x6ba   :  { %3885 = vrot.lane.b32.xlu2 %v8201_v48, %s8782_s12  ;;  %3883 = vrot.lane.b32.xlu1 %v8200_v12, %s8782_s12  ;;  %v8202_v48 = vld [vmem:[%s17548_s0 + $0xa0] sm:$0xff] }
 0x6bb   :  { %3881 = vrot.lane.b32.xlu0 %v8199_v33, %s8782_s12 }
 0x6bc   :  { %v12653_v6 = vpop.permute.xlu2 %3563  ;;  %v12655_v20 = vpop.permute.xlu1 %3543 }
 0x6bd   :  { %18118 = vst [vmem:[#allocation563_spill] sm:$0xff] %v12653_v6  ;;  %v12657_v27 = vpop.permute.xlu0 %3541  ;;  %v8206_v6 = vld [vmem:[%s17548_s0 + $0xc8] sm:$0xff] }
 0x6be   :  { %18119 = vst [vmem:[#allocation564_spill] sm:$0xff] %v12655_v20 }
 0x6bf   :  { %18120 = vst [vmem:[#allocation565_spill] sm:$0xff] %v12657_v27  ;;  %v8207_v27 = vld [vmem:[%s17548_s0 + $0xd0] sm:$0xff] }
 0x6c2   :  { %3891 = vrot.lane.b32.xlu2 %v8204_v29, %s8782_s12  ;;  %3889 = vrot.lane.b32.xlu1 %v8203_v60, %s8782_s12  ;;  %v8205_v29 = vld [vmem:[%s17548_s0 + $0xb8] sm:$0xff] }
 0x6c3   :  { %3887 = vrot.lane.b32.xlu0 %v8202_v48, %s8782_s12 }
 0x6c4   :  { %v12671_v12 = vpop.permute.xlu2 %3569  ;;  %v12673_v33 = vpop.permute.xlu1 %3549 }
 0x6c5   :  { %18121 = vst [vmem:[#allocation566_spill] sm:$0xff] %v12671_v12  ;;  %v12675_v20 = vpop.permute.xlu0 %3547  ;;  %v8210_v12 = vld [vmem:[%s17548_s0 + $0xf0] sm:$0xff] }
 0x6c6   :  { %18122 = vst [vmem:[#allocation567_spill] sm:$0xff] %v12673_v33  ;;  %v8209_v33 = vld [vmem:[%s17548_s0 + $0xe0] sm:$0xff] }
 0x6c7   :  { %18123 = vst [vmem:[#allocation568_spill] sm:$0xff] %v12675_v20 }
 0x6ca   :  { %3897 = vrot.lane.b32.xlu2 %v8207_v27, %s8782_s12  ;;  %3895 = vrot.lane.b32.xlu1 %v8206_v6, %s8782_s12  ;;  %v8208_v27 = vld [vmem:[%s17548_s0 + $0xd8] sm:$0xff] }
 0x6cb   :  { %3893 = vrot.lane.b32.xlu0 %v8205_v29, %s8782_s12 }
 0x6cc   :  { %v12689_v60 = vpop.permute.xlu2 %3575  ;;  %v12691_v48 = vpop.permute.xlu1 %3555 }
 0x6cd   :  { %18124 = vst [vmem:[#allocation569_spill] sm:$0xff] %v12689_v60  ;;  %v12693_v20 = vpop.permute.xlu0 %3553 }
 0x6ce   :  { %18125 = vst [vmem:[#allocation570_spill] sm:$0xff] %v12691_v48  ;;  %v8213_v48 = vld [vmem:[%s17548_s0 + $0x108] sm:$0xff] }
 0x6cf   :  { %18126 = vst [vmem:[#allocation571_spill] sm:$0xff] %v12693_v20  ;;  %v8212_v20 = vld [vmem:[%s17548_s0 + $0x100] sm:$0xff] }
 0x6d2   :  { %3903 = vrot.lane.b32.xlu2 %v8210_v12, %s8782_s12  ;;  %3901 = vrot.lane.b32.xlu1 %v8209_v33, %s8782_s12  ;;  %v8211_v12 = vld [vmem:[%s17548_s0 + $0xf8] sm:$0xff] }
 0x6d3   :  { %3899 = vrot.lane.b32.xlu0 %v8208_v27, %s8782_s12 }
 0x6d4   :  { %v12707_v6 = vpop.permute.xlu2 %3581  ;;  %v12709_v29 = vpop.permute.xlu1 %3561 }
 0x6d5   :  { %18127 = vst [vmem:[#allocation572_spill] sm:$0xff] %v12707_v6  ;;  %v12711_v60 = vpop.permute.xlu0 %3559 }
 0x6d6   :  { %18128 = vst [vmem:[#allocation573_spill] sm:$0xff] %v12709_v29  ;;  %v8216_v29 = vld [vmem:[%s17548_s0 + $0x128] sm:$0xff] }
 0x6d7   :  { %18129 = vst [vmem:[#allocation574_spill] sm:$0xff] %v12711_v60  ;;  %v8215_v60 = vld [vmem:[%s17548_s0 + $0x120] sm:$0xff] }
 0x6da   :  { %3909 = vrot.lane.b32.xlu2 %v8213_v48, %s8782_s12  ;;  %3907 = vrot.lane.b32.xlu1 %v8212_v20, %s8782_s12  ;;  %v8214_v20 = vld [vmem:[%s17548_s0 + $0x118] sm:$0xff] }
 0x6db   :  { %3905 = vrot.lane.b32.xlu0 %v8211_v12, %s8782_s12 }
 0x6dc   :  { %v12725_v33 = vpop.permute.xlu2 %3587  ;;  %v12727_v27 = vpop.permute.xlu1 %3567 }
 0x6dd   :  { %18130 = vst [vmem:[#allocation575_spill] sm:$0xff] %v12725_v33  ;;  %v12729_v6 = vpop.permute.xlu0 %3565 }
 0x6de   :  { %18131 = vst [vmem:[#allocation576_spill] sm:$0xff] %v12727_v27  ;;  %v8219_v27 = vld [vmem:[%s17548_s0 + $0x148] sm:$0xff] }
 0x6df   :  { %18132 = vst [vmem:[#allocation577_spill] sm:$0xff] %v12729_v6  ;;  %v8218_v6 = vld [vmem:[%s17548_s0 + $0x140] sm:$0xff] }
 0x6e2   :  { %3915 = vrot.lane.b32.xlu2 %v8216_v29, %s8782_s12  ;;  %3913 = vrot.lane.b32.xlu1 %v8215_v60, %s8782_s12  ;;  %v8217_v60 = vld [vmem:[%s17548_s0 + $0x130] sm:$0xff] }
 0x6e3   :  { %3911 = vrot.lane.b32.xlu0 %v8214_v20, %s8782_s12 }
 0x6e4   :  { %v12743_v48 = vpop.permute.xlu2 %3593  ;;  %v12745_v12 = vpop.permute.xlu1 %3573 }
 0x6e5   :  { %18133 = vst [vmem:[#allocation578_spill] sm:$0xff] %v12743_v48  ;;  %v12747_v33 = vpop.permute.xlu0 %3571 }
 0x6e6   :  { %18134 = vst [vmem:[#allocation579_spill] sm:$0xff] %v12745_v12  ;;  %v8222_v12 = vld [vmem:[%s17548_s0 + $0x168] sm:$0xff] }
 0x6e7   :  { %18135 = vst [vmem:[#allocation580_spill] sm:$0xff] %v12747_v33  ;;  %v8221_v33 = vld [vmem:[%s17548_s0 + $0x158] sm:$0xff] }
 0x6ea   :  { %3921 = vrot.lane.b32.xlu2 %v8219_v27, %s8782_s12  ;;  %3919 = vrot.lane.b32.xlu1 %v8218_v6, %s8782_s12  ;;  %v8220_v6 = vld [vmem:[%s17548_s0 + $0x150] sm:$0xff] }
 0x6eb   :  { %3917 = vrot.lane.b32.xlu0 %v8217_v60, %s8782_s12 }
 0x6ec   :  { %v12761_v29 = vpop.permute.xlu2 %3599  ;;  %v12763_v20 = vpop.permute.xlu1 %3579 }
 0x6ed   :  { %18136 = vst [vmem:[#allocation581_spill] sm:$0xff] %v12761_v29  ;;  %v12765_v48 = vpop.permute.xlu0 %3577 }
 0x6ee   :  { %18137 = vst [vmem:[#allocation582_spill] sm:$0xff] %v12763_v20  ;;  %v8225_v20 = vld [vmem:[%s17548_s0 + $0x180] sm:$0xff] }
 0x6ef   :  { %18138 = vst [vmem:[#allocation583_spill] sm:$0xff] %v12765_v48  ;;  %v8224_v48 = vld [vmem:[%s17548_s0 + $0x178] sm:$0xff] }
 0x6f2   :  { %3927 = vrot.lane.b32.xlu2 %v8222_v12, %s8782_s12  ;;  %3925 = vrot.lane.b32.xlu1 %v8221_v33, %s8782_s12  ;;  %v8223_v33 = vld [vmem:[%s17548_s0 + $0x170] sm:$0xff] }
 0x6f3   :  { %3923 = vrot.lane.b32.xlu0 %v8220_v6, %s8782_s12 }
 0x6f4   :  { %v12779_v27 = vpop.permute.xlu2 %3605  ;;  %v12781_v60 = vpop.permute.xlu1 %3585 }
 0x6f5   :  { %18139 = vst [vmem:[#allocation584_spill] sm:$0xff] %v12779_v27  ;;  %v12783_v29 = vpop.permute.xlu0 %3583 }
 0x6f6   :  { %18140 = vst [vmem:[#allocation585_spill] sm:$0xff] %v12781_v60  ;;  %v8228_v60 = vld [vmem:[%s17548_s0 + $0x1a0] sm:$0xff] }
 0x6f7   :  { %18141 = vst [vmem:[#allocation586_spill] sm:$0xff] %v12783_v29  ;;  %v8227_v29 = vld [vmem:[%s17548_s0 + $0x198] sm:$0xff] }
 0x6fa   :  { %3933 = vrot.lane.b32.xlu2 %v8225_v20, %s8782_s12  ;;  %3931 = vrot.lane.b32.xlu1 %v8224_v48, %s8782_s12  ;;  %v8226_v48 = vld [vmem:[%s17548_s0 + $0x190] sm:$0xff] }
 0x6fb   :  { %3929 = vrot.lane.b32.xlu0 %v8223_v33, %s8782_s12 }
 0x6fc   :  { %v12797_v12 = vpop.permute.xlu2 %3611  ;;  %v12799_v6 = vpop.permute.xlu1 %3591 }
 0x6fd   :  { %18142 = vst [vmem:[#allocation587_spill] sm:$0xff] %v12797_v12  ;;  %v12801_v27 = vpop.permute.xlu0 %3589 }
 0x6fe   :  { %18143 = vst [vmem:[#allocation588_spill] sm:$0xff] %v12799_v6  ;;  %v8231_v6 = vld [vmem:[%s17548_s0 + $0x1c0] sm:$0xff] }
 0x6ff   :  { %18144 = vst [vmem:[#allocation589_spill] sm:$0xff] %v12801_v27  ;;  %v8230_v27 = vld [vmem:[%s17548_s0 + $0x1b8] sm:$0xff] }
 0x702   :  { %3939 = vrot.lane.b32.xlu2 %v8228_v60, %s8782_s12  ;;  %3937 = vrot.lane.b32.xlu1 %v8227_v29, %s8782_s12  ;;  %v8229_v29 = vld [vmem:[%s17548_s0 + $0x1a8] sm:$0xff] }
 0x703   :  { %3935 = vrot.lane.b32.xlu0 %v8226_v48, %s8782_s12 }
 0x704   :  { %v12815_v20 = vpop.permute.xlu2 %3873  ;;  %v12817_v33 = vpop.permute.xlu1 %3597 }
 0x705   :  { %18145 = vst [vmem:[#allocation590_spill] sm:$0xff] %v12817_v33  ;;  %v12819_v12 = vpop.permute.xlu0 %3595 }
 0x706   :  { %18146 = vst [vmem:[#allocation591_spill] sm:$0xff] %v12819_v12  ;;  %v8234_v12 = vld [vmem:[%s17548_s0 + $0x1e0] sm:$0xff] }
 0x70a   :  { %3945 = vrot.lane.b32.xlu2 %v8231_v6, %s8782_s12  ;;  %3943 = vrot.lane.b32.xlu1 %v8230_v27, %s8782_s12  ;;  %v8232_v27 = vld [vmem:[%s17548_s0 + $0x1c8] sm:$0xff] }
 0x70b   :  { %3941 = vrot.lane.b32.xlu0 %v8229_v29, %s8782_s12 }
 0x70c   :  { %v12833_v60 = vpop.permute.xlu2 %3879  ;;  %v12835_v48 = vpop.permute.xlu1 %3603 }
 0x70d   :  { %18147 = vst [vmem:[#allocation592_spill] sm:$0xff] %v12835_v48  ;;  %v12837_v33 = vpop.permute.xlu0 %3601 }
 0x70e   :  { %18148 = vst [vmem:[#allocation593_spill] sm:$0xff] %v12837_v33  ;;  %v8237_v33 = vld [vmem:[%s17548_s0 + $0x1f8] sm:$0xff] }
 0x712   :  { %3951 = vrot.lane.b32.xlu2 %v8234_v12, %s8782_s12  ;;  %3949 = vrot.lane.b32.xlu1 %v8233_v3, %s8782_s12  ;;  %v8235_v3 = vld [vmem:[%s17548_s0 + $0x1e8] sm:$0xff] }
 0x713   :  { %3947 = vrot.lane.b32.xlu0 %v8232_v27, %s8782_s12 }
 0x714   :  { %v12851_v6 = vpop.permute.xlu2 %3885  ;;  %v12853_v29 = vpop.permute.xlu1 %3609 }
 0x715   :  { %18149 = vst [vmem:[#allocation594_spill] sm:$0xff] %v12853_v29  ;;  %v12855_v48 = vpop.permute.xlu0 %3607 }
 0x716   :  { %18150 = vst [vmem:[#allocation595_spill] sm:$0xff] %v12855_v48  ;;  %v8240_v48 = vld [vmem:[%s17548_s0 + $0x218] sm:$0xff] }
 0x71a   :  { %3957 = vrot.lane.b32.xlu2 %v8237_v33, %s8782_s12  ;;  %3955 = vrot.lane.b32.xlu1 %v8236_v43, %s8782_s12  ;;  %v8238_v43 = vld [vmem:[%s17548_s0 + $0x208] sm:$0xff] }
 0x71b   :  { %3953 = vrot.lane.b32.xlu0 %v8235_v3, %s8782_s12 }
 0x71c   :  { %v12869_v12 = vpop.permute.xlu2 %3891  ;;  %v12871_v27 = vpop.permute.xlu1 %3871 }
 0x71d   :  { %18151 = vst [vmem:[#allocation596_spill] sm:$0xff] %v12869_v12  ;;  %v12873_v29 = vpop.permute.xlu0 %3613  ;;  %v8243_v12 = vld [vmem:[%s17548_s0 + $0x238] sm:$0xff] }
 0x71e   :  { %18152 = vst [vmem:[#allocation597_spill] sm:$0xff] %v12873_v29 }
 0x722   :  { %3963 = vrot.lane.b32.xlu2 %v8240_v48, %s8782_s12  ;;  %3961 = vrot.lane.b32.xlu1 %v8239_v9, %s8782_s12  ;;  %v8241_v9 = vld [vmem:[%s17548_s0 + $0x220] sm:$0xff] }
 0x723   :  { %3959 = vrot.lane.b32.xlu0 %v8238_v43, %s8782_s12 }
 0x724   :  { %v12887_v33 = vpop.permute.xlu2 %3897  ;;  %v12889_v3 = vpop.permute.xlu1 %3877 }
 0x725   :  { %18153 = vst [vmem:[#allocation598_spill] sm:$0xff] %v12887_v33  ;;  %v12891_v29 = vpop.permute.xlu0 %3875 }
 0x72a   :  { %3969 = vrot.lane.b32.xlu2 %v8243_v12, %s8782_s12  ;;  %3967 = vrot.lane.b32.xlu1 %v8242_v47, %s8782_s12  ;;  %v8244_v47 = vld [vmem:[%s17548_s0 + $0x240] sm:$0xff] }
 0x72b   :  { %3965 = vrot.lane.b32.xlu0 %v8241_v9, %s8782_s12 }
 0x72c   :  { %v12905_v48 = vpop.permute.xlu2 %3903  ;;  %v12907_v43 = vpop.permute.xlu1 %3883 }
 0x72d   :  { %18154 = vst [vmem:[#allocation599_spill] sm:$0xff] %v12905_v48  ;;  %v12909_v33 = vpop.permute.xlu0 %3881 }
 0x732   :  { %3975 = vrot.lane.b32.xlu2 %v8246_v10, %s8782_s12  ;;  %3973 = vrot.lane.b32.xlu1 %v8245_v0, %s8782_s12  ;;  %v8247_v0 = vld [vmem:[%s17548_s0 + $0x260] sm:$0xff] }
 0x733   :  { %3971 = vrot.lane.b32.xlu0 %v8244_v47, %s8782_s12 }
 0x734   :  { %v12923_v12 = vpop.permute.xlu2 %3909  ;;  %v12925_v9 = vpop.permute.xlu1 %3889 }
 0x735   :  { %18155 = vst [vmem:[#allocation600_spill] sm:$0xff] %v12923_v12  ;;  %v12927_v48 = vpop.permute.xlu0 %3887 }
 0x736   :  { %18156 = vst [vmem:[#allocation601_spill] sm:$0xff] %v12925_v9  ;;  %v8252_v9 = vld [vmem:[%s17548_s0 + $0x290] sm:$0xff] }
 0x73a   :  { %3981 = vrot.lane.b32.xlu2 %v8249_v24, %s8782_s12  ;;  %3979 = vrot.lane.b32.xlu1 %v8248_v32, %s8782_s12  ;;  %v8250_v32 = vld [vmem:[%s17548_s0 + $0x280] sm:$0xff] }
 0x73b   :  { %3977 = vrot.lane.b32.xlu0 %v8247_v0, %s8782_s12 }
 0x73c   :  { %v12941_v10 = vpop.permute.xlu2 %3915  ;;  %v12943_v47 = vpop.permute.xlu1 %3895 }
 0x73d   :  { %18157 = vst [vmem:[#allocation602_spill] sm:$0xff] %v12941_v10  ;;  %v12945_v12 = vpop.permute.xlu0 %3893 }
 0x73e   :  { %18158 = vst [vmem:[#allocation603_spill] sm:$0xff] %v12943_v47  ;;  %v8255_v47 = vld [vmem:[%s17548_s0 + $0x2b0] sm:$0xff] }
 0x73f   :  { %18159 = vst [vmem:[#allocation604_spill] sm:$0xff] %v12945_v12  ;;  %v8254_v12 = vld [vmem:[%s17548_s0 + $0x2a8] sm:$0xff] }
 0x742   :  { %3987 = vrot.lane.b32.xlu2 %v8252_v9, %s8782_s12  ;;  %3985 = vrot.lane.b32.xlu1 %v8251_v34, %s8782_s12  ;;  %v8253_v34 = vld [vmem:[%s17548_s0 + $0x298] sm:$0xff] }
 0x743   :  { %3983 = vrot.lane.b32.xlu0 %v8250_v32, %s8782_s12 }
 0x744   :  { %v12959_v24 = vpop.permute.xlu2 %3921  ;;  %v12961_v0 = vpop.permute.xlu1 %3901 }
 0x745   :  { %18160 = vst [vmem:[#allocation605_spill] sm:$0xff] %v12959_v24  ;;  %v12963_v10 = vpop.permute.xlu0 %3899 }
 0x746   :  { %18161 = vst [vmem:[#allocation606_spill] sm:$0xff] %v12961_v0  ;;  %v8258_v0 = vld [vmem:[%s17548_s0 + $0x2d0] sm:$0xff] }
 0x747   :  { %18162 = vst [vmem:[#allocation607_spill] sm:$0xff] %v12963_v10  ;;  %v8257_v10 = vld [vmem:[%s17548_s0 + $0x2c0] sm:$0xff] }
 0x74a   :  { %3993 = vrot.lane.b32.xlu2 %v8255_v47, %s8782_s12  ;;  %3991 = vrot.lane.b32.xlu1 %v8254_v12, %s8782_s12  ;;  %v8256_v12 = vld [vmem:[%s17548_s0 + $0x2b8] sm:$0xff] }
 0x74b   :  { %3989 = vrot.lane.b32.xlu0 %v8253_v34, %s8782_s12 }
 0x74c   :  { %v12977_v9 = vpop.permute.xlu2 %3927  ;;  %v12979_v32 = vpop.permute.xlu1 %3907 }
 0x74d   :  { %18163 = vst [vmem:[#allocation608_spill] sm:$0xff] %v12977_v9  ;;  %v12981_v24 = vpop.permute.xlu0 %3905 }
 0x74e   :  { %18164 = vst [vmem:[#allocation609_spill] sm:$0xff] %v12979_v32  ;;  %v8261_v32 = vld [vmem:[%s17548_s0 + $0x2e8] sm:$0xff] }
 0x74f   :  { %18165 = vst [vmem:[#allocation610_spill] sm:$0xff] %v12981_v24  ;;  %v8260_v24 = vld [vmem:[%s17548_s0 + $0x2e0] sm:$0xff] }
 0x752   :  { %3999 = vrot.lane.b32.xlu2 %v8258_v0, %s8782_s12  ;;  %3997 = vrot.lane.b32.xlu1 %v8257_v10, %s8782_s12  ;;  %v8259_v10 = vld [vmem:[%s17548_s0 + $0x2d8] sm:$0xff] }
 0x753   :  { %3995 = vrot.lane.b32.xlu0 %v8256_v12, %s8782_s12 }
 0x754   :  { %v12995_v47 = vpop.permute.xlu2 %3933  ;;  %v12997_v34 = vpop.permute.xlu1 %3913 }
 0x755   :  { %18166 = vst [vmem:[#allocation611_spill] sm:$0xff] %v12995_v47  ;;  %v12999_v9 = vpop.permute.xlu0 %3911 }
 0x756   :  { %18167 = vst [vmem:[#allocation612_spill] sm:$0xff] %v12997_v34  ;;  %v8323_v34 = vld [vmem:[%s17548_s0 + $0x59] sm:$0xff] }
 0x757   :  { %18168 = vst [vmem:[#allocation613_spill] sm:$0xff] %v12999_v9  ;;  %v8450_v9 = vld [vmem:[%s17548_s0 + $0x52] sm:$0xff] }
 0x75a   :  { %4005 = vrot.lane.b32.xlu2 %v8261_v32, %s8782_s12  ;;  %4003 = vrot.lane.b32.xlu1 %v8260_v24, %s8782_s12  ;;  %v8322_v24 = vld [vmem:[%s17548_s0 + $0x51] sm:$0xff] }
 0x75b   :  { %4001 = vrot.lane.b32.xlu0 %v8259_v10, %s8782_s12 }
 0x75c   :  { %v13013_v0 = vpop.permute.xlu2 %3939  ;;  %v13015_v12 = vpop.permute.xlu1 %3919 }
 0x75d   :  { %18169 = vst [vmem:[#allocation614_spill] sm:$0xff] %v13013_v0  ;;  %v13017_v47 = vpop.permute.xlu0 %3917 }
 0x75e   :  { %18170 = vst [vmem:[#allocation615_spill] sm:$0xff] %v13015_v12  ;;  %v8324_v12 = vld [vmem:[%s17548_s0 + $0x61] sm:$0xff] }
 0x75f   :  { %18171 = vst [vmem:[#allocation616_spill] sm:$0xff] %v13017_v47  ;;  %v8262_v47 = vld [vmem:[%s17548_s0 + $0x2f8] sm:$0xff] }
 0x762   :  { %4385 = vrot.lane.b32.xlu2 %v8323_v34, %s8783_s22  ;;  %4895 = vrot.lane.b32.xlu1 %v8450_v9, %s8784_s23  ;;  %v8451_v9 = vld [vmem:[%s17548_s0 + $0x5a] sm:$0xff] }
 0x763   :  { %4383 = vrot.lane.b32.xlu0 %v8322_v24, %s8783_s22 }
 0x764   :  { %v13031_v32 = vpop.permute.xlu2 %3945  ;;  %v13033_v10 = vpop.permute.xlu1 %3925 }
 0x765   :  { %18172 = vst [vmem:[#allocation617_spill] sm:$0xff] %v13031_v32  ;;  %v13035_v0 = vpop.permute.xlu0 %3923  ;;  %v8263_v32 = vld [vmem:[%s17548_s0 + $0x300] sm:$0xff] }
 0x766   :  { %18173 = vst [vmem:[#allocation618_spill] sm:$0xff] %v13033_v10 }
 0x767   :  { %18174 = vst [vmem:[#allocation619_spill] sm:$0xff] %v13035_v0  ;;  %v8325_v0 = vld [vmem:[%s17548_s0 + $0x69] sm:$0xff] }
 0x76a   :  { %4387 = vrot.lane.b32.xlu2 %v8324_v12, %s8783_s22  ;;  %4007 = vrot.lane.b32.xlu1 %v8262_v47, %s8782_s12  ;;  %v8452_v47 = vld [vmem:[%s17548_s0 + $0x62] sm:$0xff] }
 0x76b   :  { %4897 = vrot.lane.b32.xlu0 %v8451_v9, %s8784_s23 }
 0x76c   :  { %v13049_v34 = vpop.permute.xlu2 %3951  ;;  %v13051_v24 = vpop.permute.xlu1 %3931 }
 0x76d   :  { %18175 = vst [vmem:[#allocation620_spill] sm:$0xff] %v13049_v34  ;;  %v13053_v10 = vpop.permute.xlu0 %3929  ;;  %v8326_v34 = vld [vmem:[%s17548_s0 + $0x79] sm:$0xff] }
 0x76e   :  { %18176 = vst [vmem:[#allocation621_spill] sm:$0xff] %v13051_v24 }
 0x76f   :  { %18177 = vst [vmem:[#allocation622_spill] sm:$0xff] %v13053_v10  ;;  %v8454_v10 = vld [vmem:[%s17548_s0 + $0x7a] sm:$0xff] }
 0x772   :  { %4389 = vrot.lane.b32.xlu2 %v8325_v0, %s8783_s22  ;;  %4009 = vrot.lane.b32.xlu1 %v8263_v32, %s8782_s12  ;;  %v8453_v0 = vld [vmem:[%s17548_s0 + $0x6a] sm:$0xff] }
 0x773   :  { %4899 = vrot.lane.b32.xlu0 %v8452_v47, %s8784_s23 }
 0x774   :  { %v13067_v12 = vpop.permute.xlu2 %3957  ;;  %v13069_v9 = vpop.permute.xlu1 %3937 }
 0x775   :  { %18178 = vst [vmem:[#allocation623_spill] sm:$0xff] %v13067_v12  ;;  %v13071_v24 = vpop.permute.xlu0 %3935  ;;  %v8327_v12 = vld [vmem:[%s17548_s0 + $0x81] sm:$0xff] }
 0x776   :  { %18179 = vst [vmem:[#allocation624_spill] sm:$0xff] %v13069_v9 }
 0x777   :  { %18180 = vst [vmem:[#allocation625_spill] sm:$0xff] %v13071_v24  ;;  %v8455_v24 = vld [vmem:[%s17548_s0 + $0x82] sm:$0xff] }
 0x77a   :  { %4903 = vrot.lane.b32.xlu2 %v8454_v10, %s8784_s23  ;;  %4391 = vrot.lane.b32.xlu1 %v8326_v34, %s8783_s22  ;;  %v8264_v10 = vld [vmem:[%s17548_s0 + $0x308] sm:$0xff] }
 0x77b   :  { %4901 = vrot.lane.b32.xlu0 %v8453_v0, %s8784_s23 }
 0x77c   :  { %v13085_v32 = vpop.permute.xlu2 %3963  ;;  %v13087_v47 = vpop.permute.xlu1 %3943 }
 0x77d   :  { %18181 = vst [vmem:[#allocation626_spill] sm:$0xff] %v13085_v32  ;;  %v13089_v9 = vpop.permute.xlu0 %3941 }
 0x77e   :  { %18182 = vst [vmem:[#allocation627_spill] sm:$0xff] %v13087_v47  ;;  %v8456_v47 = vld [vmem:[%s17548_s0 + $0x8a] sm:$0xff] }
 0x77f   :  { %18183 = vst [vmem:[#allocation628_spill] sm:$0xff] %v13089_v9  ;;  %v8328_v9 = vld [vmem:[%s17548_s0 + $0x89] sm:$0xff] }
 0x782   :  { %4905 = vrot.lane.b32.xlu2 %v8455_v24, %s8784_s23  ;;  %4393 = vrot.lane.b32.xlu1 %v8327_v12, %s8783_s22  ;;  %v8265_v24 = vld [vmem:[%s17548_s0 + $0x310] sm:$0xff] }
 0x783   :  { %4011 = vrot.lane.b32.xlu0 %v8264_v10, %s8782_s12 }
 0x784   :  { %v13103_v34 = vpop.permute.xlu2 %3969  ;;  %v13105_v0 = vpop.permute.xlu1 %3949 }
 0x785   :  { %18184 = vst [vmem:[#allocation629_spill] sm:$0xff] %v13103_v34  ;;  %v13107_v32 = vpop.permute.xlu0 %3947 }
 0x786   :  { %18185 = vst [vmem:[#allocation630_spill] sm:$0xff] %v13105_v0  ;;  %v8266_v0 = vld [vmem:[%s17548_s0 + $0x320] sm:$0xff] }
 0x787   :  { %18186 = vst [vmem:[#allocation631_spill] sm:$0xff] %v13107_v32  ;;  %v8457_v32 = vld [vmem:[%s17548_s0 + $0x92] sm:$0xff] }
 0x78a   :  { %4907 = vrot.lane.b32.xlu2 %v8456_v47, %s8784_s23  ;;  %4395 = vrot.lane.b32.xlu1 %v8328_v9, %s8783_s22  ;;  %v8329_v9 = vld [vmem:[%s17548_s0 + $0x91] sm:$0xff] }
 0x78b   :  { %4013 = vrot.lane.b32.xlu0 %v8265_v24, %s8782_s12 }
 0x78c   :  { %v13121_v12 = vpop.permute.xlu2 %3975  ;;  %v13123_v10 = vpop.permute.xlu1 %3955 }
 0x78d   :  { %18187 = vst [vmem:[#allocation632_spill] sm:$0xff] %v13121_v12  ;;  %v13125_v34 = vpop.permute.xlu0 %3953 }
 0x78e   :  { %18188 = vst [vmem:[#allocation633_spill] sm:$0xff] %v13123_v10  ;;  %v8267_v10 = vld [vmem:[%s17548_s0 + $0x328] sm:$0xff] }
 0x78f   :  { %18189 = vst [vmem:[#allocation634_spill] sm:$0xff] %v13125_v34  ;;  %v8458_v34 = vld [vmem:[%s17548_s0 + $0xa2] sm:$0xff] }
 0x792   :  { %4015 = vrot.lane.b32.xlu2 %v8266_v0, %s8782_s12  ;;  %4909 = vrot.lane.b32.xlu1 %v8457_v32, %s8784_s23  ;;  %v8330_v32 = vld [vmem:[%s17548_s0 + $0xa1] sm:$0xff] }
 0x793   :  { %4397 = vrot.lane.b32.xlu0 %v8329_v9, %s8783_s22 }
 0x794   :  { %v13139_v47 = vpop.permute.xlu2 %3981  ;;  %v13141_v24 = vpop.permute.xlu1 %3961 }
 0x795   :  { %18190 = vst [vmem:[#allocation635_spill] sm:$0xff] %v13139_v47  ;;  %v13143_v12 = vpop.permute.xlu0 %3959 }
 0x796   :  { %18191 = vst [vmem:[#allocation636_spill] sm:$0xff] %v13141_v24  ;;  %v8332_v24 = vld [vmem:[%s17548_s0 + $0xb1] sm:$0xff] }
 0x797   :  { %18192 = vst [vmem:[#allocation637_spill] sm:$0xff] %v13143_v12  ;;  %v8459_v12 = vld [vmem:[%s17548_s0 + $0xaa] sm:$0xff] }
 0x79a   :  { %4017 = vrot.lane.b32.xlu2 %v8267_v10, %s8782_s12  ;;  %4911 = vrot.lane.b32.xlu1 %v8458_v34, %s8784_s23  ;;  %v8331_v34 = vld [vmem:[%s17548_s0 + $0xa9] sm:$0xff] }
 0x79b   :  { %4399 = vrot.lane.b32.xlu0 %v8330_v32, %s8783_s22 }
 0x79c   :  { %v13157_v0 = vpop.permute.xlu2 %3987  ;;  %v13159_v9 = vpop.permute.xlu1 %3967 }
 0x79d   :  { %18193 = vst [vmem:[#allocation638_spill] sm:$0xff] %v13157_v0  ;;  %v13161_v47 = vpop.permute.xlu0 %3965 }
 0x79e   :  { %18194 = vst [vmem:[#allocation639_spill] sm:$0xff] %v13159_v9  ;;  %v8485_v9 = vld [vmem:[%s17548_s0 + $0x1aa] sm:$0xff] }
 0x79f   :  { %18195 = vst [vmem:[#allocation640_spill] sm:$0xff] %v13161_v47  ;;  %v8357_v47 = vld [vmem:[%s17548_s0 + $0x1a9] sm:$0xff] }
 0x7a2   :  { %4403 = vrot.lane.b32.xlu2 %v8332_v24, %s8783_s22  ;;  %4913 = vrot.lane.b32.xlu1 %v8459_v12, %s8784_s23  ;;  %v8460_v12 = vld [vmem:[%s17548_s0 + $0xb2] sm:$0xff] }
 0x7a3   :  { %4401 = vrot.lane.b32.xlu0 %v8331_v34, %s8783_s22 }
 0x7a4   :  { %v13175_v10 = vpop.permute.xlu2 %3993  ;;  %v13177_v32 = vpop.permute.xlu1 %3973 }
 0x7a5   :  { %18196 = vst [vmem:[#allocation641_spill] sm:$0xff] %v13175_v10  ;;  %v13179_v0 = vpop.permute.xlu0 %3971 }
 0x7a6   :  { %18197 = vst [vmem:[#allocation642_spill] sm:$0xff] %v13177_v32  ;;  %v6443_v32 = vld [vmem:[%s17549_s1 + $0x18] sm:$0xff] }
 0x7a7   :  { %18198 = vst [vmem:[#allocation643_spill] sm:$0xff] %v13179_v0  ;;  %v8358_v0 = vld [vmem:[%s17548_s0 + $0x1b9] sm:$0xff]  ;;  %6845 = vmatpush.msra.mxu0 %v6443_v32  ;;  %8710 = vmatpush.msra.mxu1 %v6443_v32 }
 0x7a8   :  { %8711 = vmatpush.msra.mxu2 %v6443_v32  ;;  %8712 = vmatpush.msra.mxu3 %v6443_v32  ;;  %v6440_v32 = vld [vmem:[%s17549_s1] sm:$0xff] }
 0x7aa   :  { %4965 = vrot.lane.b32.xlu2 %v8485_v9, %s8784_s23  ;;  %4453 = vrot.lane.b32.xlu1 %v8357_v47, %s8783_s22  ;;  %v8461_v47 = vld [vmem:[%s17548_s0 + $0xba] sm:$0xff] }
 0x7ab   :  { %4915 = vrot.lane.b32.xlu0 %v8460_v12, %s8784_s23  ;;  %v8333_v9 = vld [vmem:[%s17548_s0 + $0xb9] sm:$0xff]  ;;  %v6442_v12 = vld [vmem:[%s17549_s1 + $0x10] sm:$0xff] }
 0x7ac   :  { %v13193_v24 = vpop.permute.xlu2 %3999  ;;  %v13195_v34 = vpop.permute.xlu1 %3979  ;;  %6846 = vmatpush.msra.mxu0 %v6442_v12  ;;  %8713 = vmatpush.msra.mxu1 %v6442_v12 }
 0x7ad   :  { %18199 = vst [vmem:[#allocation644_spill] sm:$0xff] %v13193_v24  ;;  %v13197_v10 = vpop.permute.xlu0 %3977  ;;  %8714 = vmatpush.msra.mxu2 %v6442_v12  ;;  %8715 = vmatpush.msra.mxu3 %v6442_v12  ;;  %v8486_v12 = vld [vmem:[%s17548_s0 + $0x1ba] sm:$0xff] }
 0x7ae   :  { %18200 = vst [vmem:[#allocation645_spill] sm:$0xff] %v13195_v34 }
 0x7af   :  { %18201 = vst [vmem:[#allocation646_spill] sm:$0xff] %v13197_v10 }
 0x7b2   :  { %4455 = vrot.lane.b32.xlu2 %v8358_v0, %s8783_s22  ;;  %4917 = vrot.lane.b32.xlu1 %v8461_v47, %s8784_s23  ;;  %v6441_v0 = vld [vmem:[%s17549_s1 + $0x8] sm:$0xff] }
 0x7b3   :  { %4405 = vrot.lane.b32.xlu0 %v8333_v9, %s8783_s22  ;;  %6847 = vmatpush.msra.mxu0 %v6441_v0  ;;  %v8462_v47 = vld [vmem:[%s17548_s0 + $0xca] sm:$0xff] }
 0x7b4   :  { %v13217_v24 = vpop.permute.xlu2 %4005  ;;  %v13219_v34 = vpop.permute.xlu1 %3985  ;;  %8716 = vmatpush.msra.mxu1 %v6441_v0  ;;  %v8334_v9 = vld [vmem:[%s17548_s0 + $0xc9] sm:$0xff]  ;;  %8717 = vmatpush.msra.mxu2 %v6441_v0 }
 0x7b5   :  { %18202 = vst [vmem:[#allocation647_spill] sm:$0xff] %v13217_v24  ;;  %v13221_v10 = vpop.permute.xlu0 %3983  ;;  %8718 = vmatpush.msra.mxu3 %v6441_v0  ;;  %6848 = vmatpush.msra.mxu0 %v6440_v32  ;;  %v8335_v0 = vld [vmem:[%s17548_s0 + $0xd1] sm:$0xff] }
 0x7b6   :  { %18203 = vst [vmem:[#allocation648_spill] sm:$0xff] %v13219_v34  ;;  %8719 = vmatpush.msra.mxu1 %v6440_v32  ;;  %8720 = vmatpush.msra.mxu2 %v6440_v32 }
 0x7b7   :  { %18204 = vst [vmem:[#allocation649_spill] sm:$0xff] %v13221_v10  ;;  %8721 = vmatpush.msra.mxu3 %v6440_v32  ;;  %v8487_v32 = vld [vmem:[%s17548_s0 + $0x1c2] sm:$0xff] }
 0x7ba   :  { %4919 = vrot.lane.b32.xlu2 %v8462_v47, %s8784_s23  ;;  %4407 = vrot.lane.b32.xlu1 %v8334_v9, %s8783_s22  ;;  %v8359_v47 = vld [vmem:[%s17548_s0 + $0x1c1] sm:$0xff] }
 0x7bb   :  { %4967 = vrot.lane.b32.xlu0 %v8486_v12, %s8784_s23 }
 0x7bc   :  { %v13241_v24 = vpop.permute.xlu2 %4385  ;;  %v13243_v34 = vpop.permute.xlu1 %3991 }
 0x7bd   :  { %18205 = vst [vmem:[#allocation650_spill] sm:$0xff] %v13243_v34  ;;  %v13245_v10 = vpop.permute.xlu0 %3989 }
 0x7be   :  { %18206 = vst [vmem:[#allocation651_spill] sm:$0xff] %v13245_v10  ;;  %v8488_v10 = vld [vmem:[%s17548_s0 + $0x1ca] sm:$0xff] }
 0x7c2   :  { %4409 = vrot.lane.b32.xlu2 %v8335_v0, %s8783_s22  ;;  %4969 = vrot.lane.b32.xlu1 %v8487_v32, %s8784_s23  ;;  %v8463_v0 = vld [vmem:[%s17548_s0 + $0xd2] sm:$0xff] }
 0x7c3   :  { %4457 = vrot.lane.b32.xlu0 %v8359_v47, %s8783_s22 }
 0x7c4   :  { %v13259_v9 = vpop.permute.xlu2 %4387  ;;  %v13261_v12 = vpop.permute.xlu1 %3997 }
 0x7c5   :  { %18207 = vst [vmem:[#allocation652_spill] sm:$0xff] %v13261_v12  ;;  %v13263_v34 = vpop.permute.xlu0 %3995  ;;  %v29_v12 = vld [vmem:[%s17548_s0] sm:$0xff] }
 0x7c6   :  { %18208 = vst [vmem:[#allocation653_spill] sm:$0xff] %v13263_v34 }
 0x7ca   :  { %4971 = vrot.lane.b32.xlu2 %v8488_v10, %s8784_s23  ;;  %4459 = vrot.lane.b32.xlu1 %v8360_v5, %s8783_s22  ;;  %v8361_v10 = vld [vmem:[%s17548_s0 + $0x1d1] sm:$0xff]  ;;  %v8464_v5 = vld [vmem:[%s17548_s0 + $0xda] sm:$0xff] }
 0x7cb   :  { %4921 = vrot.lane.b32.xlu0 %v8463_v0, %s8784_s23  ;;  %v5280_v0 = vsel %vm5279_vm0, %v29_v12, %v9039_v50  ;;  %v30_v12 = vld [vmem:[%s17548_s0 + $0x8] sm:$0xff] }
 0x7cc   :  { %v13277_v32 = vpop.permute.xlu2 %4389  ;;  %v13279_v47 = vpop.permute.xlu1 %4003  ;;  %v5409_v4 = vsel %vm5408_vm1, %v5280_v0, %v9737_v41 }
 0x7cd   :  { %18209 = vst [vmem:[#allocation654_spill] sm:$0xff] %v13279_v47  ;;  %v13284_v34 = vpop.permute.xlu0 %4001  ;;  %v8336_v47 = vld [vmem:[%s17548_s0 + $0xd9] sm:$0xff] }
 0x7ce   :  { %18210 = vst [vmem:[#allocation655_spill] sm:$0xff] %v13284_v34  ;;  %v5538_v34 = vsel %vm5537_vm2, %v5409_v4, %v10567_v21 }
 0x7cf   :  { %v5667_v50 = vsel %vm5666_vm4, %v5538_v34, %v11343_v15  ;;  %v5281_v34 = vsel %vm5279_vm0, %v30_v12, %v9057_v56 }
 0x7d0   :  { %v5796_v41 = vsel %vm5795_vm3, %v5667_v50, %v12041_v1  ;;  %v8465_v1 = vld [vmem:[%s17548_s0 + $0xe2] sm:$0xff] }
 0x7d1   :  { %v5925_v21 = vsel %vm5924_vm5, %v5796_v41, %v12871_v27  ;;  %v5410_v27 = vsel %vm5408_vm1, %v5281_v34, %v9813_v45  ;;  %v8489_v41 = vld [vmem:[%s17548_s0 + $0x1d2] sm:$0xff] }
 0x7d2   :  { %4461 = vrot.lane.b32.xlu2 %v8361_v10, %s8783_s22  ;;  %4923 = vrot.lane.b32.xlu1 %v8464_v5, %s8784_s23  ;;  %v8337_v5 = vld [vmem:[%s17548_s0 + $0xe1] sm:$0xff]  ;;  %v5539_v56 = vsel %vm5537_vm2, %v5410_v27, %v10511_v57 }
 0x7d3   :  { %4411 = vrot.lane.b32.xlu0 %v8336_v47, %s8783_s22  ;;  %v5668_v12 = vsel %vm5666_vm4, %v5539_v56, %v11341_v23 }
 0x7d4   :  { %v13311_v0 = vpop.permute.xlu2 %4903  ;;  %v4896_v4 = vpop.permute.xlu1 %4895  ;;  %v5797_v45 = vsel %vm5795_vm3, %v5668_v12, %v12117_v11 }
 0x7d5   :  { %v4384_v10 = vpop.permute.xlu0 %4383  ;;  %v5926_v57 = vsel %vm5924_vm5, %v5797_v45, %v12815_v20  ;;  %v8490_v20 = vld [vmem:[%s17548_s0 + $0x1e2] sm:$0xff] }
 0x7d6   :  { %v6054_v15 = vsel %vm6053_vm7, %v5925_v21, %v4384_v10  ;;  %v6055_v23 = vsel %vm6053_vm7, %v5926_v57, %v13241_v24  ;;  %v8362_v24 = vld [vmem:[%s17548_s0 + $0x1e1] sm:$0xff]  ;;  %v8491_v57 = vld [vmem:[%s17548_s0 + $0x1ea] sm:$0xff] }
 0x7d7   :  { %v6183_v47 = vsel %vm6182_vm6, %v6054_v15, %v4896_v4  ;;  %v31_v4 = vld [vmem:[%s17548_s0 + $0x10] sm:$0xff] }
 0x7d8   :  { %v6312_v50 = vsel %vm6311_vm8, %v6183_v47, 0.0  ;;  %v5282_v11 = vsel %vm5279_vm0, %v31_v4, %v9037_v49 }
 0x7d9   :  { %8578 = vmatmul.msk.f32.vlgmr.msra.gmra.mxu0 %vm6448_vm9, %v6312_v50 }
 0x7da   :  { %4925 = vrot.lane.b32.xlu2 %v8465_v1, %s8784_s23  ;;  %4413 = vrot.lane.b32.xlu1 %v8337_v5, %s8783_s22  ;;  %v8338_v1 = vld [vmem:[%s17548_s0 + $0xf1] sm:$0xff]  ;;  %v5411_v5 = vsel %vm5408_vm1, %v5282_v11, %v9811_v31 }
 0x7db   :  { %4973 = vrot.lane.b32.xlu0 %v8489_v41, %s8784_s23  ;;  %v5540_v49 = vsel %vm5537_vm2, %v5411_v5, %v10587_v59  ;;  %v32_v31 = vld [vmem:[%s17548_s0 + $0x18] sm:$0xff] }
 0x7dc   :  { %v13346_v21 = vpop.permute.xlu2 %4905  ;;  %v13348_v10 = vpop.permute.xlu1 %4007  ;;  %v5669_v27 = vsel %vm5666_vm4, %v5540_v49, %v11285_v30  ;;  %v8364_v49 = vld [vmem:[%s17548_s0 + $0x1f1] sm:$0xff] }
 0x7dd   :  { %v4898_v15 = vpop.permute.xlu0 %4897  ;;  %v5798_v50 = vsel %vm5795_vm3, %v5669_v27, %v12115_v37  ;;  %v5283_v37 = vsel %vm5279_vm0, %v32_v31, %v9055_v55  ;;  %v33_v55 = vld [vmem:[%s17548_s0 + $0x28] sm:$0xff] }
 0x7de   :  { %v6184_v34 = vsel %vm6182_vm6, %v6055_v23, %v4898_v15  ;;  %v5927_v59 = vsel %vm5924_vm5, %v5798_v50, %v12891_v29  ;;  %v8363_v29 = vld [vmem:[%s17548_s0 + $0x1e9] sm:$0xff]  ;;  %v5412_v23 = vsel %vm5408_vm1, %v5283_v37, %v9755_v52  ;;  %v5284_v11 = vsel %vm5279_vm0, %v33_v55, %v8993_v36 }
 0x7df   :  { %v6313_v47 = vsel %vm6311_vm8, %v6184_v34, 0.0  ;;  %v6056_v30 = vsel %vm6053_vm7, %v5927_v59, %v13259_v9  ;;  %v8466_v9 = vld [vmem:[%s17548_s0 + $0xf2] sm:$0xff]  ;;  %v5541_v15 = vsel %vm5537_vm2, %v5412_v23, %v10585_v8 }
 0x7e0   :  { %v5670_v34 = vsel %vm5666_vm4, %v5541_v15, %v11361_v28  ;;  %v5413_v28 = vsel %vm5408_vm1, %v5284_v11, %v9831_v26  ;;  %v8467_v26 = vld [vmem:[%s17548_s0 + $0xfa] sm:$0xff] }
 0x7e1   :  { %8579 = vmatmul.msk.f32.gmra.mxu0 %vm6448_vm9, %v6313_v47  ;;  %v5799_v52 = vsel %vm5795_vm3, %v5670_v34, %v12059_v53  ;;  %v5542_v53 = vsel %vm5537_vm2, %v5413_v28, %v10529_v2  ;;  %v8339_v2 = vld [vmem:[%s17548_s0 + $0xf9] sm:$0xff] }
 0x7e2   :  { %4415 = vrot.lane.b32.xlu2 %v8338_v1, %s8783_s22  ;;  %4975 = vrot.lane.b32.xlu1 %v8490_v20, %s8784_s23  ;;  %v5928_v8 = vsel %vm5924_vm5, %v5799_v52, %v12889_v3  ;;  %v5671_v36 = vsel %vm5666_vm4, %v5542_v53, %v11359_v14  ;;  %v34_v14 = vld [vmem:[%s17548_s0 + $0x30] sm:$0xff]  ;;  %v8493_v11 = vld [vmem:[%s17548_s0 + $0x1fa] sm:$0xff] }
 0x7e3   :  { %4463 = vrot.lane.b32.xlu0 %v8362_v24, %s8783_s22  ;;  %v6057_v20 = vsel %vm6053_vm7, %v5928_v8, %v13277_v32  ;;  %v5800_v32 = vsel %vm5795_vm3, %v5671_v36, %v12135_v25  ;;  %v5285_v25 = vsel %vm5279_vm0, %v34_v14, %v9007_v40  ;;  %v8468_v40 = vld [vmem:[%s17548_s0 + $0x102] sm:$0xff] }
 0x7e4   :  { %v13382_v41 = vpop.permute.xlu2 %4907  ;;  %v13384_v56 = vpop.permute.xlu1 %4009  ;;  %v5929_v27 = vsel %vm5924_vm5, %v5800_v32, %v12833_v60 }
 0x7e5   :  { %v4900_v12 = vpop.permute.xlu0 %4899 }
 0x7e6   :  { %v6185_v45 = vsel %vm6182_vm6, %v6056_v30, %v4900_v12  ;;  %v5414_v30 = vsel %vm5408_vm1, %v5285_v25, %v9829_v38 }
 0x7e7   :  { %v6314_v4 = vsel %vm6311_vm8, %v6185_v45, 0.0  ;;  %v5543_v45 = vsel %vm5537_vm2, %v5414_v30, %v10605_v22  ;;  %v8492_v22 = vld [vmem:[%s17548_s0 + $0x1f2] sm:$0xff] }
 0x7e8   :  { %v5672_v37 = vsel %vm5666_vm4, %v5543_v45, %v11303_v58  ;;  %v35_v58 = vld [vmem:[%s17548_s0 + $0x38] sm:$0xff] }
 0x7e9   :  { %8580 = vmatmul.msk.f32.gmra.mxu0 %vm6448_vm9, %v6314_v4  ;;  %v8340_v4 = vld [vmem:[%s17548_s0 + $0x101] sm:$0xff]  ;;  %v5801_v38 = vsel %vm5795_vm3, %v5672_v37, %v12133_v17  ;;  %v5286_v17 = vsel %vm5279_vm0, %v35_v58, %v9075_v62  ;;  %v8341_v62 = vld [vmem:[%s17548_s0 + $0x109] sm:$0xff] }
 0x7ea   :  { %4977 = vrot.lane.b32.xlu2 %v8491_v57, %s8784_s23  ;;  %4465 = vrot.lane.b32.xlu1 %v8363_v29, %s8783_s22  ;;  %v5415_v55 = vsel %vm5408_vm1, %v5286_v17, %v9773_v46  ;;  %v18214_v17 = vld [vmem:[#allocation20_spill] sm:$0xff] }
 0x7eb   :  { %4927 = vrot.lane.b32.xlu0 %v8466_v9, %s8784_s23  ;;  %v5544_v34 = vsel %vm5537_vm2, %v5415_v55, %v10603_v35  ;;  %v8365_v35 = vld [vmem:[%s17548_s0 + $0x1f9] sm:$0xff]  ;;  %v18215_v55 = vld [vmem:[#allocation364_spill] sm:$0xff] }
 0x7ec   :  { %v13420_v47 = vpop.permute.xlu2 %4015  ;;  %v4392_v1 = vpop.permute.xlu1 %4391  ;;  %v5673_v52 = vsel %vm5666_vm4, %v5544_v34, %v11379_v16  ;;  %v36_v16 = vld [vmem:[%s17548_s0 + $0x40] sm:$0xff] }
 0x7ed   :  { %v4902_v5 = vpop.permute.xlu0 %4901  ;;  %v6058_v50 = vsel %vm6053_vm7, %v5929_v27, %v4392_v1  ;;  %v5802_v46 = vsel %vm5795_vm3, %v5673_v52, %v12077_v39  ;;  %v5287_v39 = vsel %vm5279_vm0, %v36_v16, %v9073_v61  ;;  %v8494_v61 = vld [vmem:[%s17548_s0 + $0x20a] sm:$0xff]  ;;  %v8471_v34 = vld [vmem:[%s17548_s0 + $0x122] sm:$0xff]  ;;  %v8495_v16 = vld [vmem:[%s17548_s0 + $0x212] sm:$0xff] }
 0x7ee   :  { %v6186_v24 = vsel %vm6182_vm6, %v6057_v20, %v4902_v5  ;;  %v6187_v12 = vsel %vm6182_vm6, %v6058_v50, %v13311_v0  ;;  %v5930_v0 = vsel %vm5924_vm5, %v5801_v38, %v12909_v33  ;;  %v5416_v5 = vsel %vm5408_vm1, %v5287_v39, %v9849_v18  ;;  %v18212_v38 = vld [vmem:[#allocation119_spill] sm:$0xff]  ;;  %v18219_v39 = vld [vmem:[#allocation601_spill] sm:$0xff] }
 0x7ef   :  { %v6315_v3 = vsel %vm6311_vm8, %v6186_v24, 0.0  ;;  %v6316_v57 = vsel %vm6311_vm8, %v6187_v12, 0.0  ;;  %v5545_v24 = vsel %vm5537_vm2, %v5416_v5, %v10547_v51  ;;  %v8469_v51 = vld [vmem:[%s17548_s0 + $0x10a] sm:$0xff]  ;;  %v8343_v52 = vld [vmem:[%s17548_s0 + $0x121] sm:$0xff]  ;;  %v18220_v5 = vld [vmem:[#allocation377_spill] sm:$0xff] }
 0x7f0   :  { %v5674_v36 = vsel %vm5666_vm4, %v5545_v24, %v11377_v54  ;;  %v37_v54 = vld [vmem:[%s17548_s0 + $0x50] sm:$0xff]  ;;  %v39_v24 = vld [vmem:[%s17548_s0 + $0x60] sm:$0xff] }
 0x7f1   :  { %8581 = vmatmul.msk.f32.gmra.mxu0 %vm6448_vm9, %v6315_v3  ;;  %v8366_v3 = vld [vmem:[%s17548_s0 + $0x209] sm:$0xff]  ;;  %v5803_v18 = vsel %vm5795_vm3, %v5674_v36, %v12153_v13  ;;  %v5288_v13 = vsel %vm5279_vm0, %v37_v54, %v9021_v44  ;;  %v8470_v44 = vld [vmem:[%s17548_s0 + $0x11a] sm:$0xff] }
 0x7f2   :  { %4467 = vrot.lane.b32.xlu2 %v8364_v49, %s8783_s22  ;;  %4929 = vrot.lane.b32.xlu1 %v8467_v26, %s8784_s23  ;;  %v5417_v14 = vsel %vm5408_vm1, %v5288_v13, %v9847_v42  ;;  %v18221_v36 = vld [vmem:[#allocation507_spill] sm:$0xff]  ;;  %v18223_v13 = vld [vmem:[#allocation6_spill] sm:$0xff] }
 0x7f3   :  { %4417 = vrot.lane.b32.xlu0 %v8339_v2, %s8783_s22  ;;  %v5546_v50 = vsel %vm5537_vm2, %v5417_v14, %v10623_v63  ;;  %v8342_v63 = vld [vmem:[%s17548_s0 + $0x119] sm:$0xff] }
 0x7f4   :  { %v13455_v31 = vpop.permute.xlu2 %4017  ;;  %v4394_v59 = vpop.permute.xlu1 %4393  ;;  %v5675_v25 = vsel %vm5666_vm4, %v5546_v50, %v11321_v19  ;;  %v38_v19 = vld [vmem:[%s17548_s0 + $0x58] sm:$0xff] }
 0x7f5   :  { %v13459_v60 = vpop.permute.xlu0 %4011  ;;  %v6059_v29 = vsel %vm6053_vm7, %v5930_v0, %v4394_v59  ;;  %v8367_v59 = vld [vmem:[%s17548_s0 + $0x211] sm:$0xff]  ;;  %v5804_v42 = vsel %vm5795_vm3, %v5675_v25, %v12151_v7  ;;  %v18211_v7 = vld [vmem:[#allocation7_spill] sm:$0xff] }
 0x7f6   :  { %v6188_v15 = vsel %vm6182_vm6, %v6059_v29, %v13346_v21  ;;  %v5931_v21 = vsel %vm5924_vm5, %v5802_v46, %v12907_v43  ;;  %v5933_v12 = vsel %vm5924_vm5, %v5804_v42, %v12927_v48  ;;  %v5289_v37 = vsel %vm5279_vm0, %v38_v19, %v18211_v7  ;;  %v18213_v0 = vld [vmem:[#allocation244_spill] sm:$0xff]  ;;  %v18226_v19 = vld [vmem:[#allocation363_spill] sm:$0xff] }
 0x7f7   :  { %v6317_v8 = vsel %vm6311_vm8, %v6188_v15, 0.0  ;;  %v18217_v46 = vld [vmem:[#allocation476_spill] sm:$0xff] }
 0x7f8   :  { %v8344_v25 = vld [vmem:[%s17548_s0 + $0x129] sm:$0xff] }
 0x7f9   :  { %8582 = vmatmul.msk.f32.gmra.mxu0 %vm6448_vm9, %v6316_v57  ;;  %v5418_v57 = vsel %vm5408_vm1, %v5289_v37, %v18212_v38  ;;  %v18228_v37 = vld [vmem:[#allocation596_spill] sm:$0xff] }
 0x7fa   :  { %4931 = vrot.lane.b32.xlu2 %v8468_v40, %s8784_s23  ;;  %4419 = vrot.lane.b32.xlu1 %v8340_v4, %s8783_s22  ;;  %v64_v40 = vld [vmem:[%s17548_s0 + $0x158] sm:$0xff]  ;;  %v5547_v29 = vsel %vm5537_vm2, %v5418_v57, %v18213_v0  ;;  %v65_v57 = vld [vmem:[%s17548_s0 + $0x168] sm:$0xff] }
 0x7fb   :  { %4979 = vrot.lane.b32.xlu0 %v8492_v22, %s8784_s23  ;;  %v5676_v15 = vsel %vm5666_vm4, %v5547_v29, %v18215_v55  ;;  %v18230_v29 = vld [vmem:[#allocation126_spill] sm:$0xff] }
 0x7fc   :  { %v13491_v23 = vpop.permute.xlu2 %4403  ;;  %v4396_v9 = vpop.permute.xlu1 %4395 }
 0x7fd   :  { %v13495_v33 = vpop.permute.xlu0 %4013  ;;  %v6060_v1 = vsel %vm6053_vm7, %v5931_v21, %v4396_v9  ;;  %v5315_v9 = vsel %vm5279_vm0, %v64_v40, %v18214_v17  ;;  %v18218_v21 = vld [vmem:[#allocation271_spill] sm:$0xff] }
 0x7fe   :  { %v6189_v53 = vsel %vm6182_vm6, %v6060_v1, %v13382_v41  ;;  %v5932_v41 = vsel %vm5924_vm5, %v5803_v18, %v12851_v6 }
 0x7ff   :  { %v6318_v49 = vsel %vm6311_vm8, %v6189_v53, 0.0 }
 0x801   :  { %8583 = vmatmul.msk.f32.gmra.mxu0 %vm6448_vm9, %v6317_v8  ;;  %v5805_v8 = vsel %vm5795_vm3, %v5676_v15, %v18217_v46  ;;  %v18231_v15 = vld [vmem:[#allocation247_spill] sm:$0xff] }
 0x802   :  { %4421 = vrot.lane.b32.xlu2 %v8341_v62, %s8783_s22  ;;  %4981 = vrot.lane.b32.xlu1 %v8493_v11, %s8784_s23  ;;  %v18216_v62 = vld [vmem:[#allocation150_spill] sm:$0xff] }
 0x803   :  { %4469 = vrot.lane.b32.xlu0 %v8365_v35, %s8783_s22  ;;  %v5444_v11 = vsel %vm5408_vm1, %v5315_v9, %v18216_v62 }
 0x804   :  { %v13527_v28 = vpop.permute.xlu2 %4965  ;;  %v4910_v20 = vpop.permute.xlu1 %4909  ;;  %v5573_v1 = vsel %vm5537_vm2, %v5444_v11, %v18218_v21  ;;  %v18233_v11 = vld [vmem:[#allocation359_spill] sm:$0xff] }
 0x805   :  { %v4398_v43 = vpop.permute.xlu0 %4397  ;;  %v18235_v21 = vld [vmem:[#allocation483_spill] sm:$0xff] }
 0x806   :  { %v6061_v26 = vsel %vm6053_vm7, %v5932_v41, %v4398_v43  ;;  %v5702_v43 = vsel %vm5666_vm4, %v5573_v1, %v18220_v5  ;;  %v41_v5 = vld [vmem:[%s17548_s0 + $0x78] sm:$0xff] }
 0x807   :  { %v6190_v27 = vsel %vm6182_vm6, %v6061_v26, %v4910_v20  ;;  %v5934_v20 = vsel %vm5924_vm5, %v5805_v8, %v18219_v39  ;;  %v8369_v8 = vld [vmem:[%s17548_s0 + $0x221] sm:$0xff] }
 0x808   :  { %v6319_v30 = vsel %vm6311_vm8, %v6190_v27, 0.0 }
 0x809   :  { %8584 = vmatmul.msk.f32.gmra.mxu0 %vm6448_vm9, %v6318_v49 }
 0x80a   :  { %4983 = vrot.lane.b32.xlu2 %v8494_v61, %s8784_s23  ;;  %4471 = vrot.lane.b32.xlu1 %v8366_v3, %s8783_s22  ;;  %v5831_v61 = vsel %vm5795_vm3, %v5702_v43, %v18221_v36  ;;  %v18222_v3 = vld [vmem:[#allocation628_spill] sm:$0xff]  ;;  %v18236_v43 = vld [vmem:[#allocation270_spill] sm:$0xff] }
 0x80b   :  { %4933 = vrot.lane.b32.xlu0 %v8469_v51, %s8784_s23  ;;  %v5960_v18 = vsel %vm5924_vm5, %v5831_v61, %v18222_v3  ;;  %v18238_v61 = vld [vmem:[#allocation391_spill] sm:$0xff] }
 0x80c   :  { %v13561_v32 = vpop.permute.xlu2 %4455  ;;  %v4912_v2 = vpop.permute.xlu1 %4911 }
 0x80d   :  { %v4400_v6 = vpop.permute.xlu0 %4399 }
 0x80e   :  { %v6062_v45 = vsel %vm6053_vm7, %v5933_v12, %v4400_v6  ;;  %v18224_v6 = vld [vmem:[#allocation127_spill] sm:$0xff] }
 0x80f   :  { %v6191_v58 = vsel %vm6182_vm6, %v6062_v45, %v4912_v2  ;;  %v5290_v2 = vsel %vm5279_vm0, %v39_v24, %v18223_v13  ;;  %v18227_v45 = vld [vmem:[#allocation484_spill] sm:$0xff]  ;;  %v18241_v13 = vld [vmem:[#allocation627_spill] sm:$0xff] }
 0x810   :  { %v6320_v35 = vsel %vm6311_vm8, %v6191_v58, 0.0  ;;  %v5419_v27 = vsel %vm5408_vm1, %v5290_v2, %v18224_v6  ;;  %v18237_v24 = vld [vmem:[#allocation604_spill] sm:$0xff] }
 0x811   :  { %8585 = vmatmul.msk.f32.gmra.mxu0 %vm6448_vm9, %v6319_v30 }
 0x812   :  { %4473 = vrot.lane.b32.xlu2 %v8367_v59, %s8783_s22  ;;  %4935 = vrot.lane.b32.xlu1 %v8470_v44, %s8784_s23  ;;  %v8496_v59 = vld [vmem:[%s17548_s0 + $0x21a] sm:$0xff]  ;;  %v18225_v44 = vld [vmem:[#allocation239_spill] sm:$0xff] }
 0x813   :  { %4423 = vrot.lane.b32.xlu0 %v8342_v63, %s8783_s22  ;;  %v5548_v42 = vsel %vm5537_vm2, %v5419_v27, %v18225_v44  ;;  %v40_v63 = vld [vmem:[%s17548_s0 + $0x68] sm:$0xff]  ;;  %v66_v27 = vld [vmem:[%s17548_s0 + $0x170] sm:$0xff] }
 0x814   :  { %v13597_v4 = vpop.permute.xlu2 %4919  ;;  %v4914_v48 = vpop.permute.xlu1 %4913  ;;  %v5677_v12 = vsel %vm5666_vm4, %v5548_v42, %v18226_v19  ;;  %v18244_v19 = vld [vmem:[#allocation367_spill] sm:$0xff] }
 0x815   :  { %v4402_v22 = vpop.permute.xlu0 %4401  ;;  %v5806_v7 = vsel %vm5795_vm3, %v5677_v12, %v18227_v45 }
 0x816   :  { %v6063_v53 = vsel %vm6053_vm7, %v5934_v20, %v4402_v22  ;;  %v5935_v40 = vsel %vm5924_vm5, %v5806_v7, %v18228_v37  ;;  %v8472_v20 = vld [vmem:[%s17548_s0 + $0x12a] sm:$0xff]  ;;  %v18245_v37 = vld [vmem:[#allocation33_spill] sm:$0xff] }
 0x817   :  { %v6192_v26 = vsel %vm6182_vm6, %v6063_v53, %v4914_v48  ;;  %v18229_v48 = vld [vmem:[#allocation2_spill] sm:$0xff]  ;;  %v6064_v22 = vsel %vm6053_vm7, %v5935_v40, %v13491_v23  ;;  %v8345_v7 = vld [vmem:[%s17548_s0 + $0x131] sm:$0xff]  ;;  %v5317_v40 = vsel %vm5279_vm0, %v66_v27, %v18245_v37 }
 0x818   :  { %v6321_v30 = vsel %vm6311_vm8, %v6192_v26, 0.0  ;;  %v5291_v38 = vsel %vm5279_vm0, %v40_v63, %v18229_v48  ;;  %v8390_v23 = vld [vmem:[%s17548_s0 + $0x2f9] sm:$0xff]  ;;  %v18246_v48 = vld [vmem:[#allocation479_spill] sm:$0xff] }
 0x819   :  { %8586 = vmatmul.msk.f32.gmra.mxu0 %vm6448_vm9, %v6320_v35  ;;  %v5420_v17 = vsel %vm5408_vm1, %v5291_v38, %v18230_v29  ;;  %v18234_v35 = vld [vmem:[#allocation140_spill] sm:$0xff] }
 0x81a   :  { %4937 = vrot.lane.b32.xlu2 %v8471_v34, %s8784_s23  ;;  %4425 = vrot.lane.b32.xlu1 %v8343_v52, %s8783_s22  ;;  %v5549_v34 = vsel %vm5537_vm2, %v5420_v17, %v18231_v15  ;;  %v18232_v52 = vld [vmem:[#allocation34_spill] sm:$0xff]  ;;  %v18248_v17 = vld [vmem:[#allocation603_spill] sm:$0xff] }
 0x81b   :  { %4985 = vrot.lane.b32.xlu0 %v8495_v16, %s8784_s23  ;;  %v5316_v62 = vsel %vm5279_vm0, %v65_v57, %v18232_v52  ;;  %v5678_v46 = vsel %vm5666_vm4, %v5549_v34, %v18233_v11  ;;  %v18250_v52 = vld [vmem:[#allocation390_spill] sm:$0xff] }
 0x81c   :  { %v13640_v49 = vpop.permute.xlu2 %4409  ;;  %v4454_v51 = vpop.permute.xlu1 %4453  ;;  %v5445_v16 = vsel %vm5408_vm1, %v5316_v62, %v18234_v35  ;;  %v5807_v1 = vsel %vm5795_vm3, %v5678_v46, %v18235_v21  ;;  %v42_v11 = vld [vmem:[%s17548_s0 + $0x80] sm:$0xff]  ;;  %v67_v46 = vld [vmem:[%s17548_s0 + $0x178] sm:$0xff] }
 0x81d   :  { %v6089_v54 = vsel %vm6053_vm7, %v5960_v18, %v4454_v51  ;;  %v4916_v41 = vpop.permute.xlu0 %4915  ;;  %v5574_v53 = vsel %vm5537_vm2, %v5445_v16, %v18236_v43  ;;  %v5936_v36 = vsel %vm5924_vm5, %v5807_v1, %v18237_v24  ;;  %v18239_v51 = vld [vmem:[#allocation497_spill] sm:$0xff]  ;;  %v18254_v24 = vld [vmem:[#allocation23_spill] sm:$0xff] }
 0x81e   :  { %v6218_v14 = vsel %vm6182_vm6, %v6089_v54, %v13527_v28  ;;  %v8368_v28 = vld [vmem:[%s17548_s0 + $0x219] sm:$0xff]  ;;  %v6193_v9 = vsel %vm6182_vm6, %v6064_v22, %v4916_v41  ;;  %v5703_v3 = vsel %vm5666_vm4, %v5574_v53, %v18238_v61  ;;  %v8497_v22 = vld [vmem:[%s17548_s0 + $0x222] sm:$0xff] }
 0x81f   :  { %v6347_v50 = vsel %vm6311_vm8, %v6218_v14, 0.0  ;;  %v6322_v39 = vsel %vm6311_vm8, %v6193_v9, 0.0  ;;  %v5832_v54 = vsel %vm5795_vm3, %v5703_v3, %v18239_v51  ;;  %v18240_v41 = vld [vmem:[#allocation10_spill] sm:$0xff]  ;;  %v18252_v21 = vld [vmem:[#allocation617_spill] sm:$0xff] }
 0x820   :  { %8613 = vmatmul.msk.f32.vlgmr.msra.gmra.mxu1 %vm6448_vm9, %v6347_v50  ;;  %v5292_v26 = vsel %vm5279_vm0, %v41_v5, %v18240_v41  ;;  %v5961_v2 = vsel %vm5924_vm5, %v5832_v54, %v18241_v13  ;;  %v18242_v50 = vld [vmem:[#allocation122_spill] sm:$0xff]  ;;  %v18253_v43 = vld [vmem:[#allocation9_spill] sm:$0xff] }
 0x821   :  { %8587 = vmatmul.msk.f32.gmra.mxu0 %vm6448_vm9, %v6321_v30  ;;  %v18243_v30 = vld [vmem:[#allocation246_spill] sm:$0xff]  ;;  %v5293_v53 = vsel %vm5279_vm0, %v42_v11, %v18253_v43  ;;  %v18256_v54 = vld [vmem:[#allocation153_spill] sm:$0xff] }
 0x822   :  { %4427 = vrot.lane.b32.xlu2 %v8344_v25, %s8783_s22  ;;  %4987 = vrot.lane.b32.xlu1 %v8496_v59, %s8784_s23  ;;  %v5421_v25 = vsel %vm5408_vm1, %v5292_v26, %v18242_v50  ;;  %v6090_v59 = vsel %vm6053_vm7, %v5961_v2, %v13561_v32  ;;  %v8518_v32 = vld [vmem:[%s17548_s0 + $0x2fa] sm:$0xff]  ;;  %v8473_v2 = vld [vmem:[%s17548_s0 + $0x132] sm:$0xff] }
 0x823   :  { %4475 = vrot.lane.b32.xlu0 %v8368_v28, %s8783_s22  ;;  %v5550_v28 = vsel %vm5537_vm2, %v5421_v25, %v18243_v30  ;;  %v8391_v3 = vld [vmem:[%s17548_s0 + $0x301] sm:$0xff] }
 0x824   :  { %v13684_v58 = vpop.permute.xlu2 %4971  ;;  %v4918_v0 = vpop.permute.xlu1 %4917  ;;  %v5679_v12 = vsel %vm5666_vm4, %v5550_v28, %v18244_v19  ;;  %v18255_v51 = vld [vmem:[#allocation130_spill] sm:$0xff]  ;;  %v18261_v28 = vld [vmem:[#allocation487_spill] sm:$0xff] }
 0x825   :  { %v4406_v55 = vpop.permute.xlu0 %4405  ;;  %v5808_v38 = vsel %vm5795_vm3, %v5679_v12, %v18246_v48  ;;  %v18258_v50 = vld [vmem:[#allocation274_spill] sm:$0xff] }
 0x826   :  { %v6065_v18 = vsel %vm6053_vm7, %v5936_v36, %v4406_v55  ;;  %v5937_v9 = vsel %vm5924_vm5, %v5808_v38, %v18248_v17  ;;  %v18249_v55 = vld [vmem:[#allocation260_spill] sm:$0xff]  ;;  %v5318_v36 = vsel %vm5279_vm0, %v67_v46, %v18254_v24  ;;  %v18262_v19 = vld [vmem:[#allocation510_spill] sm:$0xff]  ;;  %v43_v38 = vld [vmem:[%s17548_s0 + $0x88] sm:$0xff] }
 0x827   :  { %v6194_v42 = vsel %vm6182_vm6, %v6065_v18, %v4918_v0  ;;  %v18247_v0 = vld [vmem:[#allocation154_spill] sm:$0xff]  ;;  %v8370_v18 = vld [vmem:[%s17548_s0 + $0x231] sm:$0xff]  ;;  %v5447_v41 = vsel %vm5408_vm1, %v5318_v36, %v18256_v54 }
 0x828   :  { %v6323_v57 = vsel %vm6311_vm8, %v6194_v42, 0.0  ;;  %v5446_v29 = vsel %vm5408_vm1, %v5317_v40, %v18247_v0  ;;  %v5576_v25 = vsel %vm5537_vm2, %v5447_v41, %v18258_v50  ;;  %v18260_v42 = vld [vmem:[#allocation380_spill] sm:$0xff]  ;;  %v18267_v46 = vld [vmem:[#allocation250_spill] sm:$0xff] }
 0x829   :  { %8588 = vmatmul.msk.f32.gmra.mxu0 %vm6448_vm9, %v6322_v39  ;;  %v5575_v15 = vsel %vm5537_vm2, %v5446_v29, %v18249_v55  ;;  %v5705_v30 = vsel %vm5666_vm4, %v5576_v25, %v18260_v42  ;;  %v8392_v41 = vld [vmem:[%s17548_s0 + $0x309] sm:$0xff]  ;;  %v18276_v42 = vld [vmem:[#allocation273_spill] sm:$0xff] }
 0x82a   :  { %4519 = vrot.lane.b32.xlu2 %v8390_v23, %s8783_s22  ;;  %4477 = vrot.lane.b32.xlu1 %v8369_v8, %s8783_s22  ;;  %v5704_v62 = vsel %vm5666_vm4, %v5575_v15, %v18250_v52  ;;  %v18251_v23 = vld [vmem:[#allocation511_spill] sm:$0xff]  ;;  %v5834_v12 = vsel %vm5795_vm3, %v5705_v30, %v18262_v19  ;;  %v18278_v19 = vld [vmem:[#allocation394_spill] sm:$0xff] }
 0x82b   :  { %4939 = vrot.lane.b32.xlu0 %v8472_v20, %s8784_s23  ;;  %v5833_v8 = vsel %vm5795_vm3, %v5704_v62, %v18251_v23  ;;  %v8346_v15 = vld [vmem:[%s17548_s0 + $0x141] sm:$0xff]  ;;  %v8498_v62 = vld [vmem:[%s17548_s0 + $0x232] sm:$0xff] }
 0x82c   :  { %v13729_v14 = vpop.permute.xlu2 %4461  ;;  %v4408_v6 = vpop.permute.xlu1 %4407  ;;  %v5962_v1 = vsel %vm5924_vm5, %v5833_v8, %v18252_v21  ;;  %v18268_v8 = vld [vmem:[#allocation360_spill] sm:$0xff]  ;;  %v8474_v25 = vld [vmem:[%s17548_s0 + $0x142] sm:$0xff] }
 0x82d   :  { %v4968_v44 = vpop.permute.xlu0 %4967  ;;  %v6066_v34 = vsel %vm6053_vm7, %v5937_v9, %v4408_v6  ;;  %v18257_v6 = vld [vmem:[#allocation241_spill] sm:$0xff]  ;;  %v44_v21 = vld [vmem:[%s17548_s0 + $0x90] sm:$0xff] }
 0x82e   :  { %v6219_v63 = vsel %vm6182_vm6, %v6090_v59, %v4968_v44  ;;  %v6195_v20 = vsel %vm6182_vm6, %v6066_v34, %v13597_v4  ;;  %v5422_v4 = vsel %vm5408_vm1, %v5293_v53, %v18255_v51  ;;  %v18259_v59 = vld [vmem:[#allocation366_spill] sm:$0xff]  ;;  %v18265_v34 = vld [vmem:[#allocation3_spill] sm:$0xff]  ;;  %v18272_v51 = vld [vmem:[#allocation37_spill] sm:$0xff] }
 0x82f   :  { %v6348_v45 = vsel %vm6311_vm8, %v6219_v63, 0.0  ;;  %v6324_v26 = vsel %vm6311_vm8, %v6195_v20, 0.0  ;;  %v5551_v27 = vsel %vm5537_vm2, %v5422_v4, %v18257_v6  ;;  %v5294_v52 = vsel %vm5279_vm0, %v43_v38, %v18265_v34  ;;  %v18270_v53 = vld [vmem:[#allocation607_spill] sm:$0xff] }
 0x830   :  { %8614 = vmatmul.msk.f32.gmra.mxu1 %vm6448_vm9, %v6348_v45  ;;  %v5680_v44 = vsel %vm5666_vm4, %v5551_v27, %v18259_v59  ;;  %v18263_v45 = vld [vmem:[#allocation598_spill] sm:$0xff]  ;;  %v18274_v6 = vld [vmem:[#allocation143_spill] sm:$0xff]  ;;  %v18275_v59 = vld [vmem:[#allocation249_spill] sm:$0xff] }
 0x831   :  { %8589 = vmatmul.msk.f32.gmra.mxu0 %vm6448_vm9, %v6323_v57  ;;  %v5809_v63 = vsel %vm5795_vm3, %v5680_v44, %v18261_v28  ;;  %v18277_v28 = vld [vmem:[#allocation370_spill] sm:$0xff] }
 0x832   :  { %4429 = vrot.lane.b32.xlu2 %v8345_v7, %s8783_s22  ;;  %5031 = vrot.lane.b32.xlu1 %v8518_v32, %s8784_s23  ;;  %v5938_v7 = vsel %vm5924_vm5, %v5809_v63, %v18263_v45  ;;  %v18264_v32 = vld [vmem:[#allocation631_spill] sm:$0xff]  ;;  %v18279_v45 = vld [vmem:[#allocation480_spill] sm:$0xff] }
 0x833   :  { %4989 = vrot.lane.b32.xlu0 %v8497_v22, %s8784_s23  ;;  %v5963_v37 = vsel %vm5924_vm5, %v5834_v12, %v18264_v32  ;;  %v6067_v57 = vsel %vm6053_vm7, %v5938_v7, %v13640_v49  ;;  %v8519_v49 = vld [vmem:[%s17548_s0 + $0x302] sm:$0xff]  ;;  %v18280_v32 = vld [vmem:[#allocation500_spill] sm:$0xff] }
 0x834   :  { %v13781_v35 = vpop.permute.xlu2 %4925  ;;  %v4970_v16 = vpop.permute.xlu1 %4969 }
 0x835   :  { %v4458_v39 = vpop.permute.xlu0 %4457 }
 0x836   :  { %v6091_v5 = vsel %vm6053_vm7, %v5962_v1, %v4458_v39  ;;  %v68_v1 = vld [vmem:[%s17548_s0 + $0x180] sm:$0xff] }
 0x837   :  { %v6220_v61 = vsel %vm6182_vm6, %v6091_v5, %v4970_v16  ;;  %v18269_v39 = vld [vmem:[#allocation486_spill] sm:$0xff]  ;;  %v5319_v4 = vsel %vm5279_vm0, %v68_v1, %v18272_v51  ;;  %v18286_v1 = vld [vmem:[#allocation393_spill] sm:$0xff] }
 0x838   :  { %v6349_v13 = vsel %vm6311_vm8, %v6220_v61, 0.0  ;;  %v5448_v27 = vsel %vm5408_vm1, %v5319_v4, %v18274_v6 }
 0x839   :  { %8590 = vmatmul.msk.f32.gmra.mxu0 %vm6448_vm9, %v6324_v26  ;;  %8615 = vmatmul.msk.f32.gmra.mxu1 %vm6448_vm9, %v6349_v13  ;;  %v8371_v26 = vld [vmem:[%s17548_s0 + $0x239] sm:$0xff]  ;;  %v18273_v13 = vld [vmem:[#allocation123_spill] sm:$0xff]  ;;  %v5577_v30 = vsel %vm5537_vm2, %v5448_v27, %v18276_v42 }
 0x83a   :  { %4521 = vrot.lane.b32.xlu2 %v8391_v3, %s8783_s22  ;;  %4479 = vrot.lane.b32.xlu1 %v8370_v18, %s8783_s22  ;;  %v18271_v3 = vld [vmem:[#allocation13_spill] sm:$0xff]  ;;  %v5706_v12 = vsel %vm5666_vm4, %v5577_v30, %v18278_v19  ;;  %v8347_v27 = vld [vmem:[%s17548_s0 + $0x149] sm:$0xff] }
 0x83b   :  { %4941 = vrot.lane.b32.xlu0 %v8473_v2, %s8784_s23  ;;  %v5295_v18 = vsel %vm5279_vm0, %v44_v21, %v18271_v3  ;;  %v18288_v3 = vld [vmem:[#allocation620_spill] sm:$0xff] }
 0x83c   :  { %v13829_v40 = vpop.permute.xlu2 %4415  ;;  %v4460_v48 = vpop.permute.xlu1 %4459  ;;  %v5424_v2 = vsel %vm5408_vm1, %v5295_v18, %v18273_v13  ;;  %v18290_v13 = vld [vmem:[#allocation26_spill] sm:$0xff] }
 0x83d   :  { %v6092_v22 = vsel %vm6053_vm7, %v5963_v37, %v4460_v48  ;;  %v4922_v0 = vpop.permute.xlu0 %4921  ;;  %v5553_v44 = vsel %vm5537_vm2, %v5424_v2, %v18275_v59  ;;  %v5835_v37 = vsel %vm5795_vm3, %v5706_v12, %v18280_v32  ;;  %v18281_v48 = vld [vmem:[#allocation606_spill] sm:$0xff]  ;;  %v18294_v12 = vld [vmem:[#allocation277_spill] sm:$0xff] }
 0x83e   :  { %v6196_v29 = vsel %vm6182_vm6, %v6067_v57, %v4922_v0  ;;  %v6221_v17 = vsel %vm6182_vm6, %v6092_v22, %v13684_v58  ;;  %v18266_v58 = vld [vmem:[#allocation129_spill] sm:$0xff]  ;;  %v5682_v63 = vsel %vm5666_vm4, %v5553_v44, %v18277_v28  ;;  %v18282_v57 = vld [vmem:[#allocation630_spill] sm:$0xff]  ;;  %v18292_v44 = vld [vmem:[#allocation156_spill] sm:$0xff] }
 0x83f   :  { %v6325_v9 = vsel %vm6311_vm8, %v6196_v29, 0.0  ;;  %v6350_v55 = vsel %vm6311_vm8, %v6221_v17, 0.0  ;;  %v5423_v11 = vsel %vm5408_vm1, %v5294_v52, %v18266_v58  ;;  %v5811_v7 = vsel %vm5795_vm3, %v5682_v63, %v18279_v45  ;;  %v69_v17 = vld [vmem:[%s17548_s0 + $0x190] sm:$0xff]  ;;  %v8417_v28 = vld [vmem:[%s17548_s0 + $0x401] sm:$0xff] }
 0x840   :  { %v5552_v23 = vsel %vm5537_vm2, %v5423_v11, %v18267_v46  ;;  %v5940_v38 = vsel %vm5924_vm5, %v5811_v7, %v18281_v48  ;;  %v5964_v22 = vsel %vm5924_vm5, %v5835_v37, %v18282_v57  ;;  %v8520_v58 = vld [vmem:[%s17548_s0 + $0x30a] sm:$0xff]  ;;  %v18293_v63 = vld [vmem:[#allocation242_spill] sm:$0xff]  ;;  %v18295_v7 = vld [vmem:[#allocation369_spill] sm:$0xff] }
 0x841   :  { %8591 = vmatmul.msk.f32.gmra.mxu0 %vm6448_vm9, %v6325_v9  ;;  %8616 = vmatmul.msk.f32.gmra.mxu1 %vm6448_vm9, %v6350_v55  ;;  %v5681_v16 = vsel %vm5666_vm4, %v5552_v23, %v18268_v8  ;;  %v6093_v9 = vsel %vm6053_vm7, %v5964_v22, %v13729_v14  ;;  %v8499_v14 = vld [vmem:[%s17548_s0 + $0x23a] sm:$0xff]  ;;  %v18283_v11 = vld [vmem:[#allocation36_spill] sm:$0xff]  ;;  %v18296_v37 = vld [vmem:[#allocation383_spill] sm:$0xff] }
 0x842   :  { %4431 = vrot.lane.b32.xlu2 %v8346_v15, %s8783_s22  ;;  %5033 = vrot.lane.b32.xlu1 %v8519_v49, %s8784_s23  ;;  %v5810_v20 = vsel %vm5795_vm3, %v5681_v16, %v18269_v39  ;;  %v5320_v46 = vsel %vm5279_vm0, %v69_v17, %v18283_v11  ;;  %v18284_v23 = vld [vmem:[#allocation157_spill] sm:$0xff]  ;;  %v18285_v16 = vld [vmem:[#allocation263_spill] sm:$0xff] }
 0x843   :  { %4991 = vrot.lane.b32.xlu0 %v8498_v62, %s8784_s23  ;;  %v5939_v24 = vsel %vm5924_vm5, %v5810_v20, %v18270_v53  ;;  %v5449_v8 = vsel %vm5408_vm1, %v5320_v46, %v18284_v23  ;;  %v45_v20 = vld [vmem:[%s17548_s0 + $0xa0] sm:$0xff]  ;;  %v18298_v22 = vld [vmem:[#allocation513_spill] sm:$0xff]  ;;  %v18299_v17 = vld [vmem:[#allocation599_spill] sm:$0xff] }
 0x844   :  { %v13872_v5 = vpop.permute.xlu2 %4977  ;;  %v4924_v43 = vpop.permute.xlu1 %4923  ;;  %v5578_v21 = vsel %vm5537_vm2, %v5449_v8, %v18285_v16  ;;  %v18287_v53 = vld [vmem:[#allocation514_spill] sm:$0xff]  ;;  %v8393_v16 = vld [vmem:[%s17548_s0 + $0x311] sm:$0xff] }
 0x845   :  { %v4412_v36 = vpop.permute.xlu0 %4411  ;;  %v5707_v39 = vsel %vm5666_vm4, %v5578_v21, %v18286_v1  ;;  %v18301_v21 = vld [vmem:[#allocation4_spill] sm:$0xff] }
 0x846   :  { %v6068_v61 = vsel %vm6053_vm7, %v5939_v24, %v4412_v36  ;;  %v5836_v24 = vsel %vm5795_vm3, %v5707_v39, %v18287_v53  ;;  %v18302_v39 = vld [vmem:[#allocation132_spill] sm:$0xff] }
 0x847   :  { %v6197_v54 = vsel %vm6182_vm6, %v6068_v61, %v4924_v43  ;;  %v70_v43 = vld [vmem:[%s17548_s0 + $0x198] sm:$0xff]  ;;  %v5965_v18 = vsel %vm5924_vm5, %v5836_v24, %v18288_v3  ;;  %v47_v3 = vld [vmem:[%s17548_s0 + $0xb0] sm:$0xff] }
 0x848   :  { %v6326_v50 = vsel %vm6311_vm8, %v6197_v54, 0.0  ;;  %v5321_v2 = vsel %vm5279_vm0, %v70_v43, %v18290_v13  ;;  %v18303_v43 = vld [vmem:[#allocation253_spill] sm:$0xff]  ;;  %v18306_v13 = vld [vmem:[#allocation610_spill] sm:$0xff] }
 0x849   :  { %8592 = vmatmul.msk.f32.gmra.mxu0 %vm6448_vm9, %v6326_v50  ;;  %v8545_v50 = vld [vmem:[%s17548_s0 + $0x402] sm:$0xff]  ;;  %v5450_v42 = vsel %vm5408_vm1, %v5321_v2, %v18292_v44  ;;  %v18304_v24 = vld [vmem:[#allocation361_spill] sm:$0xff]  ;;  %v18308_v44 = vld [vmem:[#allocation40_spill] sm:$0xff] }
 0x84a   :  { %4523 = vrot.lane.b32.xlu2 %v8392_v41, %s8783_s22  ;;  %4481 = vrot.lane.b32.xlu1 %v8371_v26, %s8783_s22  ;;  %v18289_v41 = vld [vmem:[#allocation12_spill] sm:$0xff]  ;;  %v5579_v45 = vsel %vm5537_vm2, %v5450_v42, %v18294_v12 }
 0x84b   :  { %4943 = vrot.lane.b32.xlu0 %v8474_v25, %s8784_s23  ;;  %v5296_v26 = vsel %vm5279_vm0, %v45_v20, %v18289_v41  ;;  %v18291_v25 = vld [vmem:[#allocation133_spill] sm:$0xff]  ;;  %v5708_v48 = vsel %vm5666_vm4, %v5579_v45, %v18296_v37  ;;  %v18310_v45 = vld [vmem:[#allocation146_spill] sm:$0xff]  ;;  %v8290_v37 = vld [vmem:[%s17548_s0 + $0x410] sm:$0xff] }
 0x84c   :  { %v13916_v0 = vpop.permute.xlu2 %4467  ;;  %v4414_v29 = vpop.permute.xlu1 %4413  ;;  %v5425_v59 = vsel %vm5408_vm1, %v5296_v26, %v18291_v25  ;;  %v18307_v25 = vld [vmem:[#allocation16_spill] sm:$0xff] }
 0x84d   :  { %v6069_v55 = vsel %vm6053_vm7, %v5940_v38, %v4414_v29  ;;  %v4974_v15 = vpop.permute.xlu0 %4973  ;;  %v5554_v19 = vsel %vm5537_vm2, %v5425_v59, %v18293_v63  ;;  %v18297_v38 = vld [vmem:[#allocation490_spill] sm:$0xff]  ;;  %v5837_v29 = vsel %vm5795_vm3, %v5708_v48, %v18298_v22  ;;  %v5298_v59 = vsel %vm5279_vm0, %v47_v3, %v18307_v25  ;;  %v18311_v48 = vld [vmem:[#allocation252_spill] sm:$0xff]  ;;  %v18323_v25 = vld [vmem:[#allocation517_spill] sm:$0xff] }
 0x84e   :  { %v6222_v49 = vsel %vm6182_vm6, %v6093_v9, %v4974_v15  ;;  %v6198_v34 = vsel %vm6182_vm6, %v6069_v55, %v13781_v35  ;;  %v8289_v35 = vld [vmem:[%s17548_s0 + $0x400] sm:$0xff]  ;;  %v5683_v32 = vsel %vm5666_vm4, %v5554_v19, %v18295_v7  ;;  %v18309_v19 = vld [vmem:[#allocation124_spill] sm:$0xff] }
 0x84f   :  { %v6351_v52 = vsel %vm6311_vm8, %v6222_v49, 0.0  ;;  %v6327_v62 = vsel %vm6311_vm8, %v6198_v34, 0.0  ;;  %v5812_v57 = vsel %vm5795_vm3, %v5683_v32, %v18297_v38  ;;  %v18300_v55 = vld [vmem:[#allocation634_spill] sm:$0xff]  ;;  %v5427_v12 = vsel %vm5408_vm1, %v5298_v59, %v18309_v19 }
 0x850   :  { %8617 = vmatmul.msk.f32.gmra.mxu1 %vm6448_vm9, %v6351_v52  ;;  %v5941_v9 = vsel %vm5924_vm5, %v5812_v57, %v18299_v17  ;;  %v5966_v15 = vsel %vm5924_vm5, %v5837_v29, %v18300_v55  ;;  %v46_v52 = vld [vmem:[%s17548_s0 + $0xa8] sm:$0xff]  ;;  %v5556_v38 = vsel %vm5537_vm2, %v5427_v12, %v18311_v48  ;;  %v18312_v57 = vld [vmem:[#allocation276_spill] sm:$0xff]  ;;  %v18313_v29 = vld [vmem:[#allocation373_spill] sm:$0xff] }
 0x851   :  { %8593 = vmatmul.msk.f32.gmra.mxu0 %vm6448_vm9, %v6327_v62  ;;  %v6070_v62 = vsel %vm6053_vm7, %v5941_v9, %v13829_v40  ;;  %v8372_v40 = vld [vmem:[%s17548_s0 + $0x241] sm:$0xff]  ;;  %v5297_v1 = vsel %vm5279_vm0, %v46_v52, %v18301_v21  ;;  %v5685_v17 = vsel %vm5666_vm4, %v5556_v38, %v18313_v29  ;;  %v18314_v9 = vld [vmem:[#allocation397_spill] sm:$0xff] }
 0x852   :  { %5035 = vrot.lane.b32.xlu2 %v8520_v58, %s8784_s23  ;;  %4993 = vrot.lane.b32.xlu1 %v8499_v14, %s8784_s23  ;;  %v5426_v20 = vsel %vm5408_vm1, %v5297_v1, %v18302_v39  ;;  %v8500_v63 = vld [vmem:[%s17548_s0 + $0x242] sm:$0xff] }
 0x853   :  { %4061 = vrot.lane.b32.xlu0 %v8289_v35, %s8782_s12  ;;  %v5555_v53 = vsel %vm5537_vm2, %v5426_v20, %v18303_v43  ;;  %v18316_v52 = vld [vmem:[#allocation503_spill] sm:$0xff] }
 0x854   :  { %v13959_v36 = vpop.permute.xlu2 %4931  ;;  %v4976_v61 = vpop.permute.xlu1 %4975  ;;  %v8394_v38 = vld [vmem:[%s17548_s0 + $0x321] sm:$0xff] }
 0x855   :  { %v4464_v51 = vpop.permute.xlu0 %4463 }
 0x856   :  { %v6094_v4 = vsel %vm6053_vm7, %v5965_v18, %v4464_v51  ;;  %v13964_v54 = vpop.f32.mrf.mxu0  ;;  %v71_v18 = vld [vmem:[%s17548_s0 + $0x1a0] sm:$0xff]  ;;  %v18305_v51 = vld [vmem:[#allocation489_spill] sm:$0xff] }
 0x857   :  { %v6223_v6 = vsel %vm6182_vm6, %v6094_v4, %v4976_v61  ;;  %v5684_v61 = vsel %vm5666_vm4, %v5555_v53, %v18304_v24  ;;  %v5322_v42 = vsel %vm5279_vm0, %v71_v18, %v18308_v44  ;;  %v8348_v24 = vld [vmem:[%s17548_s0 + $0x151] sm:$0xff] }
 0x858   :  { %v6352_v30 = vsel %vm6311_vm8, %v6223_v6, 0.0  ;;  %v5813_v4 = vsel %vm5795_vm3, %v5684_v61, %v18305_v51  ;;  %v5451_v7 = vsel %vm5408_vm1, %v5322_v42, %v18310_v45  ;;  %v18319_v61 = vld [vmem:[#allocation39_spill] sm:$0xff]  ;;  %v18320_v18 = vld [vmem:[#allocation160_spill] sm:$0xff] }
 0x859   :  { %8618 = vmatmul.msk.f32.gmra.mxu1 %vm6448_vm9, %v6352_v30  ;;  %v5942_v2 = vsel %vm5924_vm5, %v5813_v4, %v18306_v13  ;;  %v5580_v22 = vsel %vm5537_vm2, %v5451_v7, %v18312_v57  ;;  %v18321_v4 = vld [vmem:[#allocation266_spill] sm:$0xff]  ;;  %v18322_v13 = vld [vmem:[#allocation396_spill] sm:$0xff]  ;;  %v18325_v45 = vld [vmem:[#allocation15_spill] sm:$0xff] }
 0x85a   :  { %4433 = vrot.lane.b32.xlu2 %v8347_v27, %s8783_s22  ;;  %5085 = vrot.lane.b32.xlu1 %v8545_v50, %s8784_s23  ;;  %v5709_v55 = vsel %vm5666_vm4, %v5580_v22, %v18314_v9  ;;  %v8373_v57 = vld [vmem:[%s17548_s0 + $0x249] sm:$0xff] }
 0x85b   :  { %4573 = vrot.lane.b32.xlu0 %v8417_v28, %s8783_s22  ;;  %v8521_v28 = vld [vmem:[%s17548_s0 + $0x312] sm:$0xff] }
 0x85c   :  { %v14005_v49 = vpop.permute.xlu2 %4421  ;;  %v4466_v34 = vpop.permute.xlu1 %4465  ;;  %v18327_v22 = vld [vmem:[#allocation136_spill] sm:$0xff] }
 0x85d   :  { %v6095_v58 = vsel %vm6053_vm7, %v5966_v15, %v4466_v34  ;;  %v4928_v14 = vpop.permute.xlu0 %4927  ;;  %v18315_v15 = vld [vmem:[#allocation481_spill] sm:$0xff] }
 0x85e   :  { %v6199_v11 = vsel %vm6182_vm6, %v6070_v62, %v4928_v14  ;;  %v14014_v46 = vpop.f32.mrf.mxu0  ;;  %v6224_v35 = vsel %vm6182_vm6, %v6095_v58, %v13872_v5  ;;  %v8475_v5 = vld [vmem:[%s17548_s0 + $0x14a] sm:$0xff]  ;;  %v5814_v34 = vsel %vm5795_vm3, %v5685_v17, %v18315_v15  ;;  %v5838_v62 = vsel %vm5795_vm3, %v5709_v55, %v18316_v52  ;;  %v18317_v58 = vld [vmem:[#allocation609_spill] sm:$0xff] }
 0x85f   :  { %v6328_v23 = vsel %vm6311_vm8, %v6199_v11, 0.0  ;;  %v6353_v8 = vsel %vm6311_vm8, %v6224_v35, 0.0  ;;  %v5943_v14 = vsel %vm5924_vm5, %v5814_v34, %v18317_v58  ;;  %v18318_v11 = vld [vmem:[#allocation633_spill] sm:$0xff]  ;;  %v18328_v17 = vld [vmem:[#allocation159_spill] sm:$0xff] }
 0x860   :  { %8594 = vmatmul.msk.f32.gmra.mxu0 %vm6448_vm9, %v6328_v23  ;;  %v5967_v35 = vsel %vm5924_vm5, %v5838_v62, %v18318_v11  ;;  %v8476_v15 = vld [vmem:[%s17548_s0 + $0x152] sm:$0xff]  ;;  %v18329_v34 = vld [vmem:[#allocation243_spill] sm:$0xff] }
 0x861   :  { %8619 = vmatmul.msk.f32.gmra.mxu1 %vm6448_vm9, %v6353_v8  ;;  %v18330_v62 = vld [vmem:[#allocation280_spill] sm:$0xff] }
 0x862   :  { %4525 = vrot.lane.b32.xlu2 %v8393_v16, %s8783_s22  ;;  %4483 = vrot.lane.b32.xlu1 %v8372_v40, %s8783_s22  ;;  %v72_v16 = vld [vmem:[%s17548_s0 + $0x1a8] sm:$0xff]  ;;  %v6096_v40 = vsel %vm6053_vm7, %v5967_v35, %v13916_v0  ;;  %v8546_v0 = vld [vmem:[%s17548_s0 + $0x412] sm:$0xff]  ;;  %v18332_v35 = vld [vmem:[#allocation386_spill] sm:$0xff] }
 0x863   :  { %4945 = vrot.lane.b32.xlu0 %v8475_v5, %s8784_s23  ;;  %v5323_v3 = vsel %vm5279_vm0, %v72_v16, %v18319_v61  ;;  %v18333_v16 = vld [vmem:[#allocation493_spill] sm:$0xff]  ;;  %v49_v61 = vld [vmem:[%s17548_s0 + $0xc8] sm:$0xff] }
 0x864   :  { %v14050_v41 = vpop.permute.xlu2 %4983  ;;  %v4930_v26 = vpop.permute.xlu1 %4929  ;;  %v5452_v51 = vsel %vm5408_vm1, %v5323_v3, %v18320_v18 }
 0x865   :  { %v4418_v6 = vpop.permute.xlu0 %4417 }
 0x866   :  { %v6071_v27 = vsel %vm6053_vm7, %v5942_v2, %v4418_v6  ;;  %v14055_v50 = vpop.f32.mrf.mxu0  ;;  %v48_v6 = vld [vmem:[%s17548_s0 + $0xb8] sm:$0xff] }
 0x867   :  { %v6200_v30 = vsel %vm6182_vm6, %v6071_v27, %v4930_v26  ;;  %v5581_v26 = vsel %vm5537_vm2, %v5452_v51, %v18321_v4  ;;  %v73_v27 = vld [vmem:[%s17548_s0 + $0x1b8] sm:$0xff]  ;;  %v5299_v7 = vsel %vm5279_vm0, %v48_v6, %v18325_v45  ;;  %v8522_v6 = vld [vmem:[%s17548_s0 + $0x322] sm:$0xff]  ;;  %v50_v45 = vld [vmem:[%s17548_s0 + $0xd0] sm:$0xff] }
 0x868   :  { %v6329_v32 = vsel %vm6311_vm8, %v6200_v30, 0.0  ;;  %v5710_v2 = vsel %vm5666_vm4, %v5581_v26, %v18322_v13  ;;  %v18324_v30 = vld [vmem:[#allocation623_spill] sm:$0xff]  ;;  %v5428_v29 = vsel %vm5408_vm1, %v5299_v7, %v18327_v22  ;;  %v74_v7 = vld [vmem:[%s17548_s0 + $0x1c0] sm:$0xff] }
 0x869   :  { %8595 = vmatmul.msk.f32.gmra.mxu0 %vm6448_vm9, %v6329_v32  ;;  %v5839_v59 = vsel %vm5795_vm3, %v5710_v2, %v18323_v25  ;;  %v18326_v32 = vld [vmem:[#allocation29_spill] sm:$0xff]  ;;  %v5557_v52 = vsel %vm5537_vm2, %v5428_v29, %v18329_v34  ;;  %v18344_v34 = vld [vmem:[#allocation43_spill] sm:$0xff] }
 0x86a   :  { %5037 = vrot.lane.b32.xlu2 %v8521_v28, %s8784_s23  ;;  %4995 = vrot.lane.b32.xlu1 %v8500_v63, %s8784_s23  ;;  %v5968_v28 = vsel %vm5924_vm5, %v5839_v59, %v18324_v30  ;;  %v18338_v59 = vld [vmem:[#allocation135_spill] sm:$0xff]  ;;  %v18339_v30 = vld [vmem:[#allocation256_spill] sm:$0xff] }
 0x86b   :  { %4063 = vrot.lane.b32.xlu0 %v8290_v37, %s8782_s12  ;;  %v5324_v37 = vsel %vm5279_vm0, %v73_v27, %v18326_v32  ;;  %v18337_v27 = vld [vmem:[#allocation5_spill] sm:$0xff]  ;;  %v18341_v32 = vld [vmem:[#allocation492_spill] sm:$0xff] }
 0x86c   :  { %v14096_v23 = vpop.permute.xlu2 %4473  ;;  %v4420_v8 = vpop.permute.xlu1 %4419  ;;  %v5453_v9 = vsel %vm5408_vm1, %v5324_v37, %v18328_v17  ;;  %v5300_v25 = vsel %vm5279_vm0, %v49_v61, %v18337_v27  ;;  %v18350_v61 = vld [vmem:[#allocation400_spill] sm:$0xff] }
 0x86d   :  { %v6072_v21 = vsel %vm6053_vm7, %v5943_v14, %v4420_v8  ;;  %v4980_v1 = vpop.permute.xlu0 %4979  ;;  %v5582_v58 = vsel %vm5537_vm2, %v5453_v9, %v18330_v62  ;;  %v18331_v14 = vld [vmem:[#allocation372_spill] sm:$0xff] }
 0x86e   :  { %v6225_v5 = vsel %vm6182_vm6, %v6096_v40, %v4980_v1  ;;  %v14105_v39 = vpop.f32.mrf.mxu0  ;;  %v6201_v20 = vsel %vm6182_vm6, %v6072_v21, %v13959_v36  ;;  %v8418_v36 = vld [vmem:[%s17548_s0 + $0x411] sm:$0xff]  ;;  %v5686_v11 = vsel %vm5666_vm4, %v5557_v52, %v18331_v14  ;;  %v5711_v8 = vsel %vm5666_vm4, %v5582_v58, %v18332_v35  ;;  %v8349_v58 = vld [vmem:[%s17548_s0 + $0x159] sm:$0xff] }
 0x86f   :  { %v6354_v43 = vsel %vm6311_vm8, %v6225_v5, 0.0  ;;  %v6330_v53 = vsel %vm6311_vm8, %v6201_v20, 0.0  ;;  %v5815_v40 = vsel %vm5795_vm3, %v5686_v11, %v18333_v16  ;;  %v18334_v21 = vld [vmem:[#allocation516_spill] sm:$0xff]  ;;  %v5325_v52 = vsel %vm5279_vm0, %v74_v7, %v18344_v34  ;;  %v8547_v14 = vld [vmem:[%s17548_s0 + $0x41a] sm:$0xff] }
 0x870   :  { %8620 = vmatmul.msk.f32.gmra.mxu1 %vm6448_vm9, %v6354_v43  ;;  %v5840_v1 = vsel %vm5795_vm3, %v5711_v8, %v18334_v21  ;;  %v18335_v5 = vld [vmem:[#allocation600_spill] sm:$0xff]  ;;  %v18336_v43 = vld [vmem:[#allocation637_spill] sm:$0xff] }
 0x871   :  { %8596 = vmatmul.msk.f32.gmra.mxu0 %vm6448_vm9, %v6330_v53  ;;  %v5944_v20 = vsel %vm5924_vm5, %v5815_v40, %v18335_v5  ;;  %v5969_v53 = vsel %vm5924_vm5, %v5840_v1, %v18336_v43  ;;  %v18345_v11 = vld [vmem:[#allocation125_spill] sm:$0xff]  ;;  %v18347_v1 = vld [vmem:[#allocation255_spill] sm:$0xff] }
 0x872   :  { %4435 = vrot.lane.b32.xlu2 %v8348_v24, %s8783_s22  ;;  %5087 = vrot.lane.b32.xlu1 %v8546_v0, %s8784_s23  ;;  %v6073_v3 = vsel %vm6053_vm7, %v5944_v20, %v14005_v49  ;;  %v8501_v49 = vld [vmem:[%s17548_s0 + $0x24a] sm:$0xff]  ;;  %v18346_v8 = vld [vmem:[#allocation149_spill] sm:$0xff] }
 0x873   :  { %4575 = vrot.lane.b32.xlu0 %v8418_v36, %s8783_s22  ;;  %v5454_v16 = vsel %vm5408_vm1, %v5325_v52, %v18346_v8  ;;  %v8419_v21 = vld [vmem:[%s17548_s0 + $0x419] sm:$0xff]  ;;  %v18348_v20 = vld [vmem:[#allocation279_spill] sm:$0xff]  ;;  %v18359_v52 = vld [vmem:[#allocation520_spill] sm:$0xff] }
 0x874   :  { %v14141_v44 = vpop.permute.xlu2 %4937  ;;  %v4982_v42 = vpop.permute.xlu1 %4981  ;;  %v5583_v43 = vsel %vm5537_vm2, %v5454_v16, %v18348_v20  ;;  %v51_v34 = vld [vmem:[%s17548_s0 + $0xd8] sm:$0xff]  ;;  %v8523_v20 = vld [vmem:[%s17548_s0 + $0x32a] sm:$0xff] }
 0x875   :  { %v4470_v63 = vpop.permute.xlu0 %4469 }
 0x876   :  { %v6097_v19 = vsel %vm6053_vm7, %v5968_v28, %v4470_v63  ;;  %v14146_v12 = vpop.f32.mrf.mxu0  ;;  %v18340_v63 = vld [vmem:[#allocation362_spill] sm:$0xff] }
 0x877   :  { %v6226_v48 = vsel %vm6182_vm6, %v6097_v19, %v4982_v42  ;;  %v5429_v42 = vsel %vm5408_vm1, %v5300_v25, %v18338_v59 }
 0x878   :  { %v6355_v55 = vsel %vm6311_vm8, %v6226_v48, 0.0  ;;  %v5558_v28 = vsel %vm5537_vm2, %v5429_v42, %v18339_v30 }
 0x879   :  { %8621 = vmatmul.msk.f32.gmra.mxu1 %vm6448_vm9, %v6355_v55  ;;  %v5687_v19 = vsel %vm5666_vm4, %v5558_v28, %v18340_v63  ;;  %v18343_v55 = vld [vmem:[#allocation19_spill] sm:$0xff] }
 0x87a   :  { %4527 = vrot.lane.b32.xlu2 %v8394_v38, %s8783_s22  ;;  %4485 = vrot.lane.b32.xlu1 %v8373_v57, %s8783_s22  ;;  %v5816_v37 = vsel %vm5795_vm3, %v5687_v19, %v18341_v32  ;;  %v18342_v57 = vld [vmem:[#allocation613_spill] sm:$0xff]  ;;  %v8395_v32 = vld [vmem:[%s17548_s0 + $0x329] sm:$0xff] }
 0x87b   :  { %4947 = vrot.lane.b32.xlu0 %v8476_v15, %s8784_s23  ;;  %v5945_v22 = vsel %vm5924_vm5, %v5816_v37, %v18342_v57  ;;  %v5301_v15 = vsel %vm5279_vm0, %v50_v45, %v18343_v55  ;;  %v18355_v37 = vld [vmem:[#allocation42_spill] sm:$0xff]  ;;  %v18356_v57 = vld [vmem:[#allocation163_spill] sm:$0xff] }
 0x87c   :  { %v14187_v24 = vpop.permute.xlu2 %4427  ;;  %v4472_v0 = vpop.permute.xlu1 %4471  ;;  %v5430_v35 = vsel %vm5408_vm1, %v5301_v15, %v18345_v11  ;;  %v18358_v55 = vld [vmem:[#allocation399_spill] sm:$0xff]  ;;  %v18360_v11 = vld [vmem:[#allocation626_spill] sm:$0xff] }
 0x87d   :  { %v6098_v36 = vsel %vm6053_vm7, %v5969_v53, %v4472_v0  ;;  %v4934_v18 = vpop.permute.xlu0 %4933  ;;  %v5559_v5 = vsel %vm5537_vm2, %v5430_v35, %v18347_v1  ;;  %v18349_v53 = vld [vmem:[#allocation376_spill] sm:$0xff] }
 0x87e   :  { %v6202_v51 = vsel %vm6182_vm6, %v6073_v3, %v4934_v18  ;;  %v14196_v4 = vpop.f32.mrf.mxu0  ;;  %v6227_v26 = vsel %vm6182_vm6, %v6098_v36, %v14050_v41  ;;  %v8291_v41 = vld [vmem:[%s17548_s0 + $0x418] sm:$0xff]  ;;  %v5688_v0 = vsel %vm5666_vm4, %v5559_v5, %v18349_v53  ;;  %v5712_v3 = vsel %vm5666_vm4, %v5583_v43, %v18350_v61  ;;  %v18351_v36 = vld [vmem:[#allocation482_spill] sm:$0xff]  ;;  %v18362_v53 = vld [vmem:[#allocation139_spill] sm:$0xff] }
 0x87f   :  { %v6331_v13 = vsel %vm6311_vm8, %v6202_v51, 0.0  ;;  %v6356_v2 = vsel %vm6311_vm8, %v6227_v26, 0.0  ;;  %v5817_v18 = vsel %vm5795_vm3, %v5688_v0, %v18351_v36  ;;  %v18352_v51 = vld [vmem:[#allocation506_spill] sm:$0xff]  ;;  %v18363_v36 = vld [vmem:[#allocation245_spill] sm:$0xff] }
 0x880   :  { %8597 = vmatmul.msk.f32.gmra.mxu0 %vm6448_vm9, %v6331_v13  ;;  %v5841_v26 = vsel %vm5795_vm3, %v5712_v3, %v18352_v51  ;;  %v18353_v13 = vld [vmem:[#allocation612_spill] sm:$0xff]  ;;  %v8502_v43 = vld [vmem:[%s17548_s0 + $0x25a] sm:$0xff]  ;;  %v18364_v51 = vld [vmem:[#allocation375_spill] sm:$0xff] }
 0x881   :  { %8622 = vmatmul.msk.f32.gmra.mxu1 %vm6448_vm9, %v6356_v2  ;;  %v5946_v2 = vsel %vm5924_vm5, %v5817_v18, %v18353_v13  ;;  %v8292_v3 = vld [vmem:[%s17548_s0 + $0x420] sm:$0xff] }
 0x882   :  { %5039 = vrot.lane.b32.xlu2 %v8522_v6, %s8784_s23  ;;  %4997 = vrot.lane.b32.xlu1 %v8501_v49, %s8784_s23  ;;  %v18354_v6 = vld [vmem:[#allocation636_spill] sm:$0xff]  ;;  %v14350_v13 = vld [vmem:[%s17550_s2] ss:$0 sm:$0xff] }
 0x883   :  { %4065 = vrot.lane.b32.xlu0 %v8291_v41, %s8782_s12  ;;  %v5970_v49 = vsel %vm5924_vm5, %v5841_v26, %v18354_v6  ;;  %v75_v41 = vld [vmem:[%s17548_s0 + $0x1c8] sm:$0xff]  ;;  %v18365_v6 = vld [vmem:[#allocation496_spill] sm:$0xff] }
 0x884   :  { %v14232_v48 = vpop.permute.xlu2 %4519  ;;  %v4936_v38 = vpop.permute.xlu1 %4935  ;;  %v6099_v59 = vsel %vm6053_vm7, %v5970_v49, %v14096_v23  ;;  %v8374_v23 = vld [vmem:[%s17548_s0 + $0x259] sm:$0xff] }
 0x885   :  { %v4424_v29 = vpop.permute.xlu0 %4423 }
 0x886   :  { %v6074_v17 = vsel %vm6053_vm7, %v5945_v22, %v4424_v29  ;;  %v14237_v9 = vpop.f32.mrf.mxu0  ;;  %v18357_v29 = vld [vmem:[#allocation269_spill] sm:$0xff] }
 0x887   :  { %v6203_v62 = vsel %vm6182_vm6, %v6074_v17, %v4936_v38  ;;  %v5326_v38 = vsel %vm5279_vm0, %v75_v41, %v18355_v37  ;;  %v18366_v41 = vld [vmem:[#allocation602_spill] sm:$0xff] }
 0x888   :  { %v6332_v40 = vsel %vm6311_vm8, %v6203_v62, 0.0  ;;  %v5455_v22 = vsel %vm5408_vm1, %v5326_v38, %v18356_v57  ;;  %v18369_v57 = vld [vmem:[#allocation183_spill] sm:$0xff] }
 0x889   :  { %8598 = vmatmul.msk.f32.gmra.mxu0 %vm6448_vm9, %v6332_v40  ;;  %v5584_v17 = vsel %vm5537_vm2, %v5455_v22, %v18357_v29 }
 0x88a   :  { %4437 = vrot.lane.b32.xlu2 %v8349_v58, %s8783_s22  ;;  %5089 = vrot.lane.b32.xlu1 %v8547_v14, %s8784_s23  ;;  %v5713_v15 = vsel %vm5666_vm4, %v5584_v17, %v18358_v55  ;;  %v8350_v17 = vld [vmem:[%s17548_s0 + $0x169] sm:$0xff]  ;;  %v18370_v55 = vld [vmem:[#allocation162_spill] sm:$0xff] }
 0x88b   :  { %4577 = vrot.lane.b32.xlu0 %v8419_v21, %s8783_s22  ;;  %v5842_v62 = vsel %vm5795_vm3, %v5713_v15, %v18359_v52  ;;  %v18361_v21 = vld [vmem:[#allocation18_spill] sm:$0xff] }
 0x88c   :  { %v14278_v27 = vpop.permute.xlu2 %4429  ;;  %v4426_v25 = vpop.permute.xlu1 %4425  ;;  %v5971_v35 = vsel %vm5924_vm5, %v5842_v62, %v18360_v11  ;;  %v5302_v1 = vsel %vm5279_vm0, %v51_v34, %v18361_v21  ;;  %v18371_v34 = vld [vmem:[#allocation304_spill] sm:$0xff]  ;;  %v18374_v21 = vld [vmem:[#allocation389_spill] sm:$0xff] }
 0x88d   :  { %v6075_v42 = vsel %vm6053_vm7, %v5946_v2, %v4426_v25  ;;  %v4986_v30 = vpop.permute.xlu0 %4985  ;;  %v5431_v0 = vsel %vm5408_vm1, %v5302_v1, %v18362_v53  ;;  %v97_v2 = vld [vmem:[%s17548_s0 + $0x2a8] sm:$0xff]  ;;  %v76_v25 = vld [vmem:[%s17548_s0 + $0x1d0] sm:$0xff]  ;;  %v52_v53 = vld [vmem:[%s17548_s0 + $0xe0] sm:$0xff] }
 0x88e   :  { %v6228_v28 = vsel %vm6182_vm6, %v6099_v59, %v4986_v30  ;;  %v14287_v63 = vpop.f32.mrf.mxu0  ;;  %v6204_v19 = vsel %vm6182_vm6, %v6075_v42, %v14141_v44  ;;  %v8477_v44 = vld [vmem:[%s17548_s0 + $0x15a] sm:$0xff]  ;;  %v5560_v18 = vsel %vm5537_vm2, %v5431_v0, %v18363_v36  ;;  %v6854_v42 = vadd.f32 %v14350_v13, %v14014_v46  ;;  %v18376_v0 = vld [vmem:[#allocation519_spill] sm:$0xff] }
 0x88f   :  { %v6357_v45 = vsel %vm6311_vm8, %v6228_v28, 0.0  ;;  %v6333_v7 = vsel %vm6311_vm8, %v6204_v19, 0.0  ;;  %v5689_v26 = vsel %vm5666_vm4, %v5560_v18, %v18364_v51  ;;  %v6863_v36 = vadd.f32 %v14350_v13, %v14146_v12  ;;  %v18377_v18 = vld [vmem:[#allocation640_spill] sm:$0xff] }
 0x890   :  { %8623 = vmatmul.msk.f32.gmra.mxu1 %vm6448_vm9, %v6357_v45  ;;  %v5818_v49 = vsel %vm5795_vm3, %v5689_v26, %v18365_v6  ;;  %v7235_v62 = vmax.f32 %v6854_v42, 0.0  ;;  %v18378_v42 = vld [vmem:[#allocation8_spill] sm:$0xff] }
 0x891   :  { %8599 = vmatmul.msk.f32.gmra.mxu0 %vm6448_vm9, %v6333_v7  ;;  %v5947_v59 = vsel %vm5924_vm5, %v5818_v49, %v18366_v41  ;;  %v18367_v7 = vld [vmem:[#allocation53_spill] sm:$0xff] }
 0x892   :  { %4529 = vrot.lane.b32.xlu2 %v8395_v32, %s8783_s22  ;;  %4487 = vrot.lane.b32.xlu1 %v8374_v23, %s8783_s22  ;;  %v6076_v19 = vsel %vm6053_vm7, %v5947_v59, %v14187_v24  ;;  %v5348_v32 = vsel %vm5279_vm0, %v97_v2, %v18367_v7  ;;  %v6851_v23 = vadd.f32 %v14350_v13, %v13964_v54  ;;  %v8548_v54 = vld [vmem:[%s17548_s0 + $0x422] sm:$0xff] }
 0x893   :  { %4949 = vrot.lane.b32.xlu0 %v8477_v44, %s8784_s23  ;;  %v18368_v44 = vld [vmem:[#allocation32_spill] sm:$0xff]  ;;  %v5477_v22 = vsel %vm5408_vm1, %v5348_v32, %v18369_v57  ;;  %v6857_v24 = vadd.f32 %v14350_v13, %v14055_v50  ;;  %v8420_v50 = vld [vmem:[%s17548_s0 + $0x421] sm:$0xff] }
 0x894   :  { %v14320_v58 = vpop.permute.xlu2 %4521  ;;  %v4988_v14 = vpop.permute.xlu1 %4987  ;;  %v5327_v46 = vsel %vm5279_vm0, %v76_v25, %v18368_v44  ;;  %v5606_v52 = vsel %vm5537_vm2, %v5477_v22, %v18371_v34  ;;  %v8478_v44 = vld [vmem:[%s17548_s0 + $0x16a] sm:$0xff]  ;;  %v77_v22 = vld [vmem:[%s17548_s0 + $0x1e0] sm:$0xff]  ;;  %v18381_v34 = vld [vmem:[#allocation365_spill] sm:$0xff] }
 0x895   :  { %v4476_v8 = vpop.permute.xlu0 %4475  ;;  %v5456_v15 = vsel %vm5408_vm1, %v5327_v46, %v18370_v55  ;;  %v18379_v46 = vld [vmem:[#allocation138_spill] sm:$0xff] }
 0x896   :  { %v6100_v16 = vsel %vm6053_vm7, %v5971_v35, %v4476_v8  ;;  %v14325_v40 = vpop.f32.mrf.mxu0  ;;  %v18373_v35 = vld [vmem:[#allocation410_spill] sm:$0xff] }
 0x897   :  { %v6229_v5 = vsel %vm6182_vm6, %v6100_v16, %v4988_v14  ;;  %v18372_v14 = vld [vmem:[#allocation283_spill] sm:$0xff]  ;;  %v5735_v8 = vsel %vm5666_vm4, %v5606_v52, %v18373_v35  ;;  %v6860_v16 = vadd.f32 %v14350_v13, %v14105_v39  ;;  %v6875_v35 = vadd.f32 %v14350_v13, %v14325_v40 }
 0x898   :  { %v6358_v61 = vsel %vm6311_vm8, %v6229_v5, 0.0  ;;  %v5585_v11 = vsel %vm5537_vm2, %v5456_v15, %v18372_v14  ;;  %v18375_v5 = vld [vmem:[#allocation540_spill] sm:$0xff]  ;;  %v6872_v15 = vadd.f32 %v14350_v13, %v14287_v63 }
 0x899   :  { %8624 = vmatmul.msk.f32.gmra.mxu1 %vm6448_vm9, %v6358_v61  ;;  %v5714_v1 = vsel %vm5666_vm4, %v5585_v11, %v18374_v21  ;;  %v7237_v25 = vmax.f32 %v6860_v16, 0.0  ;;  %v18384_v16 = vld [vmem:[#allocation67_spill] sm:$0xff] }
 0x89a   :  { %5041 = vrot.lane.b32.xlu2 %v8523_v20, %s8784_s23  ;;  %4999 = vrot.lane.b32.xlu1 %v8502_v43, %s8784_s23  ;;  %v5864_v20 = vsel %vm5795_vm3, %v5735_v8, %v18375_v5  ;;  %v7234_v43 = vmax.f32 %v6851_v23, 0.0  ;;  %v5843_v61 = vsel %vm5795_vm3, %v5714_v1, %v18376_v0  ;;  %v7238_v23 = vmax.f32 %v6863_v36, 0.0  ;;  %v18383_v8 = vld [vmem:[#allocation46_spill] sm:$0xff]  ;;  %v18385_v1 = vld [vmem:[#allocation616_spill] sm:$0xff] }
 0x89b   :  { %4067 = vrot.lane.b32.xlu0 %v8292_v3, %s8782_s12  ;;  %v5993_v39 = vsel %vm5924_vm5, %v5864_v20, %v13348_v10  ;;  %v7236_v3 = vmax.f32 %v6857_v24, 0.0  ;;  %v5972_v51 = vsel %vm5924_vm5, %v5843_v61, %v18377_v18  ;;  %v6866_v10 = vadd.f32 %v14350_v13, %v14196_v4  ;;  %v98_v24 = vld [vmem:[%s17548_s0 + $0x2b0] sm:$0xff]  ;;  %v18387_v18 = vld [vmem:[#allocation173_spill] sm:$0xff] }
 0x89c   :  { %v14367_v30 = vpop.permute.xlu2 %4431  ;;  %v4478_v28 = vpop.permute.xlu1 %4477  ;;  %v7362_v26 = vadd.f32 %v7235_v62, %v7234_v43  ;;  %v6122_v2 = vsel %vm6053_vm7, %v5993_v39, %v14232_v48  ;;  %v18382_v62 = vld [vmem:[#allocation495_spill] sm:$0xff]  ;;  %v5328_v63 = vsel %vm5279_vm0, %v77_v22, %v18383_v8  ;;  %v5349_v21 = vsel %vm5279_vm0, %v98_v24, %v18384_v16  ;;  %v53_v24 = vld [vmem:[%s17548_s0 + $0xf0] sm:$0xff] }
 0x89d   :  { %v4940_v45 = vpop.permute.xlu0 %4939  ;;  %v6101_v41 = vsel %vm6053_vm7, %v5972_v51, %v4478_v28  ;;  %v8375_v28 = vld [vmem:[%s17548_s0 + $0x261] sm:$0xff]  ;;  %v7239_v55 = vmax.f32 %v6866_v10, 0.0  ;;  %v7241_v61 = vmax.f32 %v6872_v15, 0.0  ;;  %v5478_v51 = vsel %vm5408_vm1, %v5349_v21, %v18387_v18 }
 0x89e   :  { %v6205_v37 = vsel %vm6182_vm6, %v6076_v19, %v4940_v45  ;;  %v14376_v38 = vpop.f32.mrf.mxu0  ;;  %v5303_v19 = vsel %vm5279_vm0, %v52_v53, %v18378_v42  ;;  %v7363_v32 = vadd.f32 %v7362_v26, %v7236_v3  ;;  %v18386_v3 = vld [vmem:[#allocation152_spill] sm:$0xff] }
 0x89f   :  { %v6334_v29 = vsel %vm6311_vm8, %v6205_v37, 0.0  ;;  %v6869_v37 = vadd.f32 %v14350_v13, %v14237_v9  ;;  %v5432_v57 = vsel %vm5408_vm1, %v5303_v19, %v18379_v46  ;;  %v8268_v9 = vld [vmem:[%s17548_s0 + $0x330] sm:$0xff]  ;;  %v6878_v40 = vadd.f32 %v14350_v13, %v14376_v38  ;;  %v18389_v19 = vld [vmem:[#allocation303_spill] sm:$0xff] }
 0x8a0   :  { %8600 = vmatmul.msk.f32.gmra.mxu0 %vm6448_vm9, %v6334_v29  ;;  %v18380_v29 = vld [vmem:[#allocation259_spill] sm:$0xff]  ;;  %v5457_v36 = vsel %vm5408_vm1, %v5328_v63, %v18386_v3 }
 0x8a1   :  { %v7240_v11 = vmax.f32 %v6869_v37, 0.0  ;;  %v7243_v37 = vmax.f32 %v6878_v40, 0.0  ;;  %v18392_v46 = vld [vmem:[#allocation403_spill] sm:$0xff] }
 0x8a2   :  { %4439 = vrot.lane.b32.xlu2 %v8350_v17, %s8783_s22  ;;  %5091 = vrot.lane.b32.xlu1 %v8548_v54, %s8784_s23  ;;  %v5561_v17 = vsel %vm5537_vm2, %v5432_v57, %v18380_v29  ;;  %v7364_v54 = vadd.f32 %v7363_v32, %v7237_v25  ;;  %v18394_v29 = vld [vmem:[#allocation509_spill] sm:$0xff] }
 0x8a3   :  { %4579 = vrot.lane.b32.xlu0 %v8420_v50, %s8783_s22  ;;  %v5690_v52 = vsel %vm5666_vm4, %v5561_v17, %v18381_v34  ;;  %v18395_v34 = vld [vmem:[#allocation187_spill] sm:$0xff] }
 0x8a4   :  { %v14425_v6 = vpop.permute.xlu2 %4523  ;;  %v5032_v49 = vpop.permute.xlu1 %5031  ;;  %v5819_v50 = vsel %vm5795_vm3, %v5690_v52, %v18382_v62  ;;  %v7365_v14 = vadd.f32 %v7364_v54, %v7238_v23  ;;  %v18396_v62 = vld [vmem:[#allocation639_spill] sm:$0xff] }
 0x8a5   :  { %v6251_v12 = vsel %vm6182_vm6, %v6122_v2, %v5032_v49  ;;  %v4990_v59 = vpop.permute.xlu0 %4989  ;;  %v5948_v5 = vsel %vm5924_vm5, %v5819_v50, %v18385_v1  ;;  %v99_v49 = vld [vmem:[%s17548_s0 + $0x2b8] sm:$0xff]  ;;  %v18397_v1 = vld [vmem:[#allocation22_spill] sm:$0xff] }
 0x8a6   :  { %v6230_v45 = vsel %vm6182_vm6, %v6101_v41, %v4990_v59  ;;  %v6880_v7 = vpop.f32.mrf.mxu0  ;;  %v6380_v48 = vsel %vm6311_vm8, %v6251_v12, 0.0  ;;  %v7366_v53 = vadd.f32 %v7365_v14, %v7239_v55  ;;  %v6077_v0 = vsel %vm6053_vm7, %v5948_v5, %v14278_v27  ;;  %v8503_v41 = vld [vmem:[%s17548_s0 + $0x262] sm:$0xff] }
 0x8a7   :  { %v6359_v4 = vsel %vm6311_vm8, %v6230_v45, 0.0  ;;  %8646 = vmatmul.msk.f32.vlgmr.msra.gmra.mxu2 %vm6448_vm9, %v6380_v48  ;;  %v7242_v27 = vmax.f32 %v6875_v35, 0.0  ;;  %v6881_v10 = vadd.f32 %v14350_v13, %v6880_v7  ;;  %v8293_v12 = vld [vmem:[%s17548_s0 + $0x428] sm:$0xff]  ;;  %v18388_v59 = vld [vmem:[#allocation282_spill] sm:$0xff]  ;;  %v5607_v45 = vsel %vm5537_vm2, %v5478_v51, %v18389_v19  ;;  %v8396_v7 = vld [vmem:[%s17548_s0 + $0x331] sm:$0xff] }
 0x8a8   :  { %8625 = vmatmul.msk.f32.gmra.mxu1 %vm6448_vm9, %v6359_v4  ;;  %v7367_v25 = vadd.f32 %v7366_v53, %v7240_v11  ;;  %v5586_v42 = vsel %vm5537_vm2, %v5457_v36, %v18388_v59  ;;  %v18390_v48 = vld [vmem:[#allocation424_spill] sm:$0xff]  ;;  %v5304_v5 = vsel %vm5279_vm0, %v53_v24, %v18397_v1  ;;  %v18398_v53 = vld [vmem:[#allocation293_spill] sm:$0xff]  ;;  %v18403_v19 = vld [vmem:[#allocation379_spill] sm:$0xff] }
 0x8a9   :  { %v5736_v32 = vsel %vm5666_vm4, %v5607_v45, %v18390_v48  ;;  %v5715_v57 = vsel %vm5666_vm4, %v5586_v42, %v18392_v46  ;;  %v7244_v15 = vmax.f32 %v6881_v10, 0.0  ;;  %v8549_v51 = vld [vmem:[%s17548_s0 + $0x42a] sm:$0xff]  ;;  %v8524_v10 = vld [vmem:[%s17548_s0 + $0x332] sm:$0xff]  ;;  %v18412_v1 = vld [vmem:[#allocation402_spill] sm:$0xff] }
 0x8aa   :  { %4489 = vrot.lane.b32.xlu2 %v8375_v28, %s8783_s22  ;;  %4951 = vrot.lane.b32.xlu1 %v8478_v44, %s8784_s23  ;;  %v7368_v23 = vadd.f32 %v7367_v25, %v7241_v61  ;;  %v18391_v28 = vld [vmem:[#allocation66_spill] sm:$0xff]  ;;  %v5844_v17 = vsel %vm5795_vm3, %v5715_v57, %v18394_v29  ;;  %v18401_v25 = vld [vmem:[#allocation544_spill] sm:$0xff]  ;;  %v78_v48 = vld [vmem:[%s17548_s0 + $0x1e8] sm:$0xff] }
 0x8ab   :  { %4019 = vrot.lane.b32.xlu0 %v8268_v9, %s8782_s12  ;;  %v5350_v44 = vsel %vm5279_vm0, %v99_v49, %v18391_v28  ;;  %v18393_v9 = vld [vmem:[#allocation530_spill] sm:$0xff]  ;;  %v5973_v50 = vsel %vm5924_vm5, %v5844_v17, %v18396_v62  ;;  %v18407_v29 = vld [vmem:[#allocation56_spill] sm:$0xff] }
 0x8ac   :  { %v14476_v20 = vpop.permute.xlu2 %5035  ;;  %v4480_v43 = vpop.permute.xlu1 %4479  ;;  %v5865_v22 = vsel %vm5795_vm3, %v5736_v32, %v18393_v9  ;;  %v7369_v55 = vadd.f32 %v7368_v23, %v7242_v27  ;;  %v5479_v52 = vsel %vm5408_vm1, %v5350_v44, %v18395_v34  ;;  %v18404_v32 = vld [vmem:[#allocation485_spill] sm:$0xff] }
 0x8ad   :  { %v4942_v39 = vpop.permute.xlu0 %4941  ;;  %v5994_v54 = vsel %vm5924_vm5, %v5865_v22, %v13384_v56  ;;  %v6102_v63 = vsel %vm6053_vm7, %v5973_v50, %v4480_v43  ;;  %v18406_v22 = vld [vmem:[#allocation45_spill] sm:$0xff] }
 0x8ae   :  { %v6206_v26 = vsel %vm6182_vm6, %v6077_v0, %v4942_v39  ;;  %v6883_v2 = vpop.f32.mrf.mxu0  ;;  %v6123_v14 = vsel %vm6053_vm7, %v5994_v54, %v14320_v58  ;;  %v7370_v8 = vadd.f32 %v7369_v55, %v7243_v37  ;;  %v5608_v0 = vsel %vm5537_vm2, %v5479_v52, %v18398_v53  ;;  %v18399_v39 = vld [vmem:[#allocation423_spill] sm:$0xff]  ;;  %v18409_v52 = vld [vmem:[#allocation186_spill] sm:$0xff]  ;;  %v18413_v53 = vld [vmem:[#allocation413_spill] sm:$0xff] }
 0x8af   :  { %v6335_v38 = vsel %vm6311_vm8, %v6206_v26, 0.0  ;;  %v6884_v4 = vadd.f32 %v14350_v13, %v6883_v2  ;;  %v5737_v3 = vsel %vm5666_vm4, %v5608_v0, %v18399_v39  ;;  %v8421_v26 = vld [vmem:[%s17548_s0 + $0x429] sm:$0xff]  ;;  %v5329_v24 = vsel %vm5279_vm0, %v78_v48, %v18406_v22 }
 0x8b0   :  { %8601 = vmatmul.msk.f32.gmra.mxu0 %vm6448_vm9, %v6335_v38  ;;  %v7371_v36 = vadd.f32 %v7370_v8, %v7244_v15  ;;  %v18400_v2 = vld [vmem:[#allocation128_spill] sm:$0xff]  ;;  %v5866_v27 = vsel %vm5795_vm3, %v5737_v3, %v18401_v25  ;;  %v18402_v38 = vld [vmem:[#allocation258_spill] sm:$0xff]  ;;  %v18415_v39 = vld [vmem:[#allocation543_spill] sm:$0xff] }
 0x8b1   :  { %v7245_v56 = vmax.f32 %v6884_v4, 0.0  ;;  %v5433_v49 = vsel %vm5408_vm1, %v5304_v5, %v18400_v2  ;;  %v18408_v15 = vld [vmem:[#allocation166_spill] sm:$0xff]  ;;  %v18410_v8 = vld [vmem:[#allocation272_spill] sm:$0xff] }
 0x8b2   :  { %5001 = vrot.lane.b32.xlu2 %v8503_v41, %s8784_s23  ;;  %4069 = vrot.lane.b32.xlu1 %v8293_v12, %s8782_s12  ;;  %v5562_v41 = vsel %vm5537_vm2, %v5433_v49, %v18402_v38  ;;  %v5995_v12 = vsel %vm5924_vm5, %v5866_v27, %v13459_v60  ;;  %v100_v60 = vld [vmem:[%s17548_s0 + $0x2c0] sm:$0xff]  ;;  %v5458_v34 = vsel %vm5408_vm1, %v5329_v24, %v18408_v15  ;;  %v124_v27 = vld [vmem:[%s17548_s0 + $0x3b0] sm:$0xff]  ;;  %v18422_v15 = vld [vmem:[#allocation21_spill] sm:$0xff] }
 0x8b3   :  { %4531 = vrot.lane.b32.xlu0 %v8396_v7, %s8783_s22  ;;  %v7372_v59 = vadd.f32 %v7371_v36, %v7245_v56  ;;  %v5691_v45 = vsel %vm5666_vm4, %v5562_v41, %v18403_v19  ;;  %v6124_v7 = vsel %vm6053_vm7, %v5995_v12, %v14425_v6  ;;  %v18405_v6 = vld [vmem:[#allocation615_spill] sm:$0xff]  ;;  %v5351_v17 = vsel %vm5279_vm0, %v100_v60, %v18407_v29  ;;  %v18416_v36 = vld [vmem:[#allocation629_spill] sm:$0xff] }
 0x8b4   :  { %v14531_v11 = vpop.permute.xlu2 %4433  ;;  %v5034_v35 = vpop.permute.xlu1 %5033  ;;  %v5820_v23 = vsel %vm5795_vm3, %v5691_v45, %v18404_v32  ;;  %v6253_v37 = vsel %vm6182_vm6, %v6124_v7, %v14476_v20  ;;  %v5480_v62 = vsel %vm5408_vm1, %v5351_v17, %v18409_v52  ;;  %v18411_v56 = vld [vmem:[#allocation307_spill] sm:$0xff]  ;;  %v8294_v19 = vld [vmem:[%s17548_s0 + $0x438] sm:$0xff]  ;;  %v18417_v7 = vld [vmem:[#allocation80_spill] sm:$0xff] }
 0x8b5   :  { %v6252_v16 = vsel %vm6182_vm6, %v6123_v14, %v5034_v35  ;;  %v4992_v21 = vpop.permute.xlu0 %4991  ;;  %v5949_v28 = vsel %vm5924_vm5, %v5820_v23, %v18405_v6  ;;  %v6382_v55 = vsel %vm6311_vm8, %v6253_v37, 0.0  ;;  %v8479_v14 = vld [vmem:[%s17548_s0 + $0x172] sm:$0xff]  ;;  %v5375_v48 = vsel %vm5279_vm0, %v124_v27, %v18417_v7  ;;  %v8376_v60 = vld [vmem:[%s17548_s0 + $0x269] sm:$0xff]  ;;  %v18418_v32 = vld [vmem:[#allocation210_spill] sm:$0xff] }
 0x8b6   :  { %v6231_v61 = vsel %vm6182_vm6, %v6102_v63, %v4992_v21  ;;  %v6886_v40 = vpop.f32.mrf.mxu0  ;;  %v6381_v58 = vsel %vm6311_vm8, %v6252_v16, 0.0  ;;  %v6078_v57 = vsel %vm6053_vm7, %v5949_v28, %v14367_v30  ;;  %v8269_v35 = vld [vmem:[%s17548_s0 + $0x338] sm:$0xff]  ;;  %v5587_v63 = vsel %vm5537_vm2, %v5458_v34, %v18410_v8 }
 0x8b7   :  { %v6887_v43 = vadd.f32 %v14350_v13, %v6886_v40  ;;  %v6360_v18 = vsel %vm6311_vm8, %v6231_v61, 0.0  ;;  %8647 = vmatmul.msk.f32.gmra.mxu2 %vm6448_vm9, %v6381_v58  ;;  %v5609_v16 = vsel %vm5537_vm2, %v5480_v62, %v18411_v56  ;;  %v8351_v21 = vld [vmem:[%s17548_s0 + $0x171] sm:$0xff]  ;;  %v5716_v5 = vsel %vm5666_vm4, %v5587_v63, %v18412_v1  ;;  %v18414_v40 = vld [vmem:[#allocation523_spill] sm:$0xff]  ;;  %v8397_v45 = vld [vmem:[%s17548_s0 + $0x339] sm:$0xff] }
 0x8b8   :  { %8626 = vmatmul.msk.f32.gmra.mxu1 %vm6448_vm9, %v6360_v18  ;;  %v5738_v0 = vsel %vm5666_vm4, %v5609_v16, %v18413_v53  ;;  %v5845_v58 = vsel %vm5795_vm3, %v5716_v5, %v18414_v40  ;;  %v5504_v23 = vsel %vm5408_vm1, %v5375_v48, %v18418_v32  ;;  %v18420_v28 = vld [vmem:[#allocation437_spill] sm:$0xff]  ;;  %v8504_v63 = vld [vmem:[%s17548_s0 + $0x26a] sm:$0xff]  ;;  %v18425_v1 = vld [vmem:[#allocation378_spill] sm:$0xff] }
 0x8b9   :  { %v7246_v42 = vmax.f32 %v6887_v43, 0.0  ;;  %v5867_v3 = vsel %vm5795_vm3, %v5738_v0, %v18415_v39  ;;  %v5974_v43 = vsel %vm5924_vm5, %v5845_v58, %v18416_v36  ;;  %v18424_v56 = vld [vmem:[#allocation248_spill] sm:$0xff]  ;;  %v18427_v39 = vld [vmem:[#allocation605_spill] sm:$0xff] }
 0x8ba   :  { %5093 = vrot.lane.b32.xlu2 %v8549_v51, %s8784_s23  ;;  %4581 = vrot.lane.b32.xlu1 %v8421_v26, %s8783_s22  ;;  %v5996_v18 = vsel %vm5924_vm5, %v5867_v3, %v13495_v33  ;;  %v79_v53 = vld [vmem:[%s17548_s0 + $0x1f0] sm:$0xff]  ;;  %v8550_v48 = vld [vmem:[%s17548_s0 + $0x43a] sm:$0xff] }
 0x8bb   :  { %v7373_v4 = vadd.f32 %v7372_v59, %v7246_v42  ;;  %5043 = vrot.lane.b32.xlu0 %v8524_v10, %s8784_s23  ;;  %v101_v0 = vld [vmem:[%s17548_s0 + $0x2d0] sm:$0xff] }
 0x8bc   :  { %v4526_v44 = vpop.permute.xlu2 %4525  ;;  %v4482_v46 = vpop.permute.xlu1 %4481 }
 0x8bd   :  { %v4944_v9 = vpop.permute.xlu0 %4943  ;;  %v6125_v26 = vsel %vm6053_vm7, %v5996_v18, %v4526_v44  ;;  %v6103_v2 = vsel %vm6053_vm7, %v5974_v43, %v4482_v46 }
 0x8be   :  { %v6207_v20 = vsel %vm6182_vm6, %v6078_v57, %v4944_v9  ;;  %v6889_v54 = vpop.f32.mrf.mxu0  ;;  %v54_v57 = vld [vmem:[%s17548_s0 + $0xf8] sm:$0xff]  ;;  %v18421_v9 = vld [vmem:[#allocation567_spill] sm:$0xff] }
 0x8bf   :  { %v6336_v30 = vsel %vm6311_vm8, %v6207_v20, 0.0  ;;  %v6890_v50 = vadd.f32 %v14350_v13, %v6889_v54  ;;  %8648 = vmatmul.msk.f32.gmra.mxu2 %vm6448_vm9, %v6382_v55  ;;  %v5305_v34 = vsel %vm5279_vm0, %v54_v57, %v18422_v15 }
 0x8c0   :  { %8602 = vmatmul.msk.f32.gmra.mxu0 %vm6448_vm9, %v6336_v30  ;;  %v8422_v30 = vld [vmem:[%s17548_s0 + $0x439] sm:$0xff] }
 0x8c1   :  { %v7247_v61 = vmax.f32 %v6890_v50, 0.0  ;;  %v8525_v50 = vld [vmem:[%s17548_s0 + $0x33a] sm:$0xff] }
 0x8c2   :  { %4953 = vrot.lane.b32.xlu2 %v8479_v14, %s8784_s23  ;;  %4021 = vrot.lane.b32.xlu1 %v8269_v35, %s8782_s12  ;;  %v18423_v14 = vld [vmem:[#allocation142_spill] sm:$0xff] }
 0x8c3   :  { %v7374_v51 = vadd.f32 %v7373_v4, %v7247_v61  ;;  %4441 = vrot.lane.b32.xlu0 %v8351_v21, %s8783_s22  ;;  %v18419_v4 = vld [vmem:[#allocation331_spill] sm:$0xff]  ;;  %v5434_v35 = vsel %vm5408_vm1, %v5305_v34, %v18423_v14  ;;  %v8377_v14 = vld [vmem:[%s17548_s0 + $0x271] sm:$0xff] }
 0x8c4   :  { %v5038_v49 = vpop.permute.xlu2 %5037  ;;  %v4994_v25 = vpop.permute.xlu1 %4993  ;;  %v5633_v6 = vsel %vm5537_vm2, %v5504_v23, %v18419_v4  ;;  %v5563_v16 = vsel %vm5537_vm2, %v5434_v35, %v18424_v56  ;;  %v18426_v61 = vld [vmem:[#allocation499_spill] sm:$0xff]  ;;  %v18436_v4 = vld [vmem:[#allocation522_spill] sm:$0xff] }
 0x8c5   :  { %v6254_v10 = vsel %vm6182_vm6, %v6125_v26, %v5038_v49  ;;  %v6232_v38 = vsel %vm6182_vm6, %v6103_v2, %v4994_v25  ;;  %v4062_v41 = vpop.permute.xlu0 %4061  ;;  %v5762_v44 = vsel %vm5666_vm4, %v5633_v6, %v18420_v28  ;;  %v5692_v5 = vsel %vm5666_vm4, %v5563_v16, %v18425_v1  ;;  %v18428_v26 = vld [vmem:[#allocation35_spill] sm:$0xff]  ;;  %v18429_v49 = vld [vmem:[#allocation70_spill] sm:$0xff]  ;;  %v18437_v28 = vld [vmem:[#allocation533_spill] sm:$0xff] }
 0x8c6   :  { %v6892_v12 = vpop.f32.mrf.mxu0  ;;  %v6361_v33 = vsel %vm6311_vm8, %v6232_v38, 0.0  ;;  %v6383_v59 = vsel %vm6311_vm8, %v6254_v10, 0.0  ;;  %v5891_v22 = vsel %vm5795_vm3, %v5762_v44, %v18421_v9  ;;  %v5821_v40 = vsel %vm5795_vm3, %v5692_v5, %v18426_v61  ;;  %v18430_v10 = vld [vmem:[#allocation165_spill] sm:$0xff]  ;;  %v18435_v23 = vld [vmem:[#allocation427_spill] sm:$0xff]  ;;  %v18439_v35 = vld [vmem:[#allocation94_spill] sm:$0xff] }
 0x8c7   :  { %v6893_v42 = vadd.f32 %v14350_v13, %v6892_v12  ;;  %8627 = vmatmul.msk.f32.gmra.mxu1 %vm6448_vm9, %v6361_v33  ;;  %8649 = vmatmul.msk.f32.gmra.mxu2 %vm6448_vm9, %v6383_v59  ;;  %v6020_v17 = vsel %vm5924_vm5, %v5891_v22, %v4062_v41  ;;  %v5950_v3 = vsel %vm5924_vm5, %v5821_v40, %v18427_v39  ;;  %v18431_v41 = vld [vmem:[#allocation176_spill] sm:$0xff]  ;;  %v8352_v59 = vld [vmem:[%s17548_s0 + $0x179] sm:$0xff] }
 0x8c8   :  { %v6079_v18 = vsel %vm6053_vm7, %v5950_v3, %v14531_v11  ;;  %v5330_v2 = vsel %vm5279_vm0, %v79_v53, %v18428_v26  ;;  %v5352_v25 = vsel %vm5279_vm0, %v101_v0, %v18429_v49  ;;  %v8270_v11 = vld [vmem:[%s17548_s0 + $0x348] sm:$0xff]  ;;  %v8480_v56 = vld [vmem:[%s17548_s0 + $0x17a] sm:$0xff]  ;;  %v18440_v16 = vld [vmem:[#allocation200_spill] sm:$0xff] }
 0x8c9   :  { %v7248_v37 = vmax.f32 %v6893_v42, 0.0  ;;  %v5459_v38 = vsel %vm5408_vm1, %v5330_v2, %v18430_v10  ;;  %v5481_v12 = vsel %vm5408_vm1, %v5352_v25, %v18431_v41  ;;  %v18432_v42 = vld [vmem:[#allocation286_spill] sm:$0xff]  ;;  %v18442_v0 = vld [vmem:[#allocation451_spill] sm:$0xff]  ;;  %v18443_v39 = vld [vmem:[#allocation557_spill] sm:$0xff] }
 0x8ca   :  { %4071 = vrot.lane.b32.xlu2 %v8294_v19, %s8782_s12  ;;  %4533 = vrot.lane.b32.xlu1 %v8397_v45, %s8783_s22  ;;  %v5588_v19 = vsel %vm5537_vm2, %v5459_v38, %v18432_v42  ;;  %v18433_v45 = vld [vmem:[#allocation306_spill] sm:$0xff]  ;;  %v18444_v2 = vld [vmem:[#allocation11_spill] sm:$0xff]  ;;  %v8505_v38 = vld [vmem:[%s17548_s0 + $0x272] sm:$0xff] }
 0x8cb   :  { %v7375_v46 = vadd.f32 %v7374_v51, %v7248_v37  ;;  %4491 = vrot.lane.b32.xlu0 %v8376_v60, %s8783_s22  ;;  %v5610_v7 = vsel %vm5537_vm2, %v5481_v12, %v18433_v45  ;;  %v18434_v60 = vld [vmem:[#allocation392_spill] sm:$0xff]  ;;  %v18441_v1 = vld [vmem:[#allocation330_spill] sm:$0xff]  ;;  %v18445_v41 = vld [vmem:[#allocation141_spill] sm:$0xff] }
 0x8cc   :  { %v14664_v24 = vpop.permute.xlu2 %4435  ;;  %v5086_v29 = vpop.permute.xlu1 %5085  ;;  %v5717_v32 = vsel %vm5666_vm4, %v5588_v19, %v18434_v60  ;;  %v5739_v37 = vsel %vm5666_vm4, %v5610_v7, %v18435_v23  ;;  %v55_v40 = vld [vmem:[%s17548_s0 + $0x100] sm:$0xff]  ;;  %v8526_v10 = vld [vmem:[%s17548_s0 + $0x34a] sm:$0xff]  ;;  %v102_v60 = vld [vmem:[%s17548_s0 + $0x2d8] sm:$0xff] }
 0x8cd   :  { %v4574_v20 = vpop.permute.xlu0 %4573  ;;  %v5846_v6 = vsel %vm5795_vm3, %v5717_v32, %v18436_v4  ;;  %v5868_v44 = vsel %vm5795_vm3, %v5739_v37, %v18437_v28  ;;  %v5306_v49 = vsel %vm5279_vm0, %v55_v40, %v18444_v2  ;;  %v18447_v45 = vld [vmem:[#allocation368_spill] sm:$0xff]  ;;  %v18448_v32 = vld [vmem:[#allocation498_spill] sm:$0xff]  ;;  %v18449_v4 = vld [vmem:[#allocation619_spill] sm:$0xff] }
 0x8ce   :  { %v6149_v54 = vsel %vm6053_vm7, %v6020_v17, %v4574_v20  ;;  %v6895_v55 = vpop.f32.mrf.mxu0  ;;  %v5997_v9 = vsel %vm5924_vm5, %v5868_v44, %v13420_v47  ;;  %v5435_v12 = vsel %vm5408_vm1, %v5306_v49, %v18445_v41  ;;  %v126_v49 = vld [vmem:[%s17548_s0 + $0x3c8] sm:$0xff] }
 0x8cf   :  { %v6896_v52 = vadd.f32 %v14350_v13, %v6895_v55  ;;  %v6278_v62 = vsel %vm6182_vm6, %v6149_v54, %v5086_v29  ;;  %v125_v54 = vld [vmem:[%s17548_s0 + $0x3c0] sm:$0xff] }
 0x8d0   :  { %v6407_v8 = vsel %vm6311_vm8, %v6278_v62, 0.0  ;;  %v8378_v41 = vld [vmem:[%s17548_s0 + $0x281] sm:$0xff] }
 0x8d1   :  { %v7249_v21 = vmax.f32 %v6896_v52, 0.0  ;;  %8673 = vmatmul.msk.f32.vlgmr.msra.gmra.mxu3 %vm6448_vm9, %v6407_v8  ;;  %v5376_v8 = vsel %vm5279_vm0, %v125_v54, %v18439_v35  ;;  %v18455_v35 = vld [vmem:[#allocation296_spill] sm:$0xff] }
 0x8d2   :  { %4583 = vrot.lane.b32.xlu2 %v8422_v30, %s8783_s22  ;;  %5045 = vrot.lane.b32.xlu1 %v8525_v50, %s8784_s23  ;;  %v8398_v50 = vld [vmem:[%s17548_s0 + $0x349] sm:$0xff] }
 0x8d3   :  { %v7376_v58 = vadd.f32 %v7375_v46, %v7249_v21  ;;  %5003 = vrot.lane.b32.xlu0 %v8504_v63, %s8784_s23  ;;  %v18438_v46 = vld [vmem:[#allocation643_spill] sm:$0xff]  ;;  %v5505_v21 = vsel %vm5408_vm1, %v5376_v8, %v18440_v16 }
 0x8d4   :  { %v4528_v36 = vpop.permute.xlu2 %4527  ;;  %v4484_v43 = vpop.permute.xlu1 %4483  ;;  %v5975_v57 = vsel %vm5924_vm5, %v5846_v6, %v18438_v46  ;;  %v5634_v5 = vsel %vm5537_vm2, %v5505_v21, %v18441_v1  ;;  %v18457_v21 = vld [vmem:[#allocation426_spill] sm:$0xff] }
 0x8d5   :  { %v4946_v51 = vpop.permute.xlu0 %4945  ;;  %v6126_v22 = vsel %vm6053_vm7, %v5997_v9, %v4528_v36  ;;  %v6104_v29 = vsel %vm6053_vm7, %v5975_v57, %v4484_v43  ;;  %v5763_v61 = vsel %vm5666_vm4, %v5634_v5, %v18442_v0  ;;  %v18450_v9 = vld [vmem:[#allocation49_spill] sm:$0xff] }
 0x8d6   :  { %v6208_v27 = vsel %vm6182_vm6, %v6079_v18, %v4946_v51  ;;  %v5892_v3 = vsel %vm5795_vm3, %v5763_v61, %v18443_v39  ;;  %v18459_v61 = vld [vmem:[#allocation547_spill] sm:$0xff]  ;;  %v18460_v39 = vld [vmem:[#allocation642_spill] sm:$0xff] }
 0x8d7   :  { %v6337_v33 = vsel %vm6311_vm8, %v6208_v27, 0.0 }
 0x8d8   :  { %8603 = vmatmul.msk.f32.gmra.mxu0 %vm6448_vm9, %v6337_v33 }
 0x8da   :  { %4023 = vrot.lane.b32.xlu2 %v8270_v11, %s8782_s12  ;;  %4443 = vrot.lane.b32.xlu1 %v8352_v59, %s8783_s22  ;;  %v8295_v11 = vld [vmem:[%s17548_s0 + $0x440] sm:$0xff] }
 0x8db   :  { %5095 = vrot.lane.b32.xlu0 %v8550_v48, %s8784_s23  ;;  %v18446_v59 = vld [vmem:[#allocation262_spill] sm:$0xff]  ;;  %v80_v48 = vld [vmem:[%s17548_s0 + $0x1f8] sm:$0xff] }
 0x8dc   :  { %v5040_v17 = vpop.permute.xlu2 %5039  ;;  %v4996_v20 = vpop.permute.xlu1 %4995  ;;  %v5564_v42 = vsel %vm5537_vm2, %v5435_v12, %v18446_v59  ;;  %v8481_v12 = vld [vmem:[%s17548_s0 + $0x182] sm:$0xff]  ;;  %v8271_v59 = vld [vmem:[%s17548_s0 + $0x350] sm:$0xff] }
 0x8dd   :  { %v6255_v55 = vsel %vm6182_vm6, %v6126_v22, %v5040_v17  ;;  %v6233_v15 = vsel %vm6182_vm6, %v6104_v29, %v4996_v20  ;;  %v4064_v34 = vpop.permute.xlu0 %4063  ;;  %v6898_v52 = vpop.f32.mrf.mxu0  ;;  %v5693_v7 = vsel %vm5666_vm4, %v5564_v42, %v18447_v45  ;;  %v5331_v22 = vsel %vm5279_vm0, %v80_v48, %v18450_v9  ;;  %v18451_v29 = vld [vmem:[#allocation69_spill] sm:$0xff]  ;;  %v18462_v42 = vld [vmem:[#allocation214_spill] sm:$0xff]  ;;  %v18463_v45 = vld [vmem:[#allocation320_spill] sm:$0xff] }
 0x8de   :  { %v6899_v47 = vadd.f32 %v14350_v13, %v6898_v52  ;;  %v6362_v62 = vsel %vm6311_vm8, %v6233_v15, 0.0  ;;  %v6384_v30 = vsel %vm6311_vm8, %v6255_v55, 0.0  ;;  %v5822_v23 = vsel %vm5795_vm3, %v5693_v7, %v18448_v32  ;;  %v18452_v55 = vld [vmem:[#allocation155_spill] sm:$0xff]  ;;  %v18464_v48 = vld [vmem:[#allocation450_spill] sm:$0xff] }
 0x8df   :  { %8628 = vmatmul.msk.f32.gmra.mxu1 %vm6448_vm9, %v6362_v62  ;;  %8650 = vmatmul.msk.f32.gmra.mxu2 %vm6448_vm9, %v6384_v30  ;;  %v5951_v6 = vsel %vm5924_vm5, %v5822_v23, %v18449_v4  ;;  %v5353_v17 = vsel %vm5279_vm0, %v102_v60, %v18451_v29  ;;  %v5460_v15 = vsel %vm5408_vm1, %v5331_v22, %v18452_v55  ;;  %v8353_v62 = vld [vmem:[%s17548_s0 + $0x181] sm:$0xff]  ;;  %v18466_v22 = vld [vmem:[#allocation25_spill] sm:$0xff] }
 0x8e0   :  { %v7250_v63 = vmax.f32 %v6899_v47, 0.0  ;;  %v6080_v46 = vsel %vm6053_vm7, %v5951_v6, %v14664_v24  ;;  %v8551_v30 = vld [vmem:[%s17548_s0 + $0x442] sm:$0xff] }
 0x8e1   :  { %v56_v32 = vld [vmem:[%s17548_s0 + $0x108] sm:$0xff] }
 0x8e2   :  { %v7377_v53 = vadd.f32 %v7376_v58, %v7250_v63  ;;  %4535 = vrot.lane.b32.xlu2 %v8398_v50, %s8783_s22  ;;  %4493 = vrot.lane.b32.xlu1 %v8377_v14, %s8783_s22  ;;  %v6021_v58 = vsel %vm5924_vm5, %v5892_v3, %v4064_v34  ;;  %v18453_v34 = vld [vmem:[#allocation190_spill] sm:$0xff]  ;;  %v18454_v50 = vld [vmem:[#allocation285_spill] sm:$0xff]  ;;  %v18465_v23 = vld [vmem:[#allocation571_spill] sm:$0xff]  ;;  %v5307_v29 = vsel %vm5279_vm0, %v56_v32, %v18466_v22 }
 0x8e3   :  { %4955 = vrot.lane.b32.xlu0 %v8480_v56, %s8784_s23  ;;  %v5482_v52 = vsel %vm5408_vm1, %v5353_v17, %v18453_v34  ;;  %v5589_v14 = vsel %vm5537_vm2, %v5460_v15, %v18454_v50  ;;  %v8423_v63 = vld [vmem:[%s17548_s0 + $0x441] sm:$0xff] }
 0x8e4   :  { %v14780_v36 = vpop.permute.xlu2 %4437  ;;  %v5088_v43 = vpop.permute.xlu1 %5087  ;;  %v5611_v8 = vsel %vm5537_vm2, %v5482_v52, %v18455_v35  ;;  %v18456_v56 = vld [vmem:[#allocation406_spill] sm:$0xff]  ;;  %v18467_v55 = vld [vmem:[#allocation131_spill] sm:$0xff] }
 0x8e5   :  { %v4576_v18 = vpop.permute.xlu0 %4575  ;;  %v5718_v16 = vsel %vm5666_vm4, %v5589_v14, %v18456_v56  ;;  %v5740_v1 = vsel %vm5666_vm4, %v5611_v8, %v18457_v21  ;;  %v5436_v15 = vsel %vm5408_vm1, %v5307_v29, %v18467_v55  ;;  %v81_v35 = vld [vmem:[%s17548_s0 + $0x208] sm:$0xff]  ;;  %v18470_v8 = vld [vmem:[#allocation488_spill] sm:$0xff]  ;;  %v18471_v56 = vld [vmem:[#allocation618_spill] sm:$0xff] }
 0x8e6   :  { %v6150_v51 = vsel %vm6053_vm7, %v6021_v58, %v4576_v18  ;;  %v6901_v26 = vpop.f32.mrf.mxu0  ;;  %v5869_v40 = vsel %vm5795_vm3, %v5740_v1, %v18459_v61  ;;  %v8482_v29 = vld [vmem:[%s17548_s0 + $0x192] sm:$0xff] }
 0x8e7   :  { %v6902_v25 = vadd.f32 %v14350_v13, %v6901_v26  ;;  %v6279_v27 = vsel %vm6182_vm6, %v6150_v51, %v5088_v43  ;;  %v5998_v43 = vsel %vm5924_vm5, %v5869_v40, %v13455_v31  ;;  %v18483_v55 = vld [vmem:[#allocation525_spill] sm:$0xff] }
 0x8e8   :  { %v6408_v33 = vsel %vm6311_vm8, %v6279_v27, 0.0 }
 0x8e9   :  { %v7251_v19 = vmax.f32 %v6902_v25, 0.0  ;;  %8674 = vmatmul.msk.f32.gmra.mxu3 %vm6448_vm9, %v6408_v33  ;;  %v18461_v33 = vld [vmem:[#allocation93_spill] sm:$0xff] }
 0x8ea   :  { %5047 = vrot.lane.b32.xlu2 %v8526_v10, %s8784_s23  ;;  %5005 = vrot.lane.b32.xlu1 %v8505_v38, %s8784_s23 }
 0x8eb   :  { %v7378_v37 = vadd.f32 %v7377_v53, %v7251_v19  ;;  %4073 = vrot.lane.b32.xlu0 %v8295_v11, %s8782_s12  ;;  %v18458_v53 = vld [vmem:[#allocation512_spill] sm:$0xff]  ;;  %v5377_v11 = vsel %vm5279_vm0, %v126_v49, %v18461_v33 }
 0x8ec   :  { %v4530_v28 = vpop.permute.xlu2 %4529  ;;  %v4486_v44 = vpop.permute.xlu1 %4485  ;;  %v5847_v0 = vsel %vm5795_vm3, %v5718_v16, %v18458_v53  ;;  %v5506_v19 = vsel %vm5408_vm1, %v5377_v11, %v18462_v42  ;;  %v8527_v49 = vld [vmem:[%s17548_s0 + $0x352] sm:$0xff] }
 0x8ed   :  { %v4948_v57 = vpop.permute.xlu0 %4947  ;;  %v5976_v3 = vsel %vm5924_vm5, %v5847_v0, %v18460_v39  ;;  %v6127_v18 = vsel %vm6053_vm7, %v5998_v43, %v4530_v28  ;;  %v5635_v7 = vsel %vm5537_vm2, %v5506_v19, %v18463_v45  ;;  %v18472_v0 = vld [vmem:[#allocation48_spill] sm:$0xff] }
 0x8ee   :  { %v6209_v20 = vsel %vm6182_vm6, %v6080_v46, %v4948_v57  ;;  %v6904_v54 = vpop.f32.mrf.mxu0  ;;  %v6105_v51 = vsel %vm6053_vm7, %v5976_v3, %v4486_v44  ;;  %v5764_v60 = vsel %vm5666_vm4, %v5635_v7, %v18464_v48  ;;  %v5332_v61 = vsel %vm5279_vm0, %v81_v35, %v18472_v0  ;;  %v18473_v3 = vld [vmem:[#allocation169_spill] sm:$0xff]  ;;  %v127_v48 = vld [vmem:[%s17548_s0 + $0x3d0] sm:$0xff] }
 0x8ef   :  { %v6338_v47 = vsel %vm6311_vm8, %v6209_v20, 0.0  ;;  %v6905_v24 = vadd.f32 %v14350_v13, %v6904_v54  ;;  %v8506_v20 = vld [vmem:[%s17548_s0 + $0x282] sm:$0xff]  ;;  %v5461_v43 = vsel %vm5408_vm1, %v5332_v61, %v18473_v3 }
 0x8f0   :  { %8604 = vmatmul.msk.f32.gmra.mxu0 %vm6448_vm9, %v6338_v47  ;;  %v8296_v54 = vld [vmem:[%s17548_s0 + $0x448] sm:$0xff]  ;;  %v8399_v47 = vld [vmem:[%s17548_s0 + $0x351] sm:$0xff] }
 0x8f1   :  { %v7252_v5 = vmax.f32 %v6905_v24, 0.0  ;;  %v18468_v24 = vld [vmem:[#allocation261_spill] sm:$0xff] }
 0x8f2   :  { %4445 = vrot.lane.b32.xlu2 %v8353_v62, %s8783_s22  ;;  %5097 = vrot.lane.b32.xlu1 %v8551_v30, %s8784_s23  ;;  %v5565_v62 = vsel %vm5537_vm2, %v5436_v15, %v18468_v24  ;;  %v18469_v30 = vld [vmem:[#allocation382_spill] sm:$0xff] }
 0x8f3   :  { %v7379_v58 = vadd.f32 %v7378_v37, %v7252_v5  ;;  %4585 = vrot.lane.b32.xlu0 %v8423_v63, %s8783_s22  ;;  %v5893_v37 = vsel %vm5795_vm3, %v5764_v60, %v18465_v23  ;;  %v5694_v50 = vsel %vm5666_vm4, %v5565_v62, %v18469_v30  ;;  %v18479_v60 = vld [vmem:[#allocation168_spill] sm:$0xff]  ;;  %v18485_v24 = vld [vmem:[#allocation646_spill] sm:$0xff] }
 0x8f4   :  { %v5042_v26 = vpop.permute.xlu2 %5041  ;;  %v4998_v2 = vpop.permute.xlu1 %4997  ;;  %v5823_v63 = vsel %vm5795_vm3, %v5694_v50, %v18470_v8  ;;  %v18486_v50 = vld [vmem:[#allocation334_spill] sm:$0xff]  ;;  %v57_v8 = vld [vmem:[%s17548_s0 + $0x118] sm:$0xff] }
 0x8f5   :  { %v6256_v25 = vsel %vm6182_vm6, %v6127_v18, %v5042_v26  ;;  %v6234_v27 = vsel %vm6182_vm6, %v6105_v51, %v4998_v2  ;;  %v4066_v10 = vpop.permute.xlu0 %4065  ;;  %v5952_v16 = vsel %vm5924_vm5, %v5823_v63, %v18471_v56  ;;  %v8552_v51 = vld [vmem:[%s17548_s0 + $0x44a] sm:$0xff] }
 0x8f6   :  { %v6363_v31 = vsel %vm6311_vm8, %v6234_v27, 0.0  ;;  %v6385_v38 = vsel %vm6311_vm8, %v6256_v25, 0.0  ;;  %v6022_v28 = vsel %vm5924_vm5, %v5893_v37, %v4066_v10  ;;  %v6081_v5 = vsel %vm6053_vm7, %v5952_v16, %v14780_v36  ;;  %v8424_v36 = vld [vmem:[%s17548_s0 + $0x449] sm:$0xff]  ;;  %v18475_v27 = vld [vmem:[#allocation405_spill] sm:$0xff] }
 0x8f7   :  { %8629 = vmatmul.msk.f32.gmra.mxu1 %vm6448_vm9, %v6363_v31  ;;  %8651 = vmatmul.msk.f32.gmra.mxu2 %vm6448_vm9, %v6385_v38  ;;  %v18474_v26 = vld [vmem:[#allocation275_spill] sm:$0xff]  ;;  %v82_v25 = vld [vmem:[%s17548_s0 + $0x210] sm:$0xff]  ;;  %v18476_v38 = vld [vmem:[#allocation526_spill] sm:$0xff] }
 0x8f8   :  { %v5590_v2 = vsel %vm5537_vm2, %v5461_v43, %v18474_v26  ;;  %v18487_v63 = vld [vmem:[#allocation440_spill] sm:$0xff] }
 0x8f9   :  { %v5719_v10 = vsel %vm5666_vm4, %v5590_v2, %v18475_v27  ;;  %v8297_v26 = vld [vmem:[%s17548_s0 + $0x450] sm:$0xff]  ;;  %v8400_v2 = vld [vmem:[%s17548_s0 + $0x359] sm:$0xff] }
 0x8fa   :  { %4495 = vrot.lane.b32.xlu2 %v8378_v41, %s8783_s22  ;;  %4957 = vrot.lane.b32.xlu1 %v8481_v12, %s8784_s23  ;;  %v5848_v41 = vsel %vm5795_vm3, %v5719_v10, %v18476_v38  ;;  %v18477_v12 = vld [vmem:[#allocation632_spill] sm:$0xff] }
 0x8fb   :  { %4025 = vrot.lane.b32.xlu0 %v8271_v59, %s8782_s12  ;;  %v5977_v33 = vsel %vm5924_vm5, %v5848_v41, %v18477_v12  ;;  %v18478_v59 = vld [vmem:[#allocation38_spill] sm:$0xff]  ;;  %v8379_v10 = vld [vmem:[%s17548_s0 + $0x289] sm:$0xff] }
 0x8fc   :  { %v14896_v4 = vpop.permute.xlu2 %4439  ;;  %v5090_v6 = vpop.permute.xlu1 %5089  ;;  %v5333_v42 = vsel %vm5279_vm0, %v82_v25, %v18478_v59  ;;  %v18493_v41 = vld [vmem:[#allocation502_spill] sm:$0xff] }
 0x8fd   :  { %v4578_v44 = vpop.permute.xlu0 %4577  ;;  %v6907_v46 = vpop.f32.mrf.mxu0  ;;  %v5462_v32 = vsel %vm5408_vm1, %v5333_v42, %v18479_v60 }
 0x8fe   :  { %v6151_v57 = vsel %vm6053_vm7, %v6022_v28, %v4578_v44  ;;  %v6908_v9 = vadd.f32 %v14350_v13, %v6907_v46 }
 0x8ff   :  { %v6280_v17 = vsel %vm6182_vm6, %v6151_v57, %v5090_v6  ;;  %v18480_v6 = vld [vmem:[#allocation289_spill] sm:$0xff]  ;;  %v18481_v57 = vld [vmem:[#allocation395_spill] sm:$0xff] }
 0x900   :  { %v7253_v34 = vmax.f32 %v6908_v9, 0.0  ;;  %v6409_v52 = vsel %vm6311_vm8, %v6280_v17, 0.0  ;;  %v5591_v28 = vsel %vm5537_vm2, %v5462_v32, %v18480_v6  ;;  %v8272_v17 = vld [vmem:[%s17548_s0 + $0x358] sm:$0xff]  ;;  %v8507_v6 = vld [vmem:[%s17548_s0 + $0x28a] sm:$0xff] }
 0x901   :  { %8675 = vmatmul.msk.f32.gmra.mxu3 %vm6448_vm9, %v6409_v52  ;;  %v5720_v9 = vsel %vm5666_vm4, %v5591_v28, %v18481_v57  ;;  %v18484_v52 = vld [vmem:[#allocation213_spill] sm:$0xff] }
 0x902   :  { %v7380_v14 = vadd.f32 %v7379_v58, %v7253_v34  ;;  %5007 = vrot.lane.b32.xlu2 %v8506_v20, %s8784_s23  ;;  %4075 = vrot.lane.b32.xlu1 %v8296_v54, %s8782_s12  ;;  %v18482_v20 = vld [vmem:[#allocation83_spill] sm:$0xff]  ;;  %v5849_v15 = vsel %vm5795_vm3, %v5720_v9, %v18483_v55  ;;  %v8354_v34 = vld [vmem:[%s17548_s0 + $0x191] sm:$0xff]  ;;  %v8355_v55 = vld [vmem:[%s17548_s0 + $0x199] sm:$0xff] }
 0x903   :  { %4537 = vrot.lane.b32.xlu0 %v8399_v47, %s8783_s22  ;;  %v5378_v54 = vsel %vm5279_vm0, %v127_v48, %v18482_v20  ;;  %v5978_v62 = vsel %vm5924_vm5, %v5849_v15, %v18485_v24  ;;  %v18497_v15 = vld [vmem:[#allocation189_spill] sm:$0xff] }
 0x904   :  { %v4490_v21 = vpop.permute.xlu2 %4489  ;;  %v4488_v1 = vpop.permute.xlu1 %4487  ;;  %v5507_v47 = vsel %vm5408_vm1, %v5378_v54, %v18484_v52  ;;  %v8273_v54 = vld [vmem:[%s17548_s0 + $0x360] sm:$0xff]  ;;  %v18498_v52 = vld [vmem:[#allocation203_spill] sm:$0xff]  ;;  %v8553_v24 = vld [vmem:[%s17548_s0 + $0x452] sm:$0xff] }
 0x905   :  { %v4950_v53 = vpop.permute.xlu0 %4949  ;;  %v6106_v19 = vsel %vm6053_vm7, %v5977_v33, %v4488_v1  ;;  %v6107_v35 = vsel %vm6053_vm7, %v5978_v62, %v4490_v21  ;;  %v18494_v33 = vld [vmem:[#allocation608_spill] sm:$0xff]  ;;  %v18499_v62 = vld [vmem:[#allocation310_spill] sm:$0xff] }
 0x906   :  { %v6210_v40 = vsel %vm6182_vm6, %v6081_v5, %v4950_v53  ;;  %v6910_v39 = vpop.f32.mrf.mxu0  ;;  %v18488_v5 = vld [vmem:[#allocation570_spill] sm:$0xff] }
 0x907   :  { %v6339_v58 = vsel %vm6311_vm8, %v6210_v40, 0.0  ;;  %v6911_v18 = vadd.f32 %v14350_v13, %v6910_v39  ;;  %v18489_v39 = vld [vmem:[#allocation24_spill] sm:$0xff] }
 0x908   :  { %8605 = vmatmul.msk.f32.gmra.mxu0 %vm6448_vm9, %v6339_v58  ;;  %v5308_v3 = vsel %vm5279_vm0, %v57_v8, %v18489_v39 }
 0x909   :  { %v7254_v31 = vmax.f32 %v6911_v18, 0.0  ;;  %v18490_v18 = vld [vmem:[#allocation145_spill] sm:$0xff] }
 0x90a   :  { %5099 = vrot.lane.b32.xlu2 %v8552_v51, %s8784_s23  ;;  %4587 = vrot.lane.b32.xlu1 %v8424_v36, %s8783_s22  ;;  %v5437_v51 = vsel %vm5408_vm1, %v5308_v3, %v18490_v18  ;;  %v58_v3 = vld [vmem:[%s17548_s0 + $0x120] sm:$0xff] }
 0x90b   :  { %v7381_v11 = vadd.f32 %v7380_v14, %v7254_v31  ;;  %5049 = vrot.lane.b32.xlu0 %v8527_v49, %s8784_s23  ;;  %v5636_v14 = vsel %vm5537_vm2, %v5507_v47, %v18486_v50  ;;  %v18491_v49 = vld [vmem:[#allocation251_spill] sm:$0xff]  ;;  %v18492_v31 = vld [vmem:[#allocation381_spill] sm:$0xff] }
 0x90c   :  { %v5002_v45 = vpop.permute.xlu2 %5001  ;;  %v5000_v7 = vpop.permute.xlu1 %4999  ;;  %v5765_v56 = vsel %vm5666_vm4, %v5636_v14, %v18487_v63  ;;  %v5566_v25 = vsel %vm5537_vm2, %v5437_v51, %v18491_v49  ;;  %v18500_v50 = vld [vmem:[#allocation333_spill] sm:$0xff]  ;;  %v18502_v63 = vld [vmem:[#allocation454_spill] sm:$0xff] }
 0x90d   :  { %v6235_v23 = vsel %vm6182_vm6, %v6106_v19, %v5000_v7  ;;  %v4068_v37 = vpop.permute.xlu0 %4067  ;;  %v6236_v16 = vsel %vm6182_vm6, %v6107_v35, %v5002_v45  ;;  %v5894_v53 = vsel %vm5795_vm3, %v5765_v56, %v18488_v5  ;;  %v5695_v38 = vsel %vm5666_vm4, %v5566_v25, %v18492_v31  ;;  %v18501_v35 = vld [vmem:[#allocation416_spill] sm:$0xff] }
 0x90e   :  { %v6913_v44 = vpop.f32.mrf.mxu0  ;;  %v6364_v46 = vsel %vm6311_vm8, %v6235_v23, 0.0  ;;  %v6023_v61 = vsel %vm5924_vm5, %v5894_v53, %v4068_v37  ;;  %v6365_v58 = vsel %vm6311_vm8, %v6236_v16, 0.0  ;;  %v5824_v12 = vsel %vm5795_vm3, %v5695_v38, %v18493_v41  ;;  %v8425_v23 = vld [vmem:[%s17548_s0 + $0x451] sm:$0xff]  ;;  %v18503_v16 = vld [vmem:[#allocation546_spill] sm:$0xff] }
 0x90f   :  { %v6914_v22 = vadd.f32 %v14350_v13, %v6913_v44  ;;  %8630 = vmatmul.msk.f32.gmra.mxu1 %vm6448_vm9, %v6364_v46  ;;  %v128_v44 = vld [vmem:[%s17548_s0 + $0x3d8] sm:$0xff]  ;;  %v18504_v5 = vld [vmem:[#allocation560_spill] sm:$0xff]  ;;  %v18505_v38 = vld [vmem:[#allocation14_spill] sm:$0xff] }
 0x910   :  { %v8380_v31 = vld [vmem:[%s17548_s0 + $0x291] sm:$0xff]  ;;  %v5309_v41 = vsel %vm5279_vm0, %v58_v3, %v18505_v38 }
 0x911   :  { %v7255_v30 = vmax.f32 %v6914_v22, 0.0  ;;  %v18495_v22 = vld [vmem:[#allocation59_spill] sm:$0xff]  ;;  %v18519_v3 = vld [vmem:[#allocation536_spill] sm:$0xff]  ;;  %v18523_v38 = vld [vmem:[#allocation193_spill] sm:$0xff] }
 0x912   :  { %4959 = vrot.lane.b32.xlu2 %v8482_v29, %s8784_s23  ;;  %4027 = vrot.lane.b32.xlu1 %v8272_v17, %s8782_s12  ;;  %v18496_v17 = vld [vmem:[#allocation97_spill] sm:$0xff] }
 0x913   :  { %v7382_v1 = vadd.f32 %v7381_v11, %v7255_v30  ;;  %4447 = vrot.lane.b32.xlu0 %v8354_v34, %s8783_s22  ;;  %v5953_v11 = vsel %vm5924_vm5, %v5824_v12, %v18494_v33  ;;  %v5379_v20 = vsel %vm5279_vm0, %v128_v44, %v18496_v17  ;;  %v18506_v33 = vld [vmem:[#allocation144_spill] sm:$0xff]  ;;  %v83_v17 = vld [vmem:[%s17548_s0 + $0x218] sm:$0xff] }
 0x914   :  { %v15011_v21 = vpop.permute.xlu2 %5093  ;;  %v5092_v0 = vpop.permute.xlu1 %5091  ;;  %v6082_v59 = vsel %vm6053_vm7, %v5953_v11, %v14896_v4  ;;  %v8528_v4 = vld [vmem:[%s17548_s0 + $0x35a] sm:$0xff]  ;;  %v5508_v47 = vsel %vm5408_vm1, %v5379_v20, %v18498_v52  ;;  %v5438_v11 = vsel %vm5408_vm1, %v5309_v41, %v18506_v33  ;;  %v18512_v52 = vld [vmem:[#allocation52_spill] sm:$0xff] }
 0x915   :  { %v4580_v40 = vpop.permute.xlu0 %4579  ;;  %v5637_v14 = vsel %vm5537_vm2, %v5508_v47, %v18500_v50  ;;  %v5334_v47 = vsel %vm5279_vm0, %v83_v17, %v18512_v52  ;;  %v8554_v50 = vld [vmem:[%s17548_s0 + $0x462] sm:$0xff] }
 0x916   :  { %v6152_v43 = vsel %vm6053_vm7, %v6023_v61, %v4580_v40  ;;  %v5766_v56 = vsel %vm5666_vm4, %v5637_v14, %v18502_v63  ;;  %v18514_v14 = vld [vmem:[#allocation158_spill] sm:$0xff] }
 0x917   :  { %8631 = vmatmul.msk.f32.gmra.mxu1 %vm6448_vm9, %v6365_v58  ;;  %v6281_v36 = vsel %vm6182_vm6, %v6152_v43, %v5092_v0  ;;  %v5895_v53 = vsel %vm5795_vm3, %v5766_v56, %v18504_v5  ;;  %v8426_v56 = vld [vmem:[%s17548_s0 + $0x461] sm:$0xff] }
 0x918   :  { %v6410_v27 = vsel %vm6311_vm8, %v6281_v36, 0.0 }
 0x919   :  { %8676 = vmatmul.msk.f32.gmra.mxu3 %vm6448_vm9, %v6410_v27 }
 0x91a   :  { %4077 = vrot.lane.b32.xlu2 %v8297_v26, %s8782_s12  ;;  %4539 = vrot.lane.b32.xlu1 %v8400_v2, %s8783_s22  ;;  %v8774_v26 = vld [vmem:[%s17550_s2] ss:$0 sm:$0xff] }
 0x91b   :  { %4497 = vrot.lane.b32.xlu0 %v8379_v10, %s8783_s22  ;;  %v8401_v10 = vld [vmem:[%s17548_s0 + $0x361] sm:$0xff] }
 0x91c   :  { %v15046_v42 = vpop.permute.xlu2 %4953  ;;  %v4952_v19 = vpop.permute.xlu1 %4951 }
 0x91d   :  { %v6211_v45 = vsel %vm6182_vm6, %v6082_v59, %v4952_v19  ;;  %v4020_v7 = vpop.permute.xlu0 %4019  ;;  %v6916_v48 = vpop.f32.mrf.mxu0  ;;  %v18507_v59 = vld [vmem:[#allocation265_spill] sm:$0xff] }
 0x91e   :  { %v6340_v60 = vsel %vm6311_vm8, %v6211_v45, 0.0  ;;  %v6917_v32 = vadd.f32 %v14350_v13, %v6916_v48  ;;  %v103_v13 = vld [vmem:[%s17548_s0 + $0x2e0] sm:$0xff]  ;;  %v5567_v19 = vsel %vm5537_vm2, %v5438_v11, %v18507_v59  ;;  %v18524_v11 = vld [vmem:[#allocation299_spill] sm:$0xff] }
 0x91f   :  { %8606 = vmatmul.msk.f32.gmra.mxu0 %vm6448_vm9, %v6340_v60  ;;  %v5354_v29 = vsel %vm5279_vm0, %v103_v13, %v18495_v22  ;;  %v18509_v60 = vld [vmem:[#allocation501_spill] sm:$0xff] }
 0x920   :  { %v7256_v37 = vmax.f32 %v6917_v32, 0.0  ;;  %v5483_v34 = vsel %vm5408_vm1, %v5354_v29, %v18497_v15  ;;  %v8298_v29 = vld [vmem:[%s17548_s0 + $0x460] sm:$0xff]  ;;  %v18511_v15 = vld [vmem:[#allocation73_spill] sm:$0xff] }
 0x921   :  { %v5612_v30 = vsel %vm5537_vm2, %v5483_v34, %v18499_v62 }
 0x922   :  { %v7383_v28 = vadd.f32 %v7382_v1, %v7256_v37  ;;  %4589 = vrot.lane.b32.xlu2 %v8425_v23, %s8783_s22  ;;  %5051 = vrot.lane.b32.xlu1 %v8528_v4, %s8784_s23  ;;  %v5741_v8 = vsel %vm5666_vm4, %v5612_v30, %v18501_v35  ;;  %v18510_v37 = vld [vmem:[#allocation622_spill] sm:$0xff]  ;;  %v5463_v35 = vsel %vm5408_vm1, %v5334_v47, %v18514_v14 }
 0x923   :  { %5009 = vrot.lane.b32.xlu0 %v8507_v6, %s8784_s23  ;;  %v5870_v1 = vsel %vm5795_vm3, %v5741_v8, %v18503_v16  ;;  %v8356_v30 = vld [vmem:[%s17548_s0 + $0x1a1] sm:$0xff]  ;;  %v18515_v8 = vld [vmem:[#allocation309_spill] sm:$0xff] }
 0x924   :  { %v15070_v46 = vpop.permute.xlu2 %4071  ;;  %v4070_v57 = vpop.permute.xlu1 %4069  ;;  %v5999_v0 = vsel %vm5924_vm5, %v5870_v1, %v4020_v7  ;;  %v18508_v7 = vld [vmem:[#allocation371_spill] sm:$0xff]  ;;  %v105_v16 = vld [vmem:[%s17548_s0 + $0x2f8] sm:$0xff]  ;;  %v18516_v1 = vld [vmem:[#allocation288_spill] sm:$0xff] }
 0x925   :  { %v4532_v9 = vpop.permute.xlu0 %4531  ;;  %v6024_v61 = vsel %vm5924_vm5, %v5895_v53, %v4070_v57  ;;  %v5696_v48 = vsel %vm5666_vm4, %v5567_v19, %v18508_v7  ;;  %v8529_v57 = vld [vmem:[%s17548_s0 + $0x362] sm:$0xff]  ;;  %v5592_v5 = vsel %vm5537_vm2, %v5463_v35, %v18516_v1 }
 0x926   :  { %v6128_v43 = vsel %vm6053_vm7, %v5999_v0, %v4532_v9  ;;  %v5825_v32 = vsel %vm5795_vm3, %v5696_v48, %v18509_v60  ;;  %v8508_v9 = vld [vmem:[%s17548_s0 + $0x292] sm:$0xff]  ;;  %v18517_v53 = vld [vmem:[#allocation430_spill] sm:$0xff] }
 0x927   :  { %v5954_v6 = vsel %vm5924_vm5, %v5825_v32, %v18510_v37  ;;  %v18525_v48 = vld [vmem:[#allocation96_spill] sm:$0xff]  ;;  %v18526_v32 = vld [vmem:[#allocation429_spill] sm:$0xff] }
 0x92a   :  { %4029 = vrot.lane.b32.xlu2 %v8273_v54, %s8782_s12  ;;  %4449 = vrot.lane.b32.xlu1 %v8355_v55, %s8783_s22 }
 0x92b   :  { %5101 = vrot.lane.b32.xlu0 %v8553_v24, %s8784_s23  ;;  %v18513_v24 = vld [vmem:[#allocation179_spill] sm:$0xff] }
 0x92c   :  { %v15106_v40 = vpop.permute.xlu2 %4583  ;;  %v4582_v39 = vpop.permute.xlu1 %4581 }
 0x92d   :  { %v6153_v58 = vsel %vm6053_vm7, %v6024_v61, %v4582_v39  ;;  %v5044_v18 = vpop.permute.xlu0 %5043  ;;  %v6919_v51 = vpop.f32.mrf.mxu0  ;;  %v18518_v61 = vld [vmem:[#allocation409_spill] sm:$0xff] }
 0x92e   :  { %v6257_v36 = vsel %vm6182_vm6, %v6128_v43, %v5044_v18  ;;  %v6920_v2 = vadd.f32 %v8774_v26, %v6919_v51  ;;  %v6282_v49 = vsel %vm6182_vm6, %v6153_v58, %v15011_v21  ;;  %v8483_v21 = vld [vmem:[%s17548_s0 + $0x19a] sm:$0xff]  ;;  %v5721_v39 = vsel %vm5666_vm4, %v5592_v5, %v18518_v61  ;;  %v18520_v58 = vld [vmem:[#allocation515_spill] sm:$0xff]  ;;  %v8402_v5 = vld [vmem:[%s17548_s0 + $0x371] sm:$0xff] }
 0x92f   :  { %v6386_v25 = vsel %vm6311_vm8, %v6257_v36, 0.0  ;;  %v6411_v27 = vsel %vm6311_vm8, %v6282_v49, 0.0  ;;  %v5850_v18 = vsel %vm5795_vm3, %v5721_v39, %v18520_v58  ;;  %v18521_v36 = vld [vmem:[#allocation72_spill] sm:$0xff]  ;;  %v18522_v49 = vld [vmem:[#allocation645_spill] sm:$0xff]  ;;  %v84_v58 = vld [vmem:[%s17548_s0 + $0x220] sm:$0xff] }
 0x930   :  { %v7257_v12 = vmax.f32 %v6920_v2, 0.0  ;;  %8652 = vmatmul.msk.f32.gmra.mxu2 %vm6448_vm9, %v6386_v25  ;;  %8677 = vmatmul.msk.f32.gmra.mxu3 %vm6448_vm9, %v6411_v27  ;;  %v5356_v26 = vsel %vm5279_vm0, %v105_v16, %v18521_v36  ;;  %v129_v2 = vld [vmem:[%s17548_s0 + $0x3e8] sm:$0xff]  ;;  %v5979_v25 = vsel %vm5924_vm5, %v5850_v18, %v18522_v49  ;;  %v18533_v16 = vld [vmem:[#allocation134_spill] sm:$0xff]  ;;  %v18535_v61 = vld [vmem:[#allocation385_spill] sm:$0xff] }
 0x931   :  { %v5485_v41 = vsel %vm5408_vm1, %v5356_v26, %v18523_v38  ;;  %v5380_v60 = vsel %vm5279_vm0, %v129_v2, %v18525_v48  ;;  %v18537_v18 = vld [vmem:[#allocation621_spill] sm:$0xff]  ;;  %v8555_v38 = vld [vmem:[%s17548_s0 + $0x46a] sm:$0xff] }
 0x932   :  { %v15138_v45 = vadd.f32 %v7383_v28, %v7257_v12  ;;  %4541 = vrot.lane.b32.xlu2 %v8401_v10, %s8783_s22  ;;  %4499 = vrot.lane.b32.xlu1 %v8380_v31, %s8783_s22  ;;  %v5614_v59 = vsel %vm5537_vm2, %v5485_v41, %v18524_v11  ;;  %v8427_v41 = vld [vmem:[%s17548_s0 + $0x469] sm:$0xff]  ;;  %v18540_v11 = vld [vmem:[#allocation278_spill] sm:$0xff] }
 0x933   :  { %4961 = vrot.lane.b32.xlu0 %v8483_v21, %s8784_s23 }
 0x934   :  { %v4024_v23 = vpop.permute.xlu2 %4023  ;;  %v4022_v4 = vpop.permute.xlu1 %4021 }
 0x935   :  { %v4442_v13 = vpop.permute.xlu0 %4441 }
 0x936   :  { %v6083_v28 = vsel %vm6053_vm7, %v5954_v6, %v4442_v13  ;;  %v8381_v6 = vld [vmem:[%s17548_s0 + $0x299] sm:$0xff]  ;;  %v8484_v13 = vld [vmem:[%s17548_s0 + $0x1a2] sm:$0xff] }
 0x937   :  { %v6212_v44 = vsel %vm6182_vm6, %v6083_v28, %v15046_v42  ;;  %v104_v42 = vld [vmem:[%s17548_s0 + $0x2e8] sm:$0xff]  ;;  %v18527_v28 = vld [vmem:[#allocation217_spill] sm:$0xff] }
 0x938   :  { %v6341_v22 = vsel %vm6311_vm8, %v6212_v44, 0.0  ;;  %v5355_v34 = vsel %vm5279_vm0, %v104_v42, %v18511_v15  ;;  %v5509_v44 = vsel %vm5408_vm1, %v5380_v60, %v18527_v28  ;;  %v18542_v60 = vld [vmem:[#allocation529_spill] sm:$0xff] }
 0x939   :  { %8607 = vmatmul.msk.f32.gmra.mxu0 %vm6448_vm9, %v6341_v22  ;;  %v5484_v62 = vsel %vm5408_vm1, %v5355_v34, %v18513_v24  ;;  %v8274_v22 = vld [vmem:[%s17548_s0 + $0x370] sm:$0xff]  ;;  %v18531_v34 = vld [vmem:[#allocation574_spill] sm:$0xff] }
 0x93a   :  { %5053 = vrot.lane.b32.xlu2 %v8529_v57, %s8784_s23  ;;  %5011 = vrot.lane.b32.xlu1 %v8508_v9, %s8784_s23  ;;  %v5613_v63 = vsel %vm5537_vm2, %v5484_v62, %v18515_v8  ;;  %v18528_v57 = vld [vmem:[#allocation550_spill] sm:$0xff]  ;;  %v18532_v8 = vld [vmem:[#allocation28_spill] sm:$0xff] }
 0x93b   :  { %4079 = vrot.lane.b32.xlu0 %v8298_v29, %s8782_s12  ;;  %v5742_v0 = vsel %vm5666_vm4, %v5613_v63, %v18517_v53  ;;  %v18529_v29 = vld [vmem:[#allocation323_spill] sm:$0xff]  ;;  %v18534_v53 = vld [vmem:[#allocation264_spill] sm:$0xff] }
 0x93c   :  { %v4536_v20 = vpop.permute.xlu2 %4535  ;;  %v4534_v54 = vpop.permute.xlu1 %4533  ;;  %v5871_v43 = vsel %vm5795_vm3, %v5742_v0, %v18519_v3  ;;  %v5638_v42 = vsel %vm5537_vm2, %v5509_v44, %v18529_v29  ;;  %v18536_v3 = vld [vmem:[#allocation491_spill] sm:$0xff]  ;;  %v130_v44 = vld [vmem:[%s17548_s0 + $0x3f0] sm:$0xff] }
 0x93d   :  { %v4492_v55 = vpop.permute.xlu0 %4491  ;;  %v6000_v51 = vsel %vm5924_vm5, %v5871_v43, %v4022_v4  ;;  %v5743_v4 = vsel %vm5666_vm4, %v5614_v59, %v18526_v32  ;;  %v18545_v29 = vld [vmem:[#allocation171_spill] sm:$0xff] }
 0x93e   :  { %v6129_v27 = vsel %vm6053_vm7, %v6000_v51, %v4534_v54  ;;  %v6108_v12 = vsel %vm6053_vm7, %v5979_v25, %v4492_v55  ;;  %v5872_v9 = vsel %vm5795_vm3, %v5743_v4, %v18528_v57  ;;  %v18530_v54 = vld [vmem:[#allocation453_spill] sm:$0xff]  ;;  %v18543_v4 = vld [vmem:[#allocation635_spill] sm:$0xff] }
 0x93f   :  { %v6001_v17 = vsel %vm5924_vm5, %v5872_v9, %v4024_v23  ;;  %v5767_v55 = vsel %vm5666_vm4, %v5638_v42, %v18530_v54  ;;  %v59_v23 = vld [vmem:[%s17548_s0 + $0x128] sm:$0xff]  ;;  %v18546_v54 = vld [vmem:[#allocation292_spill] sm:$0xff] }
 0x940   :  { %v6130_v15 = vsel %vm6053_vm7, %v6001_v17, %v4536_v20  ;;  %v5896_v52 = vsel %vm5795_vm3, %v5767_v55, %v18531_v34  ;;  %v5310_v63 = vsel %vm5279_vm0, %v59_v23, %v18532_v8  ;;  %v8403_v34 = vld [vmem:[%s17548_s0 + $0x379] sm:$0xff] }
 0x941   :  { %v6025_v24 = vsel %vm5924_vm5, %v5896_v52, %v15070_v46  ;;  %v8509_v46 = vld [vmem:[%s17548_s0 + $0x29a] sm:$0xff]  ;;  %v5439_v1 = vsel %vm5408_vm1, %v5310_v63, %v18533_v16  ;;  %v8382_v52 = vld [vmem:[%s17548_s0 + $0x2a9] sm:$0xff] }
 0x942   :  { %4451 = vrot.lane.b32.xlu2 %v8356_v30, %s8783_s22  ;;  %5103 = vrot.lane.b32.xlu1 %v8554_v50, %s8784_s23  ;;  %v6154_v30 = vsel %vm6053_vm7, %v6025_v24, %v15106_v40  ;;  %v8299_v40 = vld [vmem:[%s17548_s0 + $0x468] sm:$0xff]  ;;  %v5568_v0 = vsel %vm5537_vm2, %v5439_v1, %v18534_v53  ;;  %v18548_v24 = vld [vmem:[#allocation398_spill] sm:$0xff]  ;;  %v18551_v63 = vld [vmem:[#allocation337_spill] sm:$0xff] }
 0x943   :  { %4591 = vrot.lane.b32.xlu0 %v8426_v56, %s8783_s22  ;;  %v5697_v39 = vsel %vm5666_vm4, %v5568_v0, %v18535_v61  ;;  %v18553_v16 = vld [vmem:[#allocation443_spill] sm:$0xff]  ;;  %v60_v53 = vld [vmem:[%s17548_s0 + $0x130] sm:$0xff]  ;;  %v18554_v0 = vld [vmem:[#allocation573_spill] sm:$0xff] }
 0x944   :  { %v5048_v10 = vpop.permute.xlu2 %5047  ;;  %v5046_v31 = vpop.permute.xlu1 %5045  ;;  %v5826_v43 = vsel %vm5795_vm3, %v5697_v39, %v18536_v3 }
 0x945   :  { %v6258_v21 = vsel %vm6182_vm6, %v6129_v27, %v5046_v31  ;;  %v5004_v33 = vpop.permute.xlu0 %5003  ;;  %v6259_v47 = vsel %vm6182_vm6, %v6130_v15, %v5048_v10  ;;  %v5955_v51 = vsel %vm5924_vm5, %v5826_v43, %v18537_v18  ;;  %v18538_v27 = vld [vmem:[#allocation51_spill] sm:$0xff] }
 0x946   :  { %v6237_v19 = vsel %vm6182_vm6, %v6108_v12, %v5004_v33  ;;  %v6387_v7 = vsel %vm6311_vm8, %v6258_v21, 0.0  ;;  %v6388_v35 = vsel %vm6311_vm8, %v6259_v47, 0.0  ;;  %v5335_v10 = vsel %vm5279_vm0, %v84_v58, %v18538_v27  ;;  %v18539_v12 = vld [vmem:[#allocation172_spill] sm:$0xff]  ;;  %v18547_v47 = vld [vmem:[#allocation86_spill] sm:$0xff] }
 0x947   :  { %v6366_v37 = vsel %vm6311_vm8, %v6237_v19, 0.0  ;;  %8653 = vmatmul.msk.f32.gmra.mxu2 %vm6448_vm9, %v6387_v7  ;;  %v5464_v21 = vsel %vm5408_vm1, %v5335_v10, %v18539_v12  ;;  %v8530_v33 = vld [vmem:[%s17548_s0 + $0x372] sm:$0xff]  ;;  %v5381_v23 = vsel %vm5279_vm0, %v130_v44, %v18547_v47  ;;  %v8510_v27 = vld [vmem:[%s17548_s0 + $0x2aa] sm:$0xff]  ;;  %v18557_v12 = vld [vmem:[#allocation254_spill] sm:$0xff] }
 0x948   :  { %8632 = vmatmul.msk.f32.gmra.mxu1 %vm6448_vm9, %v6366_v37  ;;  %v5593_v59 = vsel %vm5537_vm2, %v5464_v21, %v18540_v11  ;;  %v85_v19 = vld [vmem:[%s17548_s0 + $0x230] sm:$0xff] }
 0x949   :  { %v18541_v7 = vld [vmem:[#allocation408_spill] sm:$0xff] }
 0x94a   :  { %4501 = vrot.lane.b32.xlu2 %v8381_v6, %s8783_s22  ;;  %4963 = vrot.lane.b32.xlu1 %v8484_v13, %s8784_s23  ;;  %v5722_v48 = vsel %vm5666_vm4, %v5593_v59, %v18541_v7  ;;  %v18544_v13 = vld [vmem:[#allocation41_spill] sm:$0xff]  ;;  %v18556_v10 = vld [vmem:[#allocation148_spill] sm:$0xff]  ;;  %v18560_v7 = vld [vmem:[#allocation611_spill] sm:$0xff] }
 0x94b   :  { %4031 = vrot.lane.b32.xlu0 %v8274_v22, %s8782_s12  ;;  %v5851_v32 = vsel %vm5795_vm3, %v5722_v48, %v18542_v60  ;;  %v5336_v28 = vsel %vm5279_vm0, %v85_v19, %v18544_v13  ;;  %v18559_v59 = vld [vmem:[#allocation505_spill] sm:$0xff]  ;;  %v18563_v47 = vld [vmem:[#allocation192_spill] sm:$0xff] }
 0x94c   :  { %v15261_v62 = vpop.permute.xlu2 %4445  ;;  %v4444_v20 = vpop.permute.xlu1 %4443  ;;  %v5980_v37 = vsel %vm5924_vm5, %v5851_v32, %v18543_v4  ;;  %v5465_v42 = vsel %vm5408_vm1, %v5336_v28, %v18545_v29  ;;  %v8276_v28 = vld [vmem:[%s17548_s0 + $0x380] sm:$0xff]  ;;  %v8556_v44 = vld [vmem:[%s17548_s0 + $0x472] sm:$0xff] }
 0x94d   :  { %v5096_v50 = vpop.permute.xlu0 %5095  ;;  %v6084_v26 = vsel %vm6053_vm7, %v5955_v51, %v4444_v20  ;;  %v5594_v55 = vsel %vm5537_vm2, %v5465_v42, %v18546_v54 }
 0x94e   :  { %v6283_v14 = vsel %vm6182_vm6, %v6154_v30, %v5096_v50  ;;  %v5723_v20 = vsel %vm5666_vm4, %v5594_v55, %v18548_v24  ;;  %v8275_v30 = vld [vmem:[%s17548_s0 + $0x378] sm:$0xff]  ;;  %v18549_v50 = vld [vmem:[#allocation216_spill] sm:$0xff] }
 0x94f   :  { %8654 = vmatmul.msk.f32.gmra.mxu2 %vm6448_vm9, %v6388_v35  ;;  %v6412_v56 = vsel %vm6311_vm8, %v6283_v14, 0.0  ;;  %v5510_v14 = vsel %vm5408_vm1, %v5381_v23, %v18549_v50  ;;  %v18550_v35 = vld [vmem:[#allocation528_spill] sm:$0xff]  ;;  %v8301_v55 = vld [vmem:[%s17548_s0 + $0x478] sm:$0xff] }
 0x950   :  { %8678 = vmatmul.msk.f32.gmra.mxu3 %vm6448_vm9, %v6412_v56  ;;  %v5852_v8 = vsel %vm5795_vm3, %v5723_v20, %v18550_v35  ;;  %v5639_v56 = vsel %vm5537_vm2, %v5510_v14, %v18551_v63  ;;  %v8383_v24 = vld [vmem:[%s17548_s0 + $0x2b1] sm:$0xff]  ;;  %v18564_v20 = vld [vmem:[#allocation206_spill] sm:$0xff]  ;;  %v18567_v63 = vld [vmem:[#allocation419_spill] sm:$0xff] }
 0x951   :  { %v5768_v1 = vsel %vm5666_vm4, %v5639_v56, %v18553_v16  ;;  %v18565_v50 = vld [vmem:[#allocation313_spill] sm:$0xff]  ;;  %v18566_v35 = vld [vmem:[#allocation336_spill] sm:$0xff] }
 0x952   :  { %5013 = vrot.lane.b32.xlu2 %v8509_v46, %s8784_s23  ;;  %4081 = vrot.lane.b32.xlu1 %v8299_v40, %s8782_s12  ;;  %v18552_v46 = vld [vmem:[#allocation649_spill] sm:$0xff]  ;;  %v5897_v61 = vsel %vm5795_vm3, %v5768_v1, %v18554_v0 }
 0x953   :  { %4543 = vrot.lane.b32.xlu0 %v8402_v5, %s8783_s22  ;;  %v5981_v40 = vsel %vm5924_vm5, %v5852_v8, %v18552_v46  ;;  %v18568_v46 = vld [vmem:[#allocation457_spill] sm:$0xff] }
 0x954   :  { %v4496_v36 = vpop.permute.xlu2 %4495  ;;  %v4494_v2 = vpop.permute.xlu1 %4493  ;;  %v18569_v16 = vld [vmem:[#allocation549_spill] sm:$0xff] }
 0x955   :  { %v4956_v49 = vpop.permute.xlu0 %4955  ;;  %v6109_v57 = vsel %vm6053_vm7, %v5980_v37, %v4494_v2  ;;  %v6110_v5 = vsel %vm6053_vm7, %v5981_v40, %v4496_v36  ;;  %v18555_v36 = vld [vmem:[#allocation27_spill] sm:$0xff] }
 0x956   :  { %v6213_v25 = vsel %vm6182_vm6, %v6084_v26, %v4956_v49  ;;  %v5311_v26 = vsel %vm5279_vm0, %v60_v53, %v18555_v36 }
 0x957   :  { %v6342_v31 = vsel %vm6311_vm8, %v6213_v25, 0.0  ;;  %v8531_v25 = vld [vmem:[%s17548_s0 + $0x37a] sm:$0xff] }
 0x958   :  { %8608 = vmatmul.msk.f32.gmra.mxu0 %vm6448_vm9, %v6342_v31  ;;  %v5440_v31 = vsel %vm5408_vm1, %v5311_v26, %v18556_v10  ;;  %v18571_v10 = vld [vmem:[#allocation17_spill] sm:$0xff] }
 0x959   :  { %v5569_v21 = vsel %vm5537_vm2, %v5440_v31, %v18557_v12 }
 0x95a   :  { %5105 = vrot.lane.b32.xlu2 %v8555_v38, %s8784_s23  ;;  %4593 = vrot.lane.b32.xlu1 %v8427_v41, %s8783_s22  ;;  %v8300_v41 = vld [vmem:[%s17548_s0 + $0x470] sm:$0xff] }
 0x95b   :  { %5055 = vrot.lane.b32.xlu0 %v8530_v33, %s8784_s23  ;;  %v18558_v33 = vld [vmem:[#allocation384_spill] sm:$0xff] }
 0x95c   :  { %v5008_v6 = vpop.permute.xlu2 %5007  ;;  %v5006_v9 = vpop.permute.xlu1 %5005  ;;  %v5698_v11 = vsel %vm5666_vm4, %v5569_v21, %v18558_v33  ;;  %v18573_v21 = vld [vmem:[#allocation268_spill] sm:$0xff] }
 0x95d   :  { %v4074_v22 = vpop.permute.xlu0 %4073  ;;  %v6238_v17 = vsel %vm6182_vm6, %v6109_v57, %v5006_v9  ;;  %v6239_v39 = vsel %vm6182_vm6, %v6110_v5, %v5008_v6  ;;  %v5827_v19 = vsel %vm5795_vm3, %v5698_v11, %v18559_v59  ;;  %v106_v57 = vld [vmem:[%s17548_s0 + $0x300] sm:$0xff]  ;;  %v18570_v5 = vld [vmem:[#allocation563_spill] sm:$0xff] }
 0x95e   :  { %v6367_v15 = vsel %vm6311_vm8, %v6238_v17, 0.0  ;;  %v6026_v43 = vsel %vm5924_vm5, %v5897_v61, %v4074_v22  ;;  %v6368_v2 = vsel %vm6311_vm8, %v6239_v39, 0.0  ;;  %v5956_v48 = vsel %vm5924_vm5, %v5827_v19, %v18560_v7  ;;  %v131_v22 = vld [vmem:[%s17548_s0 + $0x3f8] sm:$0xff]  ;;  %v18561_v17 = vld [vmem:[#allocation62_spill] sm:$0xff]  ;;  %v18575_v19 = vld [vmem:[#allocation504_spill] sm:$0xff] }
 0x95f   :  { %8633 = vmatmul.msk.f32.gmra.mxu1 %vm6448_vm9, %v6367_v15  ;;  %v6085_v32 = vsel %vm6053_vm7, %v5956_v48, %v15261_v62  ;;  %v8428_v62 = vld [vmem:[%s17548_s0 + $0x471] sm:$0xff]  ;;  %v5357_v54 = vsel %vm5279_vm0, %v106_v57, %v18561_v17  ;;  %v8404_v15 = vld [vmem:[%s17548_s0 + $0x381] sm:$0xff] }
 0x960   :  { %v5486_v23 = vsel %vm5408_vm1, %v5357_v54, %v18563_v47  ;;  %v61_v39 = vld [vmem:[%s17548_s0 + $0x140] sm:$0xff] }
 0x961   :  { %v5615_v14 = vsel %vm5537_vm2, %v5486_v23, %v18565_v50  ;;  %v5312_v31 = vsel %vm5279_vm0, %v61_v39, %v18571_v10  ;;  %v18574_v11 = vld [vmem:[#allocation374_spill] sm:$0xff]  ;;  %v8302_v23 = vld [vmem:[%s17548_s0 + $0x488] sm:$0xff] }
 0x962   :  { %4545 = vrot.lane.b32.xlu2 %v8403_v34, %s8783_s22  ;;  %4503 = vrot.lane.b32.xlu1 %v8382_v52, %s8783_s22  ;;  %v18562_v34 = vld [vmem:[#allocation100_spill] sm:$0xff]  ;;  %v5744_v56 = vsel %vm5666_vm4, %v5615_v14, %v18567_v63  ;;  %v8512_v47 = vld [vmem:[%s17548_s0 + $0x2ba] sm:$0xff]  ;;  %v18586_v39 = vld [vmem:[#allocation539_spill] sm:$0xff] }
 0x963   :  { %4033 = vrot.lane.b32.xlu0 %v8275_v30, %s8782_s12  ;;  %v5382_v52 = vsel %vm5279_vm0, %v131_v22, %v18562_v34  ;;  %v5873_v1 = vsel %vm5795_vm3, %v5744_v56, %v18569_v16  ;;  %v8557_v22 = vld [vmem:[%s17548_s0 + $0x47a] sm:$0xff]  ;;  %v18578_v34 = vld [vmem:[#allocation76_spill] sm:$0xff] }
 0x964   :  { %v15374_v3 = vpop.permute.xlu2 %5099  ;;  %v5098_v58 = vpop.permute.xlu1 %5097  ;;  %v5511_v30 = vsel %vm5408_vm1, %v5382_v52, %v18564_v20  ;;  %v8405_v14 = vld [vmem:[%s17548_s0 + $0x389] sm:$0xff] }
 0x965   :  { %v4586_v18 = vpop.permute.xlu0 %4585  ;;  %v5640_v8 = vsel %vm5537_vm2, %v5511_v30, %v18566_v35  ;;  %v18580_v30 = vld [vmem:[#allocation182_spill] sm:$0xff]  ;;  %v18581_v35 = vld [vmem:[#allocation291_spill] sm:$0xff]  ;;  %v18582_v63 = vld [vmem:[#allocation312_spill] sm:$0xff] }
 0x966   :  { %v6155_v51 = vsel %vm6053_vm7, %v6026_v43, %v4586_v18  ;;  %v5769_v40 = vsel %vm5666_vm4, %v5640_v8, %v18568_v46  ;;  %v108_v46 = vld [vmem:[%s17548_s0 + $0x310] sm:$0xff] }
 0x967   :  { %v6284_v49 = vsel %vm6182_vm6, %v6155_v51, %v5098_v58  ;;  %8634 = vmatmul.msk.f32.gmra.mxu1 %vm6448_vm9, %v6368_v2  ;;  %v5898_v53 = vsel %vm5795_vm3, %v5769_v40, %v18570_v5  ;;  %v18583_v40 = vld [vmem:[#allocation412_spill] sm:$0xff] }
 0x968   :  { %v6413_v38 = vsel %vm6311_vm8, %v6284_v49, 0.0 }
 0x969   :  { %8679 = vmatmul.msk.f32.gmra.mxu3 %vm6448_vm9, %v6413_v38 }
 0x96a   :  { %5057 = vrot.lane.b32.xlu2 %v8531_v25, %s8784_s23  ;;  %5015 = vrot.lane.b32.xlu1 %v8510_v27, %s8784_s23  ;;  %v8429_v25 = vld [vmem:[%s17548_s0 + $0x479] sm:$0xff]  ;;  %v8532_v27 = vld [vmem:[%s17548_s0 + $0x382] sm:$0xff] }
 0x96b   :  { %4083 = vrot.lane.b32.xlu0 %v8300_v41, %s8782_s12  ;;  %v8511_v41 = vld [vmem:[%s17548_s0 + $0x2b2] sm:$0xff] }
 0x96c   :  { %v15407_v60 = vpop.permute.xlu2 %4959  ;;  %v4958_v4 = vpop.permute.xlu1 %4957 }
 0x96d   :  { %v4026_v37 = vpop.permute.xlu0 %4025  ;;  %v6214_v6 = vsel %vm6182_vm6, %v6085_v32, %v4958_v4  ;;  %v18576_v32 = vld [vmem:[#allocation625_spill] sm:$0xff] }
 0x96e   :  { %v6343_v13 = vsel %vm6311_vm8, %v6214_v6, 0.0  ;;  %v6002_v0 = vsel %vm5924_vm5, %v5873_v1, %v4026_v37  ;;  %v18584_v1 = vld [vmem:[#allocation433_spill] sm:$0xff] }
 0x96f   :  { %8609 = vmatmul.msk.f32.gmra.mxu0 %vm6448_vm9, %v6343_v13 }
 0x972   :  { %4035 = vrot.lane.b32.xlu2 %v8276_v28, %s8782_s12  ;;  %5107 = vrot.lane.b32.xlu1 %v8556_v44, %s8784_s23  ;;  %v8384_v44 = vld [vmem:[%s17548_s0 + $0x2b9] sm:$0xff] }
 0x973   :  { %4595 = vrot.lane.b32.xlu0 %v8428_v62, %s8783_s22  ;;  %v8277_v62 = vld [vmem:[%s17548_s0 + $0x388] sm:$0xff] }
 0x974   :  { %v15429_v9 = vpop.permute.xlu2 %4077  ;;  %v4076_v29 = vpop.permute.xlu1 %4075 }
 0x975   :  { %v4538_v42 = vpop.permute.xlu0 %4537  ;;  %v6027_v43 = vsel %vm5924_vm5, %v5898_v53, %v4076_v29  ;;  %v107_v29 = vld [vmem:[%s17548_s0 + $0x308] sm:$0xff]  ;;  %v18585_v53 = vld [vmem:[#allocation518_spill] sm:$0xff] }
 0x976   :  { %v6131_v58 = vsel %vm6053_vm7, %v6002_v0, %v4538_v42  ;;  %v5358_v52 = vsel %vm5279_vm0, %v107_v29, %v18578_v34  ;;  %v18596_v29 = vld [vmem:[#allocation456_spill] sm:$0xff] }
 0x977   :  { %v5487_v50 = vsel %vm5408_vm1, %v5358_v52, %v18580_v30  ;;  %v62_v52 = vld [vmem:[%s17548_s0 + $0x148] sm:$0xff] }
 0x978   :  { %v5616_v56 = vsel %vm5537_vm2, %v5487_v50, %v18582_v63  ;;  %v18598_v50 = vld [vmem:[#allocation31_spill] sm:$0xff] }
 0x979   :  { %v5745_v5 = vsel %vm5666_vm4, %v5616_v56, %v18584_v1  ;;  %v8385_v63 = vld [vmem:[%s17548_s0 + $0x2c1] sm:$0xff]  ;;  %v18601_v1 = vld [vmem:[#allocation388_spill] sm:$0xff] }
 0x97a   :  { %4085 = vrot.lane.b32.xlu2 %v8301_v55, %s8782_s12  ;;  %4547 = vrot.lane.b32.xlu1 %v8404_v15, %s8783_s22  ;;  %v18577_v55 = vld [vmem:[#allocation55_spill] sm:$0xff] }
 0x97b   :  { %4505 = vrot.lane.b32.xlu0 %v8383_v24, %s8783_s22  ;;  %v18579_v24 = vld [vmem:[#allocation161_spill] sm:$0xff] }
 0x97c   :  { %v15467_v61 = vpop.permute.xlu2 %4589  ;;  %v4588_v18 = vpop.permute.xlu1 %4587 }
 0x97d   :  { %v5050_v51 = vpop.permute.xlu0 %5049  ;;  %v6156_v36 = vsel %vm6053_vm7, %v6027_v43, %v4588_v18  ;;  %v5874_v43 = vsel %vm5795_vm3, %v5745_v5, %v18586_v39  ;;  %v18587_v18 = vld [vmem:[#allocation648_spill] sm:$0xff]  ;;  %v87_v39 = vld [vmem:[%s17548_s0 + $0x240] sm:$0xff] }
 0x97e   :  { %v6260_v26 = vsel %vm6182_vm6, %v6131_v58, %v5050_v51  ;;  %v6285_v49 = vsel %vm6182_vm6, %v6156_v36, %v15374_v3  ;;  %v18572_v3 = vld [vmem:[#allocation147_spill] sm:$0xff]  ;;  %v132_v58 = vld [vmem:[%s17548_s0 + $0x400] sm:$0xff] }
 0x97f   :  { %v6389_v2 = vsel %vm6311_vm8, %v6260_v26, 0.0  ;;  %v6414_v38 = vsel %vm6311_vm8, %v6285_v49, 0.0  ;;  %v5441_v12 = vsel %vm5408_vm1, %v5312_v31, %v18572_v3 }
 0x980   :  { %8655 = vmatmul.msk.f32.gmra.mxu2 %vm6448_vm9, %v6389_v2  ;;  %8680 = vmatmul.msk.f32.gmra.mxu3 %vm6448_vm9, %v6414_v38  ;;  %v5570_v33 = vsel %vm5537_vm2, %v5441_v12, %v18573_v21  ;;  %v18588_v2 = vld [vmem:[#allocation75_spill] sm:$0xff]  ;;  %v18589_v38 = vld [vmem:[#allocation196_spill] sm:$0xff] }
 0x981   :  { %v5699_v59 = vsel %vm5666_vm4, %v5570_v33, %v18574_v11  ;;  %v5359_v49 = vsel %vm5279_vm0, %v108_v46, %v18588_v2  ;;  %v18590_v21 = vld [vmem:[#allocation99_spill] sm:$0xff]  ;;  %v18591_v11 = vld [vmem:[#allocation302_spill] sm:$0xff]  ;;  %v8278_v46 = vld [vmem:[%s17548_s0 + $0x398] sm:$0xff] }
 0x982   :  { %4597 = vrot.lane.b32.xlu2 %v8429_v25, %s8783_s22  ;;  %5059 = vrot.lane.b32.xlu1 %v8532_v27, %s8784_s23  ;;  %v5828_v7 = vsel %vm5795_vm3, %v5699_v59, %v18575_v19  ;;  %v5383_v33 = vsel %vm5279_vm0, %v132_v58, %v18590_v21 }
 0x983   :  { %5017 = vrot.lane.b32.xlu0 %v8511_v41, %s8784_s23  ;;  %v5957_v4 = vsel %vm5924_vm5, %v5828_v7, %v18576_v32  ;;  %v5488_v41 = vsel %vm5408_vm1, %v5359_v49, %v18589_v38  ;;  %v8558_v32 = vld [vmem:[%s17548_s0 + $0x48a] sm:$0xff]  ;;  %v18604_v49 = vld [vmem:[#allocation54_spill] sm:$0xff] }
 0x984   :  { %v15504_v48 = vpop.permute.xlu2 %4029  ;;  %v4028_v37 = vpop.permute.xlu1 %4027  ;;  %v5617_v59 = vsel %vm5537_vm2, %v5488_v41, %v18591_v11  ;;  %v18605_v38 = vld [vmem:[#allocation175_spill] sm:$0xff] }
 0x985   :  { %v4448_v6 = vpop.permute.xlu0 %4447  ;;  %v6003_v36 = vsel %vm5924_vm5, %v5874_v43, %v4028_v37  ;;  %v18592_v37 = vld [vmem:[#allocation220_spill] sm:$0xff]  ;;  %v18607_v11 = vld [vmem:[#allocation411_spill] sm:$0xff] }
 0x986   :  { %v6086_v13 = vsel %vm6053_vm7, %v5957_v4, %v4448_v6  ;;  %v8430_v4 = vld [vmem:[%s17548_s0 + $0x489] sm:$0xff]  ;;  %v5512_v6 = vsel %vm5408_vm1, %v5383_v33, %v18592_v37  ;;  %v15688_v37 = vpop.f32.mrf.mxu1 }
 0x987   :  { %v6215_v28 = vsel %vm6182_vm6, %v6086_v13, %v15407_v60  ;;  %v86_v60 = vld [vmem:[%s17548_s0 + $0x238] sm:$0xff]  ;;  %v18593_v13 = vld [vmem:[#allocation432_spill] sm:$0xff]  ;;  %v88_v33 = vld [vmem:[%s17548_s0 + $0x248] sm:$0xff] }
 0x988   :  { %v6344_v57 = vsel %vm6311_vm8, %v6215_v28, 0.0  ;;  %v5337_v15 = vsel %vm5279_vm0, %v86_v60, %v18577_v55  ;;  %v5746_v28 = vsel %vm5666_vm4, %v5617_v59, %v18593_v13  ;;  %v18597_v55 = vld [vmem:[#allocation577_spill] sm:$0xff]  ;;  %v18603_v43 = vld [vmem:[#allocation624_spill] sm:$0xff] }
 0x989   :  { %8610 = vmatmul.msk.f32.gmra.mxu0 %vm6448_vm9, %v6344_v57  ;;  %v5466_v20 = vsel %vm5408_vm1, %v5337_v15, %v18579_v24  ;;  %v18610_v13 = vld [vmem:[#allocation44_spill] sm:$0xff] }
 0x98a   :  { %4507 = vrot.lane.b32.xlu2 %v8384_v44, %s8783_s22  ;;  %4037 = vrot.lane.b32.xlu1 %v8277_v62, %s8782_s12  ;;  %v5595_v8 = vsel %vm5537_vm2, %v5466_v20, %v18581_v35  ;;  %v8533_v44 = vld [vmem:[%s17548_s0 + $0x38a] sm:$0xff]  ;;  %v18594_v62 = vld [vmem:[#allocation326_spill] sm:$0xff] }
 0x98b   :  { %5109 = vrot.lane.b32.xlu0 %v8557_v22, %s8784_s23  ;;  %v5724_v16 = vsel %vm5666_vm4, %v5595_v8, %v18583_v40  ;;  %v5641_v57 = vsel %vm5537_vm2, %v5512_v6, %v18594_v62  ;;  %v18595_v22 = vld [vmem:[#allocation553_spill] sm:$0xff]  ;;  %v18600_v40 = vld [vmem:[#allocation267_spill] sm:$0xff] }
 0x98c   :  { %v4542_v42 = vpop.permute.xlu2 %4541  ;;  %v4540_v17 = vpop.permute.xlu1 %4539  ;;  %v5853_v0 = vsel %vm5795_vm3, %v5724_v16, %v18585_v53  ;;  %v5875_v60 = vsel %vm5795_vm3, %v5746_v28, %v18595_v22  ;;  %v18602_v53 = vld [vmem:[#allocation494_spill] sm:$0xff]  ;;  %v5339_v28 = vsel %vm5279_vm0, %v88_v33, %v18610_v13 }
 0x98d   :  { %v4498_v54 = vpop.permute.xlu0 %4497  ;;  %v5982_v51 = vsel %vm5924_vm5, %v5853_v0, %v18587_v18  ;;  %v6132_v25 = vsel %vm6053_vm7, %v6003_v36, %v4540_v17  ;;  %v5770_v17 = vsel %vm5666_vm4, %v5641_v57, %v18596_v29 }
 0x98e   :  { %v6111_v27 = vsel %vm6053_vm7, %v5982_v51, %v4498_v54  ;;  %v6004_v54 = vsel %vm5924_vm5, %v5875_v60, %v15504_v48  ;;  %v5899_v15 = vsel %vm5795_vm3, %v5770_v17, %v18597_v55  ;;  %v18611_v60 = vld [vmem:[#allocation174_spill] sm:$0xff] }
 0x98f   :  { %v6133_v34 = vsel %vm6053_vm7, %v6004_v54, %v4542_v42  ;;  %v5468_v29 = vsel %vm5408_vm1, %v5339_v28, %v18611_v60  ;;  %v18612_v54 = vld [vmem:[#allocation295_spill] sm:$0xff]  ;;  %v109_v60 = vld [vmem:[%s17548_s0 + $0x320] sm:$0xff] }
 0x990   :  { %v5597_v55 = vsel %vm5537_vm2, %v5468_v29, %v18612_v54 }
 0x992   :  { %5019 = vrot.lane.b32.xlu2 %v8512_v47, %s8784_s23  ;;  %4087 = vrot.lane.b32.xlu1 %v8302_v23, %s8782_s12  ;;  %v6028_v47 = vsel %vm5924_vm5, %v5899_v15, %v15429_v9  ;;  %v8406_v9 = vld [vmem:[%s17548_s0 + $0x399] sm:$0xff] }
 0x993   :  { %4549 = vrot.lane.b32.xlu0 %v8405_v14, %s8783_s22  ;;  %v6157_v24 = vsel %vm6053_vm7, %v6028_v47, %v15467_v61  ;;  %v5313_v14 = vsel %vm5279_vm0, %v62_v52, %v18598_v50  ;;  %v18599_v61 = vld [vmem:[#allocation137_spill] sm:$0xff] }
 0x994   :  { %v5054_v26 = vpop.permute.xlu2 %5053  ;;  %v5052_v10 = vpop.permute.xlu1 %5051  ;;  %v5442_v56 = vsel %vm5408_vm1, %v5313_v14, %v18599_v61  ;;  %v8559_v52 = vld [vmem:[%s17548_s0 + $0x492] sm:$0xff]  ;;  %v18616_v14 = vld [vmem:[#allocation531_spill] sm:$0xff] }
 0x995   :  { %v5010_v31 = vpop.permute.xlu0 %5009  ;;  %v6261_v3 = vsel %vm6182_vm6, %v6132_v25, %v5052_v10  ;;  %v6262_v48 = vsel %vm6182_vm6, %v6133_v34, %v5054_v26  ;;  %v5571_v16 = vsel %vm5537_vm2, %v5442_v56, %v18600_v40  ;;  %v5338_v25 = vsel %vm5279_vm0, %v87_v39, %v18604_v49  ;;  %v8534_v10 = vld [vmem:[%s17548_s0 + $0x39a] sm:$0xff] }
 0x996   :  { %v6240_v12 = vsel %vm6182_vm6, %v6111_v27, %v5010_v31  ;;  %v6390_v7 = vsel %vm6311_vm8, %v6261_v3, 0.0  ;;  %v6391_v35 = vsel %vm6311_vm8, %v6262_v48, 0.0  ;;  %v5700_v5 = vsel %vm5666_vm4, %v5571_v16, %v18601_v1  ;;  %v8513_v31 = vld [vmem:[%s17548_s0 + $0x2c2] sm:$0xff]  ;;  %v8303_v3 = vld [vmem:[%s17548_s0 + $0x490] sm:$0xff]  ;;  %v18613_v47 = vld [vmem:[#allocation89_spill] sm:$0xff] }
 0x997   :  { %v6369_v19 = vsel %vm6311_vm8, %v6240_v12, 0.0  ;;  %8656 = vmatmul.msk.f32.gmra.mxu2 %vm6448_vm9, %v6390_v7  ;;  %v5829_v0 = vsel %vm5795_vm3, %v5700_v5, %v18602_v53  ;;  %v5467_v41 = vsel %vm5408_vm1, %v5338_v25, %v18605_v38  ;;  %v18606_v12 = vld [vmem:[#allocation281_spill] sm:$0xff]  ;;  %v8279_v34 = vld [vmem:[%s17548_s0 + $0x3a0] sm:$0xff]  ;;  %v63_v16 = vld [vmem:[%s17548_s0 + $0x150] sm:$0xff]  ;;  %v15735_v53 = vpop.f32.mrf.mxu1 }
 0x998   :  { %8635 = vmatmul.msk.f32.gmra.mxu1 %vm6448_vm9, %v6369_v19  ;;  %v5958_v58 = vsel %vm5924_vm5, %v5829_v0, %v18603_v43  ;;  %v5596_v21 = vsel %vm5537_vm2, %v5467_v41, %v18606_v12  ;;  %v18608_v19 = vld [vmem:[#allocation532_spill] sm:$0xff]  ;;  %v18619_v56 = vld [vmem:[#allocation446_spill] sm:$0xff]  ;;  %v8304_v25 = vld [vmem:[%s17548_s0 + $0x498] sm:$0xff] }
 0x999   :  { %v5725_v59 = vsel %vm5666_vm4, %v5596_v21, %v18607_v11  ;;  %v18620_v1 = vld [vmem:[#allocation576_spill] sm:$0xff]  ;;  %v18624_v21 = vld [vmem:[#allocation387_spill] sm:$0xff] }
 0x99a   :  { %5111 = vrot.lane.b32.xlu2 %v8558_v32, %s8784_s23  ;;  %4599 = vrot.lane.b32.xlu1 %v8430_v4, %s8783_s22  ;;  %v5854_v7 = vsel %vm5795_vm3, %v5725_v59, %v18608_v19  ;;  %v18609_v32 = vld [vmem:[#allocation638_spill] sm:$0xff]  ;;  %v8386_v41 = vld [vmem:[%s17548_s0 + $0x2d1] sm:$0xff] }
 0x99b   :  { %5061 = vrot.lane.b32.xlu0 %v8533_v44, %s8784_s23  ;;  %v5983_v4 = vsel %vm5924_vm5, %v5854_v7, %v18609_v32  ;;  %v133_v44 = vld [vmem:[%s17548_s0 + $0x410] sm:$0xff]  ;;  %v18626_v19 = vld [vmem:[#allocation614_spill] sm:$0xff] }
 0x99c   :  { %v15621_v23 = vpop.permute.xlu2 %4451  ;;  %v4450_v20 = vpop.permute.xlu1 %4449  ;;  %v5384_v48 = vsel %vm5279_vm0, %v133_v44, %v18613_v47  ;;  %v18625_v11 = vld [vmem:[#allocation508_spill] sm:$0xff]  ;;  %v8280_v47 = vld [vmem:[%s17548_s0 + $0x3a8] sm:$0xff] }
 0x99d   :  { %v5102_v30 = vpop.permute.xlu0 %5101  ;;  %v6087_v51 = vsel %vm6053_vm7, %v5958_v58, %v4450_v20 }
 0x99e   :  { %v6286_v42 = vsel %vm6182_vm6, %v6157_v24, %v5102_v30  ;;  %v18614_v24 = vld [vmem:[#allocation401_spill] sm:$0xff] }
 0x99f   :  { %v6415_v8 = vsel %vm6311_vm8, %v6286_v42, 0.0  ;;  %8657 = vmatmul.msk.f32.gmra.mxu2 %vm6448_vm9, %v6391_v35  ;;  %v5726_v20 = vsel %vm5666_vm4, %v5597_v55, %v18614_v24  ;;  %v8431_v30 = vld [vmem:[%s17548_s0 + $0x491] sm:$0xff]  ;;  %v18615_v42 = vld [vmem:[#allocation219_spill] sm:$0xff]  ;;  %v15775_v28 = vpop.f32.mrf.mxu1 }
 0x9a0   :  { %8681 = vmatmul.msk.f32.gmra.mxu3 %vm6448_vm9, %v6415_v8  ;;  %v5513_v50 = vsel %vm5408_vm1, %v5384_v48, %v18615_v42  ;;  %v5855_v35 = vsel %vm5795_vm3, %v5726_v20, %v18616_v14  ;;  %v18617_v8 = vld [vmem:[#allocation340_spill] sm:$0xff]  ;;  %v18628_v48 = vld [vmem:[#allocation103_spill] sm:$0xff]  ;;  %v18630_v14 = vld [vmem:[#allocation209_spill] sm:$0xff] }
 0x9a1   :  { %v18629_v20 = vld [vmem:[#allocation195_spill] sm:$0xff] }
 0x9a2   :  { %4551 = vrot.lane.b32.xlu2 %v8406_v9, %s8783_s22  ;;  %4509 = vrot.lane.b32.xlu1 %v8385_v63, %s8783_s22  ;;  %v5642_v9 = vsel %vm5537_vm2, %v5513_v50, %v18617_v8  ;;  %v18618_v63 = vld [vmem:[#allocation651_spill] sm:$0xff]  ;;  %v8560_v50 = vld [vmem:[%s17548_s0 + $0x49a] sm:$0xff]  ;;  %v18631_v8 = vld [vmem:[#allocation316_spill] sm:$0xff] }
 0x9a3   :  { %4039 = vrot.lane.b32.xlu0 %v8278_v46, %s8782_s12  ;;  %v5984_v61 = vsel %vm5924_vm5, %v5855_v35, %v18618_v63  ;;  %v5771_v46 = vsel %vm5666_vm4, %v5642_v9, %v18619_v56  ;;  %v18632_v63 = vld [vmem:[#allocation339_spill] sm:$0xff]  ;;  %v18633_v56 = vld [vmem:[#allocation422_spill] sm:$0xff] }
 0x9a4   :  { %v4502_v18 = vpop.permute.xlu2 %4501  ;;  %v4500_v36 = vpop.permute.xlu1 %4499  ;;  %v5900_v5 = vsel %vm5795_vm3, %v5771_v46, %v18620_v1  ;;  %v18635_v1 = vld [vmem:[#allocation552_spill] sm:$0xff] }
 0x9a5   :  { %v4962_v26 = vpop.permute.xlu0 %4961  ;;  %v6112_v62 = vsel %vm6053_vm7, %v5983_v4, %v4500_v36  ;;  %v6113_v40 = vsel %vm6053_vm7, %v5984_v61, %v4502_v18  ;;  %v18621_v36 = vld [vmem:[#allocation30_spill] sm:$0xff] }
 0x9a6   :  { %v6216_v2 = vsel %vm6182_vm6, %v6087_v51, %v4962_v26  ;;  %v5314_v26 = vsel %vm5279_vm0, %v63_v16, %v18621_v36 }
 0x9a7   :  { %v6345_v27 = vsel %vm6311_vm8, %v6216_v2, 0.0  ;;  %v15810_v42 = vpop.f32.mrf.mxu1 }
 0x9a8   :  { %8611 = vmatmul.msk.f32.gmra.mxu0 %vm6448_vm9, %v6345_v27  ;;  %v8407_v27 = vld [vmem:[%s17548_s0 + $0x3a1] sm:$0xff] }
 0x9aa   :  { %5063 = vrot.lane.b32.xlu2 %v8534_v10, %s8784_s23  ;;  %5021 = vrot.lane.b32.xlu1 %v8513_v31, %s8784_s23  ;;  %v18622_v10 = vld [vmem:[#allocation151_spill] sm:$0xff] }
 0x9ab   :  { %4089 = vrot.lane.b32.xlu0 %v8303_v3, %s8782_s12  ;;  %v5443_v31 = vsel %vm5408_vm1, %v5314_v26, %v18622_v10  ;;  %v18623_v3 = vld [vmem:[#allocation257_spill] sm:$0xff] }
 0x9ac   :  { %v5014_v6 = vpop.permute.xlu2 %5013  ;;  %v5012_v57 = vpop.permute.xlu1 %5011  ;;  %v5572_v12 = vsel %vm5537_vm2, %v5443_v31, %v18623_v3 }
 0x9ad   :  { %v4080_v22 = vpop.permute.xlu0 %4079  ;;  %v6241_v17 = vsel %vm6182_vm6, %v6112_v62, %v5012_v57  ;;  %v6242_v0 = vsel %vm6182_vm6, %v6113_v40, %v5014_v6  ;;  %v5701_v33 = vsel %vm5666_vm4, %v5572_v12, %v18624_v21  ;;  %v8432_v57 = vld [vmem:[%s17548_s0 + $0x499] sm:$0xff]  ;;  %v18634_v40 = vld [vmem:[#allocation460_spill] sm:$0xff] }
 0x9ae   :  { %v6370_v15 = vsel %vm6311_vm8, %v6241_v17, 0.0  ;;  %v6029_v43 = vsel %vm5924_vm5, %v5900_v5, %v4080_v22  ;;  %v6371_v2 = vsel %vm6311_vm8, %v6242_v0, 0.0  ;;  %v5830_v59 = vsel %vm5795_vm3, %v5701_v33, %v18625_v11  ;;  %v8535_v22 = vld [vmem:[%s17548_s0 + $0x3a2] sm:$0xff]  ;;  %v134_v17 = vld [vmem:[%s17548_s0 + $0x418] sm:$0xff] }
 0x9af   :  { %8636 = vmatmul.msk.f32.gmra.mxu1 %vm6448_vm9, %v6370_v15  ;;  %v5959_v7 = vsel %vm5924_vm5, %v5830_v59, %v18626_v19  ;;  %v18627_v15 = vld [vmem:[#allocation65_spill] sm:$0xff]  ;;  %v5385_v24 = vsel %vm5279_vm0, %v134_v17, %v18628_v48  ;;  %v18636_v0 = vld [vmem:[#allocation566_spill] sm:$0xff]  ;;  %v15851_v3 = vpop.f32.mrf.mxu1  ;;  %v8408_v21 = vld [vmem:[%s17548_s0 + $0x3a9] sm:$0xff] }
 0x9b0   :  { %v6088_v4 = vsel %vm6053_vm7, %v5959_v7, %v15621_v23  ;;  %v8514_v23 = vld [vmem:[%s17548_s0 + $0x2d2] sm:$0xff]  ;;  %v5514_v35 = vsel %vm5408_vm1, %v5385_v24, %v18630_v14  ;;  %v18637_v33 = vld [vmem:[#allocation79_spill] sm:$0xff]  ;;  %v18642_v17 = vld [vmem:[#allocation58_spill] sm:$0xff] }
 0x9b1   :  { %v5643_v61 = vsel %vm5537_vm2, %v5514_v35, %v18632_v63  ;;  %v18638_v11 = vld [vmem:[#allocation185_spill] sm:$0xff]  ;;  %v18639_v19 = vld [vmem:[#allocation315_spill] sm:$0xff] }
 0x9b2   :  { %4041 = vrot.lane.b32.xlu2 %v8279_v34, %s8782_s12  ;;  %5113 = vrot.lane.b32.xlu1 %v8559_v52, %s8784_s23  ;;  %v5360_v34 = vsel %vm5279_vm0, %v109_v60, %v18627_v15  ;;  %v8387_v52 = vld [vmem:[%s17548_s0 + $0x2d9] sm:$0xff]  ;;  %v5772_v16 = vsel %vm5666_vm4, %v5643_v61, %v18634_v40  ;;  %v8561_v15 = vld [vmem:[%s17548_s0 + $0x4a2] sm:$0xff] }
 0x9b3   :  { %4601 = vrot.lane.b32.xlu0 %v8431_v30, %s8783_s22  ;;  %v5489_v30 = vsel %vm5408_vm1, %v5360_v34, %v18629_v20  ;;  %v18643_v34 = vld [vmem:[#allocation164_spill] sm:$0xff]  ;;  %v8433_v48 = vld [vmem:[%s17548_s0 + $0x4a1] sm:$0xff] }
 0x9b4   :  { %v15738_v39 = vpop.permute.xlu2 %5105  ;;  %v5104_v58 = vpop.permute.xlu1 %5103  ;;  %v5618_v9 = vsel %vm5537_vm2, %v5489_v30, %v18631_v8  ;;  %v8536_v24 = vld [vmem:[%s17548_s0 + $0x3aa] sm:$0xff]  ;;  %v18644_v20 = vld [vmem:[#allocation294_spill] sm:$0xff] }
 0x9b5   :  { %v4592_v51 = vpop.permute.xlu0 %4591  ;;  %v5747_v46 = vsel %vm5666_vm4, %v5618_v9, %v18633_v56  ;;  %v18647_v9 = vld [vmem:[#allocation650_spill] sm:$0xff] }
 0x9b6   :  { %v6158_v18 = vsel %vm6053_vm7, %v6029_v43, %v4592_v51  ;;  %v5876_v5 = vsel %vm5795_vm3, %v5747_v46, %v18635_v1  ;;  %v5901_v43 = vsel %vm5795_vm3, %v5772_v16, %v18636_v0  ;;  %v135_v56 = vld [vmem:[%s17548_s0 + $0x420] sm:$0xff]  ;;  %v8409_v0 = vld [vmem:[%s17548_s0 + $0x3b1] sm:$0xff] }
 0x9b7   :  { %v6287_v49 = vsel %vm6182_vm6, %v6158_v18, %v5104_v58  ;;  %8637 = vmatmul.msk.f32.gmra.mxu1 %vm6448_vm9, %v6371_v2  ;;  %v15899_v35 = vpop.f32.mrf.mxu1 }
 0x9b8   :  { %v6416_v38 = vsel %vm6311_vm8, %v6287_v49, 0.0  ;;  %v110_v49 = vld [vmem:[%s17548_s0 + $0x328] sm:$0xff] }
 0x9b9   :  { %8682 = vmatmul.msk.f32.gmra.mxu3 %vm6448_vm9, %v6416_v38  ;;  %v8515_v38 = vld [vmem:[%s17548_s0 + $0x2da] sm:$0xff] }
 0x9ba   :  { %4091 = vrot.lane.b32.xlu2 %v8304_v25, %s8782_s12  ;;  %4553 = vrot.lane.b32.xlu1 %v8407_v27, %s8783_s22 }
 0x9bb   :  { %4511 = vrot.lane.b32.xlu0 %v8386_v41, %s8783_s22  ;;  %v8305_v41 = vld [vmem:[%s17548_s0 + $0x4a0] sm:$0xff] }
 0x9bc   :  { %v15771_v32 = vpop.permute.xlu2 %4545  ;;  %v4964_v6 = vpop.permute.xlu1 %4963 }
 0x9bd   :  { %v4032_v13 = vpop.permute.xlu0 %4031  ;;  %v6217_v44 = vsel %vm6182_vm6, %v6088_v4, %v4964_v6  ;;  %v89_v4 = vld [vmem:[%s17548_s0 + $0x258] sm:$0xff]  ;;  %v18640_v6 = vld [vmem:[#allocation436_spill] sm:$0xff] }
 0x9be   :  { %v6346_v62 = vsel %vm6311_vm8, %v6217_v44, 0.0  ;;  %v6005_v58 = vsel %vm5924_vm5, %v5876_v5, %v4032_v13 }
 0x9bf   :  { %8612 = vmatmul.msk.f32.gmra.mxu0 %vm6448_vm9, %v6346_v62  ;;  %v18641_v62 = vld [vmem:[#allocation542_spill] sm:$0xff] }
 0x9c2   :  { %4603 = vrot.lane.b32.xlu2 %v8432_v57, %s8783_s22  ;;  %5065 = vrot.lane.b32.xlu1 %v8535_v22, %s8784_s23 }
 0x9c3   :  { %5023 = vrot.lane.b32.xlu0 %v8514_v23, %s8784_s23 }
 0x9c4   :  { %v5058_v29 = vpop.permute.xlu2 %5057  ;;  %v4082_v54 = vpop.permute.xlu1 %4081 }
 0x9c5   :  { %v4544_v55 = vpop.permute.xlu0 %4543  ;;  %v6030_v18 = vsel %vm5924_vm5, %v5901_v43, %v4082_v54  ;;  %v5340_v54 = vsel %vm5279_vm0, %v89_v4, %v18642_v17  ;;  %v18648_v43 = vld [vmem:[#allocation102_spill] sm:$0xff]  ;;  %v15969_v17 = vpop.f32.mrf.mxu0 }
 0x9c6   :  { %v6134_v36 = vsel %vm6053_vm7, %v6005_v58, %v4544_v55  ;;  %v5386_v58 = vsel %vm5279_vm0, %v135_v56, %v18648_v43  ;;  %v8516_v4 = vld [vmem:[%s17548_s0 + $0x2e2] sm:$0xff] }
 0x9c7   :  { %v136_v43 = vld [vmem:[%s17548_s0 + $0x428] sm:$0xff] }
 0x9ca   :  { %4513 = vrot.lane.b32.xlu2 %v8387_v52, %s8783_s22  ;;  %4043 = vrot.lane.b32.xlu1 %v8280_v47, %s8782_s12  ;;  %v5469_v52 = vsel %vm5408_vm1, %v5340_v54, %v18643_v34  ;;  %v18653_v54 = vld [vmem:[#allocation57_spill] sm:$0xff] }
 0x9cb   :  { %5115 = vrot.lane.b32.xlu0 %v8560_v50, %s8784_s23  ;;  %v18645_v50 = vld [vmem:[#allocation415_spill] sm:$0xff] }
 0x9cc   :  { %v15833_v51 = vpop.permute.xlu2 %4035  ;;  %v4594_v26 = vpop.permute.xlu1 %4593 }
 0x9cd   :  { %v5056_v2 = vpop.permute.xlu0 %5055  ;;  %v6159_v25 = vsel %vm6053_vm7, %v6030_v18, %v4594_v26  ;;  %v8388_v18 = vld [vmem:[%s17548_s0 + $0x2e1] sm:$0xff] }
 0x9ce   :  { %v6263_v27 = vsel %vm6182_vm6, %v6134_v36, %v5056_v2  ;;  %v6288_v31 = vsel %vm6182_vm6, %v6159_v25, %v15738_v39  ;;  %v5361_v39 = vsel %vm5279_vm0, %v110_v49, %v18637_v33  ;;  %v8281_v36 = vld [vmem:[%s17548_s0 + $0x3b0] sm:$0xff]  ;;  %v18649_v26 = vld [vmem:[#allocation223_spill] sm:$0xff]  ;;  %v18650_v49 = vld [vmem:[#allocation329_spill] sm:$0xff] }
 0x9cf   :  { %v6392_v10 = vsel %vm6311_vm8, %v6263_v27, 0.0  ;;  %v6417_v12 = vsel %vm6311_vm8, %v6288_v31, 0.0  ;;  %v5490_v59 = vsel %vm5408_vm1, %v5361_v39, %v18638_v11  ;;  %v5515_v2 = vsel %vm5408_vm1, %v5386_v58, %v18649_v26  ;;  %v18651_v27 = vld [vmem:[#allocation459_spill] sm:$0xff]  ;;  %v18652_v31 = vld [vmem:[#allocation580_spill] sm:$0xff]  ;;  %v18663_v58 = vld [vmem:[#allocation641_spill] sm:$0xff] }
 0x9d0   :  { %8658 = vmatmul.msk.f32.gmra.mxu2 %vm6448_vm9, %v6392_v10  ;;  %8683 = vmatmul.msk.f32.gmra.mxu3 %vm6448_vm9, %v6417_v12  ;;  %v5619_v7 = vsel %vm5537_vm2, %v5490_v59, %v18639_v19  ;;  %v5644_v25 = vsel %vm5537_vm2, %v5515_v2, %v18650_v49  ;;  %v8537_v19 = vld [vmem:[%s17548_s0 + $0x3b2] sm:$0xff]  ;;  %v18664_v2 = vld [vmem:[#allocation47_spill] sm:$0xff] }
 0x9d1   :  { %v5748_v13 = vsel %vm5666_vm4, %v5619_v7, %v18640_v6  ;;  %v5773_v10 = vsel %vm5666_vm4, %v5644_v25, %v18651_v27  ;;  %v8306_v6 = vld [vmem:[%s17548_s0 + $0x4b0] sm:$0xff] }
 0x9d2   :  { %5025 = vrot.lane.b32.xlu2 %v8515_v38, %s8784_s23  ;;  %4093 = vrot.lane.b32.xlu1 %v8305_v41, %s8782_s12  ;;  %v5877_v57 = vsel %vm5795_vm3, %v5748_v13, %v18641_v62  ;;  %v5902_v38 = vsel %vm5795_vm3, %v5773_v10, %v18652_v31  ;;  %v15940_v41 = vpop.f32.mrf.mxu1  ;;  %v90_v13 = vld [vmem:[%s17548_s0 + $0x260] sm:$0xff]  ;;  %v111_v62 = vld [vmem:[%s17548_s0 + $0x330] sm:$0xff] }
 0x9d3   :  { %4555 = vrot.lane.b32.xlu0 %v8408_v21, %s8783_s22 }
 0x9d4   :  { %v15873_v44 = vpop.permute.xlu2 %4085  ;;  %v4504_v22 = vpop.permute.xlu1 %4503 }
 0x9d5   :  { %v4034_v23 = vpop.permute.xlu0 %4033 }
 0x9d6   :  { %v6006_v60 = vsel %vm5924_vm5, %v5877_v57, %v4034_v23 }
 0x9d7   :  { %v6135_v55 = vsel %vm6053_vm7, %v6006_v60, %v15771_v32  ;;  %v5598_v32 = vsel %vm5537_vm2, %v5469_v52, %v18644_v20  ;;  %v8282_v52 = vld [vmem:[%s17548_s0 + $0x3c0] sm:$0xff] }
 0x9d8   :  { %v6264_v47 = vsel %vm6182_vm6, %v6135_v55, %v5058_v29  ;;  %v5727_v14 = vsel %vm5666_vm4, %v5598_v32, %v18645_v50  ;;  %v18646_v29 = vld [vmem:[#allocation521_spill] sm:$0xff]  ;;  %v5341_v55 = vsel %vm5279_vm0, %v90_v13, %v18653_v54  ;;  %v18657_v50 = vld [vmem:[#allocation284_spill] sm:$0xff] }
 0x9d9   :  { %v6393_v30 = vsel %vm6311_vm8, %v6264_v47, 0.0  ;;  %v5856_v8 = vsel %vm5795_vm3, %v5727_v14, %v18646_v29  ;;  %v18655_v47 = vld [vmem:[#allocation178_spill] sm:$0xff]  ;;  %v8562_v32 = vld [vmem:[%s17548_s0 + $0x4b2] sm:$0xff] }
 0x9da   :  { %8659 = vmatmul.msk.f32.gmra.mxu2 %vm6448_vm9, %v6393_v30  ;;  %5117 = vrot.lane.b32.xlu2 %v8561_v15, %s8784_s23  ;;  %v5985_v63 = vsel %vm5924_vm5, %v5856_v8, %v18647_v9  ;;  %v15967_v57 = vpop.f32.mrf.mxu1  ;;  %v18654_v15 = vld [vmem:[#allocation78_spill] sm:$0xff]  ;;  %v8434_v30 = vld [vmem:[%s17548_s0 + $0x4b1] sm:$0xff]  ;;  %v91_v9 = vld [vmem:[%s17548_s0 + $0x268] sm:$0xff] }
 0x9db   :  { %4605 = vrot.lane.b32.xlu1 %v8433_v48, %s8783_s22  ;;  %5067 = vrot.lane.b32.xlu0 %v8536_v24, %s8784_s23  ;;  %v6114_v46 = vsel %vm6053_vm7, %v5985_v63, %v4504_v22  ;;  %v5362_v34 = vsel %vm5279_vm0, %v111_v62, %v18654_v15  ;;  %v5470_v48 = vsel %vm5408_vm1, %v5341_v55, %v18655_v47  ;;  %v18656_v24 = vld [vmem:[#allocation199_spill] sm:$0xff]  ;;  %v18658_v29 = vld [vmem:[#allocation305_spill] sm:$0xff]  ;;  %v18659_v63 = vld [vmem:[#allocation414_spill] sm:$0xff] }
 0x9dc   :  { %v15909_v61 = vpop.permute.xlu2 %4597  ;;  %v5016_v40 = vpop.permute.xlu1 %5015  ;;  %v5491_v20 = vsel %vm5408_vm1, %v5362_v34, %v18656_v24  ;;  %v5599_v14 = vsel %vm5537_vm2, %v5470_v48, %v18657_v50  ;;  %v5342_v49 = vsel %vm5279_vm0, %v91_v9, %v18664_v2  ;;  %v8307_v62 = vld [vmem:[%s17548_s0 + $0x4b8] sm:$0xff]  ;;  %v18669_v54 = vld [vmem:[#allocation404_spill] sm:$0xff]  ;;  %v8410_v15 = vld [vmem:[%s17548_s0 + $0x3c1] sm:$0xff] }
 0x9dd   :  { %v4084_v16 = vpop.permute.xlu0 %4083  ;;  %v6243_v1 = vsel %vm6182_vm6, %v6114_v46, %v5016_v40  ;;  %v5620_v8 = vsel %vm5537_vm2, %v5491_v20, %v18658_v29  ;;  %v5728_v56 = vsel %vm5666_vm4, %v5599_v14, %v18659_v63  ;;  %v18660_v46 = vld [vmem:[#allocation435_spill] sm:$0xff]  ;;  %v18671_v48 = vld [vmem:[#allocation534_spill] sm:$0xff]  ;;  %v18672_v20 = vld [vmem:[#allocation449_spill] sm:$0xff] }
 0x9de   :  { %v6372_v5 = vsel %vm6311_vm8, %v6243_v1, 0.0  ;;  %v6031_v21 = vsel %vm5924_vm5, %v5902_v38, %v4084_v16  ;;  %v5749_v40 = vsel %vm5666_vm4, %v5620_v8, %v18660_v46  ;;  %v18661_v16 = vld [vmem:[#allocation535_spill] sm:$0xff]  ;;  %v18665_v38 = vld [vmem:[#allocation177_spill] sm:$0xff] }
 0x9df   :  { %8638 = vmatmul.msk.f32.gmra.mxu1 %vm6448_vm9, %v6372_v5  ;;  %v5857_v1 = vsel %vm5795_vm3, %v5728_v56, %v18661_v16  ;;  %v18662_v5 = vld [vmem:[#allocation556_spill] sm:$0xff]  ;;  %v18674_v14 = vld [vmem:[#allocation579_spill] sm:$0xff] }
 0x9e0   :  { %v8389_v34 = vld [vmem:[%s17548_s0 + $0x2e9] sm:$0xff] }
 0x9e2   :  { %4557 = vrot.lane.b32.xlu2 %v8409_v0, %s8783_s22  ;;  %v5878_v0 = vsel %vm5795_vm3, %v5749_v40, %v18662_v5 }
 0x9e3   :  { %4515 = vrot.lane.b32.xlu1 %v8388_v18, %s8783_s22  ;;  %4045 = vrot.lane.b32.xlu0 %v8281_v36, %s8782_s12  ;;  %v5986_v18 = vsel %vm5924_vm5, %v5857_v1, %v18663_v58  ;;  %v6007_v36 = vsel %vm5924_vm5, %v5878_v0, %v15833_v51  ;;  %v112_v58 = vld [vmem:[%s17548_s0 + $0x338] sm:$0xff] }
 0x9e4   :  { %v15942_v12 = vpop.permute.xlu2 %4507  ;;  %v5108_v33 = vpop.permute.xlu1 %5107 }
 0x9e5   :  { %v4596_v39 = vpop.permute.xlu0 %4595 }
 0x9e6   :  { %v6160_v11 = vsel %vm6053_vm7, %v6031_v21, %v4596_v39  ;;  %v5471_v21 = vsel %vm5408_vm1, %v5342_v49, %v18665_v38  ;;  %v16023_v39 = vpop.f32.mrf.mxu0  ;;  %v18676_v38 = vld [vmem:[#allocation106_spill] sm:$0xff] }
 0x9e7   :  { %v6289_v59 = vsel %vm6182_vm6, %v6160_v11, %v5108_v33  ;;  %v16021_v33 = vpop.f32.mrf.mxu1 }
 0x9e8   :  { %v6418_v7 = vsel %vm6311_vm8, %v6289_v59, 0.0  ;;  %v18666_v59 = vld [vmem:[#allocation92_spill] sm:$0xff] }
 0x9e9   :  { %8684 = vmatmul.msk.f32.gmra.mxu3 %vm6448_vm9, %v6418_v7  ;;  %v18667_v7 = vld [vmem:[#allocation298_spill] sm:$0xff] }
 0x9ea   :  { %5069 = vrot.lane.b32.xlu2 %v8537_v19, %s8784_s23  ;;  %v5387_v19 = vsel %vm5279_vm0, %v136_v43, %v18666_v59  ;;  %v8517_v43 = vld [vmem:[%s17548_s0 + $0x2ea] sm:$0xff] }
 0x9eb   :  { %5027 = vrot.lane.b32.xlu1 %v8516_v4, %s8784_s23  ;;  %4095 = vrot.lane.b32.xlu0 %v8306_v6, %s8782_s12  ;;  %v5600_v4 = vsel %vm5537_vm2, %v5471_v21, %v18667_v7  ;;  %v8563_v7 = vld [vmem:[%s17548_s0 + $0x4ba] sm:$0xff] }
 0x9ec   :  { %v5020_v22 = vpop.permute.xlu2 %5019  ;;  %v4548_v23 = vpop.permute.xlu1 %4547  ;;  %v5729_v55 = vsel %vm5666_vm4, %v5600_v4, %v18669_v54  ;;  %v18678_v4 = vld [vmem:[#allocation212_spill] sm:$0xff]  ;;  %v18681_v54 = vld [vmem:[#allocation425_spill] sm:$0xff] }
 0x9ed   :  { %v4506_v60 = vpop.permute.xlu0 %4505  ;;  %v6136_v25 = vsel %vm6053_vm7, %v6007_v36, %v4548_v23  ;;  %v18668_v23 = vld [vmem:[#allocation222_spill] sm:$0xff]  ;;  %v5858_v24 = vsel %vm5795_vm3, %v5729_v55, %v18671_v48  ;;  %v137_v36 = vld [vmem:[%s17548_s0 + $0x438] sm:$0xff] }
 0x9ee   :  { %v6115_v27 = vsel %vm6053_vm7, %v5986_v18, %v4506_v60  ;;  %v5516_v60 = vsel %vm5408_vm1, %v5387_v19, %v18668_v23  ;;  %v16070_v1 = vpop.f32.mrf.mxu0  ;;  %v5388_v21 = vsel %vm5279_vm0, %v137_v36, %v18676_v38  ;;  %v8283_v19 = vld [vmem:[%s17548_s0 + $0x3c8] sm:$0xff]  ;;  %v18680_v23 = vld [vmem:[#allocation342_spill] sm:$0xff]  ;;  %v18684_v48 = vld [vmem:[#allocation569_spill] sm:$0xff] }
 0x9f2   :  { %4047 = vrot.lane.b32.xlu2 %v8282_v52, %s8782_s12  ;;  %v18670_v52 = vld [vmem:[#allocation343_spill] sm:$0xff] }
 0x9f3   :  { %5119 = vrot.lane.b32.xlu1 %v8562_v32, %s8784_s23  ;;  %4607 = vrot.lane.b32.xlu0 %v8434_v30, %s8783_s22  ;;  %v5645_v47 = vsel %vm5537_vm2, %v5516_v60, %v18670_v52  ;;  %v18673_v30 = vld [vmem:[#allocation653_spill] sm:$0xff]  ;;  %v18683_v52 = vld [vmem:[#allocation555_spill] sm:$0xff] }
 0x9f4   :  { %v16013_v26 = vpop.permute.xlu2 %5111  ;;  %v5060_v10 = vpop.permute.xlu1 %5059  ;;  %v5774_v32 = vsel %vm5666_vm4, %v5645_v47, %v18672_v20  ;;  %v5987_v50 = vsel %vm5924_vm5, %v5858_v24, %v18673_v30 }
 0x9f5   :  { %v5018_v31 = vpop.permute.xlu0 %5017  ;;  %v6265_v51 = vsel %vm6182_vm6, %v6136_v25, %v5060_v10  ;;  %v5903_v29 = vsel %vm5795_vm3, %v5774_v32, %v18674_v14  ;;  %v6116_v8 = vsel %vm6053_vm7, %v5987_v50, %v15942_v12 }
 0x9f6   :  { %v6244_v11 = vsel %vm6182_vm6, %v6115_v27, %v5018_v31  ;;  %v6394_v13 = vsel %vm6311_vm8, %v6265_v51, 0.0  ;;  %v6032_v9 = vsel %vm5924_vm5, %v5903_v29, %v15873_v44  ;;  %v6245_v63 = vsel %vm6182_vm6, %v6116_v8, %v5020_v22  ;;  %v8435_v44 = vld [vmem:[%s17548_s0 + $0x4b9] sm:$0xff]  ;;  %v16078_v22 = vpop.f32.mrf.mxu1  ;;  %v16097_v25 = vpop.f32.mrf.mxu0  ;;  %v18675_v27 = vld [vmem:[#allocation68_spill] sm:$0xff]  ;;  %v113_v8 = vld [vmem:[%s17548_s0 + $0x348] sm:$0xff] }
 0x9f7   :  { %v6373_v6 = vsel %vm6311_vm8, %v6244_v11, 0.0  ;;  %8660 = vmatmul.msk.f32.gmra.mxu2 %vm6448_vm9, %v6394_v13  ;;  %v6161_v46 = vsel %vm6053_vm7, %v6032_v9, %v15909_v61  ;;  %v6374_v5 = vsel %vm6311_vm8, %v6245_v63, 0.0  ;;  %v8538_v61 = vld [vmem:[%s17548_s0 + $0x3c2] sm:$0xff]  ;;  %v5363_v10 = vsel %vm5279_vm0, %v112_v58, %v18675_v27  ;;  %v92_v27 = vld [vmem:[%s17548_s0 + $0x270] sm:$0xff] }
 0x9f8   :  { %8639 = vmatmul.msk.f32.gmra.mxu1 %vm6448_vm9, %v6373_v6  ;;  %v8411_v31 = vld [vmem:[%s17548_s0 + $0x3c9] sm:$0xff]  ;;  %v18677_v51 = vld [vmem:[#allocation198_spill] sm:$0xff]  ;;  %v5517_v6 = vsel %vm5408_vm1, %v5388_v21, %v18678_v4  ;;  %v18689_v21 = vld [vmem:[#allocation545_spill] sm:$0xff] }
 0x9f9   :  { %v5492_v11 = vsel %vm5408_vm1, %v5363_v10, %v18677_v51  ;;  %v18679_v13 = vld [vmem:[#allocation319_spill] sm:$0xff]  ;;  %v5646_v60 = vsel %vm5537_vm2, %v5517_v6, %v18680_v23  ;;  %v18690_v6 = vld [vmem:[#allocation61_spill] sm:$0xff] }
 0x9fa   :  { %4097 = vrot.lane.b32.xlu2 %v8307_v62, %s8782_s12  ;;  %v5621_v62 = vsel %vm5537_vm2, %v5492_v11, %v18679_v13  ;;  %v18688_v10 = vld [vmem:[#allocation439_spill] sm:$0xff]  ;;  %v5343_v13 = vsel %vm5279_vm0, %v92_v27, %v18690_v6  ;;  %v8412_v23 = vld [vmem:[%s17548_s0 + $0x3d1] sm:$0xff] }
 0x9fb   :  { %4559 = vrot.lane.b32.xlu1 %v8410_v15, %s8783_s22  ;;  %4517 = vrot.lane.b32.xlu0 %v8389_v34, %s8783_s22  ;;  %v5750_v55 = vsel %vm5666_vm4, %v5621_v62, %v18681_v54  ;;  %v18682_v15 = vld [vmem:[#allocation463_spill] sm:$0xff] }
 0x9fc   :  { %v16066_v56 = vpop.permute.xlu2 %4551  ;;  %v4038_v40 = vpop.permute.xlu1 %4037  ;;  %v5775_v34 = vsel %vm5666_vm4, %v5646_v60, %v18682_v15  ;;  %v5879_v47 = vsel %vm5795_vm3, %v5750_v55, %v18683_v52  ;;  %v18691_v60 = vld [vmem:[#allocation167_spill] sm:$0xff]  ;;  %v8284_v15 = vld [vmem:[%s17548_s0 + $0x3d0] sm:$0xff]  ;;  %v18692_v52 = vld [vmem:[#allocation297_spill] sm:$0xff] }
 0x9fd   :  { %v5110_v16 = vpop.permute.xlu0 %5109  ;;  %v5904_v24 = vsel %vm5795_vm3, %v5775_v34, %v18684_v48  ;;  %v6008_v20 = vsel %vm5924_vm5, %v5879_v47, %v4038_v40  ;;  %v5472_v54 = vsel %vm5408_vm1, %v5343_v13, %v18691_v60  ;;  %v8564_v34 = vld [vmem:[%s17548_s0 + $0x4c2] sm:$0xff] }
 0x9fe   :  { %v6290_v12 = vsel %vm6182_vm6, %v6161_v46, %v5110_v16  ;;  %v16108_v59 = vpop.f32.mrf.mxu1  ;;  %v16141_v9 = vpop.f32.mrf.mxu0  ;;  %v18693_v48 = vld [vmem:[#allocation418_spill] sm:$0xff] }
 0x9ff   :  { %v6419_v0 = vsel %vm6311_vm8, %v6290_v12, 0.0  ;;  %v8436_v12 = vld [vmem:[%s17548_s0 + $0x4c1] sm:$0xff] }
 0xa00   :  { %8640 = vmatmul.msk.f32.gmra.mxu1 %vm6448_vm9, %v6374_v5  ;;  %8685 = vmatmul.msk.f32.gmra.mxu3 %vm6448_vm9, %v6419_v0  ;;  %v8539_v0 = vld [vmem:[%s17548_s0 + $0x3ca] sm:$0xff] }
 0xa02   :  { %4609 = vrot.lane.b32.xlu2 %v8435_v44, %s8783_s22  ;;  %v8308_v44 = vld [vmem:[%s17548_s0 + $0x4c0] sm:$0xff] }
 0xa03   :  { %5071 = vrot.lane.b32.xlu1 %v8538_v61, %s8784_s23  ;;  %5029 = vrot.lane.b32.xlu0 %v8517_v43, %s8784_s23  ;;  %v18685_v61 = vld [vmem:[#allocation82_spill] sm:$0xff] }
 0xa04   :  { %v5064_v18 = vpop.permute.xlu2 %5063  ;;  %v4088_v2 = vpop.permute.xlu1 %4087  ;;  %v5364_v43 = vsel %vm5279_vm0, %v113_v8, %v18685_v61  ;;  %v138_v8 = vld [vmem:[%s17548_s0 + $0x440] sm:$0xff] }
 0xa05   :  { %v4550_v49 = vpop.permute.xlu0 %4549  ;;  %v6033_v30 = vsel %vm5924_vm5, %v5904_v24, %v4088_v2  ;;  %v18687_v2 = vld [vmem:[#allocation318_spill] sm:$0xff] }
 0xa06   :  { %v6137_v50 = vsel %vm6053_vm7, %v6008_v20, %v4550_v49  ;;  %v16164_v36 = vpop.f32.mrf.mxu1 }
 0xa0a   :  { %4561 = vrot.lane.b32.xlu2 %v8411_v31, %s8783_s22 }
 0xa0b   :  { %4049 = vrot.lane.b32.xlu1 %v8283_v19, %s8782_s12  ;;  %5121 = vrot.lane.b32.xlu0 %v8563_v7, %s8784_s23  ;;  %v16180_v7 = vpop.f32.mrf.mxu0 }
 0xa0c   :  { %v16134_v32 = vpop.permute.xlu2 %4041  ;;  %v4600_v14 = vpop.permute.xlu1 %4599 }
 0xa0d   :  { %v5062_v29 = vpop.permute.xlu0 %5061  ;;  %v6162_v63 = vsel %vm6053_vm7, %v6033_v30, %v4600_v14 }
 0xa0e   :  { %v6266_v46 = vsel %vm6182_vm6, %v6137_v50, %v5062_v29  ;;  %v6291_v16 = vsel %vm6182_vm6, %v6162_v63, %v16013_v26  ;;  %v18686_v26 = vld [vmem:[#allocation188_spill] sm:$0xff]  ;;  %v16204_v20 = vpop.f32.mrf.mxu1 }
 0xa0f   :  { %v6395_v40 = vsel %vm6311_vm8, %v6266_v46, 0.0  ;;  %v6420_v5 = vsel %vm6311_vm8, %v6291_v16, 0.0  ;;  %v5493_v58 = vsel %vm5408_vm1, %v5364_v43, %v18686_v26  ;;  %v18695_v50 = vld [vmem:[#allocation652_spill] sm:$0xff]  ;;  %v8309_v26 = vld [vmem:[%s17548_s0 + $0x4c8] sm:$0xff] }
 0xa10   :  { %8661 = vmatmul.msk.f32.gmra.mxu2 %vm6448_vm9, %v6395_v40  ;;  %8686 = vmatmul.msk.f32.gmra.mxu3 %vm6448_vm9, %v6420_v5  ;;  %v5622_v49 = vsel %vm5537_vm2, %v5493_v58, %v18687_v2  ;;  %v8540_v43 = vld [vmem:[%s17548_s0 + $0x3d2] sm:$0xff]  ;;  %v18697_v58 = vld [vmem:[#allocation226_spill] sm:$0xff] }
 0xa11   :  { %v5751_v31 = vsel %vm5666_vm4, %v5622_v49, %v18688_v10  ;;  %v18698_v49 = vld [vmem:[#allocation332_spill] sm:$0xff] }
 0xa12   :  { %4611 = vrot.lane.b32.xlu2 %v8436_v12, %s8783_s22  ;;  %v5880_v51 = vsel %vm5795_vm3, %v5751_v31, %v18689_v21  ;;  %v18699_v31 = vld [vmem:[#allocation462_spill] sm:$0xff] }
 0xa13   :  { %5073 = vrot.lane.b32.xlu1 %v8539_v0, %s8784_s23  ;;  %4099 = vrot.lane.b32.xlu0 %v8308_v44, %s8782_s12  ;;  %v16220_v16 = vpop.f32.mrf.mxu0  ;;  %v8437_v0 = vld [vmem:[%s17548_s0 + $0x4c9] sm:$0xff]  ;;  %v18696_v44 = vld [vmem:[#allocation105_spill] sm:$0xff] }
 0xa14   :  { %v16176_v38 = vpop.permute.xlu2 %4091  ;;  %v4510_v11 = vpop.permute.xlu1 %4509  ;;  %v5389_v61 = vsel %vm5279_vm0, %v138_v8, %v18696_v44  ;;  %v18701_v44 = vld [vmem:[#allocation50_spill] sm:$0xff] }
 0xa15   :  { %v4040_v19 = vpop.permute.xlu0 %4039  ;;  %v5518_v2 = vsel %vm5408_vm1, %v5389_v61, %v18697_v58  ;;  %v18703_v58 = vld [vmem:[#allocation81_spill] sm:$0xff] }
 0xa16   :  { %v6009_v4 = vsel %vm5924_vm5, %v5880_v51, %v4040_v19  ;;  %v5647_v27 = vsel %vm5537_vm2, %v5518_v2, %v18698_v49  ;;  %v16240_v10 = vpop.f32.mrf.mxu1  ;;  %v18700_v51 = vld [vmem:[#allocation583_spill] sm:$0xff] }
 0xa17   :  { %v6138_v62 = vsel %vm6053_vm7, %v6009_v4, %v16066_v56  ;;  %v5601_v56 = vsel %vm5537_vm2, %v5472_v54, %v18692_v52  ;;  %v5776_v21 = vsel %vm5666_vm4, %v5647_v27, %v18699_v31  ;;  %v18704_v2 = vld [vmem:[#allocation95_spill] sm:$0xff]  ;;  %v18705_v27 = vld [vmem:[#allocation181_spill] sm:$0xff]  ;;  %v18706_v31 = vld [vmem:[#allocation202_spill] sm:$0xff] }
 0xa18   :  { %v6267_v55 = vsel %vm6182_vm6, %v6138_v62, %v5064_v18  ;;  %v5730_v24 = vsel %vm5666_vm4, %v5601_v56, %v18693_v48  ;;  %v18694_v18 = vld [vmem:[#allocation524_spill] sm:$0xff]  ;;  %v16255_v62 = vld [vmem:[%s17550_s2] ss:$0 sm:$0xff]  ;;  %v8285_v56 = vld [vmem:[%s17548_s0 + $0x3d8] sm:$0xff] }
 0xa19   :  { %v6396_v47 = vsel %vm6311_vm8, %v6267_v55, 0.0  ;;  %v5859_v30 = vsel %vm5795_vm3, %v5730_v24, %v18694_v18  ;;  %v6929_v24 = vadd.f32 %v16255_v62, %v16070_v1  ;;  %v93_v18 = vld [vmem:[%s17548_s0 + $0x280] sm:$0xff]  ;;  %v139_v1 = vld [vmem:[%s17548_s0 + $0x448] sm:$0xff] }
 0xa1a   :  { %8662 = vmatmul.msk.f32.gmra.mxu2 %vm6448_vm9, %v6396_v47  ;;  %4563 = vrot.lane.b32.xlu2 %v8412_v23, %s8783_s22  ;;  %v5988_v14 = vsel %vm5924_vm5, %v5859_v30, %v18695_v50  ;;  %v6923_v23 = vadd.f32 %v16255_v62, %v15969_v17  ;;  %v8565_v17 = vld [vmem:[%s17548_s0 + $0x4ca] sm:$0xff]  ;;  %v5390_v49 = vsel %vm5279_vm0, %v139_v1, %v18704_v2  ;;  %v18712_v1 = vld [vmem:[#allocation538_spill] sm:$0xff] }
 0xa1b   :  { %4051 = vrot.lane.b32.xlu1 %v8284_v15, %s8782_s12  ;;  %5123 = vrot.lane.b32.xlu0 %v8564_v34, %s8784_s23  ;;  %v6117_v63 = vsel %vm6053_vm7, %v5988_v14, %v4510_v11  ;;  %v5905_v11 = vsel %vm5795_vm3, %v5776_v21, %v18700_v51  ;;  %v6943_v60 = vpop.f32.mrf.mxu0  ;;  %v8413_v15 = vld [vmem:[%s17548_s0 + $0x3d9] sm:$0xff]  ;;  %v6926_v34 = vadd.f32 %v16255_v62, %v16023_v39  ;;  %v94_v39 = vld [vmem:[%s17548_s0 + $0x288] sm:$0xff] }
 0xa1c   :  { %v16214_v29 = vpop.permute.xlu2 %4603  ;;  %v5022_v46 = vpop.permute.xlu1 %5021  ;;  %v7258_v47 = vmax.f32 %v6923_v23, 0.0  ;;  %v114_v30 = vld [vmem:[%s17548_s0 + $0x350] sm:$0xff]  ;;  %v6932_v14 = vadd.f32 %v16255_v62, %v16097_v25  ;;  %v5345_v61 = vsel %vm5279_vm0, %v94_v39, %v18701_v44  ;;  %v18714_v44 = vld [vmem:[#allocation225_spill] sm:$0xff]  ;;  %v6944_v2 = vadd.f32 %v16255_v62, %v6943_v60 }
 0xa1d   :  { %v4090_v40 = vpop.permute.xlu0 %4089  ;;  %v6246_v12 = vsel %vm6182_vm6, %v6117_v63, %v5022_v46  ;;  %v7259_v50 = vmax.f32 %v6926_v34, 0.0  ;;  %v5365_v25 = vsel %vm5279_vm0, %v114_v30, %v18703_v58 }
 0xa1e   :  { %v6375_v5 = vsel %vm6311_vm8, %v6246_v12, 0.0  ;;  %v6034_v4 = vsel %vm5924_vm5, %v5905_v11, %v4090_v40  ;;  %v16274_v48 = vpop.f32.mrf.mxu1  ;;  %v7385_v40 = vadd.f32 %v15138_v45, %v7258_v47  ;;  %v7260_v12 = vmax.f32 %v6929_v24, 0.0  ;;  %v8438_v45 = vld [vmem:[%s17548_s0 + $0x4d9] sm:$0xff] }
 0xa1f   :  { %8641 = vmatmul.msk.f32.gmra.mxu1 %vm6448_vm9, %v6375_v5  ;;  %v6935_v5 = vadd.f32 %v16255_v62, %v16141_v9  ;;  %v5494_v21 = vsel %vm5408_vm1, %v5365_v25, %v18706_v31  ;;  %v7261_v11 = vmax.f32 %v6932_v14, 0.0  ;;  %v18711_v47 = vld [vmem:[#allocation438_spill] sm:$0xff]  ;;  %v18713_v14 = vld [vmem:[#allocation559_spill] sm:$0xff]  ;;  %v18716_v31 = vld [vmem:[#allocation301_spill] sm:$0xff] }
 0xa20   :  { %v7386_v51 = vadd.f32 %v7385_v40, %v7259_v50 }
 0xa21   :  { %v7262_v30 = vmax.f32 %v6935_v5, 0.0 }
 0xa22   :  { %4613 = vrot.lane.b32.xlu2 %v8437_v0, %s8783_s22 }
 0xa23   :  { %5075 = vrot.lane.b32.xlu1 %v8540_v43, %s8784_s23  ;;  %4101 = vrot.lane.b32.xlu0 %v8309_v26, %s8782_s12  ;;  %v6946_v0 = vpop.f32.mrf.mxu0  ;;  %v18702_v43 = vld [vmem:[#allocation60_spill] sm:$0xff] }
 0xa24   :  { %v16249_v19 = vpop.permute.xlu2 %4513  ;;  %v5114_v6 = vpop.permute.xlu1 %5113  ;;  %v5344_v26 = vsel %vm5279_vm0, %v93_v18, %v18702_v43  ;;  %v7387_v18 = vadd.f32 %v7386_v51, %v7260_v12  ;;  %v18715_v12 = vld [vmem:[#allocation644_spill] sm:$0xff] }
 0xa25   :  { %v4602_v13 = vpop.permute.xlu0 %4601  ;;  %v5473_v9 = vsel %vm5408_vm1, %v5344_v26, %v18705_v27 }
 0xa26   :  { %v6163_v54 = vsel %vm6053_vm7, %v6034_v4, %v4602_v13  ;;  %v8541_v4 = vld [vmem:[%s17548_s0 + $0x3da] sm:$0xff]  ;;  %v18707_v13 = vld [vmem:[#allocation180_spill] sm:$0xff]  ;;  %v16333_v39 = vpop.f32.mrf.mxu1  ;;  %v7388_v43 = vadd.f32 %v7387_v18, %v7261_v11 }
 0xa27   :  { %v6292_v55 = vsel %vm6182_vm6, %v6163_v54, %v5114_v6  ;;  %v8310_v6 = vld [vmem:[%s17548_s0 + $0x4d8] sm:$0xff]  ;;  %v5474_v23 = vsel %vm5408_vm1, %v5345_v61, %v18707_v13  ;;  %v18708_v54 = vld [vmem:[#allocation287_spill] sm:$0xff]  ;;  %v5519_v61 = vsel %vm5408_vm1, %v5390_v49, %v18714_v44  ;;  %v18717_v13 = vld [vmem:[#allocation346_spill] sm:$0xff] }
 0xa28   :  { %v6421_v52 = vsel %vm6311_vm8, %v6292_v55, 0.0  ;;  %v5602_v55 = vsel %vm5537_vm2, %v5473_v9, %v18708_v54  ;;  %v5603_v49 = vsel %vm5537_vm2, %v5474_v23, %v18716_v31  ;;  %v5648_v23 = vsel %vm5537_vm2, %v5519_v61, %v18717_v13  ;;  %v18718_v54 = vld [vmem:[#allocation407_spill] sm:$0xff]  ;;  %v140_v13 = vld [vmem:[%s17548_s0 + $0x450] sm:$0xff] }
 0xa29   :  { %8687 = vmatmul.msk.f32.gmra.mxu3 %vm6448_vm9, %v6421_v52  ;;  %v6938_v52 = vadd.f32 %v16255_v62, %v16180_v7  ;;  %v6941_v7 = vadd.f32 %v16255_v62, %v16220_v16 }
 0xa2a   :  { %4565 = vrot.lane.b32.xlu2 %v8413_v15, %s8783_s22  ;;  %v18709_v15 = vld [vmem:[#allocation308_spill] sm:$0xff] }
 0xa2b   :  { %4053 = vrot.lane.b32.xlu1 %v8285_v56, %s8782_s12  ;;  %5125 = vrot.lane.b32.xlu0 %v8565_v17, %s8784_s23  ;;  %v5623_v34 = vsel %vm5537_vm2, %v5494_v21, %v18709_v15  ;;  %v18710_v56 = vld [vmem:[#allocation417_spill] sm:$0xff]  ;;  %v7263_v25 = vmax.f32 %v6938_v52, 0.0  ;;  %v7389_v21 = vadd.f32 %v7388_v43, %v7262_v30  ;;  %v6949_v51 = vpop.f32.mrf.mxu0  ;;  %v18721_v30 = vld [vmem:[#allocation655_spill] sm:$0xff] }
 0xa2c   :  { %v16295_v8 = vpop.permute.xlu2 %5025  ;;  %v4554_v63 = vpop.permute.xlu1 %4553  ;;  %v5731_v17 = vsel %vm5666_vm4, %v5602_v55, %v18710_v56  ;;  %v5752_v24 = vsel %vm5666_vm4, %v5623_v34, %v18711_v47  ;;  %v5732_v55 = vsel %vm5666_vm4, %v5603_v49, %v18718_v54  ;;  %v8566_v15 = vld [vmem:[%s17548_s0 + $0x4da] sm:$0xff]  ;;  %v6950_v47 = vadd.f32 %v16255_v62, %v6949_v51 }
 0xa2d   :  { %v4512_v46 = vpop.permute.xlu0 %4511  ;;  %v5860_v50 = vsel %vm5795_vm3, %v5731_v17, %v18712_v1  ;;  %v5881_v40 = vsel %vm5795_vm3, %v5752_v24, %v18713_v14  ;;  %v18719_v34 = vld [vmem:[#allocation537_spill] sm:$0xff]  ;;  %v7390_v56 = vadd.f32 %v7389_v21, %v7263_v25  ;;  %v7265_v17 = vmax.f32 %v6944_v2, 0.0  ;;  %v18720_v24 = vld [vmem:[#allocation452_spill] sm:$0xff]  ;;  %v18722_v14 = vld [vmem:[#allocation582_spill] sm:$0xff] }
 0xa2e   :  { %v5989_v5 = vsel %vm5924_vm5, %v5860_v50, %v18715_v12  ;;  %v6010_v26 = vsel %vm5924_vm5, %v5881_v40, %v16134_v32  ;;  %v5861_v52 = vsel %vm5795_vm3, %v5732_v55, %v18719_v34  ;;  %v5777_v18 = vsel %vm5666_vm4, %v5648_v23, %v18720_v24  ;;  %v16384_v50 = vpop.f32.mrf.mxu1  ;;  %v8311_v21 = vld [vmem:[%s17548_s0 + $0x4e0] sm:$0xff]  ;;  %v18724_v24 = vld [vmem:[#allocation109_spill] sm:$0xff] }
 0xa2f   :  { %v6139_v16 = vsel %vm6053_vm7, %v6010_v26, %v4554_v63  ;;  %v5990_v1 = vsel %vm5924_vm5, %v5861_v52, %v18721_v30  ;;  %v5906_v40 = vsel %vm5795_vm3, %v5777_v18, %v18722_v14  ;;  %v7267_v2 = vmax.f32 %v6950_v47, 0.0  ;;  %v8415_v47 = vld [vmem:[%s17548_s0 + $0x3f1] sm:$0xff] }
 0xa30   :  { %v6119_v61 = vsel %vm6053_vm7, %v5990_v1, %v16249_v19  ;;  %v6035_v12 = vsel %vm5924_vm5, %v5906_v40, %v16176_v38  ;;  %v6956_v19 = vadd.f32 %v16255_v62, %v15688_v37  ;;  %v8542_v37 = vld [vmem:[%s17548_s0 + $0x3ea] sm:$0xff]  ;;  %v6959_v51 = vadd.f32 %v16255_v62, %v15735_v53  ;;  %v18725_v30 = vld [vmem:[#allocation201_spill] sm:$0xff] }
 0xa31   :  { %v6164_v25 = vsel %vm6053_vm7, %v6035_v12, %v16214_v29  ;;  %v8439_v29 = vld [vmem:[%s17548_s0 + $0x4e1] sm:$0xff]  ;;  %v6965_v54 = vadd.f32 %v16255_v62, %v15810_v42  ;;  %v5391_v18 = vsel %vm5279_vm0, %v140_v13, %v18724_v24  ;;  %v6971_v1 = vadd.f32 %v16255_v62, %v15899_v35  ;;  %v8287_v14 = vld [vmem:[%s17548_s0 + $0x3f0] sm:$0xff] }
 0xa32   :  { %4615 = vrot.lane.b32.xlu2 %v8438_v45, %s8783_s22  ;;  %v6118_v45 = vsel %vm6053_vm7, %v5989_v5, %v4512_v46  ;;  %v8414_v46 = vld [vmem:[%s17548_s0 + $0x3e9] sm:$0xff]  ;;  %v6248_v5 = vsel %vm6182_vm6, %v6119_v61, %v16295_v8  ;;  %v7270_v23 = vmax.f32 %v6959_v51, 0.0  ;;  %v116_v13 = vld [vmem:[%s17548_s0 + $0x360] sm:$0xff]  ;;  %v6983_v24 = vadd.f32 %v16255_v62, %v16078_v22 }
 0xa33   :  { %5077 = vrot.lane.b32.xlu1 %v8541_v4, %s8784_s23  ;;  %4103 = vrot.lane.b32.xlu0 %v8310_v6, %s8782_s12  ;;  %v7264_v4 = vmax.f32 %v6941_v7, 0.0  ;;  %v6947_v6 = vadd.f32 %v16255_v62, %v6946_v0  ;;  %v8286_v0 = vld [vmem:[%s17548_s0 + $0x3e8] sm:$0xff]  ;;  %v6377_v38 = vsel %vm6311_vm8, %v6248_v5, 0.0  ;;  %v7272_v12 = vmax.f32 %v6965_v54, 0.0  ;;  %v18729_v35 = vld [vmem:[#allocation428_spill] sm:$0xff] }
 0xa34   :  { %v16350_v58 = vpop.permute.xlu2 %5117  ;;  %v5066_v27 = vpop.permute.xlu1 %5065  ;;  %v18726_v40 = vld [vmem:[#allocation215_spill] sm:$0xff]  ;;  %v18736_v22 = vld [vmem:[#allocation64_spill] sm:$0xff] }
 0xa35   :  { %v5024_v9 = vpop.permute.xlu0 %5023  ;;  %v6268_v11 = vsel %vm6182_vm6, %v6139_v16, %v5066_v27  ;;  %v7391_v7 = vadd.f32 %v7390_v56, %v7264_v4  ;;  %v7266_v44 = vmax.f32 %v6947_v6, 0.0  ;;  %v7269_v6 = vmax.f32 %v6956_v19, 0.0  ;;  %v18730_v19 = vld [vmem:[#allocation466_spill] sm:$0xff] }
 0xa36   :  { %v6247_v32 = vsel %vm6182_vm6, %v6118_v45, %v5024_v9  ;;  %v6397_v63 = vsel %vm6311_vm8, %v6268_v11, 0.0  ;;  %v16420_v4 = vpop.f32.mrf.mxu1  ;;  %v6968_v56 = vadd.f32 %v16255_v62, %v15851_v3  ;;  %v8567_v3 = vld [vmem:[%s17548_s0 + $0x4e2] sm:$0xff] }
 0xa37   :  { %v6376_v60 = vsel %vm6311_vm8, %v6247_v32, 0.0  ;;  %8663 = vmatmul.msk.f32.gmra.mxu2 %vm6448_vm9, %v6397_v63  ;;  %v7392_v26 = vadd.f32 %v7391_v7, %v7265_v17  ;;  %v5520_v7 = vsel %vm5408_vm1, %v5391_v18, %v18726_v40  ;;  %v6986_v40 = vadd.f32 %v16255_v62, %v16108_v59 }
 0xa38   :  { %8642 = vmatmul.msk.f32.gmra.mxu1 %vm6448_vm9, %v6376_v60  ;;  %v6962_v60 = vadd.f32 %v16255_v62, %v15775_v28  ;;  %v6989_v59 = vadd.f32 %v16255_v62, %v16164_v36  ;;  %v8416_v36 = vld [vmem:[%s17548_s0 + $0x3f9] sm:$0xff] }
 0xa39   :  { %v7393_v31 = vadd.f32 %v7392_v26, %v7266_v44  ;;  %v18727_v44 = vld [vmem:[#allocation322_spill] sm:$0xff]  ;;  %v18728_v26 = vld [vmem:[#allocation345_spill] sm:$0xff] }
 0xa3a   :  { %4567 = vrot.lane.b32.xlu2 %v8414_v46, %s8783_s22  ;;  %v115_v46 = vld [vmem:[%s17548_s0 + $0x358] sm:$0xff]  ;;  %v7271_v52 = vmax.f32 %v6962_v60, 0.0 }
 0xa3b   :  { %4055 = vrot.lane.b32.xlu1 %v8286_v0, %s8782_s12  ;;  %5127 = vrot.lane.b32.xlu0 %v8566_v15, %s8784_s23  ;;  %v7394_v11 = vadd.f32 %v7393_v31, %v7267_v2  ;;  %v18723_v15 = vld [vmem:[#allocation71_spill] sm:$0xff] }
 0xa3c   :  { %v16397_v43 = vpop.permute.xlu2 %4557  ;;  %v4044_v16 = vpop.permute.xlu1 %4043  ;;  %v5366_v34 = vsel %vm5279_vm0, %v115_v46, %v18723_v15 }
 0xa3d   :  { %v5116_v45 = vpop.permute.xlu0 %5115  ;;  %v6952_v9 = vpop.f32.mrf.mxu0  ;;  %v5495_v42 = vsel %vm5408_vm1, %v5366_v34, %v18725_v30  ;;  %v18734_v30 = vld [vmem:[#allocation191_spill] sm:$0xff] }
 0xa3e   :  { %v6293_v27 = vsel %vm6182_vm6, %v6164_v25, %v5116_v45  ;;  %v6953_v8 = vadd.f32 %v16255_v62, %v6952_v9  ;;  %v5624_v61 = vsel %vm5537_vm2, %v5495_v42, %v18727_v44  ;;  %v5649_v25 = vsel %vm5537_vm2, %v5520_v7, %v18728_v26  ;;  %v18731_v9 = vld [vmem:[#allocation558_spill] sm:$0xff] }
 0xa3f   :  { %v6422_v49 = vsel %vm6311_vm8, %v6293_v27, 0.0  ;;  %v5753_v2 = vsel %vm5666_vm4, %v5624_v61, %v18729_v35  ;;  %v6974_v45 = vadd.f32 %v16255_v62, %v15940_v41  ;;  %v5778_v27 = vsel %vm5666_vm4, %v5649_v25, %v18730_v19  ;;  %v18737_v61 = vld [vmem:[#allocation442_spill] sm:$0xff]  ;;  %v18738_v25 = vld [vmem:[#allocation548_spill] sm:$0xff] }
 0xa40   :  { %8643 = vmatmul.msk.f32.gmra.mxu1 %vm6448_vm9, %v6377_v38  ;;  %8688 = vmatmul.msk.f32.gmra.mxu3 %vm6448_vm9, %v6422_v49  ;;  %v7268_v32 = vmax.f32 %v6953_v8, 0.0  ;;  %v5882_v31 = vsel %vm5795_vm3, %v5753_v2, %v18731_v9  ;;  %v7273_v38 = vmax.f32 %v6968_v56, 0.0  ;;  %v18732_v49 = vld [vmem:[#allocation572_spill] sm:$0xff]  ;;  %v18733_v56 = vld [vmem:[#allocation85_spill] sm:$0xff]  ;;  %v7278_v2 = vmax.f32 %v6983_v24, 0.0  ;;  %v18739_v9 = vld [vmem:[#allocation170_spill] sm:$0xff] }
 0xa41   :  { %v6011_v41 = vsel %vm5924_vm5, %v5882_v31, %v4044_v16 }
 0xa42   :  { %4617 = vrot.lane.b32.xlu2 %v8439_v29, %s8783_s22  ;;  %v7395_v63 = vadd.f32 %v7394_v11, %v7268_v32  ;;  %v5907_v29 = vsel %vm5795_vm3, %v5778_v27, %v18732_v49  ;;  %v6977_v11 = vadd.f32 %v16255_v62, %v15967_v57  ;;  %v6992_v49 = vadd.f32 %v16255_v62, %v16204_v20  ;;  %v8568_v20 = vld [vmem:[%s17548_s0 + $0x4ea] sm:$0xff] }
 0xa43   :  { %5079 = vrot.lane.b32.xlu1 %v8542_v37, %s8784_s23  ;;  %4105 = vrot.lane.b32.xlu0 %v8311_v21, %s8782_s12  ;;  %v7274_v37 = vmax.f32 %v6971_v1, 0.0  ;;  %v16475_v21 = vpop.f32.mrf.mxu1  ;;  %v18735_v1 = vld [vmem:[#allocation321_spill] sm:$0xff] }
 0xa44   :  { %v16430_v53 = vpop.permute.xlu2 %5069  ;;  %v7396_v28 = vadd.f32 %v7395_v63, %v7269_v6  ;;  %v4094_v55 = vpop.permute.xlu1 %4093 }
 0xa45   :  { %v4556_v0 = vpop.permute.xlu0 %4555  ;;  %v6036_v6 = vsel %vm5924_vm5, %v5907_v29, %v4094_v55 }
 0xa46   :  { %v7397_v17 = vadd.f32 %v7396_v28, %v7270_v23  ;;  %v6140_v60 = vsel %vm6053_vm7, %v6011_v41, %v4556_v0  ;;  %v7275_v23 = vmax.f32 %v6974_v45, 0.0  ;;  %v6980_v28 = vadd.f32 %v16255_v62, %v16021_v33  ;;  %v8440_v0 = vld [vmem:[%s17548_s0 + $0x4e9] sm:$0xff] }
 0xa47   :  { %v8312_v33 = vld [vmem:[%s17548_s0 + $0x4e8] sm:$0xff]  ;;  %v18740_v41 = vld [vmem:[#allocation300_spill] sm:$0xff] }
 0xa48   :  { %v7398_v5 = vadd.f32 %v7397_v17, %v7271_v52  ;;  %v8543_v52 = vld [vmem:[%s17548_s0 + $0x3f2] sm:$0xff]  ;;  %v5367_v17 = vsel %vm5279_vm0, %v116_v13, %v18733_v56 }
 0xa49   :  { %v5496_v42 = vsel %vm5408_vm1, %v5367_v17, %v18734_v30  ;;  %v18741_v13 = vld [vmem:[#allocation421_spill] sm:$0xff] }
 0xa4a   :  { %4569 = vrot.lane.b32.xlu2 %v8415_v47, %s8783_s22  ;;  %v7399_v8 = vadd.f32 %v7398_v5, %v7272_v12  ;;  %v7276_v47 = vmax.f32 %v6977_v11, 0.0 }
 0xa4b   :  { %4057 = vrot.lane.b32.xlu1 %v8287_v14, %s8782_s12  ;;  %5129 = vrot.lane.b32.xlu0 %v8567_v3, %s8784_s23  ;;  %v5625_v14 = vsel %vm5537_vm2, %v5496_v42, %v18735_v1  ;;  %v7277_v3 = vmax.f32 %v6980_v28, 0.0  ;;  %v16526_v5 = vpop.f32.mrf.mxu1  ;;  %v6998_v28 = vadd.f32 %v16255_v62, %v16274_v48  ;;  %v8441_v1 = vld [vmem:[%s17548_s0 + $0x4f1] sm:$0xff] }
 0xa4c   :  { %v16478_v51 = vpop.permute.xlu2 %4047  ;;  %v7400_v32 = vadd.f32 %v7399_v8, %v7273_v38  ;;  %v5754_v12 = vsel %vm5666_vm4, %v5625_v14, %v18737_v61  ;;  %v7279_v8 = vmax.f32 %v6986_v40, 0.0  ;;  %v18744_v14 = vld [vmem:[#allocation108_spill] sm:$0xff]  ;;  %v18745_v40 = vld [vmem:[#allocation229_spill] sm:$0xff] }
 0xa4d   :  { %v4606_v63 = vpop.permute.xlu1 %4605  ;;  %v5068_v46 = vpop.permute.xlu0 %5067  ;;  %v5883_v35 = vsel %vm5795_vm3, %v5754_v12, %v18738_v25  ;;  %v7283_v24 = vmax.f32 %v6998_v28, 0.0  ;;  %v18746_v12 = vld [vmem:[#allocation335_spill] sm:$0xff] }
 0xa4e   :  { %v6165_v54 = vsel %vm6053_vm7, %v6036_v6, %v4606_v63  ;;  %v6269_v16 = vsel %vm6182_vm6, %v6140_v60, %v5068_v46  ;;  %v7401_v57 = vadd.f32 %v7400_v32, %v7274_v37  ;;  %v8288_v6 = vld [vmem:[%s17548_s0 + $0x3f8] sm:$0xff]  ;;  %v7280_v60 = vmax.f32 %v6989_v59, 0.0 }
 0xa4f   :  { %v6398_v15 = vsel %vm6311_vm8, %v6269_v16, 0.0  ;;  %v6294_v55 = vsel %vm6182_vm6, %v6165_v54, %v16350_v58  ;;  %v95_v58 = vld [vmem:[%s17548_s0 + $0x290] sm:$0xff]  ;;  %v7281_v16 = vmax.f32 %v6992_v49, 0.0 }
 0xa50   :  { %8664 = vmatmul.msk.f32.gmra.mxu2 %vm6448_vm9, %v6398_v15  ;;  %v6423_v34 = vsel %vm6311_vm8, %v6294_v55, 0.0  ;;  %v7402_v18 = vadd.f32 %v7401_v57, %v7275_v23  ;;  %v5346_v44 = vsel %vm5279_vm0, %v95_v58, %v18736_v22 }
 0xa51   :  { %8689 = vmatmul.msk.f32.gmra.mxu3 %vm6448_vm9, %v6423_v34  ;;  %v5475_v31 = vsel %vm5408_vm1, %v5346_v44, %v18739_v9  ;;  %v141_v34 = vld [vmem:[%s17548_s0 + $0x460] sm:$0xff]  ;;  %v7007_v44 = vadd.f32 %v16255_v62, %v16420_v4 }
 0xa52   :  { %4619 = vrot.lane.b32.xlu2 %v8440_v0, %s8783_s22  ;;  %v7403_v7 = vadd.f32 %v7402_v18, %v7276_v47  ;;  %v5604_v11 = vsel %vm5537_vm2, %v5475_v31, %v18740_v41  ;;  %v7004_v18 = vadd.f32 %v16255_v62, %v16384_v50  ;;  %v8313_v50 = vld [vmem:[%s17548_s0 + $0x4f0] sm:$0xff] }
 0xa53   :  { %5081 = vrot.lane.b32.xlu1 %v8543_v52, %s8784_s23  ;;  %4107 = vrot.lane.b32.xlu0 %v8312_v33, %s8782_s12  ;;  %v5733_v23 = vsel %vm5666_vm4, %v5604_v11, %v18741_v13  ;;  %v7015_v55 = vpop.f32.mrf.mxu1  ;;  %v7001_v33 = vadd.f32 %v16255_v62, %v16333_v39  ;;  %v5392_v39 = vsel %vm5279_vm0, %v141_v34, %v18744_v14  ;;  %v7286_v31 = vmax.f32 %v7007_v44, 0.0  ;;  %v18754_v14 = vld [vmem:[#allocation311_spill] sm:$0xff] }
 0xa54   :  { %v16528_v26 = vpop.permute.xlu2 %4097  ;;  %v7404_v45 = vadd.f32 %v7403_v7, %v7277_v3  ;;  %v8544_v3 = vld [vmem:[%s17548_s0 + $0x3fa] sm:$0xff]  ;;  %v5521_v7 = vsel %vm5408_vm1, %v5392_v39, %v18745_v40  ;;  %v7285_v59 = vmax.f32 %v7004_v18, 0.0  ;;  %v7016_v11 = vadd.f32 %v16255_v62, %v7015_v55  ;;  %v18749_v55 = vld [vmem:[#allocation63_spill] sm:$0xff] }
 0xa55   :  { %v4516_v19 = vpop.permute.xlu1 %4515  ;;  %v4046_v27 = vpop.permute.xlu0 %4045  ;;  %v7284_v22 = vmax.f32 %v7001_v33, 0.0  ;;  %v5650_v25 = vsel %vm5537_vm2, %v5521_v7, %v18746_v12  ;;  %v8315_v18 = vld [vmem:[%s17548_s0 + $0x508] sm:$0xff]  ;;  %v18756_v40 = vld [vmem:[#allocation441_spill] sm:$0xff] }
 0xa56   :  { %v6012_v38 = vsel %vm5924_vm5, %v5883_v35, %v4046_v27  ;;  %v7405_v29 = vadd.f32 %v7404_v45, %v7278_v2  ;;  %v18747_v35 = vld [vmem:[#allocation465_spill] sm:$0xff]  ;;  %v7010_v45 = vadd.f32 %v16255_v62, %v16475_v21  ;;  %v18748_v27 = vld [vmem:[#allocation586_spill] sm:$0xff] }
 0xa57   :  { %v6141_v37 = vsel %vm6053_vm7, %v6012_v38, %v16397_v43  ;;  %v6995_v43 = vadd.f32 %v16255_v62, %v16240_v10  ;;  %v18743_v10 = vld [vmem:[#allocation654_spill] sm:$0xff]  ;;  %v5779_v2 = vsel %vm5666_vm4, %v5650_v25, %v18747_v35  ;;  %v7013_v38 = vadd.f32 %v16255_v62, %v16526_v5  ;;  %v142_v25 = vld [vmem:[%s17548_s0 + $0x468] sm:$0xff] }
 0xa58   :  { %v6270_v32 = vsel %vm6182_vm6, %v6141_v37, %v16430_v53  ;;  %v7406_v63 = vadd.f32 %v7405_v29, %v7279_v8  ;;  %v18742_v53 = vld [vmem:[#allocation527_spill] sm:$0xff]  ;;  %v5908_v4 = vsel %vm5795_vm3, %v5779_v2, %v18748_v27  ;;  %v7287_v41 = vmax.f32 %v7010_v45, 0.0 }
 0xa59   :  { %v6399_v46 = vsel %vm6311_vm8, %v6270_v32, 0.0  ;;  %v5862_v54 = vsel %vm5795_vm3, %v5733_v23, %v18742_v53  ;;  %v7282_v52 = vmax.f32 %v6995_v43, 0.0  ;;  %v8569_v43 = vld [vmem:[%s17548_s0 + $0x4f2] sm:$0xff]  ;;  %v7289_v23 = vmax.f32 %v7016_v11, 0.0  ;;  %v18759_v35 = vld [vmem:[#allocation647_spill] sm:$0xff] }
 0xa5a   :  { %8665 = vmatmul.msk.f32.gmra.mxu2 %vm6448_vm9, %v6399_v46  ;;  %4571 = vrot.lane.b32.xlu2 %v8416_v36, %s8783_s22  ;;  %v7407_v57 = vadd.f32 %v7406_v63, %v7280_v60  ;;  %v5991_v15 = vsel %vm5924_vm5, %v5862_v54, %v18743_v10  ;;  %v8314_v60 = vld [vmem:[%s17548_s0 + $0x500] sm:$0xff]  ;;  %v7288_v63 = vmax.f32 %v7013_v38, 0.0  ;;  %v96_v54 = vld [vmem:[%s17548_s0 + $0x298] sm:$0xff]  ;;  %v8316_v11 = vld [vmem:[%s17548_s0 + $0x510] sm:$0xff] }
 0xa5b   :  { %4059 = vrot.lane.b32.xlu1 %v8288_v6, %s8782_s12  ;;  %5131 = vrot.lane.b32.xlu0 %v8568_v20, %s8784_s23  ;;  %v6120_v48 = vsel %vm6053_vm7, %v5991_v15, %v4516_v19  ;;  %v7018_v21 = vpop.f32.mrf.mxu1  ;;  %v8442_v20 = vld [vmem:[%s17548_s0 + $0x501] sm:$0xff]  ;;  %v5347_v34 = vsel %vm5279_vm0, %v96_v54, %v18749_v55 }
 0xa5c   :  { %v16569_v0 = vpop.permute.xlu2 %4609  ;;  %v7408_v17 = vadd.f32 %v7407_v57, %v7281_v16  ;;  %v7019_v46 = vadd.f32 %v16255_v62, %v7018_v21  ;;  %v117_v16 = vld [vmem:[%s17548_s0 + $0x370] sm:$0xff] }
 0xa5d   :  { %v5028_v58 = vpop.permute.xlu1 %5027  ;;  %v4096_v56 = vpop.permute.xlu0 %4095 }
 0xa5e   :  { %v6249_v47 = vsel %vm6182_vm6, %v6120_v48, %v5028_v58  ;;  %v7409_v42 = vadd.f32 %v7408_v17, %v7282_v52  ;;  %v6037_v8 = vsel %vm5924_vm5, %v5908_v4, %v4096_v56  ;;  %v7290_v28 = vmax.f32 %v7019_v46, 0.0  ;;  %v18750_v52 = vld [vmem:[#allocation84_spill] sm:$0xff] }
 0xa5f   :  { %v6378_v30 = vsel %vm6311_vm8, %v6249_v47, 0.0  ;;  %v5368_v33 = vsel %vm5279_vm0, %v117_v16, %v18750_v52  ;;  %v8443_v58 = vld [vmem:[%s17548_s0 + $0x509] sm:$0xff]  ;;  %v18752_v47 = vld [vmem:[#allocation205_spill] sm:$0xff] }
 0xa60   :  { %8644 = vmatmul.msk.f32.gmra.mxu1 %vm6448_vm9, %v6378_v30  ;;  %v7410_v61 = vadd.f32 %v7409_v42, %v7283_v24  ;;  %v18751_v56 = vld [vmem:[#allocation184_spill] sm:$0xff]  ;;  %v5497_v24 = vsel %vm5408_vm1, %v5368_v33, %v18752_v47  ;;  %v8570_v30 = vld [vmem:[%s17548_s0 + $0x502] sm:$0xff]  ;;  %v8445_v33 = vld [vmem:[%s17548_s0 + $0x519] sm:$0xff] }
 0xa61   :  { %v5476_v17 = vsel %vm5408_vm1, %v5347_v34, %v18751_v56  ;;  %v18753_v42 = vld [vmem:[#allocation290_spill] sm:$0xff]  ;;  %v5626_v39 = vsel %vm5537_vm2, %v5497_v24, %v18754_v14  ;;  %v18767_v34 = vld [vmem:[#allocation325_spill] sm:$0xff]  ;;  %v18770_v14 = vld [vmem:[#allocation112_spill] sm:$0xff] }
 0xa62   :  { %4621 = vrot.lane.b32.xlu2 %v8441_v1, %s8783_s22  ;;  %v7411_v19 = vadd.f32 %v7410_v61, %v7284_v22  ;;  %v5605_v1 = vsel %vm5537_vm2, %v5476_v17, %v18753_v42  ;;  %v5755_v7 = vsel %vm5666_vm4, %v5626_v39, %v18756_v40  ;;  %v18757_v22 = vld [vmem:[#allocation541_spill] sm:$0xff]  ;;  %v18758_v61 = vld [vmem:[#allocation562_spill] sm:$0xff] }
 0xa63   :  { %5083 = vrot.lane.b32.xlu1 %v8544_v3, %s8784_s23  ;;  %4109 = vrot.lane.b32.xlu0 %v8313_v50, %s8782_s12  ;;  %v18755_v3 = vld [vmem:[#allocation420_spill] sm:$0xff]  ;;  %v5884_v12 = vsel %vm5795_vm3, %v5755_v7, %v18758_v61  ;;  %v18769_v47 = vld [vmem:[#allocation561_spill] sm:$0xff]  ;;  %v18771_v7 = vld [vmem:[#allocation218_spill] sm:$0xff] }
 0xa64   :  { %v16608_v9 = vpop.permute.xlu2 %4561  ;;  %v7412_v49 = vadd.f32 %v7411_v19, %v7285_v59  ;;  %v5734_v50 = vsel %vm5666_vm4, %v5605_v1, %v18755_v3  ;;  %v6013_v59 = vsel %vm5924_vm5, %v5884_v12, %v16478_v51  ;;  %v8444_v51 = vld [vmem:[%s17548_s0 + $0x511] sm:$0xff] }
 0xa65   :  { %v5120_v29 = vpop.permute.xlu1 %5119  ;;  %v4608_v37 = vpop.permute.xlu0 %4607  ;;  %v5863_v44 = vsel %vm5795_vm3, %v5734_v50, %v18757_v22  ;;  %v8572_v17 = vld [vmem:[%s17548_s0 + $0x512] sm:$0xff] }
 0xa66   :  { %v6166_v36 = vsel %vm6053_vm7, %v6037_v8, %v4608_v37  ;;  %v7413_v32 = vadd.f32 %v7412_v49, %v7286_v31  ;;  %v5992_v2 = vsel %vm5924_vm5, %v5863_v44, %v18759_v35  ;;  %v18760_v49 = vld [vmem:[#allocation98_spill] sm:$0xff]  ;;  %v18772_v61 = vld [vmem:[#allocation348_spill] sm:$0xff] }
 0xa67   :  { %v6295_v6 = vsel %vm6182_vm6, %v6166_v36, %v5120_v29  ;;  %v5393_v29 = vsel %vm5279_vm0, %v142_v25, %v18760_v49  ;;  %v18761_v36 = vld [vmem:[#allocation228_spill] sm:$0xff] }
 0xa68   :  { %v6424_v5 = vsel %vm6311_vm8, %v6295_v6, 0.0  ;;  %v7414_v13 = vadd.f32 %v7413_v32, %v7287_v41  ;;  %v5522_v41 = vsel %vm5408_vm1, %v5393_v29, %v18761_v36  ;;  %v8571_v32 = vld [vmem:[%s17548_s0 + $0x50a] sm:$0xff]  ;;  %v18762_v6 = vld [vmem:[#allocation349_spill] sm:$0xff]  ;;  %v18776_v36 = vld [vmem:[#allocation194_spill] sm:$0xff] }
 0xa69   :  { %8690 = vmatmul.msk.f32.gmra.mxu3 %vm6448_vm9, %v6424_v5  ;;  %v118_v5 = vld [vmem:[%s17548_s0 + $0x378] sm:$0xff]  ;;  %v8446_v35 = vld [vmem:[%s17548_s0 + $0x529] sm:$0xff] }
 0xa6a   :  { %4623 = vrot.lane.b32.xlu2 %v8442_v20, %s8783_s22  ;;  %v7415_v53 = vadd.f32 %v7414_v13, %v7288_v63  ;;  %v5651_v20 = vsel %vm5537_vm2, %v5522_v41, %v18762_v6  ;;  %v18764_v63 = vld [vmem:[#allocation585_spill] sm:$0xff]  ;;  %v18775_v49 = vld [vmem:[#allocation88_spill] sm:$0xff] }
 0xa6b   :  { %4111 = vrot.lane.b32.xlu1 %v8314_v60, %s8782_s12  ;;  %5133 = vrot.lane.b32.xlu0 %v8569_v43, %s8784_s23  ;;  %v18763_v60 = vld [vmem:[#allocation455_spill] sm:$0xff]  ;;  %v18777_v6 = vld [vmem:[#allocation324_spill] sm:$0xff] }
 0xa6c   :  { %v16637_v62 = vpop.permute.xlu2 %4611  ;;  %v7416_v57 = vadd.f32 %v7415_v53, %v7289_v23  ;;  %v5780_v43 = vsel %vm5666_vm4, %v5651_v20, %v18763_v60  ;;  %v18765_v53 = vld [vmem:[#allocation74_spill] sm:$0xff]  ;;  %v8447_v60 = vld [vmem:[%s17548_s0 + $0x531] sm:$0xff] }
 0xa6d   :  { %v4560_v10 = vpop.permute.xlu1 %4559  ;;  %v4518_v15 = vpop.permute.xlu0 %4517  ;;  %v5909_v46 = vsel %vm5795_vm3, %v5780_v43, %v18764_v63  ;;  %v5369_v54 = vsel %vm5279_vm0, %v118_v5, %v18765_v53  ;;  %v18778_v43 = vld [vmem:[#allocation445_spill] sm:$0xff]  ;;  %v8319_v63 = vld [vmem:[%s17548_s0 + $0x530] sm:$0xff]  ;;  %v18779_v53 = vld [vmem:[#allocation551_spill] sm:$0xff] }
 0xa6e   :  { %v16643_v48 = vadd.f32 %v7416_v57, %v7290_v28  ;;  %v6142_v19 = vsel %vm6053_vm7, %v6013_v59, %v4560_v10  ;;  %v6121_v27 = vsel %vm6053_vm7, %v5992_v2, %v4518_v15  ;;  %v6038_v13 = vsel %vm5924_vm5, %v5909_v46, %v16528_v26  ;;  %v18766_v10 = vld [vmem:[#allocation204_spill] sm:$0xff]  ;;  %v18773_v2 = vld [vmem:[#allocation469_spill] sm:$0xff] }
 0xa6f   :  { %v6167_v16 = vsel %vm6053_vm7, %v6038_v13, %v16569_v0  ;;  %v5498_v15 = vsel %vm5408_vm1, %v5369_v54, %v18766_v10  ;;  %v8317_v0 = vld [vmem:[%s17548_s0 + $0x518] sm:$0xff]  ;;  %v8574_v46 = vld [vmem:[%s17548_s0 + $0x52a] sm:$0xff] }
 0xa70   :  { %v5627_v52 = vsel %vm5537_vm2, %v5498_v15, %v18767_v34  ;;  %v7511_v13 = vld [vmem:[%s17551_s3 + $0x78] sm:$0xff]  ;;  %v18780_v10 = vld [vmem:[#allocation111_spill] sm:$0xff] }
 0xa71   :  { %7513 = vmatpush.msrb.mxu1 %v7511_v13 }
 0xa72   :  { %4625 = vrot.lane.b32.xlu2 %v8443_v58, %s8783_s22  ;;  %v18768_v58 = vld [vmem:[#allocation431_spill] sm:$0xff] }
 0xa73   :  { %4113 = vrot.lane.b32.xlu1 %v8315_v18, %s8782_s12  ;;  %5135 = vrot.lane.b32.xlu0 %v8570_v30, %s8784_s23  ;;  %v5756_v56 = vsel %vm5666_vm4, %v5627_v52, %v18768_v58  ;;  %v143_v18 = vld [vmem:[%s17548_s0 + $0x470] sm:$0xff]  ;;  %v16746_v30 = vpop.f32.mrf.mxu2 }
 0xa74   :  { %v16680_v45 = vpop.permute.xlu2 %4563  ;;  %v5885_v24 = vsel %vm5795_vm3, %v5756_v56, %v18769_v47  ;;  %v5394_v39 = vsel %vm5279_vm0, %v143_v18, %v18770_v14  ;;  %v18782_v56 = vld [vmem:[#allocation338_spill] sm:$0xff] }
 0xa75   :  { %v5072_v4 = vpop.permute.xlu1 %5071  ;;  %v5030_v31 = vpop.permute.xlu0 %5029  ;;  %v5523_v22 = vsel %vm5408_vm1, %v5394_v39, %v18771_v7  ;;  %v8448_v47 = vld [vmem:[%s17548_s0 + $0x539] sm:$0xff]  ;;  %v18785_v7 = vld [vmem:[#allocation87_spill] sm:$0xff] }
 0xa76   :  { %v6271_v38 = vsel %vm6182_vm6, %v6142_v19, %v5072_v4  ;;  %v6250_v8 = vsel %vm6182_vm6, %v6121_v27, %v5030_v31  ;;  %v5652_v12 = vsel %vm5537_vm2, %v5523_v22, %v18772_v61  ;;  %v8573_v19 = vld [vmem:[%s17548_s0 + $0x51a] sm:$0xff]  ;;  %v18774_v27 = vld [vmem:[#allocation575_spill] sm:$0xff] }
 0xa77   :  { %v6379_v37 = vsel %vm6311_vm8, %v6250_v8, 0.0  ;;  %v6400_v21 = vsel %vm6311_vm8, %v6271_v38, 0.0  ;;  %v5781_v59 = vsel %vm5666_vm4, %v5652_v12, %v18773_v2  ;;  %v119_v31 = vld [vmem:[%s17548_s0 + $0x380] sm:$0xff]  ;;  %v18784_v39 = vld [vmem:[#allocation589_spill] sm:$0xff] }
 0xa78   :  { %8645 = vmatmul.msk.f32.gmra.mxu1 %vm6448_vm9, %v6379_v37  ;;  %8666 = vmatmul.msk.f32.gmra.mxu2 %vm6448_vm9, %v6400_v21  ;;  %v5910_v4 = vsel %vm5795_vm3, %v5781_v59, %v18774_v27  ;;  %v5370_v29 = vsel %vm5279_vm0, %v119_v31, %v18775_v49  ;;  %v18787_v59 = vld [vmem:[#allocation314_spill] sm:$0xff]  ;;  %v18788_v31 = vld [vmem:[#allocation444_spill] sm:$0xff] }
 0xa79   :  { %v5499_v41 = vsel %vm5408_vm1, %v5370_v29, %v18776_v36  ;;  %v8321_v49 = vld [vmem:[%s17548_s0 + $0x540] sm:$0xff] }
 0xa7a   :  { %4627 = vrot.lane.b32.xlu2 %v8444_v51, %s8783_s22  ;;  %v5628_v20 = vsel %vm5537_vm2, %v5499_v41, %v18777_v6  ;;  %v8576_v29 = vld [vmem:[%s17548_s0 + $0x53a] sm:$0xff]  ;;  %v7510_v6 = vld [vmem:[%s17551_s3 + $0x70] sm:$0xff] }
 0xa7b   :  { %4115 = vrot.lane.b32.xlu1 %v8316_v11, %s8782_s12  ;;  %5137 = vrot.lane.b32.xlu0 %v8571_v32, %s8784_s23  ;;  %v16781_v38 = vpop.f32.mrf.mxu2 }
 0xa7c   :  { %v16717_v23 = vpop.permute.xlu2 %4613  ;;  %7514 = vmatpush.msrb.mxu1 %v7510_v6 }
 0xa7d   :  { %v4050_v28 = vpop.permute.xlu1 %4049  ;;  %v5122_v57 = vpop.permute.xlu0 %5121 }
 0xa7e   :  { %v6296_v55 = vsel %vm6182_vm6, %v6167_v16, %v5122_v57  ;;  %v6014_v42 = vsel %vm5924_vm5, %v5885_v24, %v4050_v28  ;;  %v144_v16 = vld [vmem:[%s17548_s0 + $0x478] sm:$0xff]  ;;  %v18783_v24 = vld [vmem:[#allocation468_spill] sm:$0xff] }
 0xa7f   :  { %v6425_v26 = vsel %vm6311_vm8, %v6296_v55, 0.0  ;;  %v6143_v3 = vsel %vm6053_vm7, %v6014_v42, %v16608_v9  ;;  %v8318_v9 = vld [vmem:[%s17548_s0 + $0x528] sm:$0xff]  ;;  %v5395_v15 = vsel %vm5279_vm0, %v144_v16, %v18780_v10  ;;  %v8575_v42 = vld [vmem:[%s17548_s0 + $0x532] sm:$0xff]  ;;  %v18793_v10 = vld [vmem:[#allocation458_spill] sm:$0xff] }
 0xa80   :  { %8691 = vmatmul.msk.f32.gmra.mxu3 %vm6448_vm9, %v6425_v26  ;;  %v18781_v26 = vld [vmem:[#allocation232_spill] sm:$0xff] }
 0xa82   :  { %4629 = vrot.lane.b32.xlu2 %v8445_v33, %s8783_s22  ;;  %v5524_v33 = vsel %vm5408_vm1, %v5395_v15, %v18781_v26  ;;  %v121_v26 = vld [vmem:[%s17548_s0 + $0x398] sm:$0xff] }
 0xa83   :  { %4117 = vrot.lane.b32.xlu1 %v8317_v0, %s8782_s12  ;;  %5139 = vrot.lane.b32.xlu0 %v8572_v17, %s8784_s23  ;;  %v16823_v57 = vpop.f32.mrf.mxu2  ;;  %v5653_v0 = vsel %vm5537_vm2, %v5524_v33, %v18782_v56 }
 0xa84   :  { %v16752_v1 = vpop.permute.xlu2 %4565  ;;  %v5782_v18 = vsel %vm5666_vm4, %v5653_v0, %v18783_v24  ;;  %v18795_v0 = vld [vmem:[#allocation77_spill] sm:$0xff] }
 0xa85   :  { %v5074_v50 = vpop.permute.xlu1 %5073  ;;  %v4100_v40 = vpop.permute.xlu0 %4099 }
 0xa86   :  { %v6272_v44 = vsel %vm6182_vm6, %v6143_v3, %v5074_v50  ;;  %v6039_v8 = vsel %vm5924_vm5, %v5910_v4, %v4100_v40  ;;  %v5911_v3 = vsel %vm5795_vm3, %v5782_v18, %v18784_v39  ;;  %v120_v50 = vld [vmem:[%s17548_s0 + $0x388] sm:$0xff] }
 0xa87   :  { %v6401_v25 = vsel %vm6311_vm8, %v6272_v44, 0.0  ;;  %v6168_v37 = vsel %vm6053_vm7, %v6039_v8, %v16637_v62  ;;  %v5757_v62 = vsel %vm5666_vm4, %v5628_v20, %v18778_v43  ;;  %v5371_v22 = vsel %vm5279_vm0, %v120_v50, %v18785_v7  ;;  %v8449_v4 = vld [vmem:[%s17548_s0 + $0x541] sm:$0xff]  ;;  %v16875_v8 = vpop.f32.mrf.mxu1  ;;  %v18790_v20 = vld [vmem:[#allocation101_spill] sm:$0xff] }
 0xa88   :  { %8667 = vmatmul.msk.f32.gmra.mxu2 %vm6448_vm9, %v6401_v25  ;;  %v5886_v54 = vsel %vm5795_vm3, %v5757_v62, %v18779_v53  ;;  %v18786_v25 = vld [vmem:[#allocation208_spill] sm:$0xff] }
 0xa89   :  { %v18792_v53 = vld [vmem:[#allocation352_spill] sm:$0xff] }
 0xa8a   :  { %4631 = vrot.lane.b32.xlu2 %v8446_v35, %s8783_s22  ;;  %v5500_v35 = vsel %vm5408_vm1, %v5371_v22, %v18786_v25  ;;  %v18798_v22 = vld [vmem:[#allocation434_spill] sm:$0xff]  ;;  %v146_v25 = vld [vmem:[%s17548_s0 + $0x490] sm:$0xff] }
 0xa8b   :  { %4119 = vrot.lane.b32.xlu1 %v8318_v9, %s8782_s12  ;;  %5141 = vrot.lane.b32.xlu0 %v8573_v19, %s8784_s23  ;;  %v5629_v9 = vsel %vm5537_vm2, %v5500_v35, %v18787_v59  ;;  %v16867_v19 = vpop.f32.mrf.mxu2 }
 0xa8c   :  { %v16794_v32 = vpop.permute.xlu2 %4615 }
 0xa8d   :  { %v4052_v21 = vpop.permute.xlu1 %4051  ;;  %v5124_v51 = vpop.permute.xlu0 %5123 }
 0xa8e   :  { %v6297_v11 = vsel %vm6182_vm6, %v6168_v37, %v5124_v51  ;;  %v6015_v28 = vsel %vm5924_vm5, %v5886_v54, %v4052_v21  ;;  %v18789_v37 = vld [vmem:[#allocation565_spill] sm:$0xff]  ;;  %v145_v51 = vld [vmem:[%s17548_s0 + $0x488] sm:$0xff] }
 0xa8f   :  { %v6426_v5 = vsel %vm6311_vm8, %v6297_v11, 0.0  ;;  %v6144_v55 = vsel %vm6053_vm7, %v6015_v28, %v16680_v45  ;;  %v8320_v45 = vld [vmem:[%s17548_s0 + $0x538] sm:$0xff]  ;;  %v16893_v11 = vpop.f32.mrf.mxu3 }
 0xa90   :  { %8692 = vmatmul.msk.f32.gmra.mxu3 %vm6448_vm9, %v6426_v5  ;;  %v5396_v5 = vsel %vm5279_vm0, %v145_v51, %v18790_v20  ;;  %v18802_v51 = vld [vmem:[#allocation351_spill] sm:$0xff] }
 0xa92   :  { %4633 = vrot.lane.b32.xlu2 %v8447_v60, %s8783_s22 }
 0xa93   :  { %4121 = vrot.lane.b32.xlu1 %v8319_v63, %s8782_s12  ;;  %5143 = vrot.lane.b32.xlu0 %v8574_v46, %s8784_s23  ;;  %v18791_v63 = vld [vmem:[#allocation231_spill] sm:$0xff]  ;;  %v16909_v16 = vpop.f32.mrf.mxu2 }
 0xa94   :  { %v16847_v14 = vpop.permute.xlu2 %4567  ;;  %v5525_v46 = vsel %vm5408_vm1, %v5396_v5, %v18791_v63  ;;  %v18803_v5 = vld [vmem:[#allocation471_spill] sm:$0xff] }
 0xa95   :  { %v5076_v34 = vpop.permute.xlu1 %5075  ;;  %v4102_v52 = vpop.permute.xlu0 %4101  ;;  %v5654_v54 = vsel %vm5537_vm2, %v5525_v46, %v18792_v53  ;;  %v18805_v53 = vld [vmem:[#allocation91_spill] sm:$0xff] }
 0xa96   :  { %v6273_v58 = vsel %vm6182_vm6, %v6144_v55, %v5076_v34  ;;  %v6040_v40 = vsel %vm5924_vm5, %v5911_v3, %v4102_v52  ;;  %v5783_v15 = vsel %vm5666_vm4, %v5654_v54, %v18793_v10  ;;  %v16914_v55 = vpop.f32.mrf.mxu1  ;;  %v18794_v34 = vld [vmem:[#allocation588_spill] sm:$0xff] }
 0xa97   :  { %v6402_v17 = vsel %vm6311_vm8, %v6273_v58, 0.0  ;;  %v6169_v44 = vsel %vm6053_vm7, %v6040_v40, %v16717_v23  ;;  %v5758_v23 = vsel %vm5666_vm4, %v5629_v9, %v18788_v31  ;;  %v5912_v52 = vsel %vm5795_vm3, %v5783_v15, %v18794_v34  ;;  %v16926_v58 = vpop.f32.mrf.mxu3  ;;  %v18797_v3 = vld [vmem:[#allocation328_spill] sm:$0xff]  ;;  %v18800_v9 = vld [vmem:[#allocation114_spill] sm:$0xff] }
 0xa98   :  { %8668 = vmatmul.msk.f32.gmra.mxu2 %vm6448_vm9, %v6402_v17  ;;  %v5887_v21 = vsel %vm5795_vm3, %v5758_v23, %v18789_v37  ;;  %v5372_v17 = vsel %vm5279_vm0, %v121_v26, %v18795_v0  ;;  %v18807_v26 = vld [vmem:[#allocation327_spill] sm:$0xff] }
 0xa9a   :  { %4635 = vrot.lane.b32.xlu2 %v8448_v47, %s8783_s22 }
 0xa9b   :  { %4123 = vrot.lane.b32.xlu1 %v8320_v45, %s8782_s12  ;;  %5145 = vrot.lane.b32.xlu0 %v8575_v42, %s8784_s23  ;;  %v18796_v45 = vld [vmem:[#allocation207_spill] sm:$0xff]  ;;  %v16938_v40 = vpop.f32.mrf.mxu2 }
 0xa9c   :  { %v16890_v41 = vpop.permute.xlu2 %4617  ;;  %v5501_v42 = vsel %vm5408_vm1, %v5372_v17, %v18796_v45 }
 0xa9d   :  { %v4054_v61 = vpop.permute.xlu1 %4053  ;;  %v5126_v12 = vpop.permute.xlu0 %5125  ;;  %v5630_v50 = vsel %vm5537_vm2, %v5501_v42, %v18797_v3  ;;  %v147_v42 = vld [vmem:[%s17548_s0 + $0x498] sm:$0xff] }
 0xa9e   :  { %v6298_v2 = vsel %vm6182_vm6, %v6169_v44, %v5126_v12  ;;  %v6016_v36 = vsel %vm5924_vm5, %v5887_v21, %v4054_v61  ;;  %v5759_v44 = vsel %vm5666_vm4, %v5630_v50, %v18798_v22  ;;  %v18799_v61 = vld [vmem:[#allocation564_spill] sm:$0xff]  ;;  %v16952_v35 = vpop.f32.mrf.mxu1  ;;  %v18810_v22 = vld [vmem:[#allocation113_spill] sm:$0xff] }
 0xa9f   :  { %v6427_v27 = vsel %vm6311_vm8, %v6298_v2, 0.0  ;;  %v6145_v60 = vsel %vm6053_vm7, %v6016_v36, %v16752_v1  ;;  %v8577_v1 = vld [vmem:[%s17548_s0 + $0x542] sm:$0xff]  ;;  %v5888_v12 = vsel %vm5795_vm3, %v5759_v44, %v18799_v61  ;;  %v16955_v59 = vpop.f32.mrf.mxu3  ;;  %v5398_v44 = vsel %vm5279_vm0, %v147_v42, %v18810_v22 }
 0xaa0   :  { %8693 = vmatmul.msk.f32.gmra.mxu3 %vm6448_vm9, %v6427_v27  ;;  %v5397_v27 = vsel %vm5279_vm0, %v146_v25, %v18800_v9  ;;  %v18811_v25 = vld [vmem:[#allocation234_spill] sm:$0xff] }
 0xaa2   :  { %4637 = vrot.lane.b32.xlu2 %v8449_v4, %s8783_s22 }
 0xaa3   :  { %4125 = vrot.lane.b32.xlu1 %v8321_v49, %s8782_s12  ;;  %5147 = vrot.lane.b32.xlu0 %v8576_v29, %s8784_s23  ;;  %v18801_v49 = vld [vmem:[#allocation221_spill] sm:$0xff]  ;;  %v16966_v6 = vpop.f32.mrf.mxu2 }
 0xaa4   :  { %v4570_v56 = vpop.permute.xlu2 %4569  ;;  %v5526_v29 = vsel %vm5408_vm1, %v5397_v27, %v18801_v49  ;;  %v18812_v27 = vld [vmem:[#allocation341_spill] sm:$0xff] }
 0xaa5   :  { %v5078_v43 = vpop.permute.xlu1 %5077  ;;  %v4104_v62 = vpop.permute.xlu0 %4103  ;;  %v5655_v36 = vsel %vm5537_vm2, %v5526_v29, %v18802_v51  ;;  %v18814_v29 = vld [vmem:[#allocation591_spill] sm:$0xff] }
 0xaa6   :  { %v6274_v13 = vsel %vm6182_vm6, %v6145_v60, %v5078_v43  ;;  %v6041_v33 = vsel %vm5924_vm5, %v5912_v52, %v4104_v62  ;;  %v5784_v60 = vsel %vm5666_vm4, %v5655_v36, %v18803_v5  ;;  %v122_v62 = vld [vmem:[%s17548_s0 + $0x3a0] sm:$0xff]  ;;  %v16977_v63 = vpop.f32.mrf.mxu1  ;;  %v123_v51 = vld [vmem:[%s17548_s0 + $0x3a8] sm:$0xff] }
 0xaa7   :  { %v6403_v28 = vsel %vm6311_vm8, %v6274_v13, 0.0  ;;  %v6170_v47 = vsel %vm6053_vm7, %v6041_v33, %v16794_v32  ;;  %v7509_v32 = vld [vmem:[%s17551_s3 + $0x68] sm:$0xff]  ;;  %v16980_v13 = vpop.f32.mrf.mxu3  ;;  %v5373_v54 = vsel %vm5279_vm0, %v122_v62, %v18805_v53 }
 0xaa8   :  { %8669 = vmatmul.msk.f32.gmra.mxu2 %vm6448_vm9, %v6403_v28  ;;  %7515 = vmatpush.msrb.mxu1 %v7509_v32 }
 0xaab   :  { %5149 = vrot.lane.b32.xlu0 %v8577_v1, %s8784_s23  ;;  %v18806_v1 = vld [vmem:[#allocation197_spill] sm:$0xff]  ;;  %v16991_v0 = vpop.f32.mrf.mxu2 }
 0xaac   :  { %v4620_v21 = vpop.permute.xlu2 %4619  ;;  %v5502_v34 = vsel %vm5408_vm1, %v5373_v54, %v18806_v1  ;;  %v18816_v54 = vld [vmem:[#allocation211_spill] sm:$0xff] }
 0xaad   :  { %v4056_v24 = vpop.permute.xlu1 %4055  ;;  %v5128_v18 = vpop.permute.xlu0 %5127  ;;  %v5631_v33 = vsel %vm5537_vm2, %v5502_v34, %v18807_v26 }
 0xaae   :  { %v6299_v39 = vsel %vm6182_vm6, %v6170_v47, %v5128_v18  ;;  %v6017_v2 = vsel %vm5924_vm5, %v5888_v12, %v4056_v24  ;;  %v18808_v47 = vld [vmem:[#allocation448_spill] sm:$0xff]  ;;  %v18809_v18 = vld [vmem:[#allocation554_spill] sm:$0xff] }
 0xaaf   :  { %v6428_v7 = vsel %vm6311_vm8, %v6299_v39, 0.0  ;;  %v6146_v4 = vsel %vm6053_vm7, %v6017_v2, %v16847_v14  ;;  %v18804_v14 = vld [vmem:[#allocation578_spill] sm:$0xff]  ;;  %v5760_v24 = vsel %vm5666_vm4, %v5631_v33, %v18808_v47  ;;  %v17002_v39 = vpop.f32.mrf.mxu1  ;;  %v17005_v50 = vpop.f32.mrf.mxu3  ;;  %v5527_v2 = vsel %vm5408_vm1, %v5398_v44, %v18811_v25  ;;  %v18819_v33 = vld [vmem:[#allocation568_spill] sm:$0xff] }
 0xab0   :  { %8694 = vmatmul.msk.f32.gmra.mxu3 %vm6448_vm9, %v6428_v7  ;;  %v5913_v43 = vsel %vm5795_vm3, %v5784_v60, %v18804_v14  ;;  %v5889_v45 = vsel %vm5795_vm3, %v5760_v24, %v18809_v18  ;;  %v7508_v7 = vld [vmem:[%s17551_s3 + $0x60] sm:$0xff] }
 0xab1   :  { %7516 = vmatpush.msrb.mxu1 %v7508_v7  ;;  %v18815_v14 = vld [vmem:[#allocation90_spill] sm:$0xff]  ;;  %v18820_v7 = vld [vmem:[#allocation104_spill] sm:$0xff] }
 0xab2   :  { %v148_v24 = vld [vmem:[%s17548_s0 + $0x4a0] sm:$0xff] }
 0xab3   :  { %v5399_v22 = vsel %vm5279_vm0, %v148_v24, %v18820_v7  ;;  %v18828_v24 = vld [vmem:[#allocation473_spill] sm:$0xff] }
 0xab4   :  { %v18829_v7 = vld [vmem:[#allocation581_spill] sm:$0xff] }
 0xab5   :  { %v5080_v31 = vpop.permute.xlu1 %5079  ;;  %v4106_v23 = vpop.permute.xlu0 %4105 }
 0xab6   :  { %v6275_v37 = vsel %vm6182_vm6, %v6146_v4, %v5080_v31  ;;  %v6042_v46 = vsel %vm5924_vm5, %v5913_v43, %v4106_v23  ;;  %v5656_v4 = vsel %vm5537_vm2, %v5527_v2, %v18812_v27  ;;  %v18813_v23 = vld [vmem:[#allocation470_spill] sm:$0xff]  ;;  %v5374_v43 = vsel %vm5279_vm0, %v123_v51, %v18815_v14 }
 0xab7   :  { %v6404_v20 = vsel %vm6311_vm8, %v6275_v37, 0.0  ;;  %v6171_v28 = vsel %vm6053_vm7, %v6042_v46, %v16890_v41  ;;  %v4572_v41 = vpop.permute.xlu2 %4571  ;;  %v5785_v49 = vsel %vm5666_vm4, %v5656_v4, %v18813_v23  ;;  %v17024_v37 = vpop.f32.mrf.mxu2  ;;  %v17086_v14 = vld [vmem:[%s17550_s2] ss:$0 sm:$0xff] }
 0xab8   :  { %8670 = vmatmul.msk.f32.gmra.mxu2 %vm6448_vm9, %v6404_v20  ;;  %v17030_v5 = vpop.f32.mrf.mxu3  ;;  %v17032_v60 = vpop.f32.mrf.mxu1 }
 0xabd   :  { %v4058_v10 = vpop.permute.xlu1 %4057  ;;  %v5130_v15 = vpop.permute.xlu0 %5129 }
 0xabe   :  { %v6300_v52 = vsel %vm6182_vm6, %v6171_v28, %v5130_v15  ;;  %v6018_v3 = vsel %vm5924_vm5, %v5889_v45, %v4058_v10  ;;  %v5503_v28 = vsel %vm5408_vm1, %v5374_v43, %v18816_v54  ;;  %v18817_v15 = vld [vmem:[#allocation317_spill] sm:$0xff]  ;;  %v7022_v43 = vadd.f32 %v17086_v14, %v16875_v8 }
 0xabf   :  { %v6429_v17 = vsel %vm6311_vm8, %v6300_v52, 0.0  ;;  %v6147_v32 = vsel %vm6053_vm7, %v6018_v3, %v4570_v56  ;;  %v5914_v56 = vsel %vm5795_vm3, %v5785_v49, %v18814_v29  ;;  %v4622_v20 = vpop.permute.xlu2 %4621  ;;  %v5632_v1 = vsel %vm5537_vm2, %v5503_v28, %v18817_v15  ;;  %v18818_v52 = vld [vmem:[#allocation447_spill] sm:$0xff]  ;;  %v17051_v47 = vpop.f32.mrf.mxu2  ;;  %v18824_v49 = vld [vmem:[#allocation590_spill] sm:$0xff]  ;;  %v18826_v15 = vld [vmem:[#allocation224_spill] sm:$0xff] }
 0xac0   :  { %8695 = vmatmul.msk.f32.gmra.mxu3 %vm6448_vm9, %v6429_v17  ;;  %v5761_v26 = vsel %vm5666_vm4, %v5632_v1, %v18818_v52  ;;  %v17057_v45 = vpop.f32.mrf.mxu3  ;;  %v17059_v42 = vpop.f32.mrf.mxu1  ;;  %v7025_v8 = vadd.f32 %v17086_v14, %v16914_v55 }
 0xac1   :  { %v5890_v17 = vsel %vm5795_vm3, %v5761_v26, %v18819_v33  ;;  %v18827_v26 = vld [vmem:[#allocation353_spill] sm:$0xff]  ;;  %v7291_v33 = vmax.f32 %v7022_v43, 0.0 }
 0xac5   :  { %v5082_v61 = vpop.permute.xlu1 %5081  ;;  %v4108_v12 = vpop.permute.xlu0 %4107 }
 0xac6   :  { %v6276_v9 = vsel %vm6182_vm6, %v6147_v32, %v5082_v61  ;;  %v6043_v36 = vsel %vm5924_vm5, %v5914_v56, %v4108_v12  ;;  %v18821_v12 = vld [vmem:[#allocation233_spill] sm:$0xff]  ;;  %v149_v56 = vld [vmem:[%s17548_s0 + $0x4b0] sm:$0xff] }
 0xac7   :  { %v6405_v31 = vsel %vm6311_vm8, %v6276_v9, 0.0  ;;  %v6172_v62 = vsel %vm6053_vm7, %v6043_v36, %v4620_v21  ;;  %v7507_v21 = vld [vmem:[%s17551_s3 + $0x58] sm:$0xff]  ;;  %v4624_v3 = vpop.permute.xlu2 %4623  ;;  %v5528_v25 = vsel %vm5408_vm1, %v5399_v22, %v18821_v12  ;;  %v18822_v9 = vld [vmem:[#allocation354_spill] sm:$0xff]  ;;  %v17075_v29 = vpop.f32.mrf.mxu2  ;;  %v7292_v12 = vmax.f32 %v7025_v8, 0.0 }
 0xac8   :  { %8671 = vmatmul.msk.f32.gmra.mxu2 %vm6448_vm9, %v6405_v31  ;;  %7517 = vmatpush.msrb.mxu1 %v7507_v21  ;;  %v5657_v27 = vsel %vm5537_vm2, %v5528_v25, %v18822_v9  ;;  %v18823_v31 = vld [vmem:[#allocation461_spill] sm:$0xff]  ;;  %v17081_v36 = vpop.f32.mrf.mxu3  ;;  %v7028_v25 = vadd.f32 %v17086_v14, %v16952_v35  ;;  %v7031_v35 = vadd.f32 %v17086_v14, %v16977_v63 }
 0xac9   :  { %v5786_v23 = vsel %vm5666_vm4, %v5657_v27, %v18823_v31  ;;  %v18831_v27 = vld [vmem:[#allocation236_spill] sm:$0xff]  ;;  %v7037_v63 = vadd.f32 %v17086_v14, %v17032_v60 }
 0xacd   :  { %v4060_v46 = vpop.permute.xlu1 %4059  ;;  %v5132_v53 = vpop.permute.xlu0 %5131 }
 0xace   :  { %v6301_v10 = vsel %vm6182_vm6, %v6172_v62, %v5132_v53  ;;  %v6019_v18 = vsel %vm5924_vm5, %v5890_v17, %v4060_v46  ;;  %v7042_v62 = vpop.f32.mrf.mxu1  ;;  %v18825_v46 = vld [vmem:[#allocation116_spill] sm:$0xff] }
 0xacf   :  { %v6430_v34 = vsel %vm6311_vm8, %v6301_v10, 0.0  ;;  %v6148_v44 = vsel %vm6053_vm7, %v6019_v18, %v4572_v41  ;;  %v5915_v41 = vsel %vm5795_vm3, %v5786_v23, %v18824_v49  ;;  %v5400_v53 = vsel %vm5279_vm0, %v149_v56, %v18825_v46  ;;  %v4626_v52 = vpop.permute.xlu2 %4625  ;;  %v150_v18 = vld [vmem:[%s17548_s0 + $0x4b8] sm:$0xff] }
 0xad0   :  { %8696 = vmatmul.msk.f32.gmra.mxu3 %vm6448_vm9, %v6430_v34  ;;  %v5529_v1 = vsel %vm5408_vm1, %v5400_v53, %v18826_v15  ;;  %v17113_v55 = vpop.f32.mrf.mxu3  ;;  %v7293_v46 = vmax.f32 %v7028_v25, 0.0  ;;  %v7034_v53 = vadd.f32 %v17086_v14, %v17002_v39  ;;  %v7043_v60 = vadd.f32 %v17086_v14, %v7042_v62  ;;  %v152_v62 = vld [vmem:[%s17548_s0 + $0x4c8] sm:$0xff] }
 0xad1   :  { %v5658_v21 = vsel %vm5537_vm2, %v5529_v1, %v18827_v26  ;;  %v18834_v1 = vld [vmem:[#allocation593_spill] sm:$0xff] }
 0xad5   :  { %v5084_v32 = vpop.permute.xlu1 %5083  ;;  %v4110_v61 = vpop.permute.xlu0 %4109 }
 0xad6   :  { %v6277_v2 = vsel %vm6182_vm6, %v6148_v44, %v5084_v32  ;;  %v6044_v51 = vsel %vm5924_vm5, %v5915_v41, %v4110_v61  ;;  %v7418_v44 = vadd.f32 %v16643_v48, %v7291_v33  ;;  %v17111_v61 = vpop.f32.mrf.mxu2  ;;  %v18832_v41 = vld [vmem:[#allocation344_spill] sm:$0xff] }
 0xad7   :  { %v6406_v4 = vsel %vm6311_vm8, %v6277_v2, 0.0  ;;  %v6173_v54 = vsel %vm6053_vm7, %v6044_v51, %v4622_v20  ;;  %v5787_v20 = vsel %vm5666_vm4, %v5658_v21, %v18828_v24  ;;  %v18830_v2 = vld [vmem:[#allocation115_spill] sm:$0xff]  ;;  %v7045_v51 = vpop.f32.mrf.mxu1  ;;  %v4628_v15 = vpop.permute.xlu2 %4627  ;;  %v7294_v24 = vmax.f32 %v7031_v35, 0.0 }
 0xad8   :  { %8672 = vmatmul.msk.f32.gmra.mxu2 %vm6448_vm9, %v6406_v4  ;;  %v5916_v22 = vsel %vm5795_vm3, %v5787_v20, %v18829_v7  ;;  %v5401_v9 = vsel %vm5279_vm0, %v150_v18, %v18830_v2  ;;  %v7419_v31 = vadd.f32 %v7418_v44, %v7292_v12  ;;  %v18835_v21 = vld [vmem:[#allocation107_spill] sm:$0xff]  ;;  %v17143_v8 = vpop.f32.mrf.mxu3  ;;  %v7295_v20 = vmax.f32 %v7034_v53, 0.0 }
 0xad9   :  { %v5530_v4 = vsel %vm5408_vm1, %v5401_v9, %v18831_v27  ;;  %v7040_v18 = vadd.f32 %v17086_v14, %v17059_v42  ;;  %v18836_v7 = vld [vmem:[#allocation235_spill] sm:$0xff]  ;;  %v18837_v9 = vld [vmem:[#allocation356_spill] sm:$0xff]  ;;  %v7046_v42 = vadd.f32 %v17086_v14, %v7045_v51  ;;  %v7298_v35 = vmax.f32 %v7043_v60, 0.0 }
 0xada   :  { %v5659_v56 = vsel %vm5537_vm2, %v5530_v4, %v18832_v41  ;;  %v7420_v26 = vadd.f32 %v7419_v31, %v7293_v46  ;;  %v18838_v41 = vld [vmem:[#allocation464_spill] sm:$0xff]  ;;  %v7055_v60 = vadd.f32 %v17086_v14, %v16746_v30  ;;  %v7058_v30 = vadd.f32 %v17086_v14, %v16781_v38 }
 0xadc   :  { %v7421_v44 = vadd.f32 %v7420_v26, %v7294_v24 }
 0xadd   :  { %v4112_v28 = vpop.permute.xlu1 %4111  ;;  %v5134_v10 = vpop.permute.xlu0 %5133 }
 0xade   :  { %v6302_v34 = vsel %vm6182_vm6, %v6173_v54, %v5134_v10  ;;  %v6045_v32 = vsel %vm5924_vm5, %v5916_v22, %v4112_v28  ;;  %v18833_v28 = vld [vmem:[#allocation472_spill] sm:$0xff] }
 0xadf   :  { %v6431_v17 = vsel %vm6311_vm8, %v6302_v34, 0.0  ;;  %v6174_v23 = vsel %vm6053_vm7, %v6045_v32, %v4624_v3  ;;  %v151_v3 = vld [vmem:[%s17548_s0 + $0x4c0] sm:$0xff]  ;;  %v5788_v10 = vsel %vm5666_vm4, %v5659_v56, %v18833_v28  ;;  %v7296_v32 = vmax.f32 %v7037_v63, 0.0  ;;  %v7048_v4 = vpop.f32.mrf.mxu1  ;;  %v18841_v63 = vld [vmem:[#allocation227_spill] sm:$0xff] }
 0xae0   :  { %8697 = vmatmul.msk.f32.gmra.mxu3 %vm6448_vm9, %v6431_v17  ;;  %v5917_v34 = vsel %vm5795_vm3, %v5788_v10, %v18834_v1  ;;  %v5402_v33 = vsel %vm5279_vm0, %v151_v3, %v18835_v21  ;;  %v17145_v17 = vpop.f32.mrf.mxu2  ;;  %v7049_v53 = vadd.f32 %v17086_v14, %v7048_v4  ;;  %v17168_v3 = vpop.f32.mrf.mxu3  ;;  %v7299_v1 = vmax.f32 %v7046_v42, 0.0  ;;  %v18844_v4 = vld [vmem:[#allocation584_spill] sm:$0xff] }
 0xae1   :  { %v5531_v22 = vsel %vm5408_vm1, %v5402_v33, %v18836_v7  ;;  %v18842_v7 = vld [vmem:[#allocation355_spill] sm:$0xff] }
 0xae2   :  { %v5660_v27 = vsel %vm5537_vm2, %v5531_v22, %v18837_v9  ;;  %v7300_v33 = vmax.f32 %v7049_v53, 0.0  ;;  %v18843_v9 = vld [vmem:[#allocation475_spill] sm:$0xff] }
 0xae3   :  { %v5789_v56 = vsel %vm5666_vm4, %v5660_v27, %v18838_v41 }
 0xae5   :  { %v4114_v48 = vpop.permute.xlu1 %4113  ;;  %v5136_v49 = vpop.permute.xlu0 %5135 }
 0xae6   :  { %v6303_v43 = vsel %vm6182_vm6, %v6174_v23, %v5136_v49  ;;  %v6046_v39 = vsel %vm5924_vm5, %v5917_v34, %v4114_v48  ;;  %v7422_v23 = vadd.f32 %v7421_v44, %v7295_v20  ;;  %v7297_v48 = vmax.f32 %v7040_v18, 0.0  ;;  %v18840_v34 = vld [vmem:[#allocation118_spill] sm:$0xff] }
 0xae7   :  { %v6432_v54 = vsel %vm6311_vm8, %v6303_v43, 0.0  ;;  %v6175_v12 = vsel %vm6053_vm7, %v6046_v39, %v4626_v52  ;;  %v18839_v52 = vld [vmem:[#allocation592_spill] sm:$0xff]  ;;  %v5403_v26 = vsel %vm5279_vm0, %v152_v62, %v18840_v34  ;;  %v7061_v62 = vadd.f32 %v17086_v14, %v16823_v57 }
 0xae8   :  { %8698 = vmatmul.msk.f32.gmra.mxu3 %vm6448_vm9, %v6432_v54  ;;  %v5918_v43 = vsel %vm5795_vm3, %v5789_v56, %v18839_v52  ;;  %v7423_v46 = vadd.f32 %v7422_v23, %v7296_v32  ;;  %v4630_v54 = vpop.permute.xlu2 %4629  ;;  %v17170_v28 = vpop.f32.mrf.mxu2  ;;  %v5532_v39 = vsel %vm5408_vm1, %v5403_v26, %v18841_v63  ;;  %v7302_v56 = vmax.f32 %v7055_v60, 0.0 }
 0xae9   :  { %v5661_v22 = vsel %vm5537_vm2, %v5532_v39, %v18842_v7  ;;  %v17199_v52 = vpop.f32.mrf.mxu3  ;;  %v18847_v39 = vld [vmem:[#allocation347_spill] sm:$0xff]  ;;  %v18848_v7 = vld [vmem:[#allocation474_spill] sm:$0xff]  ;;  %v7070_v60 = vadd.f32 %v17086_v14, %v16938_v40  ;;  %v7076_v40 = vadd.f32 %v17086_v14, %v16991_v0  ;;  %v7079_v0 = vadd.f32 %v17086_v14, %v17024_v37 }
 0xaea   :  { %v7424_v10 = vadd.f32 %v7423_v46, %v7297_v48  ;;  %v5790_v27 = vsel %vm5666_vm4, %v5661_v22, %v18843_v9  ;;  %v18849_v22 = vld [vmem:[#allocation595_spill] sm:$0xff]  ;;  %v7073_v9 = vadd.f32 %v17086_v14, %v16966_v6 }
 0xaec   :  { %v7425_v21 = vadd.f32 %v7424_v10, %v7298_v35  ;;  %v18846_v35 = vld [vmem:[#allocation238_spill] sm:$0xff]  ;;  %v7064_v10 = vadd.f32 %v17086_v14, %v16867_v19 }
 0xaed   :  { %v4116_v25 = vpop.permute.xlu1 %4115  ;;  %v5138_v2 = vpop.permute.xlu0 %5137  ;;  %v154_v19 = vld [vmem:[%s17548_s0 + $0x4e0] sm:$0xff] }
 0xaee   :  { %v6304_v31 = vsel %vm6182_vm6, %v6175_v12, %v5138_v2  ;;  %v6047_v51 = vsel %vm5924_vm5, %v5918_v43, %v4116_v25  ;;  %v7426_v12 = vadd.f32 %v7425_v21, %v7299_v1 }
 0xaef   :  { %v6433_v49 = vsel %vm6311_vm8, %v6304_v31, 0.0  ;;  %v6176_v24 = vsel %vm6053_vm7, %v6047_v51, %v4628_v15  ;;  %v153_v15 = vld [vmem:[%s17548_s0 + $0x4d8] sm:$0xff]  ;;  %v5919_v31 = vsel %vm5795_vm3, %v5790_v27, %v18844_v4  ;;  %v7303_v51 = vmax.f32 %v7058_v30, 0.0 }
 0xaf0   :  { %8699 = vmatmul.msk.f32.gmra.mxu3 %vm6448_vm9, %v6433_v49  ;;  %v7427_v23 = vadd.f32 %v7426_v12, %v7300_v33  ;;  %v18845_v49 = vld [vmem:[#allocation117_spill] sm:$0xff]  ;;  %v17201_v43 = vpop.f32.mrf.mxu2  ;;  %v4632_v38 = vpop.permute.xlu2 %4631  ;;  %v7304_v33 = vmax.f32 %v7061_v62, 0.0  ;;  %v18852_v62 = vld [vmem:[#allocation358_spill] sm:$0xff] }
 0xaf1   :  { %v5404_v41 = vsel %vm5279_vm0, %v153_v15, %v18845_v49  ;;  %v17229_v27 = vpop.f32.mrf.mxu3  ;;  %v18851_v30 = vld [vmem:[#allocation237_spill] sm:$0xff] }
 0xaf2   :  { %v5533_v53 = vsel %vm5408_vm1, %v5404_v41, %v18846_v35  ;;  %v7506_v41 = vld [vmem:[%s17551_s3 + $0x50] sm:$0xff] }
 0xaf3   :  { %v5662_v57 = vsel %vm5537_vm2, %v5533_v53, %v18847_v39  ;;  %7518 = vmatpush.msrb.mxu1 %v7506_v41  ;;  %v18854_v39 = vld [vmem:[#allocation594_spill] sm:$0xff] }
 0xaf5   :  { %v4118_v20 = vpop.permute.xlu1 %4117  ;;  %v5140_v18 = vpop.permute.xlu0 %5139 }
 0xaf6   :  { %v6305_v44 = vsel %vm6182_vm6, %v6176_v24, %v5140_v18  ;;  %v7051_v32 = vpop.f32.mrf.mxu1  ;;  %v6048_v42 = vsel %vm5924_vm5, %v5919_v31, %v4118_v20  ;;  %v7067_v24 = vadd.f32 %v17086_v14, %v16909_v16 }
 0xaf7   :  { %v6434_v25 = vsel %vm6311_vm8, %v6305_v44, 0.0  ;;  %v7052_v2 = vadd.f32 %v17086_v14, %v7051_v32  ;;  %v6177_v34 = vsel %vm6053_vm7, %v6048_v42, %v4630_v54  ;;  %v5791_v54 = vsel %vm5666_vm4, %v5662_v57, %v18848_v7 }
 0xaf8   :  { %8700 = vmatmul.msk.f32.gmra.mxu3 %vm6448_vm9, %v6434_v25  ;;  %v5920_v44 = vsel %vm5795_vm3, %v5791_v54, %v18849_v22  ;;  %v7305_v32 = vmax.f32 %v7064_v10, 0.0  ;;  %v18850_v25 = vld [vmem:[#allocation110_spill] sm:$0xff]  ;;  %v7306_v15 = vmax.f32 %v7067_v24, 0.0  ;;  %v17231_v4 = vpop.f32.mrf.mxu2  ;;  %v4634_v53 = vpop.permute.xlu2 %4633  ;;  %v7309_v57 = vmax.f32 %v7076_v40, 0.0 }
 0xaf9   :  { %v7301_v48 = vmax.f32 %v7052_v2, 0.0  ;;  %v5405_v2 = vsel %vm5279_vm0, %v154_v19, %v18850_v25  ;;  %v7504_v24 = vld [vmem:[%s17551_s3 + $0x40] sm:$0xff]  ;;  %v7310_v7 = vmax.f32 %v7079_v0, 0.0  ;;  %v7085_v54 = vadd.f32 %v17086_v14, %v17075_v29  ;;  %v17268_v22 = vpop.f32.mrf.mxu3 }
 0xafa   :  { %v7097_v0 = vadd.f32 %v17086_v14, %v17201_v43 }
 0xafb   :  { %v7428_v46 = vadd.f32 %v7427_v23, %v7301_v48  ;;  %v5534_v23 = vsel %vm5408_vm1, %v5405_v2, %v18851_v30  ;;  %v7307_v48 = vmax.f32 %v7070_v60, 0.0 }
 0xafd   :  { %v7429_v1 = vadd.f32 %v7428_v46, %v7302_v56  ;;  %v4120_v26 = vpop.permute.xlu1 %4119  ;;  %v5142_v63 = vpop.permute.xlu0 %5141  ;;  %v5663_v46 = vsel %vm5537_vm2, %v5534_v23, %v18852_v62  ;;  %v7312_v23 = vmax.f32 %v7085_v54, 0.0 }
 0xafe   :  { %v6306_v21 = vsel %vm6182_vm6, %v6177_v34, %v5142_v63  ;;  %v6049_v12 = vsel %vm5924_vm5, %v5920_v44, %v4120_v26  ;;  %v155_v34 = vld [vmem:[%s17548_s0 + $0x4e8] sm:$0xff] }
 0xaff   :  { %v7430_v20 = vadd.f32 %v7429_v1, %v7303_v51  ;;  %v6435_v18 = vsel %vm6311_vm8, %v6306_v21, 0.0  ;;  %v6178_v49 = vsel %vm6053_vm7, %v6049_v12, %v4632_v38  ;;  %v7308_v51 = vmax.f32 %v7073_v9, 0.0  ;;  %v7505_v1 = vld [vmem:[%s17551_s3 + $0x48] sm:$0xff] }
 0xb00   :  { %8701 = vmatmul.msk.f32.gmra.mxu3 %vm6448_vm9, %v6435_v18  ;;  %v18853_v26 = vld [vmem:[#allocation467_spill] sm:$0xff]  ;;  %7519 = vmatpush.msrb.mxu1 %v7505_v1  ;;  %v7082_v21 = vadd.f32 %v17086_v14, %v17051_v47  ;;  %v18855_v18 = vld [vmem:[#allocation121_spill] sm:$0xff]  ;;  %v17270_v44 = vpop.f32.mrf.mxu2  ;;  %v7088_v12 = vadd.f32 %v17086_v14, %v17111_v61  ;;  %v4636_v41 = vpop.permute.xlu2 %4635 }
 0xb01   :  { %v7431_v16 = vadd.f32 %v7430_v20, %v7304_v33  ;;  %v5792_v63 = vsel %vm5666_vm4, %v5663_v46, %v18853_v26  ;;  %v5406_v19 = vsel %vm5279_vm0, %v155_v34, %v18855_v18  ;;  %v18860_v34 = vld [vmem:[#allocation120_spill] sm:$0xff] }
 0xb02   :  { %v5921_v37 = vsel %vm5795_vm3, %v5792_v63, %v18854_v39  ;;  %7520 = vmatpush.msrb.mxu1 %v7504_v24  ;;  %v7313_v46 = vmax.f32 %v7088_v12, 0.0  ;;  %v7100_v39 = vadd.f32 %v17086_v14, %v17231_v4  ;;  %v7503_v24 = vld [vmem:[%s17551_s3 + $0x38] sm:$0xff] }
 0xb03   :  { %v7432_v31 = vadd.f32 %v7431_v16, %v7305_v32  ;;  %v18856_v32 = vld [vmem:[#allocation230_spill] sm:$0xff]  ;;  %v7311_v16 = vmax.f32 %v7082_v21, 0.0  ;;  %v18861_v21 = vld [vmem:[#allocation240_spill] sm:$0xff] }
 0xb04   :  { %v5535_v60 = vsel %vm5408_vm1, %v5406_v19, %v18856_v32  ;;  %v7316_v19 = vmax.f32 %v7097_v0, 0.0  ;;  %7521 = vmatpush.msrb.mxu1 %v7503_v24  ;;  %v7317_v12 = vmax.f32 %v7100_v39, 0.0 }
 0xb05   :  { %v7433_v42 = vadd.f32 %v7432_v31, %v7306_v15  ;;  %v4122_v6 = vpop.permute.xlu1 %4121  ;;  %v5144_v56 = vpop.permute.xlu0 %5143  ;;  %v18857_v31 = vld [vmem:[#allocation357_spill] sm:$0xff] }
 0xb06   :  { %v6307_v35 = vsel %vm6182_vm6, %v6178_v49, %v5144_v56  ;;  %v6050_v20 = vsel %vm5924_vm5, %v5921_v37, %v4122_v6  ;;  %v5664_v29 = vsel %vm5537_vm2, %v5535_v60, %v18857_v31  ;;  %v18858_v49 = vld [vmem:[#allocation478_spill] sm:$0xff]  ;;  %v156_v6 = vld [vmem:[%s17548_s0 + $0x4f0] sm:$0xff]  ;;  %v18859_v56 = vld [vmem:[#allocation587_spill] sm:$0xff] }
 0xb07   :  { %v7434_v10 = vadd.f32 %v7433_v42, %v7307_v48  ;;  %v6436_v38 = vsel %vm6311_vm8, %v6307_v35, 0.0  ;;  %v6179_v2 = vsel %vm6053_vm7, %v6050_v20, %v4634_v53  ;;  %v7091_v48 = vadd.f32 %v17086_v14, %v17145_v17  ;;  %v18862_v20 = vld [vmem:[#allocation350_spill] sm:$0xff]  ;;  %v18864_v60 = vld [vmem:[#allocation597_spill] sm:$0xff] }
 0xb08   :  { %8702 = vmatmul.msk.f32.gmra.mxu3 %vm6448_vm9, %v6436_v38  ;;  %v5793_v61 = vsel %vm5666_vm4, %v5664_v29, %v18858_v49  ;;  %v7094_v17 = vadd.f32 %v17086_v14, %v17170_v28  ;;  %v7105_v38 = vpop.f32.mrf.mxu2  ;;  %v5407_v26 = vsel %vm5279_vm0, %v156_v6, %v18860_v34  ;;  %vm7605_vm0 = vcmask 523264  }
 0xb09   :  { %v7435_v33 = vadd.f32 %v7434_v10, %v7308_v51  ;;  %v5922_v62 = vsel %vm5795_vm3, %v5793_v61, %v18859_v56  ;;  %v7314_v51 = vmax.f32 %v7091_v48, 0.0  ;;  %v17296_v10 = vpop.f32.mrf.mxu3  ;;  %v7502_v61 = vld [vmem:[%s17551_s3 + $0x30] sm:$0xff]  ;;  %v7106_v0 = vadd.f32 %v17086_v14, %v7105_v38 }
 0xb0a   :  { %v7315_v63 = vmax.f32 %v7094_v17, 0.0  ;;  %7522 = vmatpush.msrb.mxu1 %v7502_v61  ;;  %v7103_v17 = vadd.f32 %v17086_v14, %v17270_v44 }
 0xb0b   :  { %v7436_v47 = vadd.f32 %v7435_v33, %v7309_v57  ;;  %v5536_v33 = vsel %vm5408_vm1, %v5407_v26, %v18861_v21  ;;  %v7319_v34 = vmax.f32 %v7106_v0, 0.0 }
 0xb0c   :  { %v5665_v18 = vsel %vm5537_vm2, %v5536_v33, %v18862_v20  ;;  %vm7780_vm2 = vcmask 1040384  }
 0xb0d   :  { %v7437_v25 = vadd.f32 %v7436_v47, %v7310_v7  ;;  %v4124_v15 = vpop.permute.xlu1 %4123  ;;  %v5146_v9 = vpop.permute.xlu0 %5145  ;;  %v18863_v47 = vld [vmem:[#allocation477_spill] sm:$0xff] }
 0xb0e   :  { %v6308_v30 = vsel %vm6182_vm6, %v6179_v2, %v5146_v9  ;;  %v6051_v53 = vsel %vm5924_vm5, %v5922_v62, %v4124_v15  ;;  %v5794_v32 = vsel %vm5666_vm4, %v5665_v18, %v18863_v47  ;;  %v4638_v15 = vpop.permute.xlu2 %4637  ;;  %vm7803_vm4 = vcmask 1042432  }
 0xb0f   :  { %v7438_v40 = vadd.f32 %v7437_v25, %v7311_v16  ;;  %v6437_v42 = vsel %vm6311_vm8, %v6308_v30, 0.0  ;;  %v6180_v28 = vsel %vm6053_vm7, %v6051_v53, %v4636_v41  ;;  %v5923_v16 = vsel %vm5795_vm3, %v5794_v32, %v18864_v60 }
 0xb10   :  { %8703 = vmatmul.msk.f32.gmra.mxu3 %vm6448_vm9, %v6437_v42  ;;  %v7108_v31 = vpop.f32.mrf.mxu2  ;;  %vm7801_vm3 = vcmask 1041408  }
 0xb11   :  { %v7439_v35 = vadd.f32 %v7438_v40, %v7312_v23  ;;  %v17318_v9 = vpop.f32.mrf.mxu3  ;;  %v7109_v26 = vadd.f32 %v17086_v14, %v7108_v31 }
 0xb13   :  { %v7440_v1 = vadd.f32 %v7439_v35, %v7313_v46  ;;  %v7501_v46 = vld [vmem:[%s17551_s3 + $0x28] sm:$0xff] }
 0xb14   :  { %7523 = vmatpush.msrb.mxu1 %v7501_v46 }
 0xb15   :  { %v7441_v37 = vadd.f32 %v7440_v1, %v7314_v51  ;;  %v5148_v57 = vpop.permute.xlu0 %5147  ;;  %v4126_v54 = vpop.permute.xlu1 %4125  ;;  %v7318_v51 = vmax.f32 %v7103_v17, 0.0 }
 0xb16   :  { %v6309_v43 = vsel %vm6182_vm6, %v6180_v28, %v5148_v57  ;;  %v6052_v2 = vsel %vm5924_vm5, %v5923_v16, %v4126_v54  ;;  %v7320_v28 = vmax.f32 %v7109_v26, 0.0 }
 0xb17   :  { %v7442_v7 = vadd.f32 %v7441_v37, %v7315_v63  ;;  %v6438_v4 = vsel %vm6311_vm8, %v6309_v43, 0.0  ;;  %v6181_v30 = vsel %vm6053_vm7, %v6052_v2, %v4638_v15 }
 0xb18   :  { %8704 = vmatmul.msk.f32.gmra.mxu3 %vm6448_vm9, %v6438_v4  ;;  %v7111_v49 = vpop.f32.mrf.mxu2 }
 0xb19   :  { %v7443_v25 = vadd.f32 %v7442_v7, %v7316_v19  ;;  %v17324_v42 = vpop.f32.mrf.mxu3  ;;  %v7112_v57 = vadd.f32 %v17086_v14, %v7111_v49 }
 0xb1b   :  { %v7444_v29 = vadd.f32 %v7443_v25, %v7317_v12  ;;  %v7321_v33 = vmax.f32 %v7112_v57, 0.0 }
 0xb1d   :  { %v5150_v23 = vpop.permute.xlu0 %5149  ;;  %v7445_v1 = vadd.f32 %v7444_v29, %v7318_v51 }
 0xb1e   :  { %v6310_v48 = vsel %vm6182_vm6, %v6181_v30, %v5150_v23 }
 0xb1f   :  { %v6439_v40 = vsel %vm6311_vm8, %v6310_v48, 0.0  ;;  %v7446_v37 = vadd.f32 %v7445_v1, %v7319_v34  ;;  %v7145_v1 = vadd.f32 %v17086_v14, %v16980_v13  ;;  %v7157_v13 = vadd.f32 %v17086_v14, %v17081_v36 }
 0xb20   :  { %8705 = vmatmul.msk.f32.gmra.mxu3 %vm6448_vm9, %v6439_v40  ;;  %v7114_v6 = vpop.f32.mrf.mxu2  ;;  %v7136_v40 = vadd.f32 %v17086_v14, %v16893_v11  ;;  %v7169_v36 = vadd.f32 %v17086_v14, %v17199_v52  ;;  %v7499_v52 = vld [vmem:[%s17551_s3 + $0x18] sm:$0xff] }
 0xb21   :  { %v17329_v41 = vpop.f32.mrf.mxu3  ;;  %v7447_v21 = vadd.f32 %v7446_v37, %v7320_v28  ;;  %v7115_v44 = vadd.f32 %v17086_v14, %v7114_v6  ;;  %v7139_v6 = vadd.f32 %v17086_v14, %v16926_v58  ;;  %v7332_v58 = vmax.f32 %v7145_v1, 0.0 }
 0xb22   :  { %v7329_v17 = vmax.f32 %v7136_v40, 0.0  ;;  %v7151_v28 = vadd.f32 %v17086_v14, %v17030_v5  ;;  %v7163_v5 = vadd.f32 %v17086_v14, %v17143_v8  ;;  %v7172_v8 = vadd.f32 %v17086_v14, %v17229_v27 }
 0xb23   :  { %v7448_v20 = vadd.f32 %v7447_v21, %v7321_v33  ;;  %v7322_v38 = vmax.f32 %v7115_v44, 0.0  ;;  %v7330_v0 = vmax.f32 %v7139_v6, 0.0  ;;  %v7181_v27 = vadd.f32 %v17086_v14, %v17318_v9  ;;  %v7497_v9 = vld [vmem:[%s17551_s3 + $0x8] sm:$0xff] }
 0xb24   :  { %v7334_v44 = vmax.f32 %v7151_v28, 0.0  ;;  %v7184_v6 = vadd.f32 %v17086_v14, %v17324_v42 }
 0xb25   :  { %v7449_v19 = vadd.f32 %v7448_v20, %v7322_v38 }
 0xb28   :  { %v7117_v62 = vpop.f32.mrf.mxu2 }
 0xb29   :  { %v17331_v56 = vpop.f32.mrf.mxu3  ;;  %v7118_v18 = vadd.f32 %v17086_v14, %v7117_v62 }
 0xb2b   :  { %v7323_v7 = vmax.f32 %v7118_v18, 0.0 }
 0xb2d   :  { %v7450_v60 = vadd.f32 %v7449_v19, %v7323_v7  ;;  %v7336_v19 = vmax.f32 %v7157_v13, 0.0 }
 0xb30   :  { %v7120_v53 = vpop.f32.mrf.mxu2 }
 0xb31   :  { %v17338_v35 = vpop.f32.mrf.mxu3  ;;  %v7121_v54 = vadd.f32 %v17086_v14, %v7120_v53  ;;  %v7142_v53 = vadd.f32 %v17086_v14, %v16955_v59  ;;  %v7154_v59 = vadd.f32 %v17086_v14, %v17057_v45  ;;  %v7166_v45 = vadd.f32 %v17086_v14, %v17168_v3 }
 0xb32   :  { %v7175_v3 = vadd.f32 %v17086_v14, %v17268_v22  ;;  %v7498_v22 = vld [vmem:[%s17551_s3 + $0x10] sm:$0xff]  ;;  %v7193_v42 = vadd.f32 %v17086_v14, %v17338_v35 }
 0xb33   :  { %v7324_v12 = vmax.f32 %v7121_v54, 0.0  ;;  %v7331_v11 = vmax.f32 %v7142_v53, 0.0  ;;  %v7335_v38 = vmax.f32 %v7154_v59, 0.0  ;;  %v7345_v53 = vmax.f32 %v7184_v6, 0.0 }
 0xb35   :  { %v7451_v15 = vadd.f32 %v7450_v60, %v7324_v12  ;;  %v7339_v12 = vmax.f32 %v7166_v45, 0.0  ;;  %v7496_v45 = vld [vmem:[%s17551_s3] sm:$0xff] }
 0xb38   :  { %v7123_v39 = vpop.f32.mrf.mxu2 }
 0xb39   :  { %v17342_v63 = vpop.f32.mrf.mxu3  ;;  %v7124_v4 = vadd.f32 %v17086_v14, %v7123_v39  ;;  %v7148_v39 = vadd.f32 %v17086_v14, %v17005_v50  ;;  %v7160_v50 = vadd.f32 %v17086_v14, %v17113_v55  ;;  %v7500_v55 = vld [vmem:[%s17551_s3 + $0x20] sm:$0xff]  ;;  %s8787_s3 = smov 112  }
 0xb3a   :  { %7524 = vmatpush.msrb.mxu1 %v7500_v55 }
 0xb3b   :  { %v7325_v25 = vmax.f32 %v7124_v4, 0.0  ;;  %v7333_v21 = vmax.f32 %v7148_v39, 0.0  ;;  %v7337_v54 = vmax.f32 %v7160_v50, 0.0 }
 0xb3c   :  { %7525 = vmatpush.msrb.mxu1 %v7499_v52 }
 0xb3d   :  { %v7452_v29 = vadd.f32 %v7451_v15, %v7325_v25 }
 0xb3e   :  { %7526 = vmatpush.msrb.mxu1 %v7498_v22  ;;  %v7591_v22 = vld [vmem:[%s17552_s7 + $0x50] sm:$0xff] }
 0xb40   :  { %v7126_v24 = vpop.f32.mrf.mxu2  ;;  %7527 = vmatpush.msrb.mxu1 %v7497_v9 }
 0xb41   :  { %v17346_v43 = vpop.f32.mrf.mxu3  ;;  %v7127_v16 = vadd.f32 %v17086_v14, %v7126_v24 }
 0xb42   :  { %v7199_v28 = vadd.f32 %v17086_v14, %v17346_v43  ;;  %7528 = vmatpush.msrb.mxu1 %v7496_v45 }
 0xb43   :  { %v7326_v31 = vmax.f32 %v7127_v16, 0.0 }
 0xb45   :  { %v7453_v49 = vadd.f32 %v7452_v29, %v7326_v31  ;;  %v7341_v31 = vmax.f32 %v7172_v8, 0.0  ;;  %v7178_v29 = vadd.f32 %v17086_v14, %v17296_v10  ;;  %v7187_v10 = vadd.f32 %v17086_v14, %v17329_v41 }
 0xb46   :  { %v7196_v41 = vadd.f32 %v17086_v14, %v17342_v63 }
 0xb47   :  { %v7346_v1 = vmax.f32 %v7187_v10, 0.0 }
 0xb49   :  { %v17351_v47 = vpop.f32.mrf.mxu3 }
 0xb4b   :  { %v7129_v32 = vpop.f32.mrf.mxu2 }
 0xb4c   :  { %v7130_v2 = vadd.f32 %v17086_v14, %v7129_v32  ;;  %v7338_v32 = vmax.f32 %v7163_v5, 0.0 }
 0xb4e   :  { %v7327_v30 = vmax.f32 %v7130_v2, 0.0  ;;  %v7340_v2 = vmax.f32 %v7169_v36, 0.0 }
 0xb50   :  { %v7454_v62 = vadd.f32 %v7453_v49, %v7327_v30 }
 0xb53   :  { %v17355_v23 = vpop.f32.mrf.mxu3 }
 0xb54   :  { %v7205_v35 = vadd.f32 %v17086_v14, %v17355_v23 }
 0xb56   :  { %v7352_v50 = vmax.f32 %v7205_v35, 0.0  ;;  %v7535_v35 = vld [vmem:[%s17555_s6] sm:$0x1] }
 0xb5b   :  { %v7132_v48 = vpop.f32.mrf.mxu2 }
 0xb5c   :  { %v7133_v61 = vadd.f32 %v17086_v14, %v7132_v48  ;;  %v7342_v48 = vmax.f32 %v7175_v3, 0.0  ;;  %v7597_v3 = vld [vmem:[%s17552_s7 + $0x80] sm:$0xff] }
 0xb5e   :  { %v7328_v46 = vmax.f32 %v7133_v61, 0.0  ;;  %v7343_v61 = vmax.f32 %v7178_v29, 0.0  ;;  %v7594_v29 = vld [vmem:[%s17552_s7 + $0x68] sm:$0xff] }
 0xb60   :  { %v7455_v51 = vadd.f32 %v7454_v62, %v7328_v46  ;;  %v7344_v46 = vmax.f32 %v7181_v27, 0.0 }
 0xb62   :  { %v7456_v34 = vadd.f32 %v7455_v51, %v7329_v17  ;;  %v7190_v51 = vadd.f32 %v17086_v14, %v17331_v56  ;;  %v7202_v56 = vadd.f32 %v17086_v14, %v17351_v47 }
 0xb63   :  { %v17366_v26 = vpop.f32.mrf.mxu3 }
 0xb64   :  { %v7457_v37 = vadd.f32 %v7456_v34, %v7330_v0  ;;  %v7347_v39 = vmax.f32 %v7190_v51, 0.0  ;;  %v7208_v63 = vadd.f32 %v17086_v14, %v17366_v26  ;;  %v7603_v26 = vld [vmem:[%s17552_s7 + $0xb0] sm:$0xff] }
 0xb65   :  { %7637 = vmatpush.msrb.mxu3 %v7603_v26 }
 0xb66   :  { %v7458_v57 = vadd.f32 %v7457_v37, %v7331_v11 }
 0xb68   :  { %v7459_v33 = vadd.f32 %v7458_v57, %v7332_v58  ;;  %v7348_v58 = vmax.f32 %v7193_v42, 0.0 }
 0xb6a   :  { %v7460_v24 = vadd.f32 %v7459_v33, %v7333_v21  ;;  %v7349_v21 = vmax.f32 %v7196_v41, 0.0  ;;  %v7350_v33 = vmax.f32 %v7199_v28, 0.0  ;;  %v7590_v28 = vld [vmem:[%s17552_s7 + $0x48] sm:$0xff] }
 0xb6b   :  { %v17376_v20 = vpop.f32.mrf.mxu3 }
 0xb6c   :  { %v7461_v18 = vadd.f32 %v7460_v24, %v7334_v44  ;;  %v7351_v24 = vmax.f32 %v7202_v56, 0.0  ;;  %v7211_v43 = vadd.f32 %v17086_v14, %v17376_v20 }
 0xb6e   :  { %v7462_v7 = vadd.f32 %v7461_v18, %v7335_v38 }
 0xb70   :  { %v7463_v4 = vadd.f32 %v7462_v7, %v7336_v19  ;;  %v7353_v19 = vmax.f32 %v7208_v63, 0.0  ;;  %v8788_v63 = vmov 14  }
 0xb71   :  { %8753 = vset.pattern.permute.xlu2 %v8788_v63 }
 0xb72   :  { %v7464_v60 = vadd.f32 %v7463_v4, %v7337_v54  ;;  %v7354_v54 = vmax.f32 %v7211_v43, 0.0  ;;  %v8790_v43 = vmov 15  }
 0xb73   :  { %v7213_v16 = vpop.f32.mrf.mxu3 }
 0xb74   :  { %v7465_v25 = vadd.f32 %v7464_v60, %v7338_v32  ;;  %v7214_v47 = vadd.f32 %v17086_v14, %v7213_v16 }
 0xb76   :  { %v7466_v15 = vadd.f32 %v7465_v25, %v7339_v12  ;;  %v7355_v32 = vmax.f32 %v7214_v47, 0.0  ;;  %v7600_v25 = vld [vmem:[%s17552_s7 + $0x98] sm:$0xff] }
 0xb77   :  { %7638 = vmatpush.msrb.mxu3 %v7600_v25  ;;  %v7581_v25 = vld [vmem:[%s17552_s7] sm:$0xff] }
 0xb78   :  { %v7467_v30 = vadd.f32 %v7466_v15, %v7340_v2  ;;  %v7602_v2 = vld [vmem:[%s17552_s7 + $0xa8] sm:$0xff]  ;;  %v7599_v15 = vld [vmem:[%s17552_s7 + $0x90] sm:$0xff] }
 0xb79   :  { %7617 = vmatpush.msrb.mxu2 %v7602_v2  ;;  %7639 = vmatpush.msrb.mxu3 %v7597_v3  ;;  %v7582_v2 = vld [vmem:[%s17552_s7 + $0x8] sm:$0xff]  ;;  %v7604_v3 = vld [vmem:[%s17552_s7 + $0xb8] sm:$0xff] }
 0xb7a   :  { %v7468_v40 = vadd.f32 %v7467_v30, %v7341_v31  ;;  %v7596_v31 = vld [vmem:[%s17552_s7 + $0x78] sm:$0xff] }
 0xb7b   :  { %v7216_v49 = vpop.f32.mrf.mxu3  ;;  %7618 = vmatpush.msrb.mxu2 %v7599_v15  ;;  %7640 = vmatpush.msrb.mxu3 %v7594_v29  ;;  %v7601_v15 = vld [vmem:[%s17552_s7 + $0xa0] sm:$0xff] }
 0xb7c   :  { %v7469_v62 = vadd.f32 %v7468_v40, %v7342_v48  ;;  %v7217_v23 = vadd.f32 %v17086_v14, %v7216_v49  ;;  %v7593_v40 = vld [vmem:[%s17552_s7 + $0x60] sm:$0xff] }
 0xb7d   :  { %7619 = vmatpush.msrb.mxu2 %v7596_v31  ;;  %7641 = vmatpush.msrb.mxu3 %v7591_v22  ;;  %v8793_v31 = vmov 10   ;;  %v7586_v22 = vld [vmem:[%s17552_s7 + $0x28] sm:$0xff] }
 0xb7e   :  { %v7470_v17 = vadd.f32 %v7469_v62, %v7343_v61  ;;  %v7356_v55 = vmax.f32 %v7217_v23, 0.0 }
 0xb7f   :  { %7620 = vmatpush.msrb.mxu2 %v7593_v40  ;;  %v7589_v40 = vld [vmem:[%s17552_s7 + $0x40] sm:$0xff] }
 0xb80   :  { %v7471_v0 = vadd.f32 %v7470_v17, %v7344_v46 }
 0xb81   :  { %7621 = vmatpush.msrb.mxu2 %v7590_v28  ;;  %v8802_v28 = vmov 11  }
 0xb82   :  { %v7472_v34 = vadd.f32 %v7471_v0, %v7345_v53 }
 0xb83   :  { %v7219_v11 = vpop.f32.mrf.mxu3 }
 0xb84   :  { %v7473_v37 = vadd.f32 %v7472_v34, %v7346_v1  ;;  %v7220_v36 = vadd.f32 %v17086_v14, %v7219_v11 }
 0xb86   :  { %v7474_v57 = vadd.f32 %v7473_v37, %v7347_v39  ;;  %v7357_v12 = vmax.f32 %v7220_v36, 0.0  ;;  %v8785_v37 = vmov 12  }
 0xb87   :  { %8751 = vset.pattern.permute.xlu0 %v8785_v37  ;;  %v8800_v37 = vmov 9  }
 0xb88   :  { %v7475_v59 = vadd.f32 %v7474_v57, %v7348_v58  ;;  %v8786_v58 = vmov 13   ;;  %v7587_v57 = vld [vmem:[%s17552_s7 + $0x30] sm:$0xff] }
 0xb89   :  { %8752 = vset.pattern.permute.xlu1 %v8786_v58  ;;  %7622 = vmatpush.msrb.mxu2 %v7587_v57  ;;  %v8801_v58 = vmov 6  }
 0xb8a   :  { %v7476_v44 = vadd.f32 %v7475_v59, %v7349_v21  ;;  %v7512_v21 = vld [vmem:[%s17553_s4] sm:$0x1] }
 0xb8b   :  { %v7222_v13 = vpop.f32.mrf.mxu3  ;;  %v7533_v59 = vld [vmem:[%s17554_s5] sm:$0x1] }
 0xb8c   :  { %v7477_v38 = vadd.f32 %v7476_v44, %v7350_v33  ;;  %v7223_v8 = vadd.f32 %v17086_v14, %v7222_v13 }
 0xb8e   :  { %v7478_v18 = vadd.f32 %v7477_v38, %v7351_v24  ;;  %v7358_v48 = vmax.f32 %v7223_v8, 0.0 }
 0xb90   :  { %v7479_v5 = vadd.f32 %v7478_v18, %v7352_v50  ;;  %v8789_v18 = vmov 5  }
 0xb92   :  { %v7480_v7 = vadd.f32 %v7479_v5, %v7353_v19 }
 0xb93   :  { %v7225_v4 = vpop.f32.mrf.mxu3 }
 0xb94   :  { %v7481_v20 = vadd.f32 %v7480_v7, %v7354_v54  ;;  %v7226_v27 = vadd.f32 %v17086_v14, %v7225_v4  ;;  %v7585_v7 = vld [vmem:[%s17552_s7 + $0x20] sm:$0xff] }
 0xb96   :  { %v7482_v60 = vadd.f32 %v7481_v20, %v7355_v32  ;;  %v7359_v6 = vmax.f32 %v7226_v27, 0.0  ;;  %v7592_v27 = vld [vmem:[%s17552_s7 + $0x58] sm:$0xff] }
 0xb98   :  { %v7483_v16 = vadd.f32 %v7482_v60, %v7356_v55  ;;  %v7584_v60 = vld [vmem:[%s17552_s7 + $0x18] sm:$0xff] }
 0xb99   :  { %7623 = vmatpush.msrb.mxu2 %v7584_v60 }
 0xb9a   :  { %v7484_v52 = vadd.f32 %v7483_v16, %v7357_v12 }
 0xb9b   :  { %v7228_v30 = vpop.f32.mrf.mxu3  ;;  %7624 = vmatpush.msrb.mxu2 %v7581_v25 }
 0xb9c   :  { %v7485_v49 = vadd.f32 %v7484_v52, %v7358_v48  ;;  %v7229_v61 = vadd.f32 %v17086_v14, %v7228_v30  ;;  %v7598_v52 = vld [vmem:[%s17552_s7 + $0x88] sm:$0xff]  ;;  %v8794_v30 = vmov 3   ;;  %v7595_v48 = vld [vmem:[%s17552_s7 + $0x70] sm:$0xff] }
 0xb9d   :  { %7657 = vmatpush.msra.mxu2 %v7604_v3 }
 0xb9e   :  { %v7486_v62 = vadd.f32 %v7485_v49, %v7359_v6  ;;  %v7360_v46 = vmax.f32 %v7229_v61, 0.0  ;;  %v7583_v49 = vld [vmem:[%s17552_s7 + $0x10] sm:$0xff]  ;;  %v8795_v61 = vmov 2  }
 0xb9f   :  { %7658 = vmatpush.msra.mxu2 %v7601_v15 }
 0xba0   :  { %v7487_v9 = vadd.f32 %v7486_v62, %v7360_v46 }
 0xba1   :  { %7659 = vmatpush.msra.mxu2 %v7598_v52 }
 0xba3   :  { %v7231_v10 = vpop.f32.mrf.mxu3  ;;  %7660 = vmatpush.msra.mxu2 %v7595_v48 }
 0xba4   :  { %v7232_v17 = vadd.f32 %v17086_v14, %v7231_v10  ;;  %v7588_v14 = vld [vmem:[%s17552_s7 + $0x38] sm:$0xff]  ;;  %s8798_s7 = smov 2  }
 0xba5   :  { %7642 = vmatpush.msrb.mxu3 %v7588_v14  ;;  %7661 = vmatpush.msra.mxu2 %v7592_v27 }
 0xba6   :  { %v7361_v53 = vmax.f32 %v7232_v17, 0.0 }
 0xba7   :  { %7643 = vmatpush.msrb.mxu3 %v7585_v7  ;;  %7662 = vmatpush.msra.mxu2 %v7589_v40 }
 0xba8   :  { %v7488_v51 = vadd.f32 %v7487_v9, %v7361_v53  ;;  %v8796_v9 = vmov 0  }
 0xba9   :  { %7644 = vmatpush.msrb.mxu3 %v7582_v2  ;;  %7663 = vmatpush.msra.mxu2 %v7586_v22 }
 0xbaa   :  { %v7489_v0 = vrot.slane %v7488_v51, 4 }
 0xbab   :  { %7664 = vmatpush.msra.mxu2 %v7583_v49 }
 0xbac   :  { %v7490_v1 = vadd.f32 %v7489_v0, %v7488_v51  ;;  %v8797_v51 = vmov 4  }
 0xbae   :  { %v7491_v42 = vrot.slane %v7490_v1, 2 }
 0xbb0   :  { %v7492_v34 = vadd.f32 %v7491_v42, %v7490_v1 }
 0xbb2   :  { %v7493_v11 = vrot.slane %v7492_v34, 1 }
 0xbb4   :  { %v7494_v39 = vadd.f32 %v7493_v11, %v7492_v34 }
 0xbb6   :  { %v7495_v41 = vmul.f32 0.0009765625, %v7494_v39 }
 0xbb8   :  { %7529 = vmatmul.f32.vlgmr.msrb.gmra.mxu1 %v7495_v41  ;;  %v8799_v41 = vmov 8  }
 0xc35   :  { %v7530_v56 = vpop.f32.mrf.mxu1 }
 0xc36   :  { %v7531_v33 = vadd.f32 %v7530_v56, %v7512_v21 }
 0xc38   :  { %v7534_v44 = vmul.f32 %v7533_v59, %v7531_v33 }
 0xc3a   :  { %v17481_v13 = vadd.f32 %v7535_v35, %v7534_v44 }
 0xc3c   :  { %7714 = vperm.xlu0 %8751, %v17481_v13   ;;  %7574 = vrot.lane.b32.xlu1 %v17481_v13, %s8787_s3  ;;  %v8706_v24 = vmul.f32 -1.442695, %v17481_v13 }
 0xc3e   :  { %8770 = vpow2.f32 %v8706_v24 }
 0xc44   :  { %v8771_v38 = vpop.eup %8770  ;;  %7719 = vperm.xlu1 %8752, %v17481_v13   ;;  %8757 = vset.pattern.permute.xlu0 %v8789_v18 }
 0xc45   :  { %v7540_v50 = vadd.f32 1.0, %v8771_v38 }
 0xc47   :  { %8772 = vrcp.f32 %v7540_v50  ;;  %v7552_v54 = vand.u32 2147483648, %v7540_v50  ;;  %v7550_v45 = vand.u32 2147483647, %v7540_v50  ;;  %vm7546_vm11 = vweird.f32 %v7540_v50 }
 0xc49   :  { %v7553_v4 = vor.u32 1.1754944e-38, %v7552_v54  ;;  %vm7551_vm13 = vcmp.eq.f32.partialorder %v7550_v45, 8.507059e+37 }
 0xc4c   :  { %8754 = vset.pattern.permute.xlu1 %v8790_v43 }
 0xc4d   :  { %v8773_v19 = vpop.eup %8772  ;;  %7731 = vperm.xlu1 %8754, %v17481_v13  }
 0xc4e   :  { %v7542_v5 = vmul.f32 %v8773_v19, %v7540_v50  ;;  %vm7547_vm10 = vweird.f32 %v8773_v19 }
 0xc4f   :  { %vm7548_vm12 = vmor %vm7546_vm11, %vm7547_vm10 }
 0xc50   :  { %v7543_v47 = vsub.f32 1.0, %v7542_v5 }
 0xc52   :  { %v7544_v23 = vmul.f32 %v8773_v19, %v7543_v47  ;;  %v7776_v47 = vlaneseq }
 0xc54   :  { %v7545_v26 = vadd.f32 %v8773_v19, %v7544_v23  ;;  %v8803_v23 = vmov 7  }
 0xc55   :  { %8763 = vset.pattern.permute.xlu1 %v8803_v23 }
 0xc56   :  { %v7549_v20 = vsel %vm7548_vm12, %v8773_v19, %v7545_v26 }
 0xc57   :  { %v7554_v32 = vsel %vm7551_vm13, %v7553_v4, %v7549_v20  ;;  %v7777_v20 = vand.u32 127, %v7776_v47 }
 0xc58   :  { %v7557_v36 = vmul.f32 0.75, %v7554_v32  ;;  %v7556_v1 = vmul.f32 32.0, %v7554_v32 }
 0xc59   :  { %vm7778_vm1 = vcmp.lt.s32.totalorder %v7777_v20, 68 }
 0xc5a   :  { %v7558_v55 = vadd.f32 0.25, %v7557_v36 }
 0xc5c   :  { %v7559_v16 = vmul.f32 32.0, %v7558_v55 }
 0xc5e   :  { %v17494_v12 = vmul.f32 0.008333334, %v7559_v16  ;;  %v7560_v8 = vmul.f32 0.5, %v7559_v16 }
 0xc60   :  { %7568 = vrot.lane.b32.xlu2 %v17494_v12, %s8791_s30  ;;  %7562 = vrot.lane.b32.xlu0 %v7560_v8, %s8792_s9  ;;  %v7750_v29 = vsub.f32 0.0, %v17494_v12  ;;  %v7757_v21 = vmul.f32 120.0, %v17494_v12 }
 0xc68   :  { %7725 = vperm.xlu2 %8753, %v17481_v13   ;;  %7740 = vrot.lane.b32.xlu0 %v17494_v12, %s8792_s9 }
 0xc70   :  { %7675 = vperm.xlu0 %8757, %v17481_v13   ;;  %8755 = vset.pattern.permute.xlu2 %v8795_v61 }
 0xc78   :  { %8760 = vset.pattern.permute.xlu0 %v8793_v31 }
 0xc79   :  { %7703 = vperm.xlu0 %8760, %v17481_v13  }
 0xc81   :  { %8764 = vset.pattern.permute.xlu0 %v8794_v30 }
 0xc82   :  { %7753 = vperm.xlu0 %8764, %v7750_v29  }
 0xc8a   :  { %8767 = vset.pattern.permute.xlu0 %v8796_v9 }
 0xcae   :  { %v7575_v6 = vpop.permute.xlu1 %7574  ;;  %v7715_v0 = vpop.permute.xlu0 %7714 }
 0xcaf   :  { %v7578_v62 = vsel %vm7577_vm14, %v7575_v6, 1.0 }
 0xcb0   :  { %v7580_v46 = vsel %vm7579_vm15, %v7578_v62, 0.0 }
 0xcb1   :  { %8707 = vmatmul.msk.f32.vlgmr.msrb.gmra.mxu2 %vm7605_vm0, %v7580_v46  ;;  %8708 = vmatmul.msk.f32.vlgmr.msrb.gmra.mxu3 %vm7605_vm0, %v7580_v46 }
 0xcb6   :  { %v7720_v44 = vpop.permute.xlu1 %7719 }
 0xcb9   :  { %8709 = vmatmul.msk.f32.vlgmr.msra.gmra.mxu2 %vm7605_vm0, %v7580_v46 }
 0xcba   :  { %v7569_v10 = vpop.permute.xlu2 %7568 }
 0xcbb   :  { %v7571_v17 = vadd.f32 %v7569_v10, %v17494_v12 }
 0xcbd   :  { %v7572_v53 = vmul.f32 0.5, %v7571_v17 }
 0xcbf   :  { %7771 = vperm.xlu2 %8755, %v7572_v53   ;;  %v7732_v26 = vpop.permute.xlu1 %7731 }
 0xcc2   :  { %v7726_v14 = vpop.permute.xlu2 %7725 }
 0xcc7   :  { %8756 = vset.pattern.permute.xlu2 %v8797_v51 }
 0xcd2   :  { %v7563_v42 = vpop.permute.xlu0 %7562 }
 0xcd3   :  { %v7565_v34 = vsub.f32 %v7556_v1, %v7563_v42 }
 0xcd5   :  { %7759 = vrot.lane.b32.xlu2 %v7565_v34, %s8798_s7 }
 0xcda   :  { %v7741_v11 = vpop.permute.xlu0 %7740 }
 0xcdb   :  { %v7743_v39 = vsub.f32 %v7565_v34, %v7741_v11 }
 0xcdd   :  { %7670 = vperm.xlu2 %8756, %v17481_v13   ;;  %7746 = vperm.xlu0 %8767, %v7743_v39  }
 0xce2   :  { %v7676_v24 = vpop.permute.xlu0 %7675 }
 0xce5   :  { %8758 = vset.pattern.permute.xlu2 %v8799_v41  ;;  %8768 = vset.pattern.permute.xlu0 %v8795_v61 }
 0xce6   :  { %7692 = vperm.xlu2 %8758, %v17481_v13  }
 0xceb   :  { %v7704_v2 = vpop.permute.xlu0 %7703 }
 0xcee   :  { %8759 = vset.pattern.permute.xlu2 %v8800_v37 }
 0xcef   :  { %7697 = vperm.xlu2 %8759, %v17481_v13  }
 0xcf4   :  { %v7754_v17 = vpop.permute.xlu0 %7753 }
 0xcf7   :  { %8761 = vset.pattern.permute.xlu2 %v8801_v58 }
 0xcf8   :  { %7681 = vperm.xlu2 %8761, %v17481_v13  }
 0xd00   :  { %8762 = vset.pattern.permute.xlu2 %v8802_v28 }
 0xd01   :  { %7709 = vperm.xlu2 %8762, %v17481_v13  }
 0xd09   :  { %8765 = vset.pattern.permute.xlu2 %v8795_v61 }
 0xd0a   :  { %7736 = vperm.xlu2 %8765, %v17494_v12  }
 0xd12   :  { %8766 = vset.pattern.permute.xlu2 %v8794_v30 }
 0xd19   :  { %v7772_v57 = vpop.permute.xlu2 %7771 }
 0xd2f   :  { %v7760_v56 = vpop.permute.xlu2 %7759 }
 0xd30   :  { %v7762_v59 = vadd.f32 %v7760_v56, %v7757_v21 }
 0xd32   :  { %7765 = vperm.xlu2 %8766, %v7762_v59  }
 0xd34   :  { %v7626_v33 = vpop.f32.mrf.mxu2  ;;  %v7646_v35 = vpop.f32.mrf.mxu3 }
 0xd35   :  { %v7678_v38 = vmul.f32 %v7676_v24, %v7646_v35  ;;  %v7717_v18 = vmul.f32 %v7715_v0, %v7626_v33  ;;  %v7722_v43 = vmul.f32 %v7720_v44, %v7646_v35 }
 0xd37   :  { %v7671_v63 = vpop.permute.xlu2 %7670  ;;  %v7723_v7 = vadd.f32 %v7722_v43, %v7717_v18 }
 0xd38   :  { %v7673_v50 = vmul.f32 %v7671_v63, %v7626_v33 }
 0xd3a   :  { %v7679_v19 = vadd.f32 %v7678_v38, %v7673_v50 }
 0xd3c   :  { %v7666_v5 = vpop.f32.mrf.mxu2 }
 0xd3d   :  { %v7728_v54 = vmul.f32 %v7726_v14, %v7666_v5  ;;  %v7706_v3 = vmul.f32 %v7704_v2, %v7666_v5 }
 0xd3f   :  { %v7729_v45 = vadd.f32 %v7728_v54, %v7723_v7 }
 0xd40   :  { %v7693_v4 = vpop.permute.xlu2 %7692 }
 0xd41   :  { %v7734_v32 = vadd.f32 %v7732_v26, %v7729_v45  ;;  %v7695_v8 = vmul.f32 %v7693_v4, %v7626_v33 }
 0xd43   :  { %v7774_v36 = vmul.f32 %v7772_v57, %v7734_v32 }
 0xd45   :  { %v7775_v60 = vsub.f32 %v7774_v36, %v7772_v57 }
 0xd47   :  { %v7779_v55 = vsel %vm7778_vm1, %v7775_v60, inf }
 0xd48   :  { %v7781_v16 = vsel %vm7780_vm2, %v7779_v55, inf }
 0xd49   :  { %7782 = vmin.xlane.f32.xlu1 %v7781_v16  ;;  %v7698_v12 = vpop.permute.xlu2 %7697 }
 0xd4a   :  { %v7700_v25 = vmul.f32 %v7698_v12, %v7646_v35 }
 0xd4c   :  { %v7701_v15 = vadd.f32 %v7700_v25, %v7695_v8 }
 0xd4e   :  { %v7707_v52 = vadd.f32 %v7706_v3, %v7701_v15 }
 0xd4f   :  { %v7747_v34 = vpop.permute.xlu0 %7746 }
 0xd52   :  { %v7682_v31 = vpop.permute.xlu2 %7681 }
 0xd53   :  { %v7684_v29 = vmul.f32 %v7682_v31, %v7666_v5 }
 0xd55   :  { %v7685_v30 = vadd.f32 %v7684_v29, %v7679_v19 }
 0xd5b   :  { %v7710_v22 = vpop.permute.xlu2 %7709 }
 0xd5c   :  { %v7712_v10 = vadd.f32 %v7710_v22, %v7707_v52 }
 0xd5e   :  { %v7756_v53 = vmul.f32 %v7754_v17, %v7712_v10 }
 0xd62   :  { %7687 = vperm.xlu1 %8763, %v17481_v13  }
 0xd64   :  { %v7737_v46 = vpop.permute.xlu2 %7736 }
 0xd8c   :  { %v7766_v9 = vpop.permute.xlu2 %7765 }
 0xd8d   :  { %v7768_v0 = vadd.f32 %v7766_v9, %v7756_v53 }
 0xd8f   :  { %v7795_v13 = vrot.slane %v7768_v0, 7 }
 0xdbc   :  { %v7783_v48 = vpop.xlane.xlu1 %7782 }
 0xdbd   :  { %v7784_v27 = vrot.slane %v7783_v48, 4 }
 0xdbf   :  { %v7785_v40 = vmin.f32 %v7783_v48, %v7784_v27 }
 0xdc1   :  { %v7786_v49 = vrot.slane %v7785_v40, 2 }
 0xdc3   :  { %v7787_v61 = vmin.f32 %v7785_v40, %v7786_v49 }
 0xdc5   :  { %v7788_v6 = vrot.slane %v7787_v61, 1 }
 0xdc7   :  { %v7789_v62 = vmin.f32 %v7787_v61, %v7788_v6 }
 0xdc9   :  { %8722 = vpush %v7789_v62 }
 0xdd4   :  { %v7688_v51 = vpop.permute.xlu1 %7687 }
 0xdd5   :  { %v7690_v1 = vadd.f32 %v7688_v51, %v7685_v30 }
 0xdd7   :  { %v7739_v42 = vmul.f32 %v7737_v46, %v7690_v1 }
 0xdd9   :  { %v7749_v11 = vadd.f32 %v7747_v34, %v7739_v42 }
 0xddb   :  { %v7800_v39 = vsel %vm7780_vm2, %v7749_v11, %v7795_v13 }
 0xdfa   :  { %s8723_s27 = spop %8722 }
 0xdfb   :  { %v7791_v41 = vstv %s8723_s27 }
 0xdfc   :  { %v7792_v37 = vsub.f32 %v7775_v60, %v7791_v41 }
 0xdfe   :  { %v7793_v58 = vsel %vm7778_vm1, %v7792_v37, 0.0 }
 0xdff   :  { %v7798_v28 = vrot.slane %v7793_v58, 6 }
 0xe01   :  { %v7802_v14 = vsel %vm7801_vm3, %v7800_v39, %v7798_v28 }
 0xe02   :  { %v7804_v57 = vsel %vm7803_vm4, %v7802_v14, 0.0 }
 0xe03   :  { %7805 = vst [vmem:[%s17556_s8] sm:$0xff] %v7804_v57 }

</bundles_post_ra>
